<compile_context>
chip_gen: v5e
topology: v5e:2x2
jax: 0.10.0
libtpu: 0.0.40
codegen_flags: <defaults>
</compile_context>

<pallas_src>
import functools

import jax
import jax.numpy as jnp
from jax.experimental import pallas as pl
from jax.experimental.pallas import tpu as pltpu

EMB_PAD = 128                      # embedding lane-padded width (true dim is 84)
COMPUTE_DTYPE = jnp.bfloat16       # MXU operand dtype (accumulation stays f32)


# ----------------------------------------------------------------------------
# Kernel 1: fused embedder, IMG_B images per grid step
# ----------------------------------------------------------------------------
def _embedder_kernel(x_ref,
                     b1w_ref, b1b_ref, pr1_ref,
                     b2w_ref, b2b_ref, pr2_ref,
                     b3w_ref, b3b_ref,
                     sel_ref, wfc_ref, bfc_ref,
                     out_ref):
    # x_ref: (IMG_B*H, W) f32 -- IMG_B images stacked along rows ("tall image").
    x = x_ref[...]

    def conv_relu(a, bw_ref, bb_ref):
        # a: (M_in, K) f32; bw_ref: (KH, K, N) banded bf16 weights; bb_ref: (1, N) f32.
        # Row-shifted matmuls over the flat batch; rows straddling an image boundary
        # are garbage and get dropped by the following pool/select matrix.
        kh = bw_ref.shape[0]
        m_out = a.shape[0] - kh + 1
        acc = jnp.dot(a[0:m_out].astype(COMPUTE_DTYPE), bw_ref[0],
                      preferred_element_type=jnp.float32)
        for i in range(1, kh):
            acc = acc + jnp.dot(a[i:i + m_out].astype(COMPUTE_DTYPE), bw_ref[i],
                                preferred_element_type=jnp.float32)
        return jnp.maximum(acc + bb_ref[...], 0.0)            # (M_out, N) f32

    def row_pool(h, p_ref):
        # Per-image 2-row average (0.25 folded into p_ref) + garbage-row compaction.
        # The column half of the 2x2 pool is folded into the next banded weights.
        return jnp.dot(p_ref[...], h.astype(COMPUTE_DTYPE),
                       preferred_element_type=jnp.float32)

    h1 = conv_relu(x, b1w_ref, b1b_ref)       # (IMG_B*H-4,   OW1*6)
    p1 = row_pool(h1, pr1_ref)                # (IMG_B*PH1,   OW1*6)
    h2 = conv_relu(p1, b2w_ref, b2b_ref)      # (IMG_B*PH1-4, OW2*16)
    p2 = row_pool(h2, pr2_ref)                # (IMG_B*PH2,   OW2*16)
    h3 = conv_relu(p2, b3w_ref, b3b_ref)      # (IMG_B*PH2-4, OW3*120)

    # AdaptiveAvgPool2d((1,1)) + Flatten + Linear: Sel sums each image's valid conv3
    # rows; Wfc carries the spatial mean / channel grouping + FC weight (lane-padded).
    s = jnp.dot(sel_ref[...], h3.astype(COMPUTE_DTYPE),
                preferred_element_type=jnp.float32)           # (IMG_B, OW3*120)
    emb = jnp.dot(s.astype(COMPUTE_DTYPE), wfc_ref[...],
                  preferred_element_type=jnp.float32) + bfc_ref[...]
    out_ref[...] = emb.astype(out_ref.dtype)                  # (IMG_B, 128) dense store


def _const_block(arr):
    nd = arr.ndim
    return pl.BlockSpec(arr.shape, lambda i, _nd=nd: (0,) * _nd)


def embed_images(kp, x_all, img_b):
    """x_all: (N, 1, H, W) f32 -> embeddings (N, 128) f32 (cols 84..127 are zero)."""
    n, _, h, w = x_all.shape
    n_pad = -(-n // img_b) * img_b
    if n_pad != n:
        x_all = jnp.pad(x_all, ((0, n_pad - n), (0, 0), (0, 0), (0, 0)))
    x_flat = x_all.reshape(n_pad * h, w)            # row b*H + s  =  image b, row s

    names = ('B1', 'b1', 'PrB1', 'B2', 'b2', 'PrB2', 'B3', 'b3', 'Sel', 'Wfc', 'bfc')
    weights = [kp[k] for k in names]
    in_specs = [pl.BlockSpec((img_b * h, w), lambda i: (i, 0))]
    in_specs += [_const_block(wt) for wt in weights]   # constant index -> fetched once

    out = pl.pallas_call(
        _embedder_kernel,
        out_shape=jax.ShapeDtypeStruct((n_pad, EMB_PAD), jnp.float32),
        grid=(n_pad // img_b,),
        in_specs=in_specs,
        out_specs=pl.BlockSpec((img_b, EMB_PAD), lambda i: (i, 0)),
        compiler_params=pltpu.CompilerParams(dimension_semantics=("parallel",)),
    )(x_flat, *weights)
    return out[:n]


# ----------------------------------------------------------------------------
# Kernel 2: fused class-prototype means + cosine logits (kept separate so the
# embedder grid can stay "parallel" on v7x; see review item 8 caveat)
# ----------------------------------------------------------------------------
def _proto_logits_kernel(n_train, num_classes, y_ref, emb_ref, out_ref):
    emb = emb_ref[...]                                        # (Ntot, 128) f32
    et = emb[:n_train]                                        # train embeddings
    eq = emb[n_train:]                                        # query embeddings
    y = y_ref[...]                                            # (1, n_train) int32

    cls = jax.lax.broadcasted_iota(jnp.int32, (num_classes, n_train), 0)
    onehot = (cls == y).astype(jnp.float32)                   # (C, n_train)
    counts = jnp.maximum(jnp.sum(onehot, axis=1, keepdims=True), 1.0)
    # guard: torch would NaN on an empty class; reciprocal-multiply instead of divide.
    protos = jnp.dot(onehot, et, preferred_element_type=jnp.float32) * (1.0 / counts)

    # rsqrt lowers to the otherwise-idle EUP; +1e-12 inside matches the reference
    # 1/(norm + 1e-6) to ~1e-6 relative for non-degenerate norms.
    p_inv = jax.lax.rsqrt(jnp.sum(protos * protos, axis=1, keepdims=True) + 1e-12)
    q_inv = jax.lax.rsqrt(jnp.sum(eq * eq, axis=1, keepdims=True) + 1e-12)
    sim = jax.lax.dot_general(eq, protos * p_inv, (((1,), (1,)), ((), ())),
                              preferred_element_type=jnp.float32)        # (Nq, C)
    out_ref[...] = (sim * q_inv).astype(out_ref.dtype)


def proto_cosine_logits(emb_all, y_train, n_train, num_classes):
    n_test = emb_all.shape[0] - n_train
    y2d = y_train.reshape(1, n_train).astype(jnp.int32)
    vmem = pl.BlockSpec(memory_space=pltpu.MemorySpace.VMEM)
    return pl.pallas_call(
        functools.partial(_proto_logits_kernel, n_train, num_classes),
        out_shape=jax.ShapeDtypeStruct((n_test, num_classes), jnp.float32),
        in_specs=[vmem, vmem],
        out_specs=vmem,
    )(y2d, emb_all)


# ----------------------------------------------------------------------------
# Weight preprocessing (plain JAX, weights-only): banded conv matrices with the
# column pools folded in, row-pool / row-select matrices for the flat batched
# layout, FC folded with the adaptive pool and lane-padded to 128.
# ----------------------------------------------------------------------------
def _banded_conv_weight(w, wsp):
    """w: PyTorch (OC, IC, KH, KW) -> B: (KH, wsp*IC, OW*OC) with
    B[i, win*IC+ic, ow*OC+oc] = w[oc, ic, i, win-ow] for 0 <= win-ow < KW, else 0."""
    oc, ic, kh, kw = w.shape
    ow = wsp - kw + 1
    delta = jnp.arange(wsp)[:, None] - jnp.arange(ow)[None, :]        # (wsp, ow)
    valid = (delta >= 0) & (delta < kw)
    dclip = jnp.clip(delta, 0, kw - 1)
    wt = jnp.transpose(w.astype(jnp.float32), (2, 3, 1, 0))           # (KH, KW, IC, OC)
    b5 = wt[:, dclip]                                                 # (KH, wsp, ow, IC, OC)
    b5 = b5 * valid[None, :, :, None, None].astype(jnp.float32)
    return jnp.transpose(b5, (0, 1, 3, 2, 4)).reshape(kh, wsp * ic, ow * oc)


def _col_pool_matrix(ow, c):
    """Column half of the 2x2 avg pool: (ow*c, (ow//2)*c) 0/1 matrix (no 0.25)."""
    pw = ow // 2
    owc = jnp.arange(ow * c)
    pwc = jnp.arange(pw * c)
    return (((owc[:, None] // c) // 2 == pwc[None, :] // c) &
            (owc[:, None] % c == pwc[None, :] % c)).astype(jnp.float32)


def _row_pool_matrix(img_b, s_in, oh, m_in):
    """Row half of the 2x2 avg pool on the flat batched layout (0.25 folded in).

    Valid conv rows of image b sit at b*s_in + r, r < oh; rows past oh are
    cross-image garbage and are dropped.  Output rows: b*(oh//2) + p.
    """
    ph = oh // 2
    q = jnp.arange(img_b * ph)
    base = (q // ph) * s_in + 2 * (q % ph)
    m = jnp.arange(m_in)
    hit = (m[None, :] == base[:, None]) | (m[None, :] == base[:, None] + 1)
    return hit.astype(jnp.float32) * 0.25


def _row_select_matrix(img_b, s_in, oh_valid, m_in):
    """Sums each image's oh_valid valid conv3 rows (row part of AdaptiveAvgPool)."""
    q = jnp.arange(img_b)
    m = jnp.arange(m_in)
    base = (q * s_in)[:, None]
    return ((m[None, :] >= base) & (m[None, :] < base + oh_valid)).astype(jnp.float32)


def prepare_kernel_inputs(params, h, w, img_b):
    w1, w2, w3 = params['w1'], params['w2'], params['w3']
    oc1, oc2, oc3 = w1.shape[0], w2.shape[0], w3.shape[0]
    kh = w1.shape[2]

    oh1, ow1 = h - kh + 1, w - kh + 1
    assert oh1 % 2 == 0 and ow1 % 2 == 0
    ph1, pw1 = oh1 // 2, ow1 // 2
    oh2, ow2 = ph1 - kh + 1, pw1 - kh + 1
    assert oh2 % 2 == 0 and ow2 % 2 == 0
    ph2, pw2 = oh2 // 2, ow2 // 2
    oh3, ow3 = ph2 - kh + 1, pw2 - kh + 1
    assert oh3 >= 1 and ow3 >= 1

    cdt = COMPUTE_DTYPE
    B1 = _banded_conv_weight(w1, w)                                   # (kh, w, ow1*oc1)
    B2 = _banded_conv_weight(w2, pw1)                                 # (kh, pw1*oc1, ow2*oc2)
    B3 = _banded_conv_weight(w3, pw2)                                 # (kh, pw2*oc2, ow3*oc3)
    # Fold the column half of each 2x2 avg pool into the NEXT conv's banded weights.
    Pc1 = _col_pool_matrix(ow1, oc1)                                  # (ow1*oc1, pw1*oc1)
    Pc2 = _col_pool_matrix(ow2, oc2)
    B2 = jnp.einsum('pq,kqn->kpn', Pc1, B2)                           # (kh, ow1*oc1, ow2*oc2)
    B3 = jnp.einsum('pq,kqn->kpn', Pc2, B3)                           # (kh, ow2*oc2, ow3*oc3)

    b1 = jnp.tile(params['b1'].astype(jnp.float32), ow1)[None, :]
    b2 = jnp.tile(params['b2'].astype(jnp.float32), ow2)[None, :]
    b3 = jnp.tile(params['b3'].astype(jnp.float32), ow3)[None, :]

    m1 = img_b * h - (kh - 1)
    m2 = img_b * ph1 - (kh - 1)
    m3 = img_b * ph2 - (kh - 1)
    PrB1 = _row_pool_matrix(img_b, h, oh1, m1)
    PrB2 = _row_pool_matrix(img_b, ph1, oh2, m2)
    Sel = _row_select_matrix(img_b, ph2, oh3, m3)

    # Fold AdaptiveAvgPool2d((1,1)) (mean over oh3*ow3, grouped per channel) into the
    # FC weight; pad the FC output to 128 lanes with zeros.
    oc_idx = jnp.arange(ow3 * oc3) % oc3
    gmean = (oc_idx[:, None] == jnp.arange(oc3)[None, :]).astype(jnp.float32)
    gmean = gmean / float(oh3 * ow3)                                  # (ow3*oc3, oc3)
    wfc = params['fc_w'].astype(jnp.float32).T                        # (oc3, 84)
    nfc = wfc.shape[1]
    Wfc = gmean @ jnp.pad(wfc, ((0, 0), (0, EMB_PAD - nfc)))          # (ow3*oc3, 128)
    bfc = jnp.pad(params['fc_b'].astype(jnp.float32), (0, EMB_PAD - nfc))[None, :]

    return dict(B1=B1.astype(cdt), b1=b1, PrB1=PrB1.astype(cdt),
                B2=B2.astype(cdt), b2=b2, PrB2=PrB2.astype(cdt),
                B3=B3.astype(cdt), b3=b3, Sel=Sel.astype(cdt),
                Wfc=Wfc.astype(cdt), bfc=bfc)


# ----------------------------------------------------------------------------
# ProtoNet forward
# ----------------------------------------------------------------------------
def protonet_forward(params, x_ep_train, y_ep_train, x_ep_test, num_classes):
    n_train = x_ep_train.shape[0]
    x_all = jnp.concatenate([x_ep_train, x_ep_test], axis=0)
    if x_all.dtype != jnp.float32:
        x_all = x_all.astype(jnp.float32)
    n_total = x_all.shape[0]
    # Images per grid step (multiple of 8 -> sublane-dense output stores).  Larger
    # episodes get larger blocks (bigger MXU M); when possible keep >=2 grid steps
    # so ("parallel",) can shard across both v7x TensorCores.
    if n_total >= 128:
        img_b = 32
    elif n_total >= 32:
        img_b = 16
    else:
        img_b = 8
    kp = prepare_kernel_inputs(params, x_all.shape[2], x_all.shape[3], img_b)
    emb_all = embed_images(kp, x_all, img_b)                 # one fused embedder call
    return proto_cosine_logits(emb_all, y_ep_train, n_train, num_classes)


# ----------------------------------------------------------------------------
# Pure-JAX reference (for in-script correctness check only)
# ----------------------------------------------------------------------------
def reference_forward(params, x_train, y_train, x_test, num_classes):
    def conv(x, w, b):
        y = jax.lax.conv_general_dilated(x, w, (1, 1), 'VALID',
                                         dimension_numbers=('NCHW', 'OIHW', 'NCHW'))
        return jax.nn.relu(y + b[None, :, None, None])

    def pool(x):
        n, c, hh, ww = x.shape
        return x.reshape(n, c, hh // 2, 2, ww // 2, 2).mean(axis=(3, 5))

    def embed(x):
        x = pool(conv(x, params['w1'], params['b1']))
        x = pool(conv(x, params['w2'], params['b2']))
        x = conv(x, params['w3'], params['b3'])
        x = x.mean(axis=(2, 3))                               # AdaptiveAvgPool + Flatten
        return x @ params['fc_w'].T + params['fc_b']

    et, eq = embed(x_train), embed(x_test)
    onehot = jax.nn.one_hot(y_train, num_classes, dtype=jnp.float32)   # (Ntr, C)
    protos = (onehot.T @ et) / onehot.sum(axis=0)[:, None]
    return (eq @ protos.T) \
        / (jnp.linalg.norm(eq, axis=1, keepdims=True) + 1e-6) \
        / (jnp.linalg.norm(protos, axis=1, keepdims=True).T + 1e-6)


# ----------------------------------------------------------------------------
# Deterministic parameter init (PyTorch layouts / shapes from ProtoNet.__init__)
# ----------------------------------------------------------------------------
def init_params(key):
    def u(k, shape, fan_in):
        bound = 1.0 / (fan_in ** 0.5)
        return jax.random.uniform(k, shape, jnp.float32, -bound, bound)

    ks = jax.random.split(key, 8)
    return {
        'w1': u(ks[0], (6, 1, 5, 5), 25),     'b1': u(ks[1], (6,), 25),
        'w2': u(ks[2], (16, 6, 5, 5), 150),   'b2': u(ks[3], (16,), 150),
        'w3': u(ks[4], (120, 16, 5, 5), 400), 'b3': u(ks[5], (120,), 400),
        'fc_w': u(ks[6], (84, 120), 120),     'fc_b': u(ks[7], (84,), 120),
    }


if __name__ == "__main__":
    key = jax.random.PRNGKey(0)
    k_params, k_train, k_test = jax.random.split(key, 3)

    num_classes = 2     # config['training']['num_classes_per_task']
    batch_size = 2      # images per class in the episode
    n_train = num_classes * batch_size

    params = init_params(k_params)
    # 32x32 single-channel images (classic LeNet input size implied by the embedder).
    x_ep_train = jax.random.normal(k_train, (n_train, 1, 32, 32), jnp.float32)
    y_ep_train = jnp.array([0, 1, 0, 1], dtype=jnp.int32)
    x_ep_test = jax.random.normal(k_test, (n_train, 1, 32, 32), jnp.float32)

    fwd = jax.jit(functools.partial(protonet_forward, num_classes=num_classes))
    logits = fwd(params, x_ep_train, y_ep_train, x_ep_test)
    jax.block_until_ready(logits)

    assert logits.shape == (n_train, num_classes)
    assert bool(jnp.all(jnp.isfinite(logits)))

    ref = reference_forward(params, x_ep_train, y_ep_train, x_ep_test, num_classes)
    # bf16 MXU operands (f32 accumulation, per the perf review) vs the f32 reference:
    # relax the tolerance to cover bf16 operand rounding through 3 conv layers + FC.
    tol = 3e-2 if COMPUTE_DTYPE == jnp.bfloat16 else 1e-3
    assert bool(jnp.allclose(logits, ref, atol=tol, rtol=tol)), (
        "mismatch vs reference, max abs err = %g"
        % float(jnp.max(jnp.abs(logits - ref))))

    print("KERNEL_OK")
</pallas_src>

<mosaic_0001>
module attributes {stable_mosaic.version = 11 : i64} {
  func.func @_embedder_kernel(%arg0: i32, %arg1: memref<256x32xf32, #tpu.memory_space<vmem>>, %arg2: memref<5x32x168xbf16, #tpu.memory_space<vmem>>, %arg3: memref<1x168xf32, #tpu.memory_space<vmem>>, %arg4: memref<112x252xbf16, #tpu.memory_space<vmem>>, %arg5: memref<5x168x160xbf16, #tpu.memory_space<vmem>>, %arg6: memref<1x160xf32, #tpu.memory_space<vmem>>, %arg7: memref<40x108xbf16, #tpu.memory_space<vmem>>, %arg8: memref<5x160x120xbf16, #tpu.memory_space<vmem>>, %arg9: memref<1x120xf32, #tpu.memory_space<vmem>>, %arg10: memref<8x36xbf16, #tpu.memory_space<vmem>>, %arg11: memref<120x128xbf16, #tpu.memory_space<vmem>>, %arg12: memref<1x128xf32, #tpu.memory_space<vmem>>, %arg13: memref<8x128xf32, #tpu.memory_space<vmem>>) attributes {dimension_semantics = [#tpu.dimension_semantics<parallel>], iteration_bounds = array<i64: 1>, scalar_prefetch = 0 : i64, scratch_operands = 0 : i64, tpu.core_type = #tpu.core_type<tc>, window_params = [{transform_indices = @transform_0, window_bounds = array<i64: 256, 32>}, {pipeline_mode = #tpu.pipeline_mode<synchronous>, transform_indices = @transform_1, window_bounds = array<i64: 5, 32, 168>}, {pipeline_mode = #tpu.pipeline_mode<synchronous>, transform_indices = @transform_2, window_bounds = array<i64: 1, 168>}, {pipeline_mode = #tpu.pipeline_mode<synchronous>, transform_indices = @transform_3, window_bounds = array<i64: 112, 252>}, {pipeline_mode = #tpu.pipeline_mode<synchronous>, transform_indices = @transform_4, window_bounds = array<i64: 5, 168, 160>}, {pipeline_mode = #tpu.pipeline_mode<synchronous>, transform_indices = @transform_5, window_bounds = array<i64: 1, 160>}, {pipeline_mode = #tpu.pipeline_mode<synchronous>, transform_indices = @transform_6, window_bounds = array<i64: 40, 108>}, {pipeline_mode = #tpu.pipeline_mode<synchronous>, transform_indices = @transform_7, window_bounds = array<i64: 5, 160, 120>}, {pipeline_mode = #tpu.pipeline_mode<synchronous>, transform_indices = @transform_8, window_bounds = array<i64: 1, 120>}, {pipeline_mode = #tpu.pipeline_mode<synchronous>, transform_indices = @transform_9, window_bounds = array<i64: 8, 36>}, {pipeline_mode = #tpu.pipeline_mode<synchronous>, transform_indices = @transform_10, window_bounds = array<i64: 120, 128>}, {pipeline_mode = #tpu.pipeline_mode<synchronous>, transform_indices = @transform_11, window_bounds = array<i64: 1, 128>}, {transform_indices = @transform_12, window_bounds = array<i64: 8, 128>}]} {
    %c0 = arith.constant 0 : index
    %c0_0 = arith.constant 0 : index
    %0 = vector.load %arg1[%c0, %c0_0] : memref<256x32xf32, #tpu.memory_space<vmem>>, vector<256x32xf32>
    %1 = vector.extract_strided_slice %0 {offsets = [0, 0], sizes = [252, 32], strides = [1, 1]} : vector<256x32xf32> to vector<252x32xf32>
    %2 = arith.truncf %1 : vector<252x32xf32> to vector<252x32xbf16>
    %c0_1 = arith.constant 0 : index
    %c0_2 = arith.constant 0 : index
    %c0_3 = arith.constant 0 : index
    %3 = vector.load %arg2[%c0_1, %c0_2, %c0_3] : memref<5x32x168xbf16, #tpu.memory_space<vmem>>, vector<1x32x168xbf16>
    %4 = vector.shape_cast %3 : vector<1x32x168xbf16> to vector<32x168xbf16>
    %cst = arith.constant dense<0.000000e+00> : vector<252x168xf32>
    %5 = tpu.matmul %2, %4, %cst {dimension_numbers = #tpu.dot_dimension_numbers<[1], [0], [0], [1], [0, 0, 1, 1], [], []>} : vector<252x32xbf16>, vector<32x168xbf16>, vector<252x168xf32> -> vector<252x168xf32>
    %6 = vector.extract_strided_slice %0 {offsets = [1, 0], sizes = [252, 32], strides = [1, 1]} : vector<256x32xf32> to vector<252x32xf32>
    %7 = arith.truncf %6 : vector<252x32xf32> to vector<252x32xbf16>
    %c1 = arith.constant 1 : index
    %c0_4 = arith.constant 0 : index
    %c0_5 = arith.constant 0 : index
    %8 = vector.load %arg2[%c1, %c0_4, %c0_5] : memref<5x32x168xbf16, #tpu.memory_space<vmem>>, vector<1x32x168xbf16>
    %9 = vector.shape_cast %8 : vector<1x32x168xbf16> to vector<32x168xbf16>
    %cst_6 = arith.constant dense<0.000000e+00> : vector<252x168xf32>
    %10 = tpu.matmul %7, %9, %cst_6 {dimension_numbers = #tpu.dot_dimension_numbers<[1], [0], [0], [1], [0, 0, 1, 1], [], []>} : vector<252x32xbf16>, vector<32x168xbf16>, vector<252x168xf32> -> vector<252x168xf32>
    %11 = arith.addf %5, %10 : vector<252x168xf32>
    %12 = vector.extract_strided_slice %0 {offsets = [2, 0], sizes = [252, 32], strides = [1, 1]} : vector<256x32xf32> to vector<252x32xf32>
    %13 = arith.truncf %12 : vector<252x32xf32> to vector<252x32xbf16>
    %c2 = arith.constant 2 : index
    %c0_7 = arith.constant 0 : index
    %c0_8 = arith.constant 0 : index
    %14 = vector.load %arg2[%c2, %c0_7, %c0_8] : memref<5x32x168xbf16, #tpu.memory_space<vmem>>, vector<1x32x168xbf16>
    %15 = vector.shape_cast %14 : vector<1x32x168xbf16> to vector<32x168xbf16>
    %cst_9 = arith.constant dense<0.000000e+00> : vector<252x168xf32>
    %16 = tpu.matmul %13, %15, %cst_9 {dimension_numbers = #tpu.dot_dimension_numbers<[1], [0], [0], [1], [0, 0, 1, 1], [], []>} : vector<252x32xbf16>, vector<32x168xbf16>, vector<252x168xf32> -> vector<252x168xf32>
    %17 = arith.addf %11, %16 : vector<252x168xf32>
    %18 = vector.extract_strided_slice %0 {offsets = [3, 0], sizes = [252, 32], strides = [1, 1]} : vector<256x32xf32> to vector<252x32xf32>
    %19 = arith.truncf %18 : vector<252x32xf32> to vector<252x32xbf16>
    %c3 = arith.constant 3 : index
    %c0_10 = arith.constant 0 : index
    %c0_11 = arith.constant 0 : index
    %20 = vector.load %arg2[%c3, %c0_10, %c0_11] : memref<5x32x168xbf16, #tpu.memory_space<vmem>>, vector<1x32x168xbf16>
    %21 = vector.shape_cast %20 : vector<1x32x168xbf16> to vector<32x168xbf16>
    %cst_12 = arith.constant dense<0.000000e+00> : vector<252x168xf32>
    %22 = tpu.matmul %19, %21, %cst_12 {dimension_numbers = #tpu.dot_dimension_numbers<[1], [0], [0], [1], [0, 0, 1, 1], [], []>} : vector<252x32xbf16>, vector<32x168xbf16>, vector<252x168xf32> -> vector<252x168xf32>
    %23 = arith.addf %17, %22 : vector<252x168xf32>
    %24 = vector.extract_strided_slice %0 {offsets = [4, 0], sizes = [252, 32], strides = [1, 1]} : vector<256x32xf32> to vector<252x32xf32>
    %25 = arith.truncf %24 : vector<252x32xf32> to vector<252x32xbf16>
    %c4 = arith.constant 4 : index
    %c0_13 = arith.constant 0 : index
    %c0_14 = arith.constant 0 : index
    %26 = vector.load %arg2[%c4, %c0_13, %c0_14] : memref<5x32x168xbf16, #tpu.memory_space<vmem>>, vector<1x32x168xbf16>
    %27 = vector.shape_cast %26 : vector<1x32x168xbf16> to vector<32x168xbf16>
    %cst_15 = arith.constant dense<0.000000e+00> : vector<252x168xf32>
    %28 = tpu.matmul %25, %27, %cst_15 {dimension_numbers = #tpu.dot_dimension_numbers<[1], [0], [0], [1], [0, 0, 1, 1], [], []>} : vector<252x32xbf16>, vector<32x168xbf16>, vector<252x168xf32> -> vector<252x168xf32>
    %29 = arith.addf %23, %28 : vector<252x168xf32>
    %c0_16 = arith.constant 0 : index
    %c0_17 = arith.constant 0 : index
    %30 = vector.load %arg3[%c0_16, %c0_17] : memref<1x168xf32, #tpu.memory_space<vmem>>, vector<1x168xf32>
    %31 = vector.broadcast %30 : vector<1x168xf32> to vector<252x168xf32>
    %32 = arith.addf %29, %31 : vector<252x168xf32>
    %cst_18 = arith.constant 0.000000e+00 : f32
    %33 = vector.broadcast %cst_18 : f32 to vector<252x168xf32>
    %34 = arith.maximumf %32, %33 : vector<252x168xf32>
    %c0_19 = arith.constant 0 : index
    %c0_20 = arith.constant 0 : index
    %35 = vector.load %arg4[%c0_19, %c0_20] : memref<112x252xbf16, #tpu.memory_space<vmem>>, vector<112x252xbf16>
    %36 = arith.truncf %34 : vector<252x168xf32> to vector<252x168xbf16>
    %cst_21 = arith.constant dense<0.000000e+00> : vector<112x168xf32>
    %37 = tpu.matmul %35, %36, %cst_21 {dimension_numbers = #tpu.dot_dimension_numbers<[1], [0], [0], [1], [0, 0, 1, 1], [], []>} : vector<112x252xbf16>, vector<252x168xbf16>, vector<112x168xf32> -> vector<112x168xf32>
    %38 = vector.extract_strided_slice %37 {offsets = [0, 0], sizes = [108, 168], strides = [1, 1]} : vector<112x168xf32> to vector<108x168xf32>
    %39 = arith.truncf %38 : vector<108x168xf32> to vector<108x168xbf16>
    %c0_22 = arith.constant 0 : index
    %c0_23 = arith.constant 0 : index
    %c0_24 = arith.constant 0 : index
    %40 = vector.load %arg5[%c0_22, %c0_23, %c0_24] : memref<5x168x160xbf16, #tpu.memory_space<vmem>>, vector<1x168x160xbf16>
    %41 = vector.shape_cast %40 : vector<1x168x160xbf16> to vector<168x160xbf16>
    %cst_25 = arith.constant dense<0.000000e+00> : vector<108x160xf32>
    %42 = tpu.matmul %39, %41, %cst_25 {dimension_numbers = #tpu.dot_dimension_numbers<[1], [0], [0], [1], [0, 0, 1, 1], [], []>} : vector<108x168xbf16>, vector<168x160xbf16>, vector<108x160xf32> -> vector<108x160xf32>
    %43 = vector.extract_strided_slice %37 {offsets = [1, 0], sizes = [108, 168], strides = [1, 1]} : vector<112x168xf32> to vector<108x168xf32>
    %44 = arith.truncf %43 : vector<108x168xf32> to vector<108x168xbf16>
    %c1_26 = arith.constant 1 : index
    %c0_27 = arith.constant 0 : index
    %c0_28 = arith.constant 0 : index
    %45 = vector.load %arg5[%c1_26, %c0_27, %c0_28] : memref<5x168x160xbf16, #tpu.memory_space<vmem>>, vector<1x168x160xbf16>
    %46 = vector.shape_cast %45 : vector<1x168x160xbf16> to vector<168x160xbf16>
    %cst_29 = arith.constant dense<0.000000e+00> : vector<108x160xf32>
    %47 = tpu.matmul %44, %46, %cst_29 {dimension_numbers = #tpu.dot_dimension_numbers<[1], [0], [0], [1], [0, 0, 1, 1], [], []>} : vector<108x168xbf16>, vector<168x160xbf16>, vector<108x160xf32> -> vector<108x160xf32>
    %48 = arith.addf %42, %47 : vector<108x160xf32>
    %49 = vector.extract_strided_slice %37 {offsets = [2, 0], sizes = [108, 168], strides = [1, 1]} : vector<112x168xf32> to vector<108x168xf32>
    %50 = arith.truncf %49 : vector<108x168xf32> to vector<108x168xbf16>
    %c2_30 = arith.constant 2 : index
    %c0_31 = arith.constant 0 : index
    %c0_32 = arith.constant 0 : index
    %51 = vector.load %arg5[%c2_30, %c0_31, %c0_32] : memref<5x168x160xbf16, #tpu.memory_space<vmem>>, vector<1x168x160xbf16>
    %52 = vector.shape_cast %51 : vector<1x168x160xbf16> to vector<168x160xbf16>
    %cst_33 = arith.constant dense<0.000000e+00> : vector<108x160xf32>
    %53 = tpu.matmul %50, %52, %cst_33 {dimension_numbers = #tpu.dot_dimension_numbers<[1], [0], [0], [1], [0, 0, 1, 1], [], []>} : vector<108x168xbf16>, vector<168x160xbf16>, vector<108x160xf32> -> vector<108x160xf32>
    %54 = arith.addf %48, %53 : vector<108x160xf32>
    %55 = vector.extract_strided_slice %37 {offsets = [3, 0], sizes = [108, 168], strides = [1, 1]} : vector<112x168xf32> to vector<108x168xf32>
    %56 = arith.truncf %55 : vector<108x168xf32> to vector<108x168xbf16>
    %c3_34 = arith.constant 3 : index
    %c0_35 = arith.constant 0 : index
    %c0_36 = arith.constant 0 : index
    %57 = vector.load %arg5[%c3_34, %c0_35, %c0_36] : memref<5x168x160xbf16, #tpu.memory_space<vmem>>, vector<1x168x160xbf16>
    %58 = vector.shape_cast %57 : vector<1x168x160xbf16> to vector<168x160xbf16>
    %cst_37 = arith.constant dense<0.000000e+00> : vector<108x160xf32>
    %59 = tpu.matmul %56, %58, %cst_37 {dimension_numbers = #tpu.dot_dimension_numbers<[1], [0], [0], [1], [0, 0, 1, 1], [], []>} : vector<108x168xbf16>, vector<168x160xbf16>, vector<108x160xf32> -> vector<108x160xf32>
    %60 = arith.addf %54, %59 : vector<108x160xf32>
    %61 = vector.extract_strided_slice %37 {offsets = [4, 0], sizes = [108, 168], strides = [1, 1]} : vector<112x168xf32> to vector<108x168xf32>
    %62 = arith.truncf %61 : vector<108x168xf32> to vector<108x168xbf16>
    %c4_38 = arith.constant 4 : index
    %c0_39 = arith.constant 0 : index
    %c0_40 = arith.constant 0 : index
    %63 = vector.load %arg5[%c4_38, %c0_39, %c0_40] : memref<5x168x160xbf16, #tpu.memory_space<vmem>>, vector<1x168x160xbf16>
    %64 = vector.shape_cast %63 : vector<1x168x160xbf16> to vector<168x160xbf16>
    %cst_41 = arith.constant dense<0.000000e+00> : vector<108x160xf32>
    %65 = tpu.matmul %62, %64, %cst_41 {dimension_numbers = #tpu.dot_dimension_numbers<[1], [0], [0], [1], [0, 0, 1, 1], [], []>} : vector<108x168xbf16>, vector<168x160xbf16>, vector<108x160xf32> -> vector<108x160xf32>
    %66 = arith.addf %60, %65 : vector<108x160xf32>
    %c0_42 = arith.constant 0 : index
    %c0_43 = arith.constant 0 : index
    %67 = vector.load %arg6[%c0_42, %c0_43] : memref<1x160xf32, #tpu.memory_space<vmem>>, vector<1x160xf32>
    %68 = vector.broadcast %67 : vector<1x160xf32> to vector<108x160xf32>
    %69 = arith.addf %66, %68 : vector<108x160xf32>
    %cst_44 = arith.constant 0.000000e+00 : f32
    %70 = vector.broadcast %cst_44 : f32 to vector<108x160xf32>
    %71 = arith.maximumf %69, %70 : vector<108x160xf32>
    %c0_45 = arith.constant 0 : index
    %c0_46 = arith.constant 0 : index
    %72 = vector.load %arg7[%c0_45, %c0_46] : memref<40x108xbf16, #tpu.memory_space<vmem>>, vector<40x108xbf16>
    %73 = arith.truncf %71 : vector<108x160xf32> to vector<108x160xbf16>
    %cst_47 = arith.constant dense<0.000000e+00> : vector<40x160xf32>
    %74 = tpu.matmul %72, %73, %cst_47 {dimension_numbers = #tpu.dot_dimension_numbers<[1], [0], [0], [1], [0, 0, 1, 1], [], []>} : vector<40x108xbf16>, vector<108x160xbf16>, vector<40x160xf32> -> vector<40x160xf32>
    %75 = vector.extract_strided_slice %74 {offsets = [0, 0], sizes = [36, 160], strides = [1, 1]} : vector<40x160xf32> to vector<36x160xf32>
    %76 = arith.truncf %75 : vector<36x160xf32> to vector<36x160xbf16>
    %c0_48 = arith.constant 0 : index
    %c0_49 = arith.constant 0 : index
    %c0_50 = arith.constant 0 : index
    %77 = vector.load %arg8[%c0_48, %c0_49, %c0_50] : memref<5x160x120xbf16, #tpu.memory_space<vmem>>, vector<1x160x120xbf16>
    %78 = vector.shape_cast %77 : vector<1x160x120xbf16> to vector<160x120xbf16>
    %cst_51 = arith.constant dense<0.000000e+00> : vector<36x120xf32>
    %79 = tpu.matmul %76, %78, %cst_51 {dimension_numbers = #tpu.dot_dimension_numbers<[1], [0], [0], [1], [0, 0, 1, 1], [], []>} : vector<36x160xbf16>, vector<160x120xbf16>, vector<36x120xf32> -> vector<36x120xf32>
    %80 = vector.extract_strided_slice %74 {offsets = [1, 0], sizes = [36, 160], strides = [1, 1]} : vector<40x160xf32> to vector<36x160xf32>
    %81 = arith.truncf %80 : vector<36x160xf32> to vector<36x160xbf16>
    %c1_52 = arith.constant 1 : index
    %c0_53 = arith.constant 0 : index
    %c0_54 = arith.constant 0 : index
    %82 = vector.load %arg8[%c1_52, %c0_53, %c0_54] : memref<5x160x120xbf16, #tpu.memory_space<vmem>>, vector<1x160x120xbf16>
    %83 = vector.shape_cast %82 : vector<1x160x120xbf16> to vector<160x120xbf16>
    %cst_55 = arith.constant dense<0.000000e+00> : vector<36x120xf32>
    %84 = tpu.matmul %81, %83, %cst_55 {dimension_numbers = #tpu.dot_dimension_numbers<[1], [0], [0], [1], [0, 0, 1, 1], [], []>} : vector<36x160xbf16>, vector<160x120xbf16>, vector<36x120xf32> -> vector<36x120xf32>
    %85 = arith.addf %79, %84 : vector<36x120xf32>
    %86 = vector.extract_strided_slice %74 {offsets = [2, 0], sizes = [36, 160], strides = [1, 1]} : vector<40x160xf32> to vector<36x160xf32>
    %87 = arith.truncf %86 : vector<36x160xf32> to vector<36x160xbf16>
    %c2_56 = arith.constant 2 : index
    %c0_57 = arith.constant 0 : index
    %c0_58 = arith.constant 0 : index
    %88 = vector.load %arg8[%c2_56, %c0_57, %c0_58] : memref<5x160x120xbf16, #tpu.memory_space<vmem>>, vector<1x160x120xbf16>
    %89 = vector.shape_cast %88 : vector<1x160x120xbf16> to vector<160x120xbf16>
    %cst_59 = arith.constant dense<0.000000e+00> : vector<36x120xf32>
    %90 = tpu.matmul %87, %89, %cst_59 {dimension_numbers = #tpu.dot_dimension_numbers<[1], [0], [0], [1], [0, 0, 1, 1], [], []>} : vector<36x160xbf16>, vector<160x120xbf16>, vector<36x120xf32> -> vector<36x120xf32>
    %91 = arith.addf %85, %90 : vector<36x120xf32>
    %92 = vector.extract_strided_slice %74 {offsets = [3, 0], sizes = [36, 160], strides = [1, 1]} : vector<40x160xf32> to vector<36x160xf32>
    %93 = arith.truncf %92 : vector<36x160xf32> to vector<36x160xbf16>
    %c3_60 = arith.constant 3 : index
    %c0_61 = arith.constant 0 : index
    %c0_62 = arith.constant 0 : index
    %94 = vector.load %arg8[%c3_60, %c0_61, %c0_62] : memref<5x160x120xbf16, #tpu.memory_space<vmem>>, vector<1x160x120xbf16>
    %95 = vector.shape_cast %94 : vector<1x160x120xbf16> to vector<160x120xbf16>
    %cst_63 = arith.constant dense<0.000000e+00> : vector<36x120xf32>
    %96 = tpu.matmul %93, %95, %cst_63 {dimension_numbers = #tpu.dot_dimension_numbers<[1], [0], [0], [1], [0, 0, 1, 1], [], []>} : vector<36x160xbf16>, vector<160x120xbf16>, vector<36x120xf32> -> vector<36x120xf32>
    %97 = arith.addf %91, %96 : vector<36x120xf32>
    %98 = vector.extract_strided_slice %74 {offsets = [4, 0], sizes = [36, 160], strides = [1, 1]} : vector<40x160xf32> to vector<36x160xf32>
    %99 = arith.truncf %98 : vector<36x160xf32> to vector<36x160xbf16>
    %c4_64 = arith.constant 4 : index
    %c0_65 = arith.constant 0 : index
    %c0_66 = arith.constant 0 : index
    %100 = vector.load %arg8[%c4_64, %c0_65, %c0_66] : memref<5x160x120xbf16, #tpu.memory_space<vmem>>, vector<1x160x120xbf16>
    %101 = vector.shape_cast %100 : vector<1x160x120xbf16> to vector<160x120xbf16>
    %cst_67 = arith.constant dense<0.000000e+00> : vector<36x120xf32>
    %102 = tpu.matmul %99, %101, %cst_67 {dimension_numbers = #tpu.dot_dimension_numbers<[1], [0], [0], [1], [0, 0, 1, 1], [], []>} : vector<36x160xbf16>, vector<160x120xbf16>, vector<36x120xf32> -> vector<36x120xf32>
    %103 = arith.addf %97, %102 : vector<36x120xf32>
    %c0_68 = arith.constant 0 : index
    %c0_69 = arith.constant 0 : index
    %104 = vector.load %arg9[%c0_68, %c0_69] : memref<1x120xf32, #tpu.memory_space<vmem>>, vector<1x120xf32>
    %105 = vector.broadcast %104 : vector<1x120xf32> to vector<36x120xf32>
    %106 = arith.addf %103, %105 : vector<36x120xf32>
    %cst_70 = arith.constant 0.000000e+00 : f32
    %107 = vector.broadcast %cst_70 : f32 to vector<36x120xf32>
    %108 = arith.maximumf %106, %107 : vector<36x120xf32>
    %c0_71 = arith.constant 0 : index
    %c0_72 = arith.constant 0 : index
    %109 = vector.load %arg10[%c0_71, %c0_72] : memref<8x36xbf16, #tpu.memory_space<vmem>>, vector<8x36xbf16>
    %110 = arith.truncf %108 : vector<36x120xf32> to vector<36x120xbf16>
    %cst_73 = arith.constant dense<0.000000e+00> : vector<8x120xf32>
    %111 = tpu.matmul %109, %110, %cst_73 {dimension_numbers = #tpu.dot_dimension_numbers<[1], [0], [0], [1], [0, 0, 1, 1], [], []>} : vector<8x36xbf16>, vector<36x120xbf16>, vector<8x120xf32> -> vector<8x120xf32>
    %112 = arith.truncf %111 : vector<8x120xf32> to vector<8x120xbf16>
    %c0_74 = arith.constant 0 : index
    %c0_75 = arith.constant 0 : index
    %113 = vector.load %arg11[%c0_74, %c0_75] : memref<120x128xbf16, #tpu.memory_space<vmem>>, vector<120x128xbf16>
    %cst_76 = arith.constant dense<0.000000e+00> : vector<8x128xf32>
    %114 = tpu.matmul %112, %113, %cst_76 {dimension_numbers = #tpu.dot_dimension_numbers<[1], [0], [0], [1], [0, 0, 1, 1], [], []>} : vector<8x120xbf16>, vector<120x128xbf16>, vector<8x128xf32> -> vector<8x128xf32>
    %c0_77 = arith.constant 0 : index
    %c0_78 = arith.constant 0 : index
    %115 = vector.load %arg12[%c0_77, %c0_78] : memref<1x128xf32, #tpu.memory_space<vmem>>, vector<1x128xf32>
    %116 = vector.broadcast %115 : vector<1x128xf32> to vector<8x128xf32>
    %117 = arith.addf %114, %116 : vector<8x128xf32>
    %c0_79 = arith.constant 0 : index
    %c0_80 = arith.constant 0 : index
    %118 = vector.load %arg13[%c0_79, %c0_80] : memref<8x128xf32, #tpu.memory_space<vmem>>, vector<8x128xf32>
    tpu.vector_store %arg13[%c0_79, %c0_80], %117 {strides = array<i32>} : memref<8x128xf32, #tpu.memory_space<vmem>>, vector<8x128xf32>,
    return
  }
  func.func @transform_0(%arg0: i32) -> (i32, i32) {
    %c0_i32 = arith.constant 0 : i32
    %c0_i32_0 = arith.constant 0 : i32
    return %arg0, %c0_i32 : i32, i32
  }
  func.func @transform_1(%arg0: i32) -> (i32, i32, i32) {
    %c0_i32 = arith.constant 0 : i32
    %c0_i32_0 = arith.constant 0 : i32
    %c0_i32_1 = arith.constant 0 : i32
    %c0_i32_2 = arith.constant 0 : i32
    return %c0_i32, %c0_i32_0, %c0_i32_1 : i32, i32, i32
  }
  func.func @transform_2(%arg0: i32) -> (i32, i32) {
    %c0_i32 = arith.constant 0 : i32
    %c0_i32_0 = arith.constant 0 : i32
    %c0_i32_1 = arith.constant 0 : i32
    return %c0_i32, %c0_i32_0 : i32, i32
  }
  func.func @transform_3(%arg0: i32) -> (i32, i32) {
    %c0_i32 = arith.constant 0 : i32
    %c0_i32_0 = arith.constant 0 : i32
    %c0_i32_1 = arith.constant 0 : i32
    return %c0_i32, %c0_i32_0 : i32, i32
  }
  func.func @transform_4(%arg0: i32) -> (i32, i32, i32) {
    %c0_i32 = arith.constant 0 : i32
    %c0_i32_0 = arith.constant 0 : i32
    %c0_i32_1 = arith.constant 0 : i32
    %c0_i32_2 = arith.constant 0 : i32
    return %c0_i32, %c0_i32_0, %c0_i32_1 : i32, i32, i32
  }
  func.func @transform_5(%arg0: i32) -> (i32, i32) {
    %c0_i32 = arith.constant 0 : i32
    %c0_i32_0 = arith.constant 0 : i32
    %c0_i32_1 = arith.constant 0 : i32
    return %c0_i32, %c0_i32_0 : i32, i32
  }
  func.func @transform_6(%arg0: i32) -> (i32, i32) {
    %c0_i32 = arith.constant 0 : i32
    %c0_i32_0 = arith.constant 0 : i32
    %c0_i32_1 = arith.constant 0 : i32
    return %c0_i32, %c0_i32_0 : i32, i32
  }
  func.func @transform_7(%arg0: i32) -> (i32, i32, i32) {
    %c0_i32 = arith.constant 0 : i32
    %c0_i32_0 = arith.constant 0 : i32
    %c0_i32_1 = arith.constant 0 : i32
    %c0_i32_2 = arith.constant 0 : i32
    return %c0_i32, %c0_i32_0, %c0_i32_1 : i32, i32, i32
  }
  func.func @transform_8(%arg0: i32) -> (i32, i32) {
    %c0_i32 = arith.constant 0 : i32
    %c0_i32_0 = arith.constant 0 : i32
    %c0_i32_1 = arith.constant 0 : i32
    return %c0_i32, %c0_i32_0 : i32, i32
  }
  func.func @transform_9(%arg0: i32) -> (i32, i32) {
    %c0_i32 = arith.constant 0 : i32
    %c0_i32_0 = arith.constant 0 : i32
    %c0_i32_1 = arith.constant 0 : i32
    return %c0_i32, %c0_i32_0 : i32, i32
  }
  func.func @transform_10(%arg0: i32) -> (i32, i32) {
    %c0_i32 = arith.constant 0 : i32
    %c0_i32_0 = arith.constant 0 : i32
    %c0_i32_1 = arith.constant 0 : i32
    return %c0_i32, %c0_i32_0 : i32, i32
  }
  func.func @transform_11(%arg0: i32) -> (i32, i32) {
    %c0_i32 = arith.constant 0 : i32
    %c0_i32_0 = arith.constant 0 : i32
    %c0_i32_1 = arith.constant 0 : i32
    return %c0_i32, %c0_i32_0 : i32, i32
  }
  func.func @transform_12(%arg0: i32) -> (i32, i32) {
    %c0_i32 = arith.constant 0 : i32
    %c0_i32_0 = arith.constant 0 : i32
    return %arg0, %c0_i32 : i32, i32
  }
}

module attributes {stable_mosaic.version = 11 : i64} {
  func.func @_proto_logits_kernel(%arg0: memref<1x4xi32, #tpu.memory_space<vmem>>, %arg1: memref<8x128xf32, #tpu.memory_space<vmem>>, %arg2: memref<4x2xf32, #tpu.memory_space<vmem>>) attributes {dimension_semantics = [], scalar_prefetch = 0 : i64, scratch_operands = 0 : i64, tpu.core_type = #tpu.core_type<tc>} {
    %c0 = arith.constant 0 : index
    %c0_0 = arith.constant 0 : index
    %0 = vector.load %arg1[%c0, %c0_0] : memref<8x128xf32, #tpu.memory_space<vmem>>, vector<8x128xf32>
    %1 = vector.extract_strided_slice %0 {offsets = [0, 0], sizes = [4, 128], strides = [1, 1]} : vector<8x128xf32> to vector<4x128xf32>
    %2 = vector.extract_strided_slice %0 {offsets = [4, 0], sizes = [4, 128], strides = [1, 1]} : vector<8x128xf32> to vector<4x128xf32>
    %c0_1 = arith.constant 0 : index
    %c0_2 = arith.constant 0 : index
    %3 = vector.load %arg0[%c0_1, %c0_2] : memref<1x4xi32, #tpu.memory_space<vmem>>, vector<1x4xi32>
    %4 = tpu.iota {dimensions = array<i32: 0>} : vector<2x4xi32>
    %5 = vector.broadcast %3 : vector<1x4xi32> to vector<2x4xi32>
    %6 = arith.cmpi eq, %4, %5 : vector<2x4xi32>
    %7 = arith.extui %6 : vector<2x4xi1> to vector<2x4xi32>
    %8 = arith.sitofp %7 : vector<2x4xi32> to vector<2x4xf32>
    %cst = arith.constant dense<0.000000e+00> : vector<2xf32>
    %9 = vector.multi_reduction <add>, %8, %cst [1] : vector<2x4xf32> to vector<2xf32>
    %10 = vector.shape_cast %9 : vector<2xf32> to vector<2x1xf32>
    %cst_3 = arith.constant 1.000000e+00 : f32
    %11 = vector.broadcast %cst_3 : f32 to vector<2x1xf32>
    %12 = arith.maximumf %10, %11 : vector<2x1xf32>
    %cst_4 = arith.constant dense<0.000000e+00> : vector<2x128xf32>
    %13 = tpu.matmul %8, %1, %cst_4 {dimension_numbers = #tpu.dot_dimension_numbers<[1], [0], [0], [1], [0, 0, 1, 1], [], []>} : vector<2x4xf32>, vector<4x128xf32>, vector<2x128xf32> -> vector<2x128xf32>
    %cst_5 = arith.constant 1.000000e+00 : f32
    %14 = vector.broadcast %cst_5 : f32 to vector<2x1xf32>
    %15 = arith.divf %14, %12 : vector<2x1xf32>
    %16 = vector.broadcast %15 : vector<2x1xf32> to vector<2x128xf32>
    %17 = arith.mulf %13, %16 : vector<2x128xf32>
    %18 = arith.mulf %17, %17 : vector<2x128xf32>
    %cst_6 = arith.constant dense<0.000000e+00> : vector<2xf32>
    %19 = vector.multi_reduction <add>, %18, %cst_6 [1] : vector<2x128xf32> to vector<2xf32>
    %20 = vector.shape_cast %19 : vector<2xf32> to vector<2x1xf32>
    %cst_7 = arith.constant 9.99999996E-13 : f32
    %21 = vector.broadcast %cst_7 : f32 to vector<2x1xf32>
    %22 = arith.addf %20, %21 : vector<2x1xf32>
    %23 = math.rsqrt %22 : vector<2x1xf32>
    %24 = arith.mulf %2, %2 : vector<4x128xf32>
    %cst_8 = arith.constant dense<0.000000e+00> : vector<4xf32>
    %25 = vector.multi_reduction <add>, %24, %cst_8 [1] : vector<4x128xf32> to vector<4xf32>
    %26 = vector.shape_cast %25 : vector<4xf32> to vector<4x1xf32>
    %cst_9 = arith.constant 9.99999996E-13 : f32
    %27 = vector.broadcast %cst_9 : f32 to vector<4x1xf32>
    %28 = arith.addf %26, %27 : vector<4x1xf32>
    %29 = math.rsqrt %28 : vector<4x1xf32>
    %30 = vector.broadcast %23 : vector<2x1xf32> to vector<2x128xf32>
    %31 = arith.mulf %17, %30 : vector<2x128xf32>
    %cst_10 = arith.constant dense<0.000000e+00> : vector<4x2xf32>
    %32 = tpu.matmul %2, %31, %cst_10 {dimension_numbers = #tpu.dot_dimension_numbers<[1], [1], [0], [0], [0, 0, 1, 0], [], []>} : vector<4x128xf32>, vector<2x128xf32>, vector<4x2xf32> -> vector<4x2xf32>
    %33 = vector.broadcast %29 : vector<4x1xf32> to vector<4x2xf32>
    %34 = arith.mulf %32, %33 : vector<4x2xf32>
    %c0_11 = arith.constant 0 : index
    %c0_12 = arith.constant 0 : index
    %35 = vector.load %arg2[%c0_11, %c0_12] : memref<4x2xf32, #tpu.memory_space<vmem>>, vector<4x2xf32>
    tpu.vector_store %arg2[%c0_11, %c0_12], %34 {strides = array<i32>} : memref<4x2xf32, #tpu.memory_space<vmem>>, vector<4x2xf32>,
    return
  }
}

</mosaic_0001>

<bundles_post_ra>
// kernel: tile.14
= control target key start
LH: loop header
LB: loop body
LE: loop exit
PB: predicated region body
PF: predicated region fallthrough
CT: control target
= control target key end

     0   :  { %s40_s0 = inlined_call_operand.vmem [shape: f32[6], index: 0, kind: input, shape index: {}]   ;;  %s41_s1 = inlined_call_operand.vmem [shape: f32[28,6], index: 1, kind: output, shape index: {}]  }
   0x1   :  { %v4_v0 = vld [vmem:[%s40_s0] ss:$0 sm:$0xff] }
   0x2   :  { %5 = vst [vmem:[%s41_s1] sm:$0xff] %v4_v0 }
   0x3   :  { %12 = vst [vmem:[%s41_s1 + $0x8] sm:$0xff] %v4_v0 }
   0x4   :  { %13 = vst [vmem:[%s41_s1 + $0x10] sm:$0xff] %v4_v0 }
   0x5   :  { %14 = vst [vmem:[%s41_s1 + $0x18] sm:$0xff] %v4_v0 }

// kernel: tile.15
= control target key start
LH: loop header
LB: loop body
LE: loop exit
PB: predicated region body
PF: predicated region fallthrough
CT: control target
= control target key end

     0   :  { %vm9_vm0 = vcmask 15360   ;;  %s248_s12 = smov 126   ;;  %s249_s13 = smov 114   ;;  %vm3_vm1 = vcmask 48128   ;;  %vm13_vm2 = vcmask 31744   ;;  %vm16_vm3 = vcmask 1048560   ;;  %s378_s0 = inlined_call_operand.vmem [shape: f32[28,6], index: 0, kind: input, shape index: {}]   ;;  %s379_s1 = inlined_call_operand.vmem [shape: f32[1,168], index: 1, kind: output, shape index: {}]  }
   0x1   :  { %v192_v0 = vld [vmem:[%s378_s0 + $0x15] sm:$0x1]   ;;  %v195_v3 = vld [vmem:[%s378_s0 + $0x13] sm:$0x1]   ;;  %v197_v4 = vld [vmem:[%s378_s0 + $0x11] sm:$0x1]  }
   0x2   :  { %v193_v1 = vld [vmem:[%s378_s0 + $0x15] sm:$0x1]   ;;  %26 = vrot.lane.b32.xlu1 %v195_v3, %s249_s13  ;;  %s250_s16 = smov 102   ;;  %v194_v5 = vld [vmem:[%s378_s0 + $0x14] sm:$0x1]   ;;  %s251_s21 = smov 120  }
   0x3   :  { %v10_v2 = vsel %vm9_vm0, %v193_v1, %v192_v0  ;;  %38 = vrot.lane.b32.xlu2 %v197_v4, %s250_s16  ;;  %v196_v6 = vld [vmem:[%s378_s0 + $0x12] sm:$0x1]   ;;  %s252_s22 = smov 108   ;;  %v198_v7 = vld [vmem:[%s378_s0 + $0x10] sm:$0x1]   ;;  %s253_s25 = smov 96  }
   0x4   :  { %11 = vrot.lane.b32.xlu0 %v10_v2, %s248_s12  ;;  %v199_v8 = vld [vmem:[%s378_s0 + $0xf] sm:$0x1]   ;;  %v200_v9 = vld [vmem:[%s378_s0 + $0xe] sm:$0x1]   ;;  %s254_s30 = smov 90   ;;  %s255_s2 = smov 84  }
   0x5   :  { %v201_v10 = vld [vmem:[%s378_s0 + $0xd] sm:$0x1]   ;;  %s256_s5 = smov 78   ;;  %v202_v11 = vld [vmem:[%s378_s0 + $0xc] sm:$0x1]   ;;  %s257_s10 = smov 72  }
   0x6   :  { %v203_v12 = vld [vmem:[%s378_s0 + $0xb] sm:$0x1]   ;;  %s258_s11 = smov 66   ;;  %v204_v13 = vld [vmem:[%s378_s0 + $0xa] sm:$0x1]   ;;  %s259_s14 = smov 60  }
   0x7   :  { %v205_v14 = vld [vmem:[%s378_s0 + $0x9] sm:$0x1]   ;;  %v206_v15 = vld [vmem:[%s378_s0 + $0x8] sm:$0x1]   ;;  %s260_s19 = smov 54   ;;  %s261_s20 = smov 48  }
   0x8   :  { %v207_v16 = vld [vmem:[%s378_s0 + $0x7] sm:$0x1]   ;;  %s262_s23 = smov 42   ;;  %v208_v17 = vld [vmem:[%s378_s0 + $0x6] sm:$0x1]   ;;  %s263_s28 = smov 36  }
   0x9   :  { %v209_v18 = vld [vmem:[%s378_s0 + $0x1b] sm:$0x1]   ;;  %s264_s29 = smov 34   ;;  %v210_v19 = vld [vmem:[%s378_s0 + $0x5] sm:$0x1]   ;;  %s265_s3 = smov 30  }
   0xa   :  { %32 = vrot.lane.b32.xlu1 %v196_v6, %s252_s22  ;;  %v211_v20 = vld [vmem:[%s378_s0 + $0x1a] sm:$0x1]   ;;  %v212_v21 = vld [vmem:[%s378_s0 + $0x4] sm:$0x1]   ;;  %s266_s8 = smov 28   ;;  %s267_s9 = smov 24  }
   0xb   :  { %44 = vrot.lane.b32.xlu2 %v198_v7, %s253_s25  ;;  %v213_v22 = vld [vmem:[%s378_s0 + $0x19] sm:$0x1]   ;;  %s268_s12 = smov 22   ;;  %v214_v23 = vld [vmem:[%s378_s0 + $0x3] sm:$0x1]   ;;  %s269_s17 = smov 18  }
   0xc   :  { %20 = vrot.lane.b32.xlu0 %v194_v5, %s251_s21  ;;  %v215_v24 = vld [vmem:[%s378_s0 + $0x18] sm:$0x1]   ;;  %s270_s18 = smov 16   ;;  %v216_v25 = vld [vmem:[%s378_s0 + $0x2] sm:$0x1]   ;;  %s271_s21 = smov 12  }
   0xd   :  { %v217_v26 = vld [vmem:[%s378_s0 + $0x17] sm:$0x1]   ;;  %v218_v27 = vld [vmem:[%s378_s0 + $0x1] sm:$0x1]   ;;  %s272_s26 = smov 10   ;;  %s273_s27 = smov 6  }
   0xe   :  { %v219_v28 = vld [vmem:[%s378_s0 + $0x16] sm:$0x1]   ;;  %v2_v29 = vld [vmem:[%s378_s0] sm:$0x1]   ;;  %vm22_vm4 = vcmask 1032128   ;;  %vm28_vm5 = vcmask 982928  }
   0xf   :  { %4 = vst.msk [vmem:[#allocation0] sm:$0x1] %vm3_vm1, %v2_v29   ;;  %vm34_vm6 = vcmask 933728   ;;  %vm40_vm7 = vcmask 884528   ;;  %vm46_vm8 = vcmask 835328   ;;  %vm52_vm9 = vcmask 786128  }
  0x10   :  { %vm58_vm10 = vcmask 736928   ;;  %vm64_vm11 = vcmask 687728   ;;  %vm70_vm12 = vcmask 638528   ;;  %vm76_vm13 = vcmask 589328  }
  0x11   :  { %vm82_vm14 = vcmask 540128   ;;  %vm88_vm15 = vcmask 490928   ;;  %vm94_vm0 = vcmask 441728   ;;  %vm100_vm1 = vcmask 392528  }
  0x12   :  { %56 = vrot.lane.b32.xlu1 %v200_v9, %s255_s2 }
  0x13   :  { %62 = vrot.lane.b32.xlu2 %v201_v10, %s256_s5 }
  0x14   :  { %50 = vrot.lane.b32.xlu0 %v199_v8, %s254_s30  ;;  %s274_s30 = smov 4  }
  0x1a   :  { %74 = vrot.lane.b32.xlu1 %v203_v12, %s258_s11 }
  0x1b   :  { %80 = vrot.lane.b32.xlu2 %v204_v13, %s259_s14 }
  0x1c   :  { %68 = vrot.lane.b32.xlu0 %v202_v11, %s257_s10 }
  0x22   :  { %92 = vrot.lane.b32.xlu1 %v206_v15, %s261_s20 }
  0x23   :  { %98 = vrot.lane.b32.xlu2 %v207_v16, %s262_s23 }
  0x24   :  { %86 = vrot.lane.b32.xlu0 %v205_v14, %s260_s19 }
  0x2a   :  { %110 = vrot.lane.b32.xlu1 %v209_v18, %s264_s29 }
  0x2b   :  { %117 = vrot.lane.b32.xlu2 %v210_v19, %s265_s3 }
  0x2c   :  { %104 = vrot.lane.b32.xlu0 %v208_v17, %s263_s28 }
  0x32   :  { %130 = vrot.lane.b32.xlu1 %v212_v21, %s267_s9 }
  0x33   :  { %136 = vrot.lane.b32.xlu2 %v213_v22, %s268_s12 }
  0x34   :  { %123 = vrot.lane.b32.xlu0 %v211_v20, %s266_s8 }
  0x3a   :  { %149 = vrot.lane.b32.xlu1 %v215_v24, %s270_s18 }
  0x3b   :  { %156 = vrot.lane.b32.xlu2 %v216_v25, %s271_s21 }
  0x3c   :  { %143 = vrot.lane.b32.xlu0 %v214_v23, %s269_s17 }
  0x42   :  { %169 = vrot.lane.b32.xlu1 %v218_v27, %s273_s27 }
  0x43   :  { %175 = vrot.lane.b32.xlu2 %v219_v28, %s274_s30 }
  0x44   :  { %162 = vrot.lane.b32.xlu0 %v217_v26, %s272_s26 }
  0x5d   :  { %v39_v30 = vpop.permute.xlu2 %38  }
  0x65   :  { %v45_v31 = vpop.permute.xlu2 %44  }
  0x6d   :  { %v63_v32 = vpop.permute.xlu2 %62  }
  0x74   :  { %v27_v34 = vpop.permute.xlu1 %26  }
  0x75   :  { %v81_v35 = vpop.permute.xlu2 %80  }
  0x76   :  { %v12_v33 = vpop.permute.xlu0 %11  }
  0x77   :  { %15 = vst.msk [vmem:[#allocation0 + $0x8] sm:$0x1] %vm13_vm2, %v12_v33   ;;  %vm106_vm2 = vcmask 343328  }
  0x78   :  { %17 = vst.msk [vmem:[#allocation0] sm:$0x1] %vm16_vm3, %v12_v33   ;;  %vm119_vm3 = vcmask 294128  }
  0x7c   :  { %v33_v37 = vpop.permute.xlu1 %32  }
  0x7d   :  { %v99_v38 = vpop.permute.xlu2 %98  }
  0x7e   :  { %v21_v36 = vpop.permute.xlu0 %20  }
  0x7f   :  { %23 = vst.msk [vmem:[#allocation0] sm:$0x1] %vm22_vm4, %v21_v36   ;;  %vm112_vm4 = vcmask 326928  }
  0x80   :  { %29 = vst.msk [vmem:[#allocation0] sm:$0x1] %vm28_vm5, %v27_v34   ;;  %vm125_vm5 = vcmask 277728  }
  0x81   :  { %35 = vst.msk [vmem:[#allocation0] sm:$0x1] %vm34_vm6, %v33_v37   ;;  %vm138_vm6 = vcmask 228528  }
  0x82   :  { %41 = vst.msk [vmem:[#allocation0] sm:$0x1] %vm40_vm7, %v39_v30   ;;  %vm132_vm7 = vcmask 244928  }
  0x83   :  { %47 = vst.msk [vmem:[#allocation0] sm:$0x1] %vm46_vm8, %v45_v31   ;;  %vm145_vm8 = vcmask 195728  }
  0x84   :  { %v57_v40 = vpop.permute.xlu1 %56  }
  0x85   :  { %v118_v41 = vpop.permute.xlu2 %117  }
  0x86   :  { %v51_v39 = vpop.permute.xlu0 %50  }
  0x87   :  { %53 = vst.msk [vmem:[#allocation0] sm:$0x1] %vm52_vm9, %v51_v39   ;;  %vm158_vm9 = vcmask 146528  }
  0x88   :  { %59 = vst.msk [vmem:[#allocation0] sm:$0x1] %vm58_vm10, %v57_v40   ;;  %vm151_vm10 = vcmask 179328  }
  0x89   :  { %65 = vst.msk [vmem:[#allocation0] sm:$0x1] %vm64_vm11, %v63_v32   ;;  %vm164_vm11 = vcmask 130128  }
  0x8c   :  { %v75_v43 = vpop.permute.xlu1 %74  }
  0x8d   :  { %v137_v44 = vpop.permute.xlu2 %136  }
  0x8e   :  { %v69_v42 = vpop.permute.xlu0 %68  }
  0x8f   :  { %71 = vst.msk [vmem:[#allocation0] sm:$0x1] %vm70_vm12, %v69_v42   ;;  %vm177_vm12 = vcmask 80928  }
  0x90   :  { %77 = vst.msk [vmem:[#allocation0] sm:$0x1] %vm76_vm13, %v75_v43   ;;  %vm171_vm13 = vcmask 97328  }
  0x91   :  { %83 = vst.msk [vmem:[#allocation0] sm:$0x1] %vm82_vm14, %v81_v35  }
  0x94   :  { %v93_v46 = vpop.permute.xlu1 %92  }
  0x95   :  { %v157_v47 = vpop.permute.xlu2 %156  }
  0x96   :  { %v87_v45 = vpop.permute.xlu0 %86  }
  0x97   :  { %89 = vst.msk [vmem:[#allocation0] sm:$0x1] %vm88_vm15, %v87_v45  }
  0x98   :  { %95 = vst.msk [vmem:[#allocation0] sm:$0x1] %vm94_vm0, %v93_v46  }
  0x99   :  { %101 = vst.msk [vmem:[#allocation0] sm:$0x1] %vm100_vm1, %v99_v38  }
  0x9c   :  { %v111_v49 = vpop.permute.xlu1 %110  }
  0x9d   :  { %114 = vst.msk [vmem:[#allocation0 + $0x8] sm:$0x1] %vm112_vm4, %v111_v49   ;;  %v176_v50 = vpop.permute.xlu2 %175  }
  0x9e   :  { %v105_v48 = vpop.permute.xlu0 %104  }
  0x9f   :  { %107 = vst.msk [vmem:[#allocation0] sm:$0x1] %vm106_vm2, %v105_v48  }
  0xa0   :  { %120 = vst.msk [vmem:[#allocation0] sm:$0x1] %vm119_vm3, %v118_v41  }
  0xa4   :  { %v131_v52 = vpop.permute.xlu1 %130  }
  0xa5   :  { %133 = vst.msk [vmem:[#allocation0] sm:$0x1] %vm132_vm7, %v131_v52  }
  0xa6   :  { %v124_v51 = vpop.permute.xlu0 %123  }
  0xa7   :  { %127 = vst.msk [vmem:[#allocation0 + $0x8] sm:$0x1] %vm125_vm5, %v124_v51  }
  0xa8   :  { %140 = vst.msk [vmem:[#allocation0 + $0x8] sm:$0x1] %vm138_vm6, %v137_v44  }
  0xac   :  { %v150_v54 = vpop.permute.xlu1 %149  }
  0xad   :  { %153 = vst.msk [vmem:[#allocation0 + $0x8] sm:$0x1] %vm151_vm10, %v150_v54  }
  0xae   :  { %v144_v53 = vpop.permute.xlu0 %143  }
  0xaf   :  { %146 = vst.msk [vmem:[#allocation0] sm:$0x1] %vm145_vm8, %v144_v53  }
  0xb0   :  { %159 = vst.msk [vmem:[#allocation0] sm:$0x1] %vm158_vm9, %v157_v47  }
  0xb4   :  { %v170_v56 = vpop.permute.xlu1 %169  }
  0xb5   :  { %172 = vst.msk [vmem:[#allocation0] sm:$0x1] %vm171_vm13, %v170_v56  }
  0xb6   :  { %v163_v55 = vpop.permute.xlu0 %162  }
  0xb7   :  { %166 = vst.msk [vmem:[#allocation0 + $0x8] sm:$0x1] %vm164_vm11, %v163_v55  }
  0xb8   :  { %179 = vst.msk [vmem:[#allocation0 + $0x8] sm:$0x1] %vm177_vm12, %v176_v50  }
  0xbc   :  { %v182_v58 = vld [vmem:[#allocation0] sm:$0x1] }
  0xbd   :  { %185 = vst [vmem:[%s379_s1] sm:$0x1] %v182_v58 }
  0xbf   :  { %v187_v57 = vld [vmem:[#allocation0 + $0x8] sm:$0x1] }
  0xc0   :  { %220 = vst [vmem:[%s379_s1 + $0x1] sm:$0x1] %v187_v57 }

// kernel: tile.19
= control target key start
LH: loop header
LB: loop body
LE: loop exit
PB: predicated region body
PF: predicated region fallthrough
CT: control target
= control target key end

     0   :  { %s28_s0 = inlined_call_operand.vmem [shape: f32[16], index: 0, kind: input, shape index: {}]   ;;  %s29_s1 = inlined_call_operand.vmem [shape: f32[10,16], index: 1, kind: output, shape index: {}]  }
   0x1   :  { %v4_v0 = vld [vmem:[%s28_s0] ss:$0 sm:$0xff] }
   0x2   :  { %5 = vst [vmem:[%s29_s1] sm:$0xff] %v4_v0 }
   0x3   :  { %8 = vst [vmem:[%s29_s1 + $0x8] sm:$0xff] %v4_v0 }

// kernel: tile.20
= control target key start
LH: loop header
LB: loop body
LE: loop exit
PB: predicated region body
PF: predicated region fallthrough
CT: control target
= control target key end

     0   :  { %s76_s10 = smov 112   ;;  %s77_s11 = smov 80   ;;  %vm4_vm0 = vcmask 130048   ;;  %vm10_vm1 = vcmask 1048448   ;;  %vm16_vm2 = vcmask 917248   ;;  %vm22_vm3 = vcmask 786048   ;;  %s123_s0 = inlined_call_operand.vmem [shape: f32[10,16], index: 0, kind: input, shape index: {}]   ;;  %s124_s1 = inlined_call_operand.vmem [shape: f32[1,160], index: 1, kind: output, shape index: {}]  }
   0x1   :  { %v61_v0 = vld [vmem:[%s123_s0 + $0x7] sm:$0x1]   ;;  %v63_v1 = vld [vmem:[%s123_s0 + $0x5] sm:$0x1]   ;;  %v65_v2 = vld [vmem:[%s123_s0 + $0x3] sm:$0x1]  }
   0x2   :  { %8 = vrot.lane.b32.xlu0 %v61_v0, %s76_s10  ;;  %20 = vrot.lane.b32.xlu1 %v63_v1, %s77_s11  ;;  %s78_s14 = smov 48   ;;  %v62_v3 = vld [vmem:[%s123_s0 + $0x6] sm:$0x1]   ;;  %v64_v4 = vld [vmem:[%s123_s0 + $0x4] sm:$0x1]   ;;  %s79_s19 = smov 96  }
   0x3   :  { %32 = vrot.lane.b32.xlu2 %v65_v2, %s78_s14  ;;  %s80_s20 = smov 64   ;;  %v66_v5 = vld [vmem:[%s123_s0 + $0x2] sm:$0x1]   ;;  %s43_s23 = smov 3  ;;  %vm28_vm4 = vcmask 654848   ;;  %vm34_vm5 = vcmask 523648  }
   0x4   :  { %s81_s24 = smov 32   ;;  %v67_v6 = vld [vmem:[%s123_s0 + $0x1] ss:$8 sm:%s43_s23]   ;;  %s82_s27 = smov 16   ;;  %vm40_vm6 = vcmask 392448   ;;  %vm47_vm7 = vcmask 261248  }
   0x5   :  { %s2_s28 = smov 3 }
   0x6   :  { %v3_v7 = vld [vmem:[%s123_s0] ss:$8 sm:%s2_s28]  }
   0x7   :  { %5 = vst.msk [vmem:[#allocation0] ss:$8 sm:$0x3] %vm4_vm0, %v3_v7  }
   0xa   :  { %14 = vrot.lane.b32.xlu0 %v62_v3, %s79_s19  ;;  %26 = vrot.lane.b32.xlu1 %v64_v4, %s80_s20 }
   0xb   :  { %38 = vrot.lane.b32.xlu2 %v66_v5, %s81_s24 }
  0x12   :  { %45 = vrot.lane.b32.xlu0 %v67_v6, %s82_s27 }
  0x5d   :  { %v33_v8 = vpop.permute.xlu2 %32  }
  0x65   :  { %v39_v9 = vpop.permute.xlu2 %38  }
  0x74   :  { %v9_v10 = vpop.permute.xlu0 %8   ;;  %v21_v11 = vpop.permute.xlu1 %20  }
  0x75   :  { %11 = vst.msk [vmem:[#allocation0] sm:$0x1] %vm10_vm1, %v9_v10  }
  0x7c   :  { %v15_v12 = vpop.permute.xlu0 %14   ;;  %v27_v13 = vpop.permute.xlu1 %26  }
  0x7d   :  { %17 = vst.msk [vmem:[#allocation0] sm:$0x1] %vm16_vm2, %v15_v12  }
  0x7e   :  { %23 = vst.msk [vmem:[#allocation0] sm:$0x1] %vm22_vm3, %v21_v11  }
  0x7f   :  { %29 = vst.msk [vmem:[#allocation0] sm:$0x1] %vm28_vm4, %v27_v13  }
  0x80   :  { %35 = vst.msk [vmem:[#allocation0] sm:$0x1] %vm34_vm5, %v33_v8  }
  0x81   :  { %41 = vst.msk [vmem:[#allocation0] sm:$0x1] %vm40_vm6, %v39_v9  }
  0x84   :  { %v46_v14 = vpop.permute.xlu0 %45  }
  0x85   :  { %48 = vst.msk [vmem:[#allocation0] ss:$8 sm:$0x3] %vm47_vm7, %v46_v14  }
  0x8c   :  { %v51_v15 = vld [vmem:[#allocation0] sm:$0x1]  ;;  %v56_v16 = vld [vmem:[#allocation0 + $0x8] sm:$0x1] }
  0x8d   :  { %54 = vst [vmem:[%s124_s1] sm:$0x1] %v51_v15 }
  0x8e   :  { %68 = vst [vmem:[%s124_s1 + $0x1] sm:$0x1] %v56_v16 }

// kernel: protonet_forward.3
= control target key start
LH: loop header
LB: loop body
LE: loop exit
PB: predicated region body
PF: predicated region fallthrough
CT: control target
= control target key end

     0   :  { %v13_v0 = vlaneseq  ;;  %vm28_vm0 = vcmask 1043456   ;;  %vm19_vm1 = vcmask 25600   ;;  %vm24_vm2 = vcmask 31744   ;;  %s169_s0 = inlined_call_operand.vmem [shape: s32[1,4], index: 0, kind: input, shape index: {}]   ;;  %s170_s1 = inlined_call_operand.vmem [shape: f32[8,128], index: 1, kind: input, shape index: {}]   ;;  %s171_s2 = inlined_call_operand.vmem [shape: f32[4,2], index: 2, kind: output, shape index: {}]  }
   0x1   :  { %v137_v1 = vld [vmem:[%s169_s0] ss:$0 sm:$0xff]  ;;  %v144_v4 = vmov 0.0   ;;  %vm85_vm4 = vcmask 1047556   ;;  %vm69_vm9 = vcmask 1041408  }
   0x2   :  { %v11_v2 = vld [vmem:[%s170_s1] sm:$0xff]  ;;  %v14_v3 = vshrl.u32 %v13_v0, 7 }
   0x3   :  { %134 = vmatpush.msk.msra.mxu0 %vm28_vm0, %v11_v2  ;;  %v84_v7 = vmul.f32 %v11_v2, %v11_v2  ;;  %v101_v35 = vrot.slane %v11_v2, 4  ;;  %vm127_vm0 = vcmask 11264  }
   0x4   :  { %vm16_vm3 = vcmp.eq.s32.totalorder %v14_v3, %v137_v1 }
   0x5   :  { %v133_v5 = vsel %vm16_vm3, 1.0, %v144_v4  ;;  %v86_v8 = vsel %vm85_vm4, %v84_v7, 0.0 }
   0x6   :  { %v20_v6 = vsel %vm19_vm1, %v133_v5, 0.0  ;;  %135 = vmatmul.msk.f32.vlgmr.msra.gmra.mxu0 %vm24_vm2, %v133_v5  ;;  %87 = vadd.xlane.f32.xlu1 %v86_v8 }
   0x7   :  { %21 = vadd.xlane.f32.xlu0 %v20_v6 }
  0x79   :  { %v88_v36 = vpop.xlane.xlu1 %87 }
  0x7a   :  { %v22_v9 = vpop.xlane.xlu0 %21  ;;  %v89_v37 = vadd.f32 1e-12, %v88_v36 }
  0x7b   :  { %v23_v10 = vmax.f32 %v22_v9, 1.0 }
  0x7c   :  { %vm96_vm13 = vweird.f32 %v89_v37 }
  0x7d   :  { %138 = vrcp.f32 %v23_v10  ;;  %v63_v14 = vand.u32 2147483648, %v23_v10  ;;  %v61_v16 = vand.u32 2147483647, %v23_v10  ;;  %vm57_vm6 = vweird.f32 %v23_v10 }
  0x7f   :  { %v64_v19 = vor.u32 1.1754944e-38, %v63_v14  ;;  %vm62_vm8 = vcmp.eq.f32.partialorder %v61_v16, 8.507059e+37 }
  0x83   :  { %v139_v11 = vpop.eup %138  ;;  %v49_v18 = vpop.f32.mrf.mxu0 }
  0x84   :  { %v53_v12 = vmul.f32 %v139_v11, %v23_v10  ;;  %vm58_vm5 = vweird.f32 %v139_v11 }
  0x85   :  { %vm59_vm7 = vmor %vm57_vm6, %vm58_vm5 }
  0x86   :  { %v54_v13 = vsub.f32 1.0, %v53_v12 }
  0x88   :  { %v55_v15 = vmul.f32 %v139_v11, %v54_v13 }
  0x8a   :  { %v56_v17 = vadd.f32 %v139_v11, %v55_v15 }
  0x8c   :  { %v60_v20 = vsel %vm59_vm7, %v139_v11, %v56_v17 }
  0x8d   :  { %v65_v21 = vsel %vm62_vm8, %v64_v19, %v60_v20 }
  0x8e   :  { %v67_v22 = vmul.f32 %v65_v21, %v49_v18 }
  0x90   :  { %v68_v23 = vmul.f32 %v67_v22, %v67_v22 }
  0x92   :  { %v70_v24 = vsel %vm69_vm9, %v68_v23, 0.0 }
  0x93   :  { %71 = vadd.xlane.f32.xlu0 %v70_v24 }
 0x106   :  { %v72_v25 = vpop.xlane.xlu0 %71 }
 0x107   :  { %v73_v26 = vadd.f32 1e-12, %v72_v25 }
 0x109   :  { %140 = vrsqrt.f32 %v73_v26  ;;  %vm80_vm11 = vweird.f32 %v73_v26 }
 0x10a   :  { %142 = vrsqrt.f32 %v89_v37 }
 0x10f   :  { %v141_v27 = vpop.eup %140 }
 0x110   :  { %v75_v28 = vmul.f32 %v141_v27, %v73_v26  ;;  %vm81_vm10 = vweird.f32 %v141_v27  ;;  %v143_v38 = vpop.eup %142 }
 0x111   :  { %vm82_vm12 = vmor %vm80_vm11, %vm81_vm10  ;;  %v91_v39 = vmul.f32 %v143_v38, %v89_v37  ;;  %vm97_vm14 = vweird.f32 %v143_v38 }
 0x112   :  { %v76_v29 = vmul.f32 %v141_v27, %v75_v28  ;;  %vm98_vm15 = vmor %vm96_vm13, %vm97_vm14 }
 0x113   :  { %v92_v40 = vmul.f32 %v143_v38, %v91_v39 }
 0x114   :  { %v77_v30 = vmul.f32 0.5, %v76_v29 }
 0x115   :  { %v93_v41 = vmul.f32 0.5, %v92_v40 }
 0x116   :  { %v78_v31 = vsub.f32 1.5, %v77_v30 }
 0x117   :  { %v94_v42 = vsub.f32 1.5, %v93_v41 }
 0x118   :  { %v79_v32 = vmul.f32 %v141_v27, %v78_v31 }
 0x119   :  { %v95_v43 = vmul.f32 %v143_v38, %v94_v42 }
 0x11a   :  { %v83_v33 = vsel %vm82_vm12, %v141_v27, %v79_v32 }
 0x11b   :  { %v100_v34 = vmul.f32 %v83_v33, %v67_v22  ;;  %v99_v44 = vsel %vm98_vm15, %v143_v38, %v95_v43 }
 0x11c   :  { %v124_v45 = vrot.slane %v99_v44, 4 }
 0x11d   :  { %118 = vmatpush.xpose.msra.mxu1 %v100_v34 }
 0x120   :  { %119 = vmatmul.f32.vlgmr.msra.gmra.mxu1 %v101_v35 }
 0x19d   :  { %v120_v46 = vpop.f32.mrf.mxu1 }
 0x19e   :  { %v126_v47 = vmul.f32 %v124_v45, %v120_v46 }
 0x1a0   :  { %128 = vst.msk [vmem:[%s171_s2] sm:$0xf] %vm127_vm0, %v126_v47 }

// kernel: protonet_forward.2
= control target key start
LH: loop header
LB: loop body
LE: loop exit
PB: predicated region body
PF: predicated region fallthrough
CT: control target
= control target key end

     0   :  { %vm247_vm0 = vcmask 261120   ;;  %vm99_vm1 = vsmask.f32 7424  ;;  %vm1072_vm2 = vsmask.f32 6400  ;;  %vm725_vm3 = vcmask 1046528   ;;  %s10212_s1 = inlined_call_operand.vmem [shape: bf16[5,32,168], index: 1, kind: input, shape index: {}]   ;;  %s10213_s0 = inlined_call_operand.vmem [shape: f32[256,32], index: 0, kind: input, shape index: {}]   ;;  %s10214_s2 = inlined_call_operand.vmem [shape: f32[1,168], index: 2, kind: input, shape index: {}]   ;;  %s10215_s3 = inlined_call_operand.vmem [shape: bf16[112,252], index: 3, kind: input, shape index: {}]   ;;  %s10216_s4 = inlined_call_operand.vmem [shape: bf16[5,168,160], index: 4, kind: input, shape index: {}]   ;;  %s10217_s5 = inlined_call_operand.vmem [shape: f32[1,160], index: 5, kind: input, shape index: {}]   ;;  %s10218_s6 = inlined_call_operand.vmem [shape: bf16[40,108], index: 6, kind: input, shape index: {}]   ;;  %s10219_s7 = inlined_call_operand.vmem [shape: bf16[5,160,120], index: 7, kind: input, shape index: {}]   ;;  %s10220_s8 = inlined_call_operand.vmem [shape: f32[1,120], index: 8, kind: input, shape index: {}]   ;;  %s10221_s10 = inlined_call_operand.vmem [shape: bf16[120,128], index: 10, kind: input, shape index: {}]   ;;  %s10222_s9 = inlined_call_operand.vmem [shape: bf16[8,36], index: 9, kind: input, shape index: {}]   ;;  %s10223_s11 = inlined_call_operand.vmem [shape: f32[1,128], index: 11, kind: input, shape index: {}]   ;;  %s10224_s12 = inlined_call_operand.vmem [shape: f32[8,128], index: 12, kind: output, shape index: {}]  }
   0x1   :  { %v5343_v0 = vld [vmem:[%s10212_s1 + $0x30] sm:$0xf]  ;;  %v6555_v1 = vld [vmem:[%s10212_s1 + $0x34] sm:$0xf0]  ;;  %v6554_v2 = vld [vmem:[%s10212_s1 + $0x34] sm:$0xf] }
   0x2   :  { %v5344_v3 = vor.u32 %v6555_v1, %v5343_v0  ;;  %v5345_v4 = vld [vmem:[%s10212_s1 + $0x38] sm:$0xf0]  ;;  %v5391_v5 = vld [vmem:[%s10212_s1 + $0x10] sm:$0xf]  ;;  %v6551_v6 = vld [vmem:[%s10212_s1 + $0x14] sm:$0xf0] }
   0x3   :  { %v5348_v7 = vor.u32 %v6554_v2, %v5345_v4  ;;  %v5392_v8 = vor.u32 %v6551_v6, %v5391_v5  ;;  %v6550_v9 = vld [vmem:[%s10212_s1 + $0x14] sm:$0xf]  ;;  %v5393_v10 = vld [vmem:[%s10212_s1 + $0x18] sm:$0xf0]  ;;  %v5335_v11 = vld [vmem:[%s10212_s1 + $0x20] sm:$0xf] }
   0x4   :  { %302 = vmatpush.bf16.msra.mxu0 %v5344_v3  ;;  %v5396_v12 = vor.u32 %v6550_v9, %v5393_v10  ;;  %v6553_v13 = vld [vmem:[%s10212_s1 + $0x24] sm:$0xf0]  ;;  %v6552_v14 = vld [vmem:[%s10212_s1 + $0x24] sm:$0xf]  ;;  %v5337_v15 = vld [vmem:[%s10212_s1 + $0x28] sm:$0xf0] }
   0x5   :  { %391 = vmatpush.bf16.msra.mxu1 %v5348_v7  ;;  %532 = vmatpush.bf16.msra.mxu2 %v5392_v8  ;;  %v5336_v16 = vor.u32 %v6553_v13, %v5335_v11  ;;  %v5340_v17 = vor.u32 %v6552_v14, %v5337_v15  ;;  %v5383_v18 = vld [vmem:[%s10212_s1] sm:$0xf]  ;;  %v6549_v19 = vld [vmem:[%s10212_s1 + $0x4] sm:$0xf0]  ;;  %v6548_v20 = vld [vmem:[%s10212_s1 + $0x4] sm:$0xf] }
   0x6   :  { %621 = vmatpush.bf16.msra.mxu3 %v5396_v12  ;;  %v5384_v21 = vor.u32 %v6549_v19, %v5383_v18  ;;  %v5385_v22 = vld [vmem:[%s10212_s1 + $0x8] sm:$0xf0]  ;;  %v42_v23 = vld [vmem:[%s10213_s0] sm:$0xff]  ;;  %v44_v26 = vld [vmem:[%s10213_s0 + $0x10] sm:$0xff]  ;;  %vm1451_vm4 = vcmask 1045504   ;;  %vm2036_vm5 = vcmask 1014784  }
   0x7   :  { %v43_v24 = vld [vmem:[%s10213_s0 + $0x8] sm:$0xff]  ;;  %v5388_v25 = vor.u32 %v6548_v20, %v5385_v22  ;;  %v45_v27 = vld [vmem:[%s10213_s0 + $0x18] sm:$0xff]  ;;  %v46_v36 = vld [vmem:[%s10213_s0 + $0x20] sm:$0xff]  ;;  %vm2542_vm6 = vcmask 1043456   ;;  %vm2520_vm7 = vcmask 326656   ;;  %vm4335_vm8 = vcmask 883712  }
   0x8   :  { %v6868_v28 = vpack.c.bf16 %v43_v24, %v42_v23  ;;  %303 = vmatpush.bf16.msra.mxu0 %v5336_v16  ;;  %v6870_v29 = vpack.c.bf16 %v45_v27, %v44_v26  ;;  %v47_v37 = vld [vmem:[%s10213_s0 + $0x28] sm:$0xff]  ;;  %v48_v45 = vld [vmem:[%s10213_s0 + $0x30] sm:$0xff]  ;;  %v49_v46 = vld [vmem:[%s10213_s0 + $0x38] sm:$0xff]  ;;  %vm5222_vm9 = vcmask 1041408   ;;  %vm5218_vm10 = vcmask 293888  }
   0x9   :  { %392 = vmatpush.bf16.msra.mxu1 %v5340_v17  ;;  %533 = vmatpush.bf16.msra.mxu2 %v5384_v21  ;;  %v6894_v39 = vpack.c.bf16 %v47_v37, %v46_v36  ;;  %v6915_v47 = vpack.c.bf16 %v49_v46, %v48_v45  ;;  %v50_v53 = vld [vmem:[%s10213_s0 + $0x40] sm:$0xff]  ;;  %v51_v54 = vld [vmem:[%s10213_s0 + $0x48] sm:$0xff]  ;;  %v52_v61 = vld [vmem:[%s10213_s0 + $0x50] sm:$0xff]  ;;  %vm5304_vm11 = vcmask 982016  }
   0xa   :  { %10278 = vst [vmem:[#allocation2_spill] sm:$0xff] %v6868_v28  ;;  %v101_v30 = vshrl.u32 %v6868_v28, 16  ;;  %v103_v31 = vshll.u32 %v6868_v28, 16  ;;  %622 = vmatpush.bf16.msra.mxu3 %v5388_v25  ;;  %v108_v32 = vshll.u32 %v6870_v29, 16  ;;  %v112_v40 = vshrl.u32 %v6870_v29, 16  ;;  %v53_v62 = vld [vmem:[%s10213_s0 + $0x58] sm:$0xff] }
   0xb   :  { %10279 = vst [vmem:[#allocation3_spill] sm:$0xff] %v6870_v29  ;;  %v116_v41 = vshll.u32 %v6894_v39, 16  ;;  %v120_v48 = vshrl.u32 %v6894_v39, 16  ;;  %v10246_v49 = vshll.u32 %v6915_v47, 16  ;;  %v6936_v55 = vpack.c.bf16 %v51_v54, %v50_v53  ;;  %v54_v5 = vld [vmem:[%s10213_s0 + $0x60] sm:$0xff]  ;;  %v55_v6 = vld [vmem:[%s10213_s0 + $0x68] sm:$0xff] }
   0xc   :  { %v105_v33 = vrot.slane %v103_v31, 1  ;;  %v110_v34 = vrot.slane %v108_v32, 1  ;;  %5397 = vmatmul.msk.bf16.vlgmr.msra.gmra.mxu2 %vm247_vm0, %v6868_v28  ;;  %10280 = vst [vmem:[#allocation4_spill] sm:$0xff] %v6894_v39  ;;  %v10247_v56 = vshrl.u32 %v6915_v47, 16  ;;  %v6957_v63 = vpack.c.bf16 %v53_v62, %v52_v61  ;;  %v56_v13 = vld [vmem:[%s10213_s0 + $0x70] sm:$0xff]  ;;  %v57_v14 = vld [vmem:[%s10213_s0 + $0x78] sm:$0xff] }
   0xd   :  { %5413 = vmatmul.msk.bf16.vlgmr.msra.gmra.mxu3 %vm247_vm0, %v6868_v28  ;;  %v118_v43 = vrot.slane %v116_v41, 1  ;;  %10281 = vst [vmem:[#allocation5_spill] sm:$0xff] %v6915_v47  ;;  %v126_v51 = vrot.slane %v10246_v49, 1  ;;  %v10244_v57 = vshll.u32 %v6936_v55, 16  ;;  %v10245_v0 = vshrl.u32 %v6936_v55, 16  ;;  %v58_v21 = vld [vmem:[%s10213_s0 + $0x80] sm:$0xff] }
   0xe   :  { %v106_v35 = vor.u32 %v105_v33, %v101_v30  ;;  %v114_v42 = vor.u32 %v112_v40, %v110_v34  ;;  %10282 = vst [vmem:[#allocation6_spill] sm:$0xff] %v6936_v55  ;;  %v10242_v1 = vshll.u32 %v6957_v63, 16  ;;  %v6978_v7 = vpack.c.bf16 %v55_v6, %v54_v5  ;;  %v59_v22 = vld [vmem:[%s10213_s0 + $0x88] sm:$0xff] }
   0xf   :  { %v122_v50 = vor.u32 %v120_v48, %v118_v43  ;;  %v130_v58 = vor.u32 %v10247_v56, %v126_v51  ;;  %v134_v59 = vrot.slane %v10244_v57, 1  ;;  %10283 = vst [vmem:[#allocation7_spill] sm:$0xff] %v6957_v63  ;;  %v10243_v8 = vshrl.u32 %v6957_v63, 16 }
  0x10   :  { %v111_v38 = vsel %vm99_vm1, %v106_v35, %v110_v34  ;;  %v119_v44 = vsel %vm99_vm1, %v114_v42, %v118_v43  ;;  %v142_v3 = vrot.slane %v10242_v1, 1  ;;  %10284 = vst [vmem:[#allocation8_spill] sm:$0xff] %v6978_v7  ;;  %v10240_v9 = vshll.u32 %v6978_v7, 16  ;;  %v60_v34 = vld [vmem:[%s10213_s0 + $0x90] sm:$0xff]  ;;  %v61_v35 = vld [vmem:[%s10213_s0 + $0x98] sm:$0xff] }
  0x11   :  { %5349 = vmatmul.msk.bf16.vlgmr.msra.gmra.mxu0 %vm247_vm0, %v111_v38  ;;  %5365 = vmatmul.msk.bf16.vlgmr.msra.gmra.mxu1 %vm247_vm0, %v111_v38  ;;  %v127_v52 = vsel %vm99_vm1, %v122_v50, %v126_v51  ;;  %v135_v60 = vsel %vm99_vm1, %v130_v58, %v134_v59  ;;  %v138_v2 = vor.u32 %v10245_v0, %v134_v59  ;;  %v10241_v16 = vshrl.u32 %v6978_v7, 16  ;;  %v62_v50 = vld [vmem:[%s10213_s0 + $0xa0] sm:$0xff]  ;;  %v63_v51 = vld [vmem:[%s10213_s0 + $0xa8] sm:$0xff] }
  0x12   :  { %v146_v10 = vor.u32 %v10243_v8, %v142_v3  ;;  %v150_v11 = vrot.slane %v10240_v9, 1  ;;  %v6999_v15 = vpack.c.bf16 %v57_v14, %v56_v13  ;;  %v7020_v23 = vpack.c.bf16 %v59_v22, %v58_v21  ;;  %v6558_v9 = vld [vmem:[%s10212_s1 + $0x54] sm:$0xf] }
  0x13   :  { %v143_v4 = vsel %vm99_vm1, %v138_v2, %v142_v3  ;;  %v7041_v36 = vpack.c.bf16 %v61_v35, %v60_v34  ;;  %v7066_v59 = vpack.c.bf16 %v63_v51, %v62_v50  ;;  %v1073_v8 = vrot.slane %v101_v30, 1  ;;  %v5435_v30 = vld [vmem:[%s10212_s1 + $0x40] sm:$0xf] }
  0x14   :  { %v151_v12 = vsel %vm99_vm1, %v146_v10, %v150_v11  ;;  %10285 = vst [vmem:[#allocation9_spill] sm:$0xff] %v6999_v15  ;;  %v10236_v17 = vshll.u32 %v6999_v15, 16  ;;  %v154_v18 = vor.u32 %v10241_v16, %v150_v11  ;;  %v10239_v24 = vshrl.u32 %v6999_v15, 16 }
  0x15   :  { %10286 = vst [vmem:[#allocation10_spill] sm:$0xff] %v7020_v23  ;;  %v10234_v25 = vshll.u32 %v7020_v23, 16  ;;  %v10235_v37 = vshrl.u32 %v7020_v23, 16  ;;  %v10232_v38 = vshll.u32 %v7041_v36, 16  ;;  %v10233_v62 = vshrl.u32 %v7041_v36, 16 }
  0x16   :  { %v158_v19 = vrot.slane %v10236_v17, 1  ;;  %10287 = vst [vmem:[#allocation11_spill] sm:$0xff] %v7041_v36  ;;  %v10228_v2 = vshll.u32 %v7066_v59, 16  ;;  %v10229_v35 = vshrl.u32 %v7066_v59, 16  ;;  %v1076_v0 = vrot.slane %v112_v40, 1 }
  0x17   :  { %v166_v27 = vrot.slane %v10234_v25, 1  ;;  %v174_v43 = vrot.slane %v10232_v38, 1  ;;  %v6556_v40 = vld [vmem:[%s10212_s1 + $0x44] sm:$0xf] }
  0x18   :  { %v159_v20 = vsel %vm99_vm1, %v154_v18, %v158_v19  ;;  %v162_v26 = vor.u32 %v10239_v24, %v158_v19  ;;  %v182_v11 = vrot.slane %v10228_v2, 1  ;;  %v64_v18 = vld [vmem:[%s10213_s0 + $0xb0] sm:$0xff]  ;;  %v65_v19 = vld [vmem:[%s10213_s0 + $0xb8] sm:$0xff] }
  0x19   :  { %v170_v42 = vor.u32 %v10235_v37, %v166_v27  ;;  %v178_v10 = vor.u32 %v10233_v62, %v174_v43 }
  0x1a   :  { %v167_v33 = vsel %vm99_vm1, %v162_v26, %v166_v27  ;;  %v7095_v27 = vpack.c.bf16 %v65_v19, %v64_v18  ;;  %v186_v50 = vor.u32 %v10229_v35, %v182_v11 }
  0x1b   :  { %v175_v46 = vsel %vm99_vm1, %v170_v42, %v174_v43  ;;  %v183_v14 = vsel %vm99_vm1, %v178_v10, %v182_v11 }
  0x1c   :  { %5398 = vmatmul.msk.bf16.gmra.mxu2 %vm247_vm0, %v6870_v29  ;;  %v10226_v42 = vshll.u32 %v7095_v27, 16  ;;  %v10227_v19 = vshrl.u32 %v7095_v27, 16 }
  0x1d   :  { %5414 = vmatmul.msk.bf16.gmra.mxu3 %vm247_vm0, %v6870_v29 }
  0x1e   :  { %v190_v51 = vrot.slane %v10226_v42, 1 }
  0x21   :  { %5350 = vmatmul.msk.bf16.gmra.mxu0 %vm247_vm0, %v119_v44  ;;  %5366 = vmatmul.msk.bf16.gmra.mxu1 %vm247_vm0, %v119_v44 }
  0x2c   :  { %5399 = vmatmul.msk.bf16.gmra.mxu2 %vm247_vm0, %v6894_v39 }
  0x2d   :  { %5415 = vmatmul.msk.bf16.gmra.mxu3 %vm247_vm0, %v6894_v39 }
  0x31   :  { %5351 = vmatmul.msk.bf16.gmra.mxu0 %vm247_vm0, %v127_v52  ;;  %5367 = vmatmul.msk.bf16.gmra.mxu1 %vm247_vm0, %v127_v52 }
  0x3c   :  { %5400 = vmatmul.msk.bf16.gmra.mxu2 %vm247_vm0, %v6915_v47 }
  0x3d   :  { %5416 = vmatmul.msk.bf16.gmra.mxu3 %vm247_vm0, %v6915_v47 }
  0x41   :  { %5352 = vmatmul.msk.bf16.gmra.mxu0 %vm247_vm0, %v135_v60  ;;  %5368 = vmatmul.msk.bf16.gmra.mxu1 %vm247_vm0, %v135_v60 }
  0x4c   :  { %5401 = vmatmul.msk.bf16.gmra.mxu2 %vm247_vm0, %v6936_v55 }
  0x4d   :  { %5417 = vmatmul.msk.bf16.gmra.mxu3 %vm247_vm0, %v6936_v55 }
  0x51   :  { %5353 = vmatmul.msk.bf16.gmra.mxu0 %vm247_vm0, %v143_v4  ;;  %5369 = vmatmul.msk.bf16.gmra.mxu1 %vm247_vm0, %v143_v4 }
  0x5c   :  { %5402 = vmatmul.msk.bf16.gmra.mxu2 %vm247_vm0, %v6957_v63 }
  0x5d   :  { %5418 = vmatmul.msk.bf16.gmra.mxu3 %vm247_vm0, %v6957_v63 }
  0x61   :  { %5354 = vmatmul.msk.bf16.gmra.mxu0 %vm247_vm0, %v151_v12  ;;  %5370 = vmatmul.msk.bf16.gmra.mxu1 %vm247_vm0, %v151_v12 }
  0x6c   :  { %5403 = vmatmul.msk.bf16.gmra.mxu2 %vm247_vm0, %v6978_v7 }
  0x6d   :  { %5419 = vmatmul.msk.bf16.gmra.mxu3 %vm247_vm0, %v6978_v7 }
  0x71   :  { %5355 = vmatmul.msk.bf16.gmra.mxu0 %vm247_vm0, %v159_v20  ;;  %5371 = vmatmul.msk.bf16.gmra.mxu1 %vm247_vm0, %v159_v20 }
  0x7c   :  { %5404 = vmatmul.msk.bf16.gmra.mxu2 %vm247_vm0, %v6999_v15 }
  0x7d   :  { %5420 = vmatmul.msk.bf16.gmra.mxu3 %vm247_vm0, %v6999_v15 }
  0x81   :  { %5356 = vmatmul.msk.bf16.gmra.mxu0 %vm247_vm0, %v167_v33  ;;  %5372 = vmatmul.msk.bf16.gmra.mxu1 %vm247_vm0, %v167_v33 }
  0x8c   :  { %5405 = vmatmul.msk.bf16.gmra.mxu2 %vm247_vm0, %v7020_v23 }
  0x8d   :  { %5421 = vmatmul.msk.bf16.gmra.mxu3 %vm247_vm0, %v7020_v23 }
  0x8e   :  { %v305_v44 = vpop.f32.mrf.mxu0  ;;  %v394_v45 = vpop.f32.mrf.mxu1 }
  0x8f   :  { %v535_v52 = vpop.f32.mrf.mxu2 }
  0x90   :  { %v7062_v53 = vadd.f32 %v535_v52, %v305_v44  ;;  %v624_v54 = vpop.f32.mrf.mxu3 }
  0x91   :  { %5357 = vmatmul.msk.bf16.gmra.mxu0 %vm247_vm0, %v175_v46  ;;  %5373 = vmatmul.msk.bf16.gmra.mxu1 %vm247_vm0, %v175_v46  ;;  %v7064_v58 = vadd.f32 %v624_v54, %v394_v45 }
  0x96   :  { %v307_v60 = vpop.f32.mrf.mxu0  ;;  %v396_v61 = vpop.f32.mrf.mxu1 }
  0x97   :  { %v537_v3 = vpop.f32.mrf.mxu2 }
  0x98   :  { %v7070_v4 = vadd.f32 %v537_v3, %v307_v60  ;;  %v626_v5 = vpop.f32.mrf.mxu3  ;;  %v191_v60 = vsel %vm99_vm1, %v186_v50, %v190_v51  ;;  %v67_v3 = vld [vmem:[%s10213_s0 + $0xc8] sm:$0xff] }
  0x99   :  { %v7072_v6 = vadd.f32 %v626_v5, %v396_v61  ;;  %v66_v61 = vld [vmem:[%s10213_s0 + $0xc0] sm:$0xff] }
  0x9c   :  { %5406 = vmatmul.msk.bf16.gmra.mxu2 %vm247_vm0, %v7041_v36 }
  0x9d   :  { %5422 = vmatmul.msk.bf16.gmra.mxu3 %vm247_vm0, %v7041_v36 }
  0x9e   :  { %v310_v12 = vpop.f32.mrf.mxu0  ;;  %v399_v13 = vpop.f32.mrf.mxu1 }
  0x9f   :  { %v540_v20 = vpop.f32.mrf.mxu2 }
  0xa0   :  { %v7091_v21 = vadd.f32 %v540_v20, %v310_v12  ;;  %v629_v22 = vpop.f32.mrf.mxu3 }
  0xa1   :  { %5358 = vmatmul.msk.bf16.gmra.mxu0 %vm247_vm0, %v183_v14  ;;  %5374 = vmatmul.msk.bf16.gmra.mxu1 %vm247_vm0, %v183_v14  ;;  %v7093_v26 = vadd.f32 %v629_v22, %v399_v13  ;;  %v7124_v13 = vpack.c.bf16 %v67_v3, %v66_v61  ;;  %v68_v61 = vld [vmem:[%s10213_s0 + $0xd0] sm:$0xff] }
  0xa3   :  { %v10225_v20 = vshll.u32 %v7124_v13, 16 }
  0xa5   :  { %v198_v50 = vrot.slane %v10225_v20, 1 }
  0xa6   :  { %v312_v33 = vpop.f32.mrf.mxu0  ;;  %v401_v34 = vpop.f32.mrf.mxu1 }
  0xa7   :  { %v542_v43 = vpop.f32.mrf.mxu2 }
  0xa8   :  { %v7099_v44 = vadd.f32 %v542_v43, %v312_v33  ;;  %v631_v45 = vpop.f32.mrf.mxu3 }
  0xa9   :  { %v7101_v46 = vadd.f32 %v631_v45, %v401_v34  ;;  %v194_v45 = vor.u32 %v10227_v19, %v190_v51  ;;  %v69_v51 = vld [vmem:[%s10213_s0 + $0xd8] sm:$0xff] }
  0xac   :  { %5407 = vmatmul.msk.bf16.gmra.mxu2 %vm247_vm0, %v7066_v59 }
  0xad   :  { %5423 = vmatmul.msk.bf16.gmra.mxu3 %vm247_vm0, %v7066_v59 }
  0xae   :  { %v315_v52 = vpop.f32.mrf.mxu0  ;;  %v404_v54 = vpop.f32.mrf.mxu1 }
  0xaf   :  { %v545_v5 = vpop.f32.mrf.mxu2 }
  0xb0   :  { %v7120_v10 = vadd.f32 %v545_v5, %v315_v52  ;;  %v634_v11 = vpop.f32.mrf.mxu3 }
  0xb1   :  { %5359 = vmatmul.msk.bf16.gmra.mxu0 %vm247_vm0, %v191_v60  ;;  %5375 = vmatmul.msk.bf16.gmra.mxu1 %vm247_vm0, %v191_v60  ;;  %v7122_v12 = vadd.f32 %v634_v11, %v404_v54  ;;  %v199_v60 = vsel %vm99_vm1, %v194_v45, %v198_v50  ;;  %v10231_v45 = vshrl.u32 %v7124_v13, 16 }
  0xb6   :  { %v317_v14 = vpop.f32.mrf.mxu0  ;;  %v406_v18 = vpop.f32.mrf.mxu1 }
  0xb7   :  { %v547_v22 = vpop.f32.mrf.mxu2 }
  0xb8   :  { %v7128_v33 = vadd.f32 %v547_v22, %v317_v14  ;;  %v636_v34 = vpop.f32.mrf.mxu3 }
  0xb9   :  { %v7130_v43 = vadd.f32 %v636_v34, %v406_v18  ;;  %v7153_v18 = vpack.c.bf16 %v69_v51, %v68_v61 }
  0xbb   :  { %v10230_v20 = vshll.u32 %v7153_v18, 16 }
  0xbc   :  { %5408 = vmatmul.msk.bf16.gmra.mxu2 %vm247_vm0, %v7095_v27 }
  0xbd   :  { %5424 = vmatmul.msk.bf16.gmra.mxu3 %vm247_vm0, %v7095_v27 }
  0xbe   :  { %v320_v52 = vpop.f32.mrf.mxu0  ;;  %v409_v54 = vpop.f32.mrf.mxu1 }
  0xbf   :  { %v550_v3 = vpop.f32.mrf.mxu2 }
  0xc0   :  { %v7149_v5 = vadd.f32 %v550_v3, %v320_v52  ;;  %v639_v11 = vpop.f32.mrf.mxu3  ;;  %v202_v52 = vor.u32 %v10231_v45, %v198_v50 }
  0xc1   :  { %5360 = vmatmul.msk.bf16.gmra.mxu0 %vm247_vm0, %v199_v60  ;;  %5376 = vmatmul.msk.bf16.gmra.mxu1 %vm247_vm0, %v199_v60  ;;  %v7151_v14 = vadd.f32 %v639_v11, %v409_v54  ;;  %v206_v54 = vrot.slane %v10230_v20, 1 }
  0xc3   :  { %v207_v51 = vsel %vm99_vm1, %v202_v52, %v206_v54 }
  0xc6   :  { %v322_v22 = vpop.f32.mrf.mxu0  ;;  %v411_v34 = vpop.f32.mrf.mxu1 }
  0xc7   :  { %v552_v42 = vpop.f32.mrf.mxu2 }
  0xc8   :  { %v7157_v19 = vadd.f32 %v552_v42, %v322_v22  ;;  %v641_v2 = vpop.f32.mrf.mxu3  ;;  %v71_v42 = vld [vmem:[%s10213_s0 + $0xe8] sm:$0xff]  ;;  %v5443_v22 = vld [vmem:[%s10212_s1 + $0x50] sm:$0xf] }
  0xc9   :  { %v7159_v35 = vadd.f32 %v641_v2, %v411_v34  ;;  %v70_v2 = vld [vmem:[%s10213_s0 + $0xe0] sm:$0xff]  ;;  %v6559_v34 = vld [vmem:[%s10212_s1 + $0x54] sm:$0xf0] }
  0xca   :  { %v7188_v20 = vpack.c.bf16 %v71_v42, %v70_v2  ;;  %v5444_v45 = vor.u32 %v6559_v34, %v5443_v22 }
  0xcc   :  { %5409 = vmatmul.msk.bf16.gmra.mxu2 %vm247_vm0, %v7124_v13  ;;  %831 = vmatpush.bf16.msrb.mxu0 %v5444_v45 }
  0xcd   :  { %5425 = vmatmul.msk.bf16.gmra.mxu3 %vm247_vm0, %v7124_v13 }
  0xce   :  { %v325_v60 = vpop.f32.mrf.mxu0  ;;  %v414_v61 = vpop.f32.mrf.mxu1 }
  0xcf   :  { %v555_v50 = vpop.f32.mrf.mxu2 }
  0xd0   :  { %v7178_v3 = vadd.f32 %v555_v50, %v325_v60  ;;  %v644_v11 = vpop.f32.mrf.mxu3  ;;  %v10238_v60 = vshrl.u32 %v7153_v18, 16 }
  0xd1   :  { %5361 = vmatmul.msk.bf16.gmra.mxu0 %vm247_vm0, %v207_v51  ;;  %5377 = vmatmul.msk.bf16.gmra.mxu1 %vm247_vm0, %v207_v51  ;;  %v7186_v52 = vadd.f32 %v644_v11, %v414_v61  ;;  %v10237_v51 = vshll.u32 %v7188_v20, 16 }
  0xd2   :  { %v210_v61 = vor.u32 %v10238_v60, %v206_v54 }
  0xd3   :  { %v214_v2 = vrot.slane %v10237_v51, 1 }
  0xd5   :  { %v215_v11 = vsel %vm99_vm1, %v210_v61, %v214_v2  ;;  %v10250_v61 = vshrl.u32 %v7188_v20, 16 }
  0xd6   :  { %v327_v38 = vpop.f32.mrf.mxu0  ;;  %v416_v62 = vpop.f32.mrf.mxu1 }
  0xd7   :  { %v557_v50 = vpop.f32.mrf.mxu2  ;;  %v218_v56 = vor.u32 %v10250_v61, %v214_v2 }
  0xd8   :  { %v7192_v25 = vadd.f32 %v557_v50, %v327_v38  ;;  %v646_v37 = vpop.f32.mrf.mxu3  ;;  %v73_v38 = vld [vmem:[%s10213_s0 + $0xf8] sm:$0xff] }
  0xd9   :  { %v7194_v17 = vadd.f32 %v646_v37, %v416_v62  ;;  %v72_v37 = vld [vmem:[%s10213_s0 + $0xf0] sm:$0xff] }
  0xda   :  { %v7215_v34 = vpack.c.bf16 %v73_v38, %v72_v37  ;;  %v6563_v37 = vld [vmem:[%s10212_s1 + $0x74] sm:$0xf0]  ;;  %v6562_v38 = vld [vmem:[%s10212_s1 + $0x74] sm:$0xf] }
  0xdc   :  { %5410 = vmatmul.msk.bf16.gmra.mxu2 %vm247_vm0, %v7153_v18  ;;  %10288 = vst [vmem:[#allocation12_spill] sm:$0xff] %v7215_v34  ;;  %v10248_v51 = vshll.u32 %v7215_v34, 16 }
  0xdd   :  { %5426 = vmatmul.msk.bf16.gmra.mxu3 %vm247_vm0, %v7153_v18 }
  0xde   :  { %v330_v45 = vpop.f32.mrf.mxu0  ;;  %v419_v42 = vpop.f32.mrf.mxu1 }
  0xdf   :  { %v560_v62 = vpop.f32.mrf.mxu2 }
  0xe0   :  { %v7213_v54 = vadd.f32 %v560_v62, %v330_v45  ;;  %v649_v22 = vpop.f32.mrf.mxu3  ;;  %v5445_v45 = vld [vmem:[%s10212_s1 + $0x58] sm:$0xf0] }
  0xe1   :  { %5362 = vmatmul.msk.bf16.gmra.mxu0 %vm247_vm0, %v215_v11  ;;  %5378 = vmatmul.msk.bf16.gmra.mxu1 %vm247_vm0, %v215_v11  ;;  %v7217_v50 = vadd.f32 %v649_v22, %v419_v42  ;;  %v5495_v11 = vld [vmem:[%s10212_s1 + $0x70] sm:$0xf]  ;;  %v5448_v42 = vor.u32 %v6558_v9, %v5445_v45  ;;  %v5497_v62 = vld [vmem:[%s10212_s1 + $0x78] sm:$0xf0]  ;;  %v1077_v9 = vrot.slane %v108_v32, 2 }
  0xe2   :  { %v5496_v16 = vor.u32 %v6563_v37, %v5495_v11  ;;  %v5500_v1 = vor.u32 %v6562_v38, %v5497_v62  ;;  %v222_v11 = vrot.slane %v10248_v51, 1  ;;  %v6557_v32 = vld [vmem:[%s10212_s1 + $0x44] sm:$0xf0]  ;;  %v5489_v37 = vld [vmem:[%s10212_s1 + $0x68] sm:$0xf0]  ;;  %v1074_v38 = vrot.slane %v103_v31, 2 }
  0xe3   :  { %920 = vmatpush.bf16.msrb.mxu1 %v5448_v42  ;;  %v6560_v42 = vld [vmem:[%s10212_s1 + $0x64] sm:$0xf] }
  0xe4   :  { %1210 = vmatpush.bf16.msrb.mxu2 %v5496_v16  ;;  %1299 = vmatpush.bf16.msrb.mxu3 %v5500_v1  ;;  %v5487_v1 = vld [vmem:[%s10212_s1 + $0x60] sm:$0xf]  ;;  %v6561_v16 = vld [vmem:[%s10212_s1 + $0x64] sm:$0xf0] }
  0xe5   :  { %v5488_v2 = vor.u32 %v6561_v16, %v5487_v1 }
  0xe6   :  { %v332_v60 = vpop.f32.mrf.mxu0  ;;  %v421_v24 = vpop.f32.mrf.mxu1 }
  0xe7   :  { %v562_v22 = vpop.f32.mrf.mxu2 }
  0xe8   :  { %v7243_v45 = vadd.f32 %v562_v22, %v332_v60  ;;  %v651_v57 = vpop.f32.mrf.mxu3  ;;  %1211 = vmatpush.bf16.msrb.mxu2 %v5488_v2 }
  0xe9   :  { %v7247_v49 = vadd.f32 %v651_v57, %v421_v24  ;;  %v5436_v57 = vor.u32 %v6557_v32, %v5435_v30  ;;  %v5437_v24 = vld [vmem:[%s10212_s1 + $0x48] sm:$0xf0]  ;;  %v223_v30 = vsel %vm99_vm1, %v218_v56, %v222_v11  ;;  %v5492_v32 = vor.u32 %v6560_v42, %v5489_v37 }
  0xea   :  { %v5440_v60 = vor.u32 %v6556_v40, %v5437_v24  ;;  %v1075_v40 = vor.u32 %v1074_v38, %v1073_v8  ;;  %v1078_v24 = vor.u32 %v1077_v9, %v1076_v0  ;;  %v10249_v0 = vshrl.u32 %v7215_v34, 16 }
  0xeb   :  { %832 = vmatpush.bf16.msrb.mxu0 %v5436_v57  ;;  %1300 = vmatpush.bf16.msrb.mxu3 %v5492_v32 }
  0xec   :  { %5411 = vmatmul.msk.bf16.gmra.mxu2 %vm247_vm0, %v7188_v20  ;;  %921 = vmatpush.bf16.msrb.mxu1 %v5440_v60  ;;  %v1079_v56 = vsel %vm1072_vm2, %v1075_v40, %v1078_v24  ;;  %v226_v37 = vor.u32 %v10249_v0, %v222_v11  ;;  %v727_v0 = vrot.slane %v6870_v29, 1 }
  0xed   :  { %5427 = vmatmul.msk.bf16.gmra.mxu3 %vm247_vm0, %v7188_v20 }
  0xee   :  { %v335_v62 = vpop.f32.mrf.mxu0  ;;  %v424_v22 = vpop.f32.mrf.mxu1 }
  0xef   :  { %v565_v1 = vpop.f32.mrf.mxu2 }
  0xf0   :  { %v7286_v31 = vadd.f32 %v565_v1, %v335_v62  ;;  %v654_v16 = vpop.f32.mrf.mxu3 }
  0xf1   :  { %5363 = vmatmul.msk.bf16.gmra.mxu0 %vm247_vm0, %v223_v30  ;;  %5379 = vmatmul.msk.bf16.gmra.mxu1 %vm247_vm0, %v223_v30  ;;  %v7289_v51 = vadd.f32 %v654_v16, %v424_v22 }
  0xf6   :  { %v337_v57 = vpop.f32.mrf.mxu0  ;;  %v426_v42 = vpop.f32.mrf.mxu1 }
  0xf7   :  { %v567_v60 = vpop.f32.mrf.mxu2 }
  0xf8   :  { %v7291_v2 = vadd.f32 %v567_v60, %v337_v57  ;;  %v656_v8 = vpop.f32.mrf.mxu3 }
  0xf9   :  { %v7294_v9 = vadd.f32 %v656_v8, %v426_v42  ;;  %v726_v8 = vrot.slane %v6868_v28, 1 }
  0xfc   :  { %5412 = vmatmul.msk.bf16.gmra.mxu2 %vm247_vm0, %v7215_v34 }
  0xfd   :  { %5428 = vmatmul.msk.bf16.gmra.mxu3 %vm247_vm0, %v7215_v34 }
  0xfe   :  { %v340_v38 = vpop.f32.mrf.mxu0  ;;  %v429_v62 = vpop.f32.mrf.mxu1 }
  0xff   :  { %v570_v22 = vpop.f32.mrf.mxu2 }
 0x100   :  { %v7304_v30 = vadd.f32 %v570_v22, %v340_v38  ;;  %v659_v32 = vpop.f32.mrf.mxu3 }
 0x101   :  { %5364 = vmatmul.msk.bf16.gmra.mxu0 %vm247_vm0, %v226_v37  ;;  %5380 = vmatmul.msk.bf16.gmra.mxu1 %vm247_vm0, %v226_v37  ;;  %v7306_v40 = vadd.f32 %v659_v32, %v429_v62  ;;  %v728_v62 = vsel %vm725_vm3, %v726_v8, %v727_v0 }
 0x106   :  { %v342_v1 = vpop.f32.mrf.mxu0  ;;  %v431_v11 = vpop.f32.mrf.mxu1 }
 0x107   :  { %v572_v16 = vpop.f32.mrf.mxu2 }
 0x108   :  { %v7308_v57 = vadd.f32 %v572_v16, %v342_v1  ;;  %v661_v42 = vpop.f32.mrf.mxu3  ;;  %v1080_v16 = vrot.slane %v120_v48, 1 }
 0x109   :  { %v7310_v60 = vadd.f32 %v661_v42, %v431_v11  ;;  %v1081_v42 = vrot.slane %v116_v41, 2 }
 0x10a   :  { %10289 = vst [vmem:[#allocation13_spill] sm:$0xff] %v7308_v57 }
 0x10b   :  { %10290 = vst [vmem:[#allocation14_spill] sm:$0xff] %v7310_v60  ;;  %v1082_v29 = vor.u32 %v1081_v42, %v1080_v16  ;;  %v10296_v42 = vshll.u32 %v6915_v47, 16 }
 0x10c   :  { %5501 = vmatmul.msk.bf16.vlgmr.msrb.gmra.mxu2 %vm247_vm0, %v1079_v56 }
 0x10d   :  { %5517 = vmatmul.msk.bf16.vlgmr.msrb.gmra.mxu3 %vm247_vm0, %v1079_v56 }
 0x10e   :  { %v345_v37 = vpop.f32.mrf.mxu0  ;;  %v434_v38 = vpop.f32.mrf.mxu1 }
 0x10f   :  { %v575_v22 = vpop.f32.mrf.mxu2 }
 0x110   :  { %v7319_v32 = vadd.f32 %v575_v22, %v345_v37  ;;  %v664_v1 = vpop.f32.mrf.mxu3  ;;  %v729_v37 = vrot.slane %v6894_v39, 1 }
 0x111   :  { %5449 = vmatmul.msk.bf16.vlgmr.msrb.gmra.mxu0 %vm247_vm0, %v728_v62  ;;  %5465 = vmatmul.msk.bf16.vlgmr.msrb.gmra.mxu1 %vm247_vm0, %v728_v62  ;;  %v7321_v11 = vadd.f32 %v664_v1, %v434_v38  ;;  %v1083_v38 = vsel %vm1072_vm2, %v1078_v24, %v1082_v29  ;;  %v10295_v24 = vshrl.u32 %v6915_v47, 16 }
 0x112   :  { %v730_v22 = vsel %vm725_vm3, %v727_v0, %v729_v37 }
 0x113   :  { %10291 = vst [vmem:[#allocation15_spill] sm:$0xff] %v7321_v11  ;;  %v1084_v16 = vrot.slane %v10295_v24, 1 }
 0x116   :  { %v347_v61 = vpop.f32.mrf.mxu0  ;;  %v436_v8 = vpop.f32.mrf.mxu1 }
 0x117   :  { %v577_v56 = vpop.f32.mrf.mxu2 }
 0x118   :  { %v7327_v28 = vadd.f32 %v577_v56, %v347_v61  ;;  %v666_v60 = vpop.f32.mrf.mxu3 }
 0x119   :  { %v7329_v57 = vadd.f32 %v666_v60, %v436_v8  ;;  %v1085_v8 = vrot.slane %v10296_v42, 2 }
 0x11a   :  { %10292 = vst [vmem:[#allocation16_spill] sm:$0xff] %v7327_v28 }
 0x11b   :  { %10293 = vst [vmem:[#allocation17_spill] sm:$0xff] %v7329_v57  ;;  %v1086_v39 = vor.u32 %v1085_v8, %v1084_v16 }
 0x11c   :  { %5502 = vmatmul.msk.bf16.gmra.mxu2 %vm247_vm0, %v1083_v38 }
 0x11d   :  { %5518 = vmatmul.msk.bf16.gmra.mxu3 %vm247_vm0, %v1083_v38 }
 0x11e   :  { %v350_v62 = vpop.f32.mrf.mxu0  ;;  %v439_v48 = vpop.f32.mrf.mxu1 }
 0x11f   :  { %v580_v41 = vpop.f32.mrf.mxu2 }
 0x120   :  { %v7338_v61 = vadd.f32 %v580_v41, %v350_v62  ;;  %v669_v60 = vpop.f32.mrf.mxu3  ;;  %v731_v62 = vrot.slane %v6915_v47, 1 }
 0x121   :  { %5450 = vmatmul.msk.bf16.gmra.mxu0 %vm247_vm0, %v730_v22  ;;  %5466 = vmatmul.msk.bf16.gmra.mxu1 %vm247_vm0, %v730_v22  ;;  %v7340_v1 = vadd.f32 %v669_v60, %v439_v48  ;;  %v1087_v48 = vsel %vm1072_vm2, %v1082_v29, %v1086_v39  ;;  %v10300_v29 = vshrl.u32 %v6936_v55, 16 }
 0x122   :  { %v732_v60 = vsel %vm725_vm3, %v729_v37, %v731_v62 }
 0x123   :  { %10294 = vst [vmem:[#allocation18_spill] sm:$0xff] %v7340_v1  ;;  %v1088_v8 = vrot.slane %v10300_v29, 1 }
 0x126   :  { %v352_v56 = vpop.f32.mrf.mxu0  ;;  %v441_v0 = vpop.f32.mrf.mxu1 }
 0x127   :  { %v582_v38 = vpop.f32.mrf.mxu2 }
 0x128   :  { %v7346_v57 = vadd.f32 %v582_v38, %v352_v56  ;;  %v671_v28 = vpop.f32.mrf.mxu3  ;;  %v10301_v56 = vshll.u32 %v6936_v55, 16 }
 0x129   :  { %v7348_v11 = vadd.f32 %v671_v28, %v441_v0 }
 0x12a   :  { %10297 = vst [vmem:[#allocation19_spill] sm:$0xff] %v7346_v57  ;;  %v1089_v0 = vrot.slane %v10301_v56, 2 }
 0x12b   :  { %10298 = vst [vmem:[#allocation20_spill] sm:$0xff] %v7348_v11 }
 0x12c   :  { %5503 = vmatmul.msk.bf16.gmra.mxu2 %vm247_vm0, %v1087_v48  ;;  %v1090_v47 = vor.u32 %v1089_v0, %v1088_v8 }
 0x12d   :  { %5519 = vmatmul.msk.bf16.gmra.mxu3 %vm247_vm0, %v1087_v48 }
 0x12e   :  { %v355_v22 = vpop.f32.mrf.mxu0  ;;  %v444_v41 = vpop.f32.mrf.mxu1 }
 0x12f   :  { %v585_v24 = vpop.f32.mrf.mxu2 }
 0x130   :  { %v7357_v16 = vadd.f32 %v585_v24, %v355_v22  ;;  %v674_v28 = vpop.f32.mrf.mxu3  ;;  %v733_v22 = vrot.slane %v6936_v55, 1 }
 0x131   :  { %5451 = vmatmul.msk.bf16.gmra.mxu0 %vm247_vm0, %v732_v60  ;;  %5467 = vmatmul.msk.bf16.gmra.mxu1 %vm247_vm0, %v732_v60  ;;  %v7359_v42 = vadd.f32 %v674_v28, %v444_v41  ;;  %v1091_v41 = vsel %vm1072_vm2, %v1086_v39, %v1090_v47  ;;  %v10305_v39 = vshrl.u32 %v6957_v63, 16 }
 0x132   :  { %v734_v28 = vsel %vm725_vm3, %v731_v62, %v733_v22 }
 0x133   :  { %10299 = vst [vmem:[#allocation21_spill] sm:$0xff] %v7359_v42  ;;  %v1092_v0 = vrot.slane %v10305_v39, 1 }
 0x136   :  { %v357_v38 = vpop.f32.mrf.mxu0  ;;  %v446_v37 = vpop.f32.mrf.mxu1 }
 0x137   :  { %v587_v48 = vpop.f32.mrf.mxu2 }
 0x138   :  { %v7365_v11 = vadd.f32 %v587_v48, %v357_v38  ;;  %v676_v57 = vpop.f32.mrf.mxu3  ;;  %v10306_v38 = vshll.u32 %v6957_v63, 16 }
 0x139   :  { %v7367_v1 = vadd.f32 %v676_v57, %v446_v37 }
 0x13a   :  { %10302 = vst [vmem:[#allocation22_spill] sm:$0xff] %v7365_v11  ;;  %v1093_v37 = vrot.slane %v10306_v38, 2 }
 0x13b   :  { %10303 = vst [vmem:[#allocation23_spill] sm:$0xff] %v7367_v1 }
 0x13c   :  { %5504 = vmatmul.msk.bf16.gmra.mxu2 %vm247_vm0, %v1091_v41  ;;  %v1094_v55 = vor.u32 %v1093_v37, %v1092_v0 }
 0x13d   :  { %5520 = vmatmul.msk.bf16.gmra.mxu3 %vm247_vm0, %v1091_v41 }
 0x13e   :  { %v360_v60 = vpop.f32.mrf.mxu0  ;;  %v449_v24 = vpop.f32.mrf.mxu1 }
 0x13f   :  { %v590_v29 = vpop.f32.mrf.mxu2 }
 0x140   :  { %v7376_v8 = vadd.f32 %v590_v29, %v360_v60  ;;  %v679_v57 = vpop.f32.mrf.mxu3  ;;  %v735_v60 = vrot.slane %v6957_v63, 1 }
 0x141   :  { %5452 = vmatmul.msk.bf16.gmra.mxu0 %vm247_vm0, %v734_v28  ;;  %5468 = vmatmul.msk.bf16.gmra.mxu1 %vm247_vm0, %v734_v28  ;;  %v7378_v56 = vadd.f32 %v679_v57, %v449_v24  ;;  %v1095_v24 = vsel %vm1072_vm2, %v1090_v47, %v1094_v55  ;;  %v10310_v47 = vshrl.u32 %v6978_v7, 16 }
 0x142   :  { %v736_v57 = vsel %vm725_vm3, %v733_v22, %v735_v60 }
 0x143   :  { %10304 = vst [vmem:[#allocation24_spill] sm:$0xff] %v7378_v56  ;;  %v1096_v37 = vrot.slane %v10310_v47, 1 }
 0x146   :  { %v362_v48 = vpop.f32.mrf.mxu0  ;;  %v451_v62 = vpop.f32.mrf.mxu1 }
 0x147   :  { %v592_v41 = vpop.f32.mrf.mxu2 }
 0x148   :  { %v7384_v1 = vadd.f32 %v592_v41, %v362_v48  ;;  %v681_v11 = vpop.f32.mrf.mxu3  ;;  %v10311_v48 = vshll.u32 %v6978_v7, 16 }
 0x149   :  { %v7386_v42 = vadd.f32 %v681_v11, %v451_v62 }
 0x14a   :  { %10307 = vst [vmem:[#allocation25_spill] sm:$0xff] %v7384_v1  ;;  %v1097_v62 = vrot.slane %v10311_v48, 2 }
 0x14b   :  { %10308 = vst [vmem:[#allocation26_spill] sm:$0xff] %v7386_v42 }
 0x14c   :  { %5505 = vmatmul.msk.bf16.gmra.mxu2 %vm247_vm0, %v1095_v24  ;;  %v1098_v63 = vor.u32 %v1097_v62, %v1096_v37 }
 0x14d   :  { %5521 = vmatmul.msk.bf16.gmra.mxu3 %vm247_vm0, %v1095_v24 }
 0x14e   :  { %v365_v28 = vpop.f32.mrf.mxu0  ;;  %v454_v29 = vpop.f32.mrf.mxu1 }
 0x14f   :  { %v595_v39 = vpop.f32.mrf.mxu2 }
 0x150   :  { %v7395_v0 = vadd.f32 %v595_v39, %v365_v28  ;;  %v684_v11 = vpop.f32.mrf.mxu3  ;;  %v737_v28 = vrot.slane %v6978_v7, 1 }
 0x151   :  { %5453 = vmatmul.msk.bf16.gmra.mxu0 %vm247_vm0, %v736_v57  ;;  %5469 = vmatmul.msk.bf16.gmra.mxu1 %vm247_vm0, %v736_v57  ;;  %v7397_v38 = vadd.f32 %v684_v11, %v454_v29  ;;  %v1099_v29 = vsel %vm1072_vm2, %v1094_v55, %v1098_v63  ;;  %v10315_v55 = vshrl.u32 %v6999_v15, 16 }
 0x152   :  { %v738_v11 = vsel %vm725_vm3, %v735_v60, %v737_v28 }
 0x153   :  { %10309 = vst [vmem:[#allocation27_spill] sm:$0xff] %v7397_v38  ;;  %v1100_v62 = vrot.slane %v10315_v55, 1 }
 0x156   :  { %v367_v41 = vpop.f32.mrf.mxu0  ;;  %v456_v22 = vpop.f32.mrf.mxu1 }
 0x157   :  { %v597_v24 = vpop.f32.mrf.mxu2 }
 0x158   :  { %v7403_v42 = vadd.f32 %v597_v24, %v367_v41  ;;  %v686_v1 = vpop.f32.mrf.mxu3  ;;  %v10316_v41 = vshll.u32 %v6999_v15, 16 }
 0x159   :  { %v7405_v56 = vadd.f32 %v686_v1, %v456_v22 }
 0x15a   :  { %10312 = vst [vmem:[#allocation28_spill] sm:$0xff] %v7403_v42  ;;  %v1101_v22 = vrot.slane %v10316_v41, 2 }
 0x15b   :  { %10313 = vst [vmem:[#allocation29_spill] sm:$0xff] %v7405_v56 }
 0x15c   :  { %5506 = vmatmul.msk.bf16.gmra.mxu2 %vm247_vm0, %v1099_v29  ;;  %v1102_v7 = vor.u32 %v1101_v22, %v1100_v62 }
 0x15d   :  { %5522 = vmatmul.msk.bf16.gmra.mxu3 %vm247_vm0, %v1099_v29 }
 0x15e   :  { %v370_v57 = vpop.f32.mrf.mxu0  ;;  %v459_v39 = vpop.f32.mrf.mxu1 }
 0x15f   :  { %v600_v47 = vpop.f32.mrf.mxu2 }
 0x160   :  { %v7414_v37 = vadd.f32 %v600_v47, %v370_v57  ;;  %v689_v1 = vpop.f32.mrf.mxu3  ;;  %v739_v57 = vrot.slane %v6999_v15, 1 }
 0x161   :  { %5454 = vmatmul.msk.bf16.gmra.mxu0 %vm247_vm0, %v738_v11  ;;  %5470 = vmatmul.msk.bf16.gmra.mxu1 %vm247_vm0, %v738_v11  ;;  %v7416_v48 = vadd.f32 %v689_v1, %v459_v39  ;;  %v1103_v39 = vsel %vm1072_vm2, %v1098_v63, %v1102_v7  ;;  %v10320_v63 = vshrl.u32 %v7020_v23, 16 }
 0x162   :  { %v740_v1 = vsel %vm725_vm3, %v737_v28, %v739_v57 }
 0x163   :  { %10314 = vst [vmem:[#allocation30_spill] sm:$0xff] %v7416_v48  ;;  %v1104_v22 = vrot.slane %v10320_v63, 1 }
 0x166   :  { %v372_v24 = vpop.f32.mrf.mxu0  ;;  %v461_v60 = vpop.f32.mrf.mxu1 }
 0x167   :  { %v602_v29 = vpop.f32.mrf.mxu2 }
 0x168   :  { %v7422_v56 = vadd.f32 %v602_v29, %v372_v24  ;;  %v691_v42 = vpop.f32.mrf.mxu3  ;;  %v10321_v24 = vshll.u32 %v7020_v23, 16 }
 0x169   :  { %v7424_v38 = vadd.f32 %v691_v42, %v461_v60 }
 0x16a   :  { %10317 = vst [vmem:[#allocation31_spill] sm:$0xff] %v7422_v56  ;;  %v1105_v60 = vrot.slane %v10321_v24, 2 }
 0x16b   :  { %10318 = vst [vmem:[#allocation32_spill] sm:$0xff] %v7424_v38 }
 0x16c   :  { %5507 = vmatmul.msk.bf16.gmra.mxu2 %vm247_vm0, %v1103_v39  ;;  %v1106_v15 = vor.u32 %v1105_v60, %v1104_v22 }
 0x16d   :  { %5523 = vmatmul.msk.bf16.gmra.mxu3 %vm247_vm0, %v1103_v39 }
 0x16e   :  { %v375_v11 = vpop.f32.mrf.mxu0  ;;  %v464_v47 = vpop.f32.mrf.mxu1 }
 0x16f   :  { %v605_v55 = vpop.f32.mrf.mxu2 }
 0x170   :  { %v7433_v62 = vadd.f32 %v605_v55, %v375_v11  ;;  %v694_v42 = vpop.f32.mrf.mxu3  ;;  %v741_v11 = vrot.slane %v7020_v23, 1 }
 0x171   :  { %5455 = vmatmul.msk.bf16.gmra.mxu0 %vm247_vm0, %v740_v1  ;;  %5471 = vmatmul.msk.bf16.gmra.mxu1 %vm247_vm0, %v740_v1  ;;  %v7435_v41 = vadd.f32 %v694_v42, %v464_v47  ;;  %v1107_v47 = vsel %vm1072_vm2, %v1102_v7, %v1106_v15  ;;  %v10324_v7 = vshrl.u32 %v7041_v36, 16 }
 0x172   :  { %v742_v42 = vsel %vm725_vm3, %v739_v57, %v741_v11 }
 0x173   :  { %10319 = vst [vmem:[#allocation33_spill] sm:$0xff] %v7435_v41  ;;  %v1108_v60 = vrot.slane %v10324_v7, 1 }
 0x176   :  { %v377_v29 = vpop.f32.mrf.mxu0  ;;  %v466_v28 = vpop.f32.mrf.mxu1 }
 0x177   :  { %v607_v39 = vpop.f32.mrf.mxu2 }
 0x178   :  { %v7441_v38 = vadd.f32 %v607_v39, %v377_v29  ;;  %v696_v56 = vpop.f32.mrf.mxu3  ;;  %v10325_v29 = vshll.u32 %v7041_v36, 16 }
 0x179   :  { %v7443_v48 = vadd.f32 %v696_v56, %v466_v28 }
 0x17a   :  { %10322 = vst [vmem:[#allocation34_spill] sm:$0xff] %v7441_v38  ;;  %v1109_v28 = vrot.slane %v10325_v29, 2 }
 0x17b   :  { %10323 = vst [vmem:[#allocation35_spill] sm:$0xff] %v7443_v48 }
 0x17c   :  { %5508 = vmatmul.msk.bf16.gmra.mxu2 %vm247_vm0, %v1107_v47  ;;  %v1110_v23 = vor.u32 %v1109_v28, %v1108_v60 }
 0x17d   :  { %5524 = vmatmul.msk.bf16.gmra.mxu3 %vm247_vm0, %v1107_v47 }
 0x17e   :  { %v380_v1 = vpop.f32.mrf.mxu0  ;;  %v469_v55 = vpop.f32.mrf.mxu1 }
 0x17f   :  { %v610_v63 = vpop.f32.mrf.mxu2 }
 0x180   :  { %v7452_v22 = vadd.f32 %v610_v63, %v380_v1  ;;  %v699_v56 = vpop.f32.mrf.mxu3  ;;  %v743_v1 = vrot.slane %v7041_v36, 1 }
 0x181   :  { %5456 = vmatmul.msk.bf16.gmra.mxu0 %vm247_vm0, %v742_v42  ;;  %5472 = vmatmul.msk.bf16.gmra.mxu1 %vm247_vm0, %v742_v42  ;;  %v7454_v24 = vadd.f32 %v699_v56, %v469_v55  ;;  %v1111_v55 = vsel %vm1072_vm2, %v1106_v15, %v1110_v23 }
 0x182   :  { %v744_v56 = vsel %vm725_vm3, %v741_v11, %v743_v1  ;;  %v10327_v11 = vshll.u32 %v7066_v59, 16 }
 0x186   :  { %v382_v39 = vpop.f32.mrf.mxu0  ;;  %v471_v57 = vpop.f32.mrf.mxu1 }
 0x187   :  { %v612_v47 = vpop.f32.mrf.mxu2 }
 0x188   :  { %v7460_v48 = vadd.f32 %v612_v47, %v382_v39  ;;  %v701_v38 = vpop.f32.mrf.mxu3  ;;  %v10326_v39 = vshrl.u32 %v7066_v59, 16  ;;  %v1113_v47 = vrot.slane %v10327_v11, 2 }
 0x189   :  { %v7462_v41 = vadd.f32 %v701_v38, %v471_v57 }
 0x18a   :  { %v1112_v57 = vrot.slane %v10326_v39, 1 }
 0x18c   :  { %5509 = vmatmul.msk.bf16.gmra.mxu2 %vm247_vm0, %v1111_v55 }
 0x18d   :  { %5525 = vmatmul.msk.bf16.gmra.mxu3 %vm247_vm0, %v1111_v55 }
 0x18e   :  { %v834_v42 = vpop.f32.mrf.mxu0  ;;  %v923_v63 = vpop.f32.mrf.mxu1 }
 0x18f   :  { %v1003_v7 = vadd.f32 %v834_v42, %v7062_v53  ;;  %v1004_v60 = vadd.f32 %v923_v63, %v7064_v58  ;;  %v1213_v29 = vpop.f32.mrf.mxu2  ;;  %v1114_v42 = vor.u32 %v1113_v47, %v1112_v57 }
 0x190   :  { %v1302_v15 = vpop.f32.mrf.mxu3 }
 0x191   :  { %5457 = vmatmul.msk.bf16.gmra.mxu0 %vm247_vm0, %v744_v56  ;;  %5473 = vmatmul.msk.bf16.gmra.mxu1 %vm247_vm0, %v744_v56  ;;  %v7473_v38 = vadd.f32 %v1213_v29, %v1003_v7  ;;  %v7475_v28 = vadd.f32 %v1302_v15, %v1004_v60  ;;  %v745_v60 = vrot.slane %v7066_v59, 1  ;;  %v1115_v15 = vsel %vm1072_vm2, %v1110_v23, %v1114_v42 }
 0x193   :  { %v746_v57 = vsel %vm725_vm3, %v743_v1, %v745_v60  ;;  %v10329_v1 = vshll.u32 %v7095_v27, 16 }
 0x196   :  { %v836_v55 = vpop.f32.mrf.mxu0  ;;  %v925_v53 = vpop.f32.mrf.mxu1 }
 0x197   :  { %v1005_v58 = vadd.f32 %v836_v55, %v7070_v4  ;;  %v1006_v63 = vadd.f32 %v925_v53, %v7072_v6  ;;  %v1215_v36 = vpop.f32.mrf.mxu2  ;;  %v10328_v53 = vshrl.u32 %v7095_v27, 16 }
 0x198   :  { %v1304_v7 = vpop.f32.mrf.mxu3 }
 0x199   :  { %v7483_v56 = vadd.f32 %v1215_v36, %v1005_v58  ;;  %v7485_v29 = vadd.f32 %v1304_v7, %v1006_v63  ;;  %v1116_v58 = vrot.slane %v10328_v53, 1  ;;  %v1117_v63 = vrot.slane %v10329_v1, 2 }
 0x19c   :  { %5510 = vmatmul.msk.bf16.gmra.mxu2 %vm247_vm0, %v1115_v15 }
 0x19d   :  { %5526 = vmatmul.msk.bf16.gmra.mxu3 %vm247_vm0, %v1115_v15  ;;  %v1118_v15 = vor.u32 %v1117_v63, %v1116_v58 }
 0x19e   :  { %v839_v39 = vpop.f32.mrf.mxu0  ;;  %v928_v11 = vpop.f32.mrf.mxu1 }
 0x19f   :  { %v1007_v4 = vadd.f32 %v839_v39, %v7091_v21  ;;  %v1008_v36 = vadd.f32 %v928_v11, %v7093_v26  ;;  %v1218_v6 = vpop.f32.mrf.mxu2 }
 0x1a0   :  { %v1307_v23 = vpop.f32.mrf.mxu3 }
 0x1a1   :  { %5458 = vmatmul.msk.bf16.gmra.mxu0 %vm247_vm0, %v746_v57  ;;  %5474 = vmatmul.msk.bf16.gmra.mxu1 %vm247_vm0, %v746_v57  ;;  %v7496_v47 = vadd.f32 %v1218_v6, %v1007_v4  ;;  %v7498_v55 = vadd.f32 %v1307_v23, %v1008_v36  ;;  %v747_v36 = vrot.slane %v7095_v27, 1  ;;  %v1119_v23 = vsel %vm1072_vm2, %v1114_v42, %v1118_v15 }
 0x1a3   :  { %v748_v58 = vsel %vm725_vm3, %v745_v60, %v747_v36  ;;  %v10331_v60 = vshll.u32 %v7124_v13, 16 }
 0x1a6   :  { %v841_v7 = vpop.f32.mrf.mxu0  ;;  %v930_v21 = vpop.f32.mrf.mxu1 }
 0x1a7   :  { %v1009_v26 = vadd.f32 %v841_v7, %v7099_v44  ;;  %v1010_v39 = vadd.f32 %v930_v21, %v7101_v46  ;;  %v1220_v11 = vpop.f32.mrf.mxu2 }
 0x1a8   :  { %v1309_v4 = vpop.f32.mrf.mxu3 }
 0x1a9   :  { %v7506_v57 = vadd.f32 %v1220_v11, %v1009_v26  ;;  %v7508_v6 = vadd.f32 %v1309_v4, %v1010_v39  ;;  %v10330_v26 = vshrl.u32 %v7124_v13, 16  ;;  %v1121_v11 = vrot.slane %v10331_v60, 2 }
 0x1ab   :  { %v1120_v39 = vrot.slane %v10330_v26, 1 }
 0x1ac   :  { %5511 = vmatmul.msk.bf16.gmra.mxu2 %vm247_vm0, %v1119_v23 }
 0x1ad   :  { %5527 = vmatmul.msk.bf16.gmra.mxu3 %vm247_vm0, %v1119_v23  ;;  %v1122_v23 = vor.u32 %v1121_v11, %v1120_v39 }
 0x1ae   :  { %v844_v53 = vpop.f32.mrf.mxu0  ;;  %v933_v1 = vpop.f32.mrf.mxu1 }
 0x1af   :  { %v1011_v44 = vadd.f32 %v844_v53, %v7120_v10  ;;  %v1012_v46 = vadd.f32 %v933_v1, %v7122_v12  ;;  %v1223_v63 = vpop.f32.mrf.mxu2 }
 0x1b0   :  { %v1312_v42 = vpop.f32.mrf.mxu3 }
 0x1b1   :  { %5459 = vmatmul.msk.bf16.gmra.mxu0 %vm247_vm0, %v748_v58  ;;  %5475 = vmatmul.msk.bf16.gmra.mxu1 %vm247_vm0, %v748_v58  ;;  %v7519_v7 = vadd.f32 %v1223_v63, %v1011_v44  ;;  %v7521_v21 = vadd.f32 %v1312_v42, %v1012_v46  ;;  %v749_v46 = vrot.slane %v7124_v13, 1  ;;  %v1123_v42 = vsel %vm1072_vm2, %v1118_v15, %v1122_v23 }
 0x1b3   :  { %v750_v39 = vsel %vm725_vm3, %v747_v36, %v749_v46  ;;  %v10333_v36 = vshll.u32 %v7153_v18, 16 }
 0x1b6   :  { %v846_v4 = vpop.f32.mrf.mxu0  ;;  %v935_v10 = vpop.f32.mrf.mxu1 }
 0x1b7   :  { %v1013_v12 = vadd.f32 %v846_v4, %v7128_v33  ;;  %v1014_v53 = vadd.f32 %v935_v10, %v7130_v43  ;;  %v1225_v1 = vpop.f32.mrf.mxu2 }
 0x1b8   :  { %v1314_v44 = vpop.f32.mrf.mxu3 }
 0x1b9   :  { %v7529_v58 = vadd.f32 %v1225_v1, %v1013_v12  ;;  %v7531_v63 = vadd.f32 %v1314_v44, %v1014_v53  ;;  %v10332_v12 = vshrl.u32 %v7153_v18, 16  ;;  %v1125_v1 = vrot.slane %v10333_v36, 2 }
 0x1bb   :  { %v1124_v53 = vrot.slane %v10332_v12, 1 }
 0x1bc   :  { %5512 = vmatmul.msk.bf16.gmra.mxu2 %vm247_vm0, %v1123_v42 }
 0x1bd   :  { %5528 = vmatmul.msk.bf16.gmra.mxu3 %vm247_vm0, %v1123_v42  ;;  %v1126_v42 = vor.u32 %v1125_v1, %v1124_v53 }
 0x1be   :  { %v849_v26 = vpop.f32.mrf.mxu0  ;;  %v938_v60 = vpop.f32.mrf.mxu1 }
 0x1bf   :  { %v1015_v33 = vadd.f32 %v849_v26, %v7149_v5  ;;  %v1016_v43 = vadd.f32 %v938_v60, %v7151_v14  ;;  %v1228_v11 = vpop.f32.mrf.mxu2 }
 0x1c0   :  { %v1317_v15 = vpop.f32.mrf.mxu3 }
 0x1c1   :  { %5460 = vmatmul.msk.bf16.gmra.mxu0 %vm247_vm0, %v750_v39  ;;  %5476 = vmatmul.msk.bf16.gmra.mxu1 %vm247_vm0, %v750_v39  ;;  %v7542_v4 = vadd.f32 %v1228_v11, %v1015_v33  ;;  %v7544_v10 = vadd.f32 %v1317_v15, %v1016_v43  ;;  %v751_v43 = vrot.slane %v7153_v18, 1  ;;  %v1127_v15 = vsel %vm1072_vm2, %v1122_v23, %v1126_v42 }
 0x1c3   :  { %v752_v53 = vsel %vm725_vm3, %v749_v46, %v751_v43  ;;  %v6567_v46 = vld [vmem:[%s10212_s1 + $0x94] sm:$0xf0] }
 0x1c6   :  { %v851_v44 = vpop.f32.mrf.mxu0  ;;  %v940_v5 = vpop.f32.mrf.mxu1 }
 0x1c7   :  { %v1017_v14 = vadd.f32 %v851_v44, %v7157_v19  ;;  %v1018_v26 = vadd.f32 %v940_v5, %v7159_v35  ;;  %v1230_v60 = vpop.f32.mrf.mxu2  ;;  %v5547_v5 = vld [vmem:[%s10212_s1 + $0x90] sm:$0xf] }
 0x1c8   :  { %v1319_v33 = vpop.f32.mrf.mxu3 }
 0x1c9   :  { %v7552_v39 = vadd.f32 %v1230_v60, %v1017_v14  ;;  %v7554_v11 = vadd.f32 %v1319_v33, %v1018_v26  ;;  %v10335_v26 = vshll.u32 %v7188_v20, 16  ;;  %v5548_v33 = vor.u32 %v6567_v46, %v5547_v5 }
 0x1cb   :  { %v1129_v60 = vrot.slane %v10335_v26, 2  ;;  %1557 = vmatpush.bf16.msra.mxu0 %v5548_v33 }
 0x1cc   :  { %5513 = vmatmul.msk.bf16.gmra.mxu2 %vm247_vm0, %v1127_v15 }
 0x1cd   :  { %5529 = vmatmul.msk.bf16.gmra.mxu3 %vm247_vm0, %v1127_v15 }
 0x1ce   :  { %v854_v12 = vpop.f32.mrf.mxu0  ;;  %v943_v36 = vpop.f32.mrf.mxu1 }
 0x1cf   :  { %v1019_v35 = vadd.f32 %v854_v12, %v7178_v3  ;;  %v1020_v19 = vadd.f32 %v943_v36, %v7186_v52  ;;  %v1233_v1 = vpop.f32.mrf.mxu2  ;;  %v10334_v3 = vshrl.u32 %v7188_v20, 16 }
 0x1d0   :  { %v1322_v23 = vpop.f32.mrf.mxu3 }
 0x1d1   :  { %5461 = vmatmul.msk.bf16.gmra.mxu0 %vm247_vm0, %v752_v53  ;;  %5477 = vmatmul.msk.bf16.gmra.mxu1 %vm247_vm0, %v752_v53  ;;  %v7565_v44 = vadd.f32 %v1233_v1, %v1019_v35  ;;  %v7573_v14 = vadd.f32 %v1322_v23, %v1020_v19  ;;  %v1128_v52 = vrot.slane %v10334_v3, 1  ;;  %v753_v23 = vrot.slane %v7188_v20, 1 }
 0x1d3   :  { %v1130_v36 = vor.u32 %v1129_v60, %v1128_v52  ;;  %v754_v52 = vsel %vm725_vm3, %v751_v43, %v753_v23  ;;  %v10337_v60 = vshrl.u32 %v7215_v34, 16  ;;  %v10338_v43 = vshll.u32 %v7215_v34, 16 }
 0x1d5   :  { %v1131_v3 = vsel %vm1072_vm2, %v1126_v42, %v1130_v36  ;;  %v1132_v33 = vrot.slane %v10337_v60, 1 }
 0x1d6   :  { %v856_v15 = vpop.f32.mrf.mxu0  ;;  %v945_v12 = vpop.f32.mrf.mxu1 }
 0x1d7   :  { %v7580_v53 = vadd.f32 %v856_v15, %v7192_v25  ;;  %v7583_v35 = vadd.f32 %v945_v12, %v7194_v17  ;;  %v7585_v1 = vpop.f32.mrf.mxu2  ;;  %v1133_v15 = vrot.slane %v10338_v43, 2 }
 0x1d8   :  { %v7587_v19 = vpop.f32.mrf.mxu3 }
 0x1dc   :  { %5514 = vmatmul.msk.bf16.gmra.mxu2 %vm247_vm0, %v1131_v3 }
 0x1dd   :  { %5530 = vmatmul.msk.bf16.gmra.mxu3 %vm247_vm0, %v1131_v3  ;;  %v1134_v3 = vor.u32 %v1133_v15, %v1132_v33  ;;  %v755_v33 = vrot.slane %v7215_v34, 1  ;;  %v6565_v15 = vld [vmem:[%s10212_s1 + $0x84] sm:$0xf0] }
 0x1de   :  { %v859_v5 = vpop.f32.mrf.mxu0  ;;  %v948_v46 = vpop.f32.mrf.mxu1 }
 0x1df   :  { %v7595_v25 = vadd.f32 %v859_v5, %v7213_v54  ;;  %v7598_v17 = vadd.f32 %v948_v46, %v7217_v50  ;;  %v7600_v26 = vpop.f32.mrf.mxu2  ;;  %v6566_v46 = vld [vmem:[%s10212_s1 + $0x94] sm:$0xf]  ;;  %v756_v34 = vsel %vm725_vm3, %v753_v23, %v755_v33 }
 0x1e0   :  { %v7604_v42 = vpop.f32.mrf.mxu3 }
 0x1e1   :  { %5462 = vmatmul.msk.bf16.gmra.mxu0 %vm247_vm0, %v754_v52  ;;  %5478 = vmatmul.msk.bf16.gmra.mxu1 %vm247_vm0, %v754_v52  ;;  %10336 = vst [vmem:[#allocation36_spill] sm:$0xff] %v7604_v42  ;;  %v5549_v52 = vld [vmem:[%s10212_s1 + $0x98] sm:$0xf0] }
 0x1e2   :  { %v5552_v43 = vor.u32 %v6566_v46, %v5549_v52  ;;  %v5541_v46 = vld [vmem:[%s10212_s1 + $0x88] sm:$0xf0] }
 0x1e4   :  { %1646 = vmatpush.bf16.msra.mxu1 %v5552_v43 }
 0x1e6   :  { %v861_v12 = vpop.f32.mrf.mxu0  ;;  %v950_v54 = vpop.f32.mrf.mxu1 }
 0x1e7   :  { %v7611_v50 = vadd.f32 %v861_v12, %v7243_v45  ;;  %v7614_v5 = vadd.f32 %v950_v54, %v7247_v49  ;;  %v7622_v60 = vpop.f32.mrf.mxu2  ;;  %v1135_v45 = vsel %vm1072_vm2, %v1130_v36, %v1134_v3  ;;  %v5539_v49 = vld [vmem:[%s10212_s1 + $0x80] sm:$0xf]  ;;  %v6564_v12 = vld [vmem:[%s10212_s1 + $0x84] sm:$0xf] }
 0x1e8   :  { %v7624_v42 = vpop.f32.mrf.mxu3  ;;  %v5540_v54 = vor.u32 %v6565_v15, %v5539_v49  ;;  %v5544_v36 = vor.u32 %v6564_v12, %v5541_v46 }
 0x1e9   :  { %10339 = vst [vmem:[#allocation37_spill] sm:$0xff] %v7614_v5 }
 0x1ea   :  { %10340 = vst [vmem:[#allocation38_spill] sm:$0xff] %v7624_v42  ;;  %1558 = vmatpush.bf16.msra.mxu0 %v5540_v54  ;;  %1647 = vmatpush.bf16.msra.mxu1 %v5544_v36 }
 0x1ec   :  { %5515 = vmatmul.msk.bf16.gmra.mxu2 %vm247_vm0, %v1135_v45 }
 0x1ed   :  { %5531 = vmatmul.msk.bf16.gmra.mxu3 %vm247_vm0, %v1135_v45 }
 0x1ee   :  { %v864_v52 = vpop.f32.mrf.mxu0  ;;  %v953_v43 = vpop.f32.mrf.mxu1 }
 0x1ef   :  { %v7644_v42 = vadd.f32 %v864_v52, %v7286_v31  ;;  %v7647_v5 = vadd.f32 %v953_v43, %v7289_v51  ;;  %v7649_v49 = vpop.f32.mrf.mxu2 }
 0x1f0   :  { %v7653_v15 = vpop.f32.mrf.mxu3 }
 0x1f1   :  { %5463 = vmatmul.msk.bf16.gmra.mxu0 %vm247_vm0, %v756_v34  ;;  %5479 = vmatmul.msk.bf16.gmra.mxu1 %vm247_vm0, %v756_v34 }
 0x1f6   :  { %v866_v12 = vpop.f32.mrf.mxu0  ;;  %v955_v23 = vpop.f32.mrf.mxu1 }
 0x1f7   :  { %v7656_v45 = vadd.f32 %v866_v12, %v7291_v2  ;;  %v7659_v31 = vadd.f32 %v955_v23, %v7294_v9  ;;  %v7661_v54 = vpop.f32.mrf.mxu2  ;;  %v10349_v23 = vld [vmem:[#allocation13_spill] sm:$0xff] }
 0x1f8   :  { %10343 = vst [vmem:[#allocation41_spill] sm:$0xff] %v7661_v54  ;;  %v7663_v51 = vpop.f32.mrf.mxu3 }
 0x1f9   :  { %10341 = vst [vmem:[#allocation39_spill] sm:$0xff] %v7656_v45 }
 0x1fa   :  { %10342 = vst [vmem:[#allocation40_spill] sm:$0xff] %v7659_v31 }
 0x1fb   :  { %10344 = vst [vmem:[#allocation42_spill] sm:$0xff] %v7663_v51 }
 0x1fc   :  { %5516 = vmatmul.msk.bf16.gmra.mxu2 %vm247_vm0, %v1134_v3 }
 0x1fd   :  { %5532 = vmatmul.msk.bf16.gmra.mxu3 %vm247_vm0, %v1134_v3  ;;  %v10351_v3 = vld [vmem:[#allocation14_spill] sm:$0xff] }
 0x1fe   :  { %v869_v46 = vpop.f32.mrf.mxu0  ;;  %v958_v36 = vpop.f32.mrf.mxu1 }
 0x1ff   :  { %v7668_v34 = vadd.f32 %v869_v46, %v7304_v30  ;;  %v7671_v52 = vadd.f32 %v958_v36, %v7306_v40  ;;  %v7673_v2 = vpop.f32.mrf.mxu2  ;;  %v10355_v46 = vld [vmem:[#allocation2_spill] sm:$0xff] }
 0x200   :  { %10347 = vst [vmem:[#allocation45_spill] sm:$0xff] %v7673_v2  ;;  %v7677_v9 = vpop.f32.mrf.mxu3  ;;  %v1452_v36 = vrot.slane %v10355_v46, 2 }
 0x201   :  { %10345 = vst [vmem:[#allocation43_spill] sm:$0xff] %v7668_v34  ;;  %5464 = vmatmul.msk.bf16.gmra.mxu0 %vm247_vm0, %v755_v33  ;;  %5480 = vmatmul.msk.bf16.gmra.mxu1 %vm247_vm0, %v755_v33 }
 0x202   :  { %10346 = vst [vmem:[#allocation44_spill] sm:$0xff] %v7671_v52  ;;  %v10356_v52 = vld [vmem:[#allocation3_spill] sm:$0xff] }
 0x203   :  { %10348 = vst [vmem:[#allocation46_spill] sm:$0xff] %v7677_v9  ;;  %v1453_v2 = vrot.slane %v10356_v52, 2 }
 0x205   :  { %v1454_v9 = vsel %vm1451_vm4, %v1452_v36, %v1453_v2  ;;  %v10361_v36 = vld [vmem:[#allocation17_spill] sm:$0xff] }
 0x206   :  { %v871_v43 = vpop.f32.mrf.mxu0  ;;  %v960_v12 = vpop.f32.mrf.mxu1 }
 0x207   :  { %v7680_v51 = vadd.f32 %v871_v43, %v10349_v23  ;;  %v7683_v31 = vadd.f32 %v960_v12, %v10351_v3  ;;  %v7685_v30 = vpop.f32.mrf.mxu2  ;;  %v10357_v43 = vld [vmem:[#allocation15_spill] sm:$0xff] }
 0x208   :  { %10353 = vst [vmem:[#allocation47_spill] sm:$0xff] %v7685_v30  ;;  %v7687_v40 = vpop.f32.mrf.mxu3 }
 0x209   :  { %10350 = vst [vmem:[#allocation13_spill] sm:$0xff] %v7680_v51 }
 0x20a   :  { %10352 = vst [vmem:[#allocation14_spill] sm:$0xff] %v7683_v31  ;;  %v10360_v31 = vld [vmem:[#allocation16_spill] sm:$0xff] }
 0x20b   :  { %10354 = vst [vmem:[#allocation48_spill] sm:$0xff] %v7687_v40 }
 0x20e   :  { %v874_v33 = vpop.f32.mrf.mxu0  ;;  %v963_v34 = vpop.f32.mrf.mxu1 }
 0x20f   :  { %v1035_v54 = vadd.f32 %v874_v33, %v7319_v32  ;;  %v1036_v23 = vadd.f32 %v963_v34, %v10357_v43  ;;  %v1253_v51 = vpop.f32.mrf.mxu2  ;;  %v10365_v33 = vld [vmem:[#allocation4_spill] sm:$0xff] }
 0x210   :  { %v1342_v3 = vpop.f32.mrf.mxu3  ;;  %v1455_v43 = vrot.slane %v10365_v33, 2 }
 0x211   :  { %5553 = vmatmul.msk.bf16.vlgmr.msra.gmra.mxu0 %vm247_vm0, %v1454_v9  ;;  %5569 = vmatmul.msk.bf16.vlgmr.msra.gmra.mxu1 %vm247_vm0, %v1454_v9  ;;  %v7696_v12 = vadd.f32 %v1253_v51, %v1035_v54  ;;  %v7698_v46 = vadd.f32 %v1342_v3, %v1036_v23  ;;  %v10366_v3 = vld [vmem:[#allocation18_spill] sm:$0xff] }
 0x212   :  { %v1456_v51 = vsel %vm1451_vm4, %v1453_v2, %v1455_v43  ;;  %v10370_v2 = vld [vmem:[#allocation20_spill] sm:$0xff] }
 0x213   :  { %10358 = vst [vmem:[#allocation2_spill] sm:$0xff] %v7696_v12 }
 0x214   :  { %10359 = vst [vmem:[#allocation3_spill] sm:$0xff] %v7698_v46 }
 0x216   :  { %v876_v52 = vpop.f32.mrf.mxu0  ;;  %v965_v40 = vpop.f32.mrf.mxu1 }
 0x217   :  { %v7701_v30 = vadd.f32 %v876_v52, %v10360_v31  ;;  %v7704_v45 = vadd.f32 %v965_v40, %v10361_v36  ;;  %v7706_v32 = vpop.f32.mrf.mxu2 }
 0x218   :  { %10363 = vst [vmem:[#allocation16_spill] sm:$0xff] %v7706_v32  ;;  %v7708_v34 = vpop.f32.mrf.mxu3 }
 0x219   :  { %10362 = vst [vmem:[#allocation15_spill] sm:$0xff] %v7704_v45 }
 0x21a   :  { %10364 = vst [vmem:[#allocation17_spill] sm:$0xff] %v7708_v34  ;;  %v10369_v34 = vld [vmem:[#allocation19_spill] sm:$0xff] }
 0x21e   :  { %v879_v9 = vpop.f32.mrf.mxu0  ;;  %v968_v54 = vpop.f32.mrf.mxu1 }
 0x21f   :  { %v1039_v23 = vadd.f32 %v879_v9, %v7338_v61  ;;  %v1040_v46 = vadd.f32 %v968_v54, %v10366_v3  ;;  %v1258_v12 = vpop.f32.mrf.mxu2  ;;  %v10374_v54 = vld [vmem:[#allocation5_spill] sm:$0xff] }
 0x220   :  { %v1347_v40 = vpop.f32.mrf.mxu3  ;;  %v1457_v3 = vrot.slane %v10374_v54, 2 }
 0x221   :  { %5554 = vmatmul.msk.bf16.gmra.mxu0 %vm247_vm0, %v1456_v51  ;;  %5570 = vmatmul.msk.bf16.gmra.mxu1 %vm247_vm0, %v1456_v51  ;;  %v7716_v31 = vadd.f32 %v1258_v12, %v1039_v23  ;;  %v7718_v52 = vadd.f32 %v1347_v40, %v1040_v46  ;;  %v10375_v40 = vld [vmem:[#allocation21_spill] sm:$0xff] }
 0x222   :  { %v1458_v23 = vsel %vm1451_vm4, %v1455_v43, %v1457_v3  ;;  %v10379_v43 = vld [vmem:[#allocation23_spill] sm:$0xff] }
 0x223   :  { %10367 = vst [vmem:[#allocation4_spill] sm:$0xff] %v7716_v31 }
 0x224   :  { %10368 = vst [vmem:[#allocation18_spill] sm:$0xff] %v7718_v52 }
 0x226   :  { %v881_v36 = vpop.f32.mrf.mxu0  ;;  %v970_v33 = vpop.f32.mrf.mxu1 }
 0x227   :  { %v7721_v45 = vadd.f32 %v881_v36, %v10369_v34  ;;  %v7724_v32 = vadd.f32 %v970_v33, %v10370_v2  ;;  %v7726_v61 = vpop.f32.mrf.mxu2 }
 0x228   :  { %10372 = vst [vmem:[#allocation20_spill] sm:$0xff] %v7726_v61  ;;  %v7728_v9 = vpop.f32.mrf.mxu3 }
 0x229   :  { %10371 = vst [vmem:[#allocation19_spill] sm:$0xff] %v7724_v32 }
 0x22a   :  { %10373 = vst [vmem:[#allocation49_spill] sm:$0xff] %v7728_v9  ;;  %v10378_v9 = vld [vmem:[#allocation22_spill] sm:$0xff] }
 0x22e   :  { %v884_v51 = vpop.f32.mrf.mxu0  ;;  %v973_v12 = vpop.f32.mrf.mxu1 }
 0x22f   :  { %v1043_v46 = vadd.f32 %v884_v51, %v7357_v16  ;;  %v1044_v52 = vadd.f32 %v973_v12, %v10375_v40  ;;  %v1263_v31 = vpop.f32.mrf.mxu2  ;;  %v10383_v12 = vld [vmem:[#allocation6_spill] sm:$0xff] }
 0x230   :  { %v1352_v36 = vpop.f32.mrf.mxu3  ;;  %v1459_v40 = vrot.slane %v10383_v12, 2 }
 0x231   :  { %5555 = vmatmul.msk.bf16.gmra.mxu0 %vm247_vm0, %v1458_v23  ;;  %5571 = vmatmul.msk.bf16.gmra.mxu1 %vm247_vm0, %v1458_v23  ;;  %v7736_v34 = vadd.f32 %v1263_v31, %v1043_v46  ;;  %v7738_v33 = vadd.f32 %v1352_v36, %v1044_v52  ;;  %v10384_v36 = vld [vmem:[#allocation24_spill] sm:$0xff] }
 0x232   :  { %v1460_v46 = vsel %vm1451_vm4, %v1457_v3, %v1459_v40  ;;  %v10389_v3 = vld [vmem:[#allocation26_spill] sm:$0xff] }
 0x233   :  { %10376 = vst [vmem:[#allocation5_spill] sm:$0xff] %v7736_v34 }
 0x234   :  { %10377 = vst [vmem:[#allocation21_spill] sm:$0xff] %v7738_v33 }
 0x236   :  { %v886_v2 = vpop.f32.mrf.mxu0  ;;  %v975_v54 = vpop.f32.mrf.mxu1 }
 0x237   :  { %v7741_v32 = vadd.f32 %v886_v2, %v10378_v9  ;;  %v7744_v61 = vadd.f32 %v975_v54, %v10379_v43  ;;  %v7746_v16 = vpop.f32.mrf.mxu2 }
 0x238   :  { %10381 = vst [vmem:[#allocation23_spill] sm:$0xff] %v7746_v16  ;;  %v7748_v51 = vpop.f32.mrf.mxu3 }
 0x239   :  { %10380 = vst [vmem:[#allocation22_spill] sm:$0xff] %v7744_v61 }
 0x23a   :  { %10382 = vst [vmem:[#allocation50_spill] sm:$0xff] %v7748_v51  ;;  %v10387_v51 = vld [vmem:[#allocation25_spill] sm:$0xff] }
 0x23e   :  { %v889_v23 = vpop.f32.mrf.mxu0  ;;  %v978_v31 = vpop.f32.mrf.mxu1 }
 0x23f   :  { %v1047_v52 = vadd.f32 %v889_v23, %v7376_v8  ;;  %v1048_v33 = vadd.f32 %v978_v31, %v10384_v36  ;;  %v1268_v34 = vpop.f32.mrf.mxu2  ;;  %v10393_v31 = vld [vmem:[#allocation7_spill] sm:$0xff] }
 0x240   :  { %v1357_v2 = vpop.f32.mrf.mxu3  ;;  %v1461_v36 = vrot.slane %v10393_v31, 2 }
 0x241   :  { %5556 = vmatmul.msk.bf16.gmra.mxu0 %vm247_vm0, %v1460_v46  ;;  %5572 = vmatmul.msk.bf16.gmra.mxu1 %vm247_vm0, %v1460_v46  ;;  %v7756_v9 = vadd.f32 %v1268_v34, %v1047_v52  ;;  %v7758_v54 = vadd.f32 %v1357_v2, %v1048_v33  ;;  %v10394_v2 = vld [vmem:[#allocation27_spill] sm:$0xff] }
 0x242   :  { %v1462_v52 = vsel %vm1451_vm4, %v1459_v40, %v1461_v36  ;;  %v10396_v40 = vld [vmem:[#allocation29_spill] sm:$0xff] }
 0x243   :  { %10385 = vst [vmem:[#allocation6_spill] sm:$0xff] %v7756_v9 }
 0x244   :  { %10386 = vst [vmem:[#allocation24_spill] sm:$0xff] %v7758_v54 }
 0x246   :  { %v891_v43 = vpop.f32.mrf.mxu0  ;;  %v980_v12 = vpop.f32.mrf.mxu1 }
 0x247   :  { %v7761_v61 = vadd.f32 %v891_v43, %v10387_v51  ;;  %v7764_v16 = vadd.f32 %v980_v12, %v10389_v3  ;;  %v7766_v8 = vpop.f32.mrf.mxu2 }
 0x248   :  { %10391 = vst [vmem:[#allocation51_spill] sm:$0xff] %v7766_v8  ;;  %v7768_v23 = vpop.f32.mrf.mxu3 }
 0x249   :  { %10388 = vst [vmem:[#allocation25_spill] sm:$0xff] %v7761_v61 }
 0x24a   :  { %10390 = vst [vmem:[#allocation26_spill] sm:$0xff] %v7764_v16 }
 0x24b   :  { %10392 = vst [vmem:[#allocation52_spill] sm:$0xff] %v7768_v23  ;;  %v10395_v23 = vld [vmem:[#allocation28_spill] sm:$0xff] }
 0x24e   :  { %v894_v46 = vpop.f32.mrf.mxu0  ;;  %v983_v34 = vpop.f32.mrf.mxu1 }
 0x24f   :  { %v1051_v33 = vadd.f32 %v894_v46, %v7395_v0  ;;  %v1052_v54 = vadd.f32 %v983_v34, %v10394_v2  ;;  %v1273_v9 = vpop.f32.mrf.mxu2  ;;  %v10398_v0 = vld [vmem:[#allocation8_spill] sm:$0xff] }
 0x250   :  { %v1362_v43 = vpop.f32.mrf.mxu3  ;;  %v1463_v46 = vrot.slane %v10398_v0, 2  ;;  %v10405_v0 = vld [vmem:[#allocation9_spill] sm:$0xff] }
 0x251   :  { %5557 = vmatmul.msk.bf16.gmra.mxu0 %vm247_vm0, %v1462_v52  ;;  %5573 = vmatmul.msk.bf16.gmra.mxu1 %vm247_vm0, %v1462_v52  ;;  %v7776_v51 = vadd.f32 %v1273_v9, %v1051_v33  ;;  %v7778_v12 = vadd.f32 %v1362_v43, %v1052_v54  ;;  %v10399_v52 = vld [vmem:[#allocation30_spill] sm:$0xff]  ;;  %v10401_v43 = vld [vmem:[#allocation31_spill] sm:$0xff] }
 0x252   :  { %v1464_v61 = vsel %vm1451_vm4, %v1461_v36, %v1463_v46  ;;  %v1465_v36 = vrot.slane %v10405_v0, 2 }
 0x256   :  { %v896_v3 = vpop.f32.mrf.mxu0  ;;  %v985_v31 = vpop.f32.mrf.mxu1 }
 0x257   :  { %v7781_v16 = vadd.f32 %v896_v3, %v10395_v23  ;;  %v7784_v8 = vadd.f32 %v985_v31, %v10396_v40  ;;  %v10403_v31 = vld [vmem:[#allocation32_spill] sm:$0xff] }
 0x259   :  { %10397 = vst [vmem:[#allocation7_spill] sm:$0xff] %v7784_v8 }
 0x25e   :  { %v899_v34 = vpop.f32.mrf.mxu0  ;;  %v988_v2 = vpop.f32.mrf.mxu1 }
 0x25f   :  { %v7789_v9 = vadd.f32 %v899_v34, %v7414_v37  ;;  %v7792_v54 = vadd.f32 %v988_v2, %v10399_v52  ;;  %v1466_v34 = vsel %vm1451_vm4, %v1463_v46, %v1465_v36  ;;  %v10406_v52 = vld [vmem:[#allocation33_spill] sm:$0xff] }
 0x261   :  { %10400 = vst [vmem:[#allocation27_spill] sm:$0xff] %v7792_v54  ;;  %5558 = vmatmul.msk.bf16.gmra.mxu0 %vm247_vm0, %v1464_v61  ;;  %5574 = vmatmul.msk.bf16.gmra.mxu1 %vm247_vm0, %v1464_v61 }
 0x266   :  { %v901_v23 = vpop.f32.mrf.mxu0  ;;  %v990_v33 = vpop.f32.mrf.mxu1 }
 0x267   :  { %v7797_v3 = vadd.f32 %v901_v23, %v10401_v43  ;;  %v7800_v40 = vadd.f32 %v990_v33, %v10403_v31  ;;  %v10407_v33 = vld [vmem:[#allocation34_spill] sm:$0xff]  ;;  %v10408_v31 = vld [vmem:[#allocation35_spill] sm:$0xff] }
 0x269   :  { %10402 = vst [vmem:[#allocation28_spill] sm:$0xff] %v7797_v3 }
 0x26a   :  { %10404 = vst [vmem:[#allocation29_spill] sm:$0xff] %v7800_v40  ;;  %v10410_v40 = vld [vmem:[#allocation10_spill] sm:$0xff] }
 0x26b   :  { %v1467_v46 = vrot.slane %v10410_v40, 2 }
 0x26e   :  { %v904_v8 = vpop.f32.mrf.mxu0  ;;  %v993_v37 = vpop.f32.mrf.mxu1 }
 0x26f   :  { %v7805_v2 = vadd.f32 %v904_v8, %v7433_v62  ;;  %v7808_v54 = vadd.f32 %v993_v37, %v10406_v52  ;;  %v1468_v8 = vsel %vm1451_vm4, %v1465_v36, %v1467_v46 }
 0x271   :  { %5559 = vmatmul.msk.bf16.gmra.mxu0 %vm247_vm0, %v1466_v34  ;;  %5575 = vmatmul.msk.bf16.gmra.mxu1 %vm247_vm0, %v1466_v34 }
 0x276   :  { %v906_v61 = vpop.f32.mrf.mxu0  ;;  %v995_v23 = vpop.f32.mrf.mxu1 }
 0x277   :  { %v7813_v43 = vadd.f32 %v906_v61, %v10407_v33  ;;  %v7816_v0 = vadd.f32 %v995_v23, %v10408_v31  ;;  %v10415_v33 = vld [vmem:[#allocation11_spill] sm:$0xff] }
 0x278   :  { %v1469_v36 = vrot.slane %v10415_v33, 2 }
 0x279   :  { %10409 = vst [vmem:[#allocation8_spill] sm:$0xff] %v7816_v0 }
 0x27e   :  { %v909_v3 = vpop.f32.mrf.mxu0  ;;  %v998_v62 = vpop.f32.mrf.mxu1 }
 0x27f   :  { %v7821_v37 = vadd.f32 %v909_v3, %v7452_v22  ;;  %v7824_v52 = vadd.f32 %v998_v62, %v7454_v24  ;;  %v1470_v3 = vsel %vm1451_vm4, %v1467_v46, %v1469_v36 }
 0x281   :  { %10411 = vst [vmem:[#allocation30_spill] sm:$0xff] %v7821_v37  ;;  %5560 = vmatmul.msk.bf16.gmra.mxu0 %vm247_vm0, %v1468_v8  ;;  %5576 = vmatmul.msk.bf16.gmra.mxu1 %vm247_vm0, %v1468_v8  ;;  %v1793_v8 = vld [vmem:[%s10214_s2] sm:$0x3] }
 0x282   :  { %10412 = vst [vmem:[#allocation31_spill] sm:$0xff] %v7824_v52 }
 0x286   :  { %v911_v34 = vpop.f32.mrf.mxu0  ;;  %v1000_v61 = vpop.f32.mrf.mxu1 }
 0x287   :  { %v7829_v23 = vadd.f32 %v911_v34, %v7460_v48  ;;  %v7832_v40 = vadd.f32 %v1000_v61, %v7462_v41  ;;  %v7843_v48 = vperm.slane %v1793_v8, 0  ;;  %v7845_v41 = vperm.slane %v1793_v8, 1 }
 0x289   :  { %10413 = vst [vmem:[#allocation32_spill] sm:$0xff] %v7829_v23 }
 0x28a   :  { %10414 = vst [vmem:[#allocation9_spill] sm:$0xff] %v7832_v40 }
 0x28e   :  { %v1560_v31 = vpop.f32.mrf.mxu0  ;;  %v1649_v22 = vpop.f32.mrf.mxu1 }
 0x28f   :  { %v1729_v24 = vadd.f32 %v1560_v31, %v7473_v38  ;;  %v1730_v62 = vadd.f32 %v1649_v22, %v7475_v28 }
 0x291   :  { %5561 = vmatmul.msk.bf16.gmra.mxu0 %vm247_vm0, %v1470_v3  ;;  %5577 = vmatmul.msk.bf16.gmra.mxu1 %vm247_vm0, %v1470_v3  ;;  %v1799_v46 = vadd.f32 %v7843_v48, %v1729_v24  ;;  %v1800_v38 = vadd.f32 %v7845_v41, %v1730_v62  ;;  %v1471_v3 = vrot.slane %v7066_v59, 2 }
 0x293   :  { %v1863_v40 = vmax.f32 %v1799_v46, 0.0  ;;  %v1864_v23 = vmax.f32 %v1800_v38, 0.0 }
 0x296   :  { %v1562_v34 = vpop.f32.mrf.mxu0  ;;  %v1651_v61 = vpop.f32.mrf.mxu1 }
 0x297   :  { %v1731_v28 = vadd.f32 %v1562_v34, %v7483_v56  ;;  %v1732_v33 = vadd.f32 %v1651_v61, %v7485_v29  ;;  %v1472_v56 = vsel %vm1451_vm4, %v1469_v36, %v1471_v3 }
 0x299   :  { %v1801_v31 = vadd.f32 %v7843_v48, %v1731_v28  ;;  %v1802_v22 = vadd.f32 %v7845_v41, %v1732_v33 }
 0x29b   :  { %v1865_v8 = vmax.f32 %v1801_v31, 0.0  ;;  %v1866_v52 = vmax.f32 %v1802_v22, 0.0 }
 0x29d   :  { %v7854_v37 = vpack.c.bf16 %v1865_v8, %v1863_v40  ;;  %v7856_v0 = vpack.c.bf16 %v1866_v52, %v1864_v23 }
 0x29e   :  { %v1565_v24 = vpop.f32.mrf.mxu0  ;;  %v1654_v62 = vpop.f32.mrf.mxu1 }
 0x29f   :  { %v1733_v29 = vadd.f32 %v1565_v24, %v7496_v47  ;;  %v1734_v34 = vadd.f32 %v1654_v62, %v7498_v55  ;;  %v1473_v55 = vrot.slane %v7095_v27, 2 }
 0x2a1   :  { %5562 = vmatmul.msk.bf16.gmra.mxu0 %vm247_vm0, %v1472_v56  ;;  %5578 = vmatmul.msk.bf16.gmra.mxu1 %vm247_vm0, %v1472_v56  ;;  %v1803_v46 = vadd.f32 %v7843_v48, %v1733_v29  ;;  %v1804_v40 = vadd.f32 %v7845_v41, %v1734_v34 }
 0x2a3   :  { %v1867_v38 = vmax.f32 %v1803_v46, 0.0  ;;  %v1868_v28 = vmax.f32 %v1804_v40, 0.0 }
 0x2a6   :  { %v1567_v59 = vpop.f32.mrf.mxu0  ;;  %v1656_v61 = vpop.f32.mrf.mxu1 }
 0x2a7   :  { %v1735_v52 = vadd.f32 %v1567_v59, %v7506_v57  ;;  %v1736_v23 = vadd.f32 %v1656_v61, %v7508_v6  ;;  %v1474_v57 = vsel %vm1451_vm4, %v1471_v3, %v1473_v55 }
 0x2a9   :  { %v1805_v36 = vadd.f32 %v7843_v48, %v1735_v52  ;;  %v1806_v47 = vadd.f32 %v7845_v41, %v1736_v23 }
 0x2ab   :  { %v1869_v33 = vmax.f32 %v1805_v36, 0.0  ;;  %v1870_v31 = vmax.f32 %v1806_v47, 0.0 }
 0x2ad   :  { %v7870_v22 = vpack.c.bf16 %v1869_v33, %v1867_v38  ;;  %v7872_v8 = vpack.c.bf16 %v1870_v31, %v1868_v28 }
 0x2ae   :  { %v1570_v24 = vpop.f32.mrf.mxu0  ;;  %v1659_v62 = vpop.f32.mrf.mxu1 }
 0x2af   :  { %v1737_v6 = vadd.f32 %v1570_v24, %v7519_v7  ;;  %v1738_v56 = vadd.f32 %v1659_v62, %v7521_v21  ;;  %v1475_v21 = vrot.slane %v7124_v13, 2 }
 0x2b1   :  { %5563 = vmatmul.msk.bf16.gmra.mxu0 %vm247_vm0, %v1474_v57  ;;  %5579 = vmatmul.msk.bf16.gmra.mxu1 %vm247_vm0, %v1474_v57  ;;  %v1807_v34 = vadd.f32 %v7843_v48, %v1737_v6  ;;  %v1808_v59 = vadd.f32 %v7845_v41, %v1738_v56 }
 0x2b3   :  { %v1871_v40 = vmax.f32 %v1807_v34, 0.0  ;;  %v1872_v52 = vmax.f32 %v1808_v59, 0.0 }
 0x2b6   :  { %v1572_v27 = vpop.f32.mrf.mxu0  ;;  %v1661_v29 = vpop.f32.mrf.mxu1 }
 0x2b7   :  { %v1739_v61 = vadd.f32 %v1572_v27, %v7529_v58  ;;  %v1740_v46 = vadd.f32 %v1661_v29, %v7531_v63  ;;  %v1476_v58 = vsel %vm1451_vm4, %v1473_v55, %v1475_v21 }
 0x2b9   :  { %v1809_v3 = vadd.f32 %v7843_v48, %v1739_v61  ;;  %v1810_v7 = vadd.f32 %v7845_v41, %v1740_v46 }
 0x2bb   :  { %v1873_v23 = vmax.f32 %v1809_v3, 0.0  ;;  %v1874_v36 = vmax.f32 %v1810_v7, 0.0 }
 0x2bd   :  { %v7886_v47 = vpack.c.bf16 %v1873_v23, %v1871_v40  ;;  %v7888_v38 = vpack.c.bf16 %v1874_v36, %v1872_v52  ;;  %v1401_v52 = vadd.f32 %v7587_v19, %v7583_v35 }
 0x2be   :  { %v1575_v28 = vpop.f32.mrf.mxu0  ;;  %v1664_v33 = vpop.f32.mrf.mxu1 }
 0x2bf   :  { %v1741_v63 = vadd.f32 %v1575_v28, %v7542_v4  ;;  %v1742_v31 = vadd.f32 %v1664_v33, %v7544_v10  ;;  %v1477_v10 = vrot.slane %v7153_v18, 2  ;;  %v1400_v18 = vadd.f32 %v7585_v1, %v7580_v53 }
 0x2c1   :  { %5564 = vmatmul.msk.bf16.gmra.mxu0 %vm247_vm0, %v1476_v58  ;;  %5580 = vmatmul.msk.bf16.gmra.mxu1 %vm247_vm0, %v1476_v58  ;;  %v1811_v62 = vadd.f32 %v7843_v48, %v1741_v63  ;;  %v1812_v57 = vadd.f32 %v7845_v41, %v1742_v31  ;;  %v1479_v63 = vrot.slane %v7188_v20, 2 }
 0x2c3   :  { %v1875_v27 = vmax.f32 %v1811_v62, 0.0  ;;  %v1876_v29 = vmax.f32 %v1812_v57, 0.0  ;;  %v1480_v57 = vsel %vm1451_vm4, %v1477_v10, %v1479_v63 }
 0x2c6   :  { %v1577_v13 = vpop.f32.mrf.mxu0  ;;  %v1666_v24 = vpop.f32.mrf.mxu1 }
 0x2c7   :  { %v1743_v6 = vadd.f32 %v1577_v13, %v7552_v39  ;;  %v1744_v56 = vadd.f32 %v1666_v24, %v7554_v11  ;;  %v1478_v39 = vsel %vm1451_vm4, %v1475_v21, %v1477_v10 }
 0x2c9   :  { %v1813_v55 = vadd.f32 %v7843_v48, %v1743_v6  ;;  %v1814_v4 = vadd.f32 %v7845_v41, %v1744_v56  ;;  %v1402_v6 = vadd.f32 %v7600_v26, %v7595_v25  ;;  %v10416_v56 = vld [vmem:[#allocation36_spill] sm:$0xff] }
 0x2cb   :  { %v1877_v34 = vmax.f32 %v1813_v55, 0.0  ;;  %v1878_v59 = vmax.f32 %v1814_v4, 0.0  ;;  %v1403_v55 = vadd.f32 %v10416_v56, %v7598_v17 }
 0x2cd   :  { %v7902_v61 = vpack.c.bf16 %v1877_v34, %v1875_v27  ;;  %v7904_v46 = vpack.c.bf16 %v1878_v59, %v1876_v29  ;;  %v1404_v27 = vadd.f32 %v7622_v60, %v7611_v50  ;;  %v10417_v29 = vld [vmem:[#allocation37_spill] sm:$0xff]  ;;  %v10418_v34 = vld [vmem:[#allocation38_spill] sm:$0xff] }
 0x2ce   :  { %v1580_v3 = vpop.f32.mrf.mxu0  ;;  %v1669_v7 = vpop.f32.mrf.mxu1  ;;  %v1405_v59 = vadd.f32 %v10418_v34, %v10417_v29 }
 0x2cf   :  { %v1745_v11 = vadd.f32 %v1580_v3, %v7565_v44  ;;  %v1746_v40 = vadd.f32 %v1669_v7, %v7573_v14 }
 0x2d1   :  { %5565 = vmatmul.msk.bf16.gmra.mxu0 %vm247_vm0, %v1478_v39  ;;  %5581 = vmatmul.msk.bf16.gmra.mxu1 %vm247_vm0, %v1478_v39  ;;  %v1815_v28 = vadd.f32 %v7843_v48, %v1745_v11  ;;  %v1816_v21 = vadd.f32 %v7845_v41, %v1746_v40  ;;  %v10419_v40 = vld [vmem:[#allocation12_spill] sm:$0xff] }
 0x2d3   :  { %v1879_v31 = vmax.f32 %v1815_v28, 0.0  ;;  %v1880_v13 = vmax.f32 %v1816_v21, 0.0 }
 0x2d6   :  { %v1582_v23 = vpop.f32.mrf.mxu0  ;;  %v1671_v36 = vpop.f32.mrf.mxu1 }
 0x2d7   :  { %v1747_v33 = vadd.f32 %v1582_v23, %v1400_v18  ;;  %v1748_v44 = vadd.f32 %v1671_v36, %v1401_v52  ;;  %v1481_v18 = vrot.slane %v10419_v40, 2 }
 0x2d9   :  { %v1817_v14 = vadd.f32 %v7843_v48, %v1747_v33  ;;  %v1818_v58 = vadd.f32 %v7845_v41, %v1748_v44  ;;  %v1482_v44 = vsel %vm1451_vm4, %v1479_v63, %v1481_v18 }
 0x2db   :  { %v1881_v53 = vmax.f32 %v1817_v14, 0.0  ;;  %v1882_v1 = vmax.f32 %v1818_v58, 0.0  ;;  %v1406_v14 = vadd.f32 %v7649_v49, %v7644_v42  ;;  %v1407_v58 = vadd.f32 %v7653_v15, %v7647_v5 }
 0x2dd   :  { %v7920_v24 = vpack.c.bf16 %v1881_v53, %v1879_v31  ;;  %v7922_v35 = vpack.c.bf16 %v1882_v1, %v1880_v13  ;;  %v10420_v53 = vld [vmem:[#allocation39_spill] sm:$0xff]  ;;  %v10421_v1 = vld [vmem:[#allocation41_spill] sm:$0xff] }
 0x2de   :  { %v1585_v19 = vpop.f32.mrf.mxu0  ;;  %v1674_v62 = vpop.f32.mrf.mxu1 }
 0x2df   :  { %v1749_v20 = vadd.f32 %v1585_v19, %v1402_v6  ;;  %v1750_v4 = vadd.f32 %v1674_v62, %v1403_v55  ;;  %v1408_v19 = vadd.f32 %v10421_v1, %v10420_v53  ;;  %v10422_v62 = vld [vmem:[#allocation40_spill] sm:$0xff] }
 0x2e1   :  { %5566 = vmatmul.msk.bf16.gmra.mxu0 %vm247_vm0, %v1480_v57  ;;  %5582 = vmatmul.msk.bf16.gmra.mxu1 %vm247_vm0, %v1480_v57  ;;  %v1819_v7 = vadd.f32 %v7843_v48, %v1749_v20  ;;  %v1820_v25 = vadd.f32 %v7845_v41, %v1750_v4  ;;  %v10423_v57 = vld [vmem:[#allocation42_spill] sm:$0xff] }
 0x2e2   :  { %v1409_v6 = vadd.f32 %v10423_v57, %v10422_v62 }
 0x2e3   :  { %v1883_v52 = vmax.f32 %v1819_v7, 0.0  ;;  %v1884_v23 = vmax.f32 %v1820_v25, 0.0  ;;  %v10424_v25 = vld [vmem:[#allocation43_spill] sm:$0xff] }
 0x2e6   :  { %v1587_v3 = vpop.f32.mrf.mxu0  ;;  %v1676_v10 = vpop.f32.mrf.mxu1 }
 0x2e7   :  { %v1751_v26 = vadd.f32 %v1587_v3, %v1404_v27  ;;  %v1752_v17 = vadd.f32 %v1676_v10, %v1405_v59 }
 0x2e9   :  { %v1821_v39 = vadd.f32 %v7843_v48, %v1751_v26  ;;  %v1822_v11 = vadd.f32 %v7845_v41, %v1752_v17  ;;  %v10425_v26 = vld [vmem:[#allocation45_spill] sm:$0xff] }
 0x2ea   :  { %v1410_v17 = vadd.f32 %v10425_v26, %v10424_v25 }
 0x2eb   :  { %v1885_v50 = vmax.f32 %v1821_v39, 0.0  ;;  %v1886_v60 = vmax.f32 %v1822_v11, 0.0  ;;  %v10426_v39 = vld [vmem:[#allocation44_spill] sm:$0xff]  ;;  %v10427_v11 = vld [vmem:[#allocation46_spill] sm:$0xff] }
 0x2ec   :  { %v1411_v40 = vadd.f32 %v10427_v11, %v10426_v39 }
 0x2ed   :  { %v7940_v36 = vpack.c.bf16 %v1885_v50, %v1883_v52  ;;  %v7942_v28 = vpack.c.bf16 %v1886_v60, %v1884_v23  ;;  %v10428_v50 = vld [vmem:[#allocation13_spill] sm:$0xff]  ;;  %v10429_v60 = vld [vmem:[#allocation47_spill] sm:$0xff] }
 0x2ee   :  { %v1590_v21 = vpop.f32.mrf.mxu0  ;;  %v1679_v33 = vpop.f32.mrf.mxu1 }
 0x2ef   :  { %v1753_v31 = vadd.f32 %v1590_v21, %v1406_v14  ;;  %v1754_v13 = vadd.f32 %v1679_v33, %v1407_v58  ;;  %v1412_v21 = vadd.f32 %v10429_v60, %v10428_v50  ;;  %v10430_v33 = vld [vmem:[#allocation14_spill] sm:$0xff] }
 0x2f1   :  { %5567 = vmatmul.msk.bf16.gmra.mxu0 %vm247_vm0, %v1482_v44  ;;  %5583 = vmatmul.msk.bf16.gmra.mxu1 %vm247_vm0, %v1482_v44  ;;  %v1823_v55 = vadd.f32 %v7843_v48, %v1753_v31  ;;  %v1824_v42 = vadd.f32 %v7845_v41, %v1754_v13  ;;  %v10431_v44 = vld [vmem:[#allocation48_spill] sm:$0xff] }
 0x2f2   :  { %v1413_v14 = vadd.f32 %v10431_v44, %v10430_v33 }
 0x2f3   :  { %v1887_v4 = vmax.f32 %v1823_v55, 0.0  ;;  %v1888_v27 = vmax.f32 %v1824_v42, 0.0 }
 0x2f6   :  { %v1592_v56 = vpop.f32.mrf.mxu0  ;;  %v1681_v63 = vpop.f32.mrf.mxu1 }
 0x2f7   :  { %v1755_v49 = vadd.f32 %v1592_v56, %v1408_v19  ;;  %v1756_v5 = vadd.f32 %v1681_v63, %v1409_v6 }
 0x2f9   :  { %v1825_v15 = vadd.f32 %v7843_v48, %v1755_v49  ;;  %v1826_v20 = vadd.f32 %v7845_v41, %v1756_v5 }
 0x2fb   :  { %v1889_v29 = vmax.f32 %v1825_v15, 0.0  ;;  %v1890_v34 = vmax.f32 %v1826_v20, 0.0  ;;  %v10432_v15 = vld [vmem:[#allocation2_spill] sm:$0xff] }
 0x2fd   :  { %v1953_v59 = vpack.c.bf16 %v1889_v29, %v1887_v4  ;;  %v7959_v3 = vpack.c.bf16 %v1890_v34, %v1888_v27  ;;  %v10433_v4 = vld [vmem:[#allocation3_spill] sm:$0xff]  ;;  %v10434_v29 = vld [vmem:[#allocation16_spill] sm:$0xff] }
 0x2fe   :  { %v1595_v10 = vpop.f32.mrf.mxu0  ;;  %v1684_v7 = vpop.f32.mrf.mxu1  ;;  %v1416_v34 = vadd.f32 %v10434_v29, %v7701_v30 }
 0x2ff   :  { %v1757_v52 = vadd.f32 %v1595_v10, %v1410_v17  ;;  %v1758_v23 = vadd.f32 %v1684_v7, %v1411_v40  ;;  %v10435_v10 = vld [vmem:[#allocation15_spill] sm:$0xff]  ;;  %v10436_v7 = vld [vmem:[#allocation17_spill] sm:$0xff] }
 0x300   :  { %v1417_v25 = vadd.f32 %v10436_v7, %v10435_v10  ;;  %v10442_v10 = vld [vmem:[#allocation5_spill] sm:$0xff] }
 0x301   :  { %5568 = vmatmul.msk.bf16.gmra.mxu0 %vm247_vm0, %v1481_v18  ;;  %5584 = vmatmul.msk.bf16.gmra.mxu1 %vm247_vm0, %v1481_v18  ;;  %v1827_v13 = vadd.f32 %v7843_v48, %v1757_v52  ;;  %v1828_v53 = vadd.f32 %v7845_v41, %v1758_v23 }
 0x303   :  { %v1891_v57 = vmax.f32 %v1827_v13, 0.0  ;;  %v1892_v6 = vmax.f32 %v1828_v53, 0.0  ;;  %v10438_v53 = vld [vmem:[#allocation18_spill] sm:$0xff] }
 0x306   :  { %v1597_v58 = vpop.f32.mrf.mxu0  ;;  %v1686_v31 = vpop.f32.mrf.mxu1 }
 0x307   :  { %v1759_v1 = vadd.f32 %v1597_v58, %v1412_v21  ;;  %v1760_v19 = vadd.f32 %v1686_v31, %v1413_v14  ;;  %v10437_v31 = vld [vmem:[#allocation4_spill] sm:$0xff] }
 0x309   :  { %v1829_v62 = vadd.f32 %v7843_v48, %v1759_v1  ;;  %v1830_v18 = vadd.f32 %v7845_v41, %v1760_v19  ;;  %v10439_v1 = vld [vmem:[#allocation20_spill] sm:$0xff] }
 0x30a   :  { %v1420_v19 = vadd.f32 %v10439_v1, %v7721_v45  ;;  %v10448_v1 = vld [vmem:[#allocation24_spill] sm:$0xff] }
 0x30b   :  { %v1893_v56 = vmax.f32 %v1829_v62, 0.0  ;;  %v1894_v63 = vmax.f32 %v1830_v18, 0.0  ;;  %v10440_v62 = vld [vmem:[#allocation19_spill] sm:$0xff]  ;;  %v10441_v18 = vld [vmem:[#allocation49_spill] sm:$0xff] }
 0x30d   :  { %v1955_v55 = vpack.c.bf16 %v1893_v56, %v1891_v57  ;;  %v1956_v42 = vpack.c.bf16 %v1894_v63, %v1892_v6 }
 0x30e   :  { %v1600_v49 = vpop.f32.mrf.mxu0  ;;  %v1689_v5 = vpop.f32.mrf.mxu1 }
 0x30f   :  { %v1761_v20 = vadd.f32 %v1600_v49, %v10432_v15  ;;  %v1762_v27 = vadd.f32 %v1689_v5, %v10433_v4  ;;  %2065 = vmatpush.bf16.msra.mxu2 %v1955_v55 }
 0x311   :  { %v1831_v39 = vadd.f32 %v7843_v48, %v1761_v20  ;;  %v1832_v11 = vadd.f32 %v7845_v41, %v1762_v27 }
 0x313   :  { %2066 = vmatpush.bf16.msra.mxu2 %v1953_v59  ;;  %v1895_v50 = vmax.f32 %v1831_v39, 0.0  ;;  %v1896_v60 = vmax.f32 %v1832_v11, 0.0  ;;  %v10445_v39 = vld [vmem:[#allocation22_spill] sm:$0xff] }
 0x316   :  { %v1602_v26 = vpop.f32.mrf.mxu0  ;;  %v1691_v17 = vpop.f32.mrf.mxu1 }
 0x317   :  { %v1763_v40 = vadd.f32 %v1602_v26, %v1416_v34  ;;  %v1764_v52 = vadd.f32 %v1691_v17, %v1417_v25  ;;  %2067 = vmatpush.bf16.msra.mxu2 %v7940_v36  ;;  %v10444_v26 = vld [vmem:[#allocation23_spill] sm:$0xff] }
 0x318   :  { %v1424_v17 = vadd.f32 %v10444_v26, %v7741_v32 }
 0x319   :  { %v1833_v23 = vadd.f32 %v7843_v48, %v1763_v40  ;;  %v1834_v59 = vadd.f32 %v7845_v41, %v1764_v52 }
 0x31b   :  { %v1897_v30 = vmax.f32 %v1833_v23, 0.0  ;;  %v1898_v21 = vmax.f32 %v1834_v59, 0.0  ;;  %2068 = vmatpush.bf16.msra.mxu2 %v7920_v24  ;;  %v1421_v24 = vadd.f32 %v10441_v18, %v10440_v62  ;;  %v10450_v62 = vld [vmem:[#allocation51_spill] sm:$0xff] }
 0x31d   :  { %v7987_v33 = vpack.c.bf16 %v1897_v30, %v1895_v50  ;;  %v7989_v44 = vpack.c.bf16 %v1898_v21, %v1896_v60 }
 0x31e   :  { %v1605_v14 = vpop.f32.mrf.mxu0  ;;  %v1694_v58 = vpop.f32.mrf.mxu1 }
 0x31f   :  { %v1765_v13 = vadd.f32 %v1605_v14, %v10437_v31  ;;  %v1766_v36 = vadd.f32 %v1694_v58, %v10438_v53  ;;  %2069 = vmatpush.bf16.msra.mxu2 %v7902_v61  ;;  %v10447_v53 = vld [vmem:[#allocation6_spill] sm:$0xff] }
 0x321   :  { %v1835_v56 = vadd.f32 %v7843_v48, %v1765_v13  ;;  %v1836_v63 = vadd.f32 %v7845_v41, %v1766_v36 }
 0x323   :  { %2070 = vmatpush.bf16.msra.mxu2 %v7886_v47  ;;  %v1899_v5 = vmax.f32 %v1835_v56, 0.0  ;;  %v1900_v15 = vmax.f32 %v1836_v63, 0.0  ;;  %v1364_v56 = vpop.f32.mrf.mxu3 }
 0x326   :  { %v1607_v57 = vpop.f32.mrf.mxu0  ;;  %v1696_v6 = vpop.f32.mrf.mxu1 }
 0x327   :  { %v1767_v55 = vadd.f32 %v1607_v57, %v1420_v19  ;;  %v1768_v49 = vadd.f32 %v1696_v6, %v1421_v24  ;;  %2071 = vmatpush.bf16.msra.mxu2 %v7870_v22  ;;  %v10443_v22 = vld [vmem:[#allocation21_spill] sm:$0xff]  ;;  %v10451_v24 = vld [vmem:[#allocation26_spill] sm:$0xff]  ;;  %v10452_v57 = vld [vmem:[#allocation52_spill] sm:$0xff]  ;;  %v1275_v6 = vpop.f32.mrf.mxu2 }
 0x328   :  { %v10449_v19 = vld [vmem:[#allocation25_spill] sm:$0xff] }
 0x329   :  { %v1837_v61 = vadd.f32 %v7843_v48, %v1767_v55  ;;  %v1838_v47 = vadd.f32 %v7845_v41, %v1768_v49  ;;  %v1428_v18 = vadd.f32 %v10450_v62, %v10449_v19  ;;  %v10454_v62 = vld [vmem:[#allocation27_spill] sm:$0xff] }
 0x32b   :  { %v1901_v45 = vmax.f32 %v1837_v61, 0.0  ;;  %v1902_v20 = vmax.f32 %v1838_v47, 0.0  ;;  %2072 = vmatpush.bf16.msra.mxu2 %v7854_v37  ;;  %v10446_v37 = vld [vmem:[#allocation50_spill] sm:$0xff]  ;;  %v1367_v26 = vpop.f32.mrf.mxu3 }
 0x32d   :  { %v8005_v4 = vpack.c.bf16 %v1901_v45, %v1899_v5  ;;  %v8007_v27 = vpack.c.bf16 %v1902_v20, %v1900_v15 }
 0x32e   :  { %v1610_v29 = vpop.f32.mrf.mxu0  ;;  %v1699_v34 = vpop.f32.mrf.mxu1 }
 0x32f   :  { %2153 = vmatpush.bf16.msrb.mxu2 %v1956_v42  ;;  %v1769_v7 = vadd.f32 %v1610_v29, %v10442_v10  ;;  %v1770_v25 = vadd.f32 %v1699_v34, %v10443_v22  ;;  %v1425_v42 = vadd.f32 %v10446_v37, %v10445_v39  ;;  %v5587_v39 = vld [vmem:[%s10215_s3] sm:$0xf]  ;;  %v6569_v37 = vld [vmem:[%s10215_s3 + $0x4] sm:$0xf0] }
 0x331   :  { %v1839_v52 = vadd.f32 %v7843_v48, %v1769_v7  ;;  %v1840_v23 = vadd.f32 %v7845_v41, %v1770_v25  ;;  %v1278_v25 = vpop.f32.mrf.mxu2 }
 0x332   :  { %v1434_v19 = vadd.f32 %v1278_v25, %v7789_v9 }
 0x333   :  { %2154 = vmatpush.bf16.msrb.mxu2 %v7959_v3  ;;  %v1903_v60 = vmax.f32 %v1839_v52, 0.0  ;;  %v1904_v30 = vmax.f32 %v1840_v23, 0.0 }
 0x336   :  { %v1612_v11 = vpop.f32.mrf.mxu0  ;;  %v1701_v40 = vpop.f32.mrf.mxu1 }
 0x337   :  { %2155 = vmatpush.bf16.msrb.mxu2 %v7942_v28  ;;  %v1771_v59 = vadd.f32 %v1612_v11, %v1424_v17  ;;  %v1772_v50 = vadd.f32 %v1701_v40, %v1425_v42  ;;  %v8052_v42 = vor.u32 %v6569_v37, %v5587_v39  ;;  %v1432_v11 = vadd.f32 %v1275_v6, %v7781_v16  ;;  %v10453_v40 = vld [vmem:[#allocation7_spill] sm:$0xff] }
 0x338   :  { %v1433_v52 = vadd.f32 %v1364_v56, %v10453_v40 }
 0x339   :  { %v1841_v3 = vadd.f32 %v7843_v48, %v1771_v59  ;;  %v1842_v28 = vadd.f32 %v7845_v41, %v1772_v50  ;;  %2073 = vmatmul.bf16.vlgmr.msra.gmra.mxu2 %v8052_v42 }
 0x33b   :  { %2156 = vmatpush.bf16.msrb.mxu2 %v7922_v35  ;;  %v1905_v32 = vmax.f32 %v1841_v3, 0.0  ;;  %v1906_v21 = vmax.f32 %v1842_v28, 0.0  ;;  %v1280_v28 = vpop.f32.mrf.mxu2 }
 0x33d   :  { %v8023_v14 = vpack.c.bf16 %v1905_v32, %v1903_v60  ;;  %v8025_v58 = vpack.c.bf16 %v1906_v21, %v1904_v30  ;;  %v1369_v60 = vpop.f32.mrf.mxu3 }
 0x33e   :  { %v1615_v31 = vpop.f32.mrf.mxu0  ;;  %v1704_v13 = vpop.f32.mrf.mxu1 }
 0x33f   :  { %2157 = vmatpush.bf16.msrb.mxu2 %v7904_v46  ;;  %v1773_v36 = vadd.f32 %v1615_v31, %v10447_v53  ;;  %v1774_v35 = vadd.f32 %v1704_v13, %v10448_v1  ;;  %v1429_v46 = vadd.f32 %v10452_v57, %v10451_v24  ;;  %v5595_v24 = vld [vmem:[%s10215_s3 + $0x10] sm:$0xf]  ;;  %v6571_v57 = vld [vmem:[%s10215_s3 + $0x14] sm:$0xf0] }
 0x341   :  { %v1843_v49 = vadd.f32 %v7843_v48, %v1773_v36  ;;  %v1844_v61 = vadd.f32 %v7845_v41, %v1774_v35 }
 0x343   :  { %2158 = vmatpush.bf16.msrb.mxu2 %v7888_v38  ;;  %v1907_v15 = vmax.f32 %v1843_v49, 0.0  ;;  %v1908_v45 = vmax.f32 %v1844_v61, 0.0  ;;  %v1283_v6 = vpop.f32.mrf.mxu2  ;;  %v10455_v49 = vld [vmem:[#allocation28_spill] sm:$0xff]  ;;  %v10456_v61 = vld [vmem:[#allocation29_spill] sm:$0xff] }
 0x344   :  { %v1436_v9 = vadd.f32 %v1280_v28, %v10455_v49  ;;  %v5611_v49 = vld [vmem:[%s10215_s3 + $0x30] sm:$0xf] }
 0x345   :  { %v1372_v56 = vpop.f32.mrf.mxu3 }
 0x346   :  { %v1617_v63 = vpop.f32.mrf.mxu0  ;;  %v1706_v55 = vpop.f32.mrf.mxu1 }
 0x347   :  { %2159 = vmatpush.bf16.msrb.mxu2 %v7872_v8  ;;  %v1775_v47 = vadd.f32 %v1617_v63, %v1428_v18  ;;  %v1776_v5 = vadd.f32 %v1706_v55, %v1429_v46  ;;  %v1435_v18 = vadd.f32 %v1367_v26, %v10454_v62  ;;  %v8073_v46 = vor.u32 %v6571_v57, %v5595_v24 }
 0x349   :  { %v1845_v8 = vadd.f32 %v7843_v48, %v1775_v47  ;;  %v1846_v38 = vadd.f32 %v7845_v41, %v1776_v5  ;;  %2078 = vmatmul.bf16.gmra.mxu2 %v8073_v46  ;;  %v1437_v47 = vadd.f32 %v1369_v60, %v10456_v61  ;;  %v10458_v61 = vld [vmem:[#allocation30_spill] sm:$0xff] }
 0x34b   :  { %2160 = vmatpush.bf16.msrb.mxu2 %v7856_v0  ;;  %v1909_v20 = vmax.f32 %v1845_v8, 0.0  ;;  %v1910_v29 = vmax.f32 %v1846_v38, 0.0 }
 0x34d   :  { %v8040_v34 = vpack.c.bf16 %v1909_v20, %v1907_v15  ;;  %v8042_v10 = vpack.c.bf16 %v1910_v29, %v1908_v45  ;;  %v1374_v39 = vpop.f32.mrf.mxu3 }
 0x34e   :  { %v1620_v7 = vpop.f32.mrf.mxu0  ;;  %v1709_v22 = vpop.f32.mrf.mxu1 }
 0x34f   :  { %v1777_v17 = vadd.f32 %v1620_v7, %v7776_v51  ;;  %v1778_v0 = vadd.f32 %v1709_v22, %v7778_v12 }
 0x351   :  { %v1847_v12 = vadd.f32 %v7843_v48, %v1777_v17  ;;  %v1848_v59 = vadd.f32 %v7845_v41, %v1778_v0  ;;  %v1285_v0 = vpop.f32.mrf.mxu2 }
 0x352   :  { %v1440_v60 = vadd.f32 %v1285_v0, %v7813_v43 }
 0x353   :  { %v1911_v21 = vmax.f32 %v1847_v12, 0.0  ;;  %v1912_v31 = vmax.f32 %v1848_v59, 0.0  ;;  %v1438_v12 = vadd.f32 %v1283_v6, %v7805_v2  ;;  %v1439_v59 = vadd.f32 %v1372_v56, %v7808_v54 }
 0x355   :  { %v1377_v54 = vpop.f32.mrf.mxu3 }
 0x356   :  { %v1622_v23 = vpop.f32.mrf.mxu0  ;;  %v1711_v51 = vpop.f32.mrf.mxu1 }
 0x357   :  { %v1779_v50 = vadd.f32 %v1622_v23, %v1432_v11  ;;  %v1780_v3 = vadd.f32 %v1711_v51, %v1433_v52  ;;  %v5603_v23 = vld [vmem:[%s10215_s3 + $0x20] sm:$0xf]  ;;  %v6573_v51 = vld [vmem:[%s10215_s3 + $0x24] sm:$0xf0] }
 0x359   :  { %v1849_v30 = vadd.f32 %v7843_v48, %v1779_v50  ;;  %v1850_v32 = vadd.f32 %v7845_v41, %v1780_v3  ;;  %v8094_v50 = vor.u32 %v6573_v51, %v5603_v23 }
 0x35b   :  { %v1913_v13 = vmax.f32 %v1849_v30, 0.0  ;;  %v1914_v16 = vmax.f32 %v1850_v32, 0.0  ;;  %2083 = vmatmul.bf16.gmra.mxu2 %v8094_v50  ;;  %v10457_v30 = vld [vmem:[#allocation8_spill] sm:$0xff] }
 0x35c   :  { %v1441_v32 = vadd.f32 %v1374_v39, %v10457_v30 }
 0x35d   :  { %v8061_v53 = vpack.c.bf16 %v1913_v13, %v1911_v21  ;;  %v8063_v36 = vpack.c.bf16 %v1914_v16, %v1912_v31 }
 0x35e   :  { %v1625_v1 = vpop.f32.mrf.mxu0  ;;  %v1714_v35 = vpop.f32.mrf.mxu1 }
 0x35f   :  { %v1781_v63 = vadd.f32 %v1625_v1, %v1434_v19  ;;  %v1782_v55 = vadd.f32 %v1714_v35, %v1435_v18  ;;  %v1288_v35 = vpop.f32.mrf.mxu2 }
 0x361   :  { %v1851_v38 = vadd.f32 %v7843_v48, %v1781_v63  ;;  %v1852_v15 = vadd.f32 %v7845_v41, %v1782_v55 }
 0x363   :  { %v1915_v22 = vmax.f32 %v1851_v38, 0.0  ;;  %v1916_v25 = vmax.f32 %v1852_v15, 0.0 }
 0x366   :  { %v1627_v5 = vpop.f32.mrf.mxu0  ;;  %v1716_v8 = vpop.f32.mrf.mxu1 }
 0x367   :  { %v1783_v45 = vadd.f32 %v1627_v5, %v1436_v9  ;;  %v1784_v20 = vadd.f32 %v1716_v8, %v1437_v47  ;;  %v6575_v9 = vld [vmem:[%s10215_s3 + $0x34] sm:$0xf0]  ;;  %v1442_v47 = vadd.f32 %v1288_v35, %v10458_v61  ;;  %v10459_v5 = vld [vmem:[#allocation31_spill] sm:$0xff]  ;;  %v1290_v15 = vpop.f32.mrf.mxu2 }
 0x368   :  { %v1443_v8 = vadd.f32 %v1377_v54, %v10459_v5  ;;  %v8111_v38 = vor.u32 %v6575_v9, %v5611_v49  ;;  %v5597_v54 = vld [vmem:[%s10215_s3 + $0x18] sm:$0xf0]  ;;  %v6580_v9 = vld [vmem:[%s10215_s3 + $0x64] sm:$0xf]  ;;  %v5637_v61 = vld [vmem:[%s10215_s3 + $0x68] sm:$0xf0] }
 0x369   :  { %v1853_v29 = vadd.f32 %v7843_v48, %v1783_v45  ;;  %v1854_v7 = vadd.f32 %v7845_v41, %v1784_v20  ;;  %v1379_v45 = vpop.f32.mrf.mxu3 }
 0x36b   :  { %v1917_v26 = vmax.f32 %v1853_v29, 0.0  ;;  %v1918_v17 = vmax.f32 %v1854_v7, 0.0  ;;  %2088 = vmatmul.bf16.gmra.mxu2 %v8111_v38  ;;  %v10460_v7 = vld [vmem:[#allocation32_spill] sm:$0xff] }
 0x36d   :  { %v8082_v37 = vpack.c.bf16 %v1917_v26, %v1915_v22  ;;  %v8084_v11 = vpack.c.bf16 %v1918_v17, %v1916_v25  ;;  %v1444_v22 = vadd.f32 %v1290_v15, %v10460_v7  ;;  %v10461_v25 = vld [vmem:[#allocation9_spill] sm:$0xff]  ;;  %v6615_v7 = vld [vmem:[%s10216_s4 + $0x10c] sm:$0xf0] }
 0x36e   :  { %v1630_v40 = vpop.f32.mrf.mxu0  ;;  %v1719_v52 = vpop.f32.mrf.mxu1  ;;  %v1445_v26 = vadd.f32 %v1379_v45, %v10461_v25  ;;  %v6616_v15 = vld [vmem:[%s10216_s4 + $0x11c] sm:$0xf]  ;;  %v6614_v25 = vld [vmem:[%s10216_s4 + $0x10c] sm:$0xf] }
 0x36f   :  { %v1785_v3 = vadd.f32 %v1630_v40, %v1438_v12  ;;  %v1786_v28 = vadd.f32 %v1719_v52, %v1439_v59 }
 0x371   :  { %v1855_v13 = vadd.f32 %v7843_v48, %v1785_v3  ;;  %v1856_v16 = vadd.f32 %v7845_v41, %v1786_v28 }
 0x373   :  { %v1919_v18 = vmax.f32 %v1855_v13, 0.0  ;;  %v1920_v24 = vmax.f32 %v1856_v16, 0.0  ;;  %v6577_v13 = vld [vmem:[%s10215_s3 + $0x44] sm:$0xf0]  ;;  %v6579_v16 = vld [vmem:[%s10215_s3 + $0x54] sm:$0xf0] }
 0x376   :  { %v1632_v21 = vpop.f32.mrf.mxu0  ;;  %v1721_v31 = vpop.f32.mrf.mxu1 }
 0x377   :  { %v1787_v1 = vadd.f32 %v1632_v21, %v1440_v60  ;;  %v1788_v2 = vadd.f32 %v1721_v31, %v1441_v32  ;;  %v5619_v31 = vld [vmem:[%s10215_s3 + $0x40] sm:$0xf] }
 0x379   :  { %v1857_v19 = vadd.f32 %v7843_v48, %v1787_v1  ;;  %v1858_v62 = vadd.f32 %v7845_v41, %v1788_v2 }
 0x37b   :  { %v1921_v57 = vmax.f32 %v1857_v19, 0.0  ;;  %v1922_v43 = vmax.f32 %v1858_v62, 0.0 }
 0x37d   :  { %v1969_v6 = vpack.c.bf16 %v1921_v57, %v1919_v18  ;;  %v1970_v56 = vpack.c.bf16 %v1922_v43, %v1920_v24  ;;  %v6576_v18 = vld [vmem:[%s10215_s3 + $0x44] sm:$0xf]  ;;  %v5621_v24 = vld [vmem:[%s10215_s3 + $0x48] sm:$0xf0] }
 0x37e   :  { %v1635_v63 = vpop.f32.mrf.mxu0  ;;  %v1724_v55 = vpop.f32.mrf.mxu1  ;;  %v8213_v57 = vor.u32 %v6576_v18, %v5621_v24  ;;  %v5678_v24 = vld [vmem:[%s10216_s4 + $0xa8] sm:$0xf] }
 0x37f   :  { %v1789_v20 = vadd.f32 %v1635_v63, %v1442_v47  ;;  %v1790_v29 = vadd.f32 %v1724_v55, %v1443_v8  ;;  %v8242_v47 = vor.u32 %v6580_v9, %v5637_v61  ;;  %v5734_v8 = vld [vmem:[%s10216_s4 + $0x118] sm:$0xf] }
 0x381   :  { %v1859_v39 = vadd.f32 %v7843_v48, %v1789_v20  ;;  %v1860_v40 = vadd.f32 %v7845_v41, %v1790_v29  ;;  %v5736_v20 = vld [vmem:[%s10216_s4 + $0x120] sm:$0xf0]  ;;  %v5726_v29 = vld [vmem:[%s10216_s4 + $0x108] sm:$0xf] }
 0x383   :  { %v1923_v59 = vmax.f32 %v1859_v39, 0.0  ;;  %v1924_v3 = vmax.f32 %v1860_v40, 0.0  ;;  %v5718_v40 = vld [vmem:[%s10216_s4 + $0xf8] sm:$0xf] }
 0x386   :  { %v1637_v17 = vpop.f32.mrf.mxu0  ;;  %v1726_v0 = vpop.f32.mrf.mxu1 }
 0x387   :  { %v1791_v52 = vadd.f32 %v1637_v17, %v1444_v22  ;;  %v1792_v23 = vadd.f32 %v1726_v0, %v1445_v26  ;;  %v5739_v22 = vor.u32 %v6616_v15, %v5736_v20  ;;  %v5728_v26 = vld [vmem:[%s10216_s4 + $0x110] sm:$0xf0]  ;;  %v5727_v17 = vor.u32 %v6615_v7, %v5726_v29 }
 0x388   :  { %v5731_v0 = vor.u32 %v6614_v25, %v5728_v26 }
 0x389   :  { %v1861_v51 = vadd.f32 %v7843_v48, %v1791_v52  ;;  %v1862_v12 = vadd.f32 %v7845_v41, %v1792_v23  ;;  %v5620_v48 = vor.u32 %v6577_v13, %v5619_v31  ;;  %v5627_v41 = vld [vmem:[%s10215_s3 + $0x50] sm:$0xf]  ;;  %2637 = vmatpush.bf16.msrb.mxu0 %v5739_v22  ;;  %v6613_v52 = vld [vmem:[%s10216_s4 + $0xfc] sm:$0xf0]  ;;  %v6612_v23 = vld [vmem:[%s10216_s4 + $0xfc] sm:$0xf] }
 0x38a   :  { %v8136_v1 = vor.u32 %v6579_v16, %v5627_v41  ;;  %v5702_v13 = vld [vmem:[%s10216_s4 + $0xd8] sm:$0xf]  ;;  %v6608_v41 = vld [vmem:[%s10216_s4 + $0xdc] sm:$0xf] }
 0x38b   :  { %v1925_v28 = vmax.f32 %v1861_v51, 0.0  ;;  %v1926_v60 = vmax.f32 %v1862_v12, 0.0  ;;  %2093 = vmatmul.bf16.gmra.mxu2 %v5620_v48  ;;  %v5719_v51 = vor.u32 %v6613_v52, %v5718_v40  ;;  %v5720_v12 = vld [vmem:[%s10216_s4 + $0x100] sm:$0xf0] }
 0x38d   :  { %v1971_v30 = vpack.c.bf16 %v1925_v28, %v1923_v59  ;;  %v1972_v32 = vpack.c.bf16 %v1926_v60, %v1924_v3  ;;  %2638 = vmatpush.bf16.msrb.mxu0 %v5731_v0  ;;  %v5723_v59 = vor.u32 %v6612_v23, %v5720_v12  ;;  %v5710_v3 = vld [vmem:[%s10216_s4 + $0xe8] sm:$0xf]  ;;  %v6611_v28 = vld [vmem:[%s10216_s4 + $0xec] sm:$0xf0]  ;;  %v6610_v60 = vld [vmem:[%s10216_s4 + $0xec] sm:$0xf] }
 0x38f   :  { %v2060_v21 = vsel %vm1451_vm4, %v1971_v30, 0  ;;  %v2063_v2 = vsel %vm1451_vm4, %v1972_v32, 0  ;;  %v5711_v32 = vor.u32 %v6611_v28, %v5710_v3 }
 0x390   :  { %2109 = vmatpush.bf16.msra.mxu3 %v2060_v21  ;;  %v5712_v21 = vld [vmem:[%s10216_s4 + $0xf0] sm:$0xf0] }
 0x391   :  { %2639 = vmatpush.bf16.msrb.mxu0 %v5723_v59  ;;  %v5715_v31 = vor.u32 %v6610_v60, %v5712_v21 }
 0x394   :  { %2110 = vmatpush.bf16.msra.mxu3 %v1969_v6  ;;  %v6578_v6 = vld [vmem:[%s10215_s3 + $0x54] sm:$0xf] }
 0x395   :  { %2640 = vmatpush.bf16.msrb.mxu0 %v5715_v31 }
 0x398   :  { %2111 = vmatpush.bf16.msra.mxu3 %v8082_v37 }
 0x39b   :  { %2098 = vmatmul.bf16.gmra.mxu2 %v8136_v1 }
 0x39c   :  { %2112 = vmatpush.bf16.msra.mxu3 %v8061_v53  ;;  %v5589_v53 = vld [vmem:[%s10215_s3 + $0x8] sm:$0xf0] }
 0x3a0   :  { %2113 = vmatpush.bf16.msra.mxu3 %v8040_v34  ;;  %v6568_v34 = vld [vmem:[%s10215_s3 + $0x4] sm:$0xf] }
 0x3a1   :  { %v8147_v37 = vor.u32 %v6568_v34, %v5589_v53  ;;  %v5694_v34 = vld [vmem:[%s10216_s4 + $0xc8] sm:$0xf]  ;;  %v6607_v53 = vld [vmem:[%s10216_s4 + $0xcc] sm:$0xf0] }
 0x3a4   :  { %2114 = vmatpush.bf16.msra.mxu3 %v8023_v14  ;;  %v6581_v14 = vld [vmem:[%s10215_s3 + $0x64] sm:$0xf0] }
 0x3a8   :  { %2115 = vmatpush.bf16.msra.mxu3 %v8005_v4  ;;  %v5635_v4 = vld [vmem:[%s10215_s3 + $0x60] sm:$0xf] }
 0x3a9   :  { %v8159_v35 = vor.u32 %v6581_v14, %v5635_v4  ;;  %v5696_v4 = vld [vmem:[%s10216_s4 + $0xd0] sm:$0xf0]  ;;  %v5695_v14 = vor.u32 %v6607_v53, %v5694_v34 }
 0x3ab   :  { %2103 = vmatmul.bf16.gmra.mxu2 %v8159_v35 }
 0x3ac   :  { %2116 = vmatpush.bf16.msra.mxu3 %v7987_v33  ;;  %v6570_v33 = vld [vmem:[%s10215_s3 + $0x14] sm:$0xf] }
 0x3ad   :  { %v8170_v19 = vor.u32 %v6570_v33, %v5597_v54 }
 0x3af   :  { %5641 = vmatmul.msk.bf16.vlgmr.msra.gmra.mxu3 %vm2036_vm5, %v8147_v37 }
 0x3b0   :  { %2197 = vmatpush.bf16.msrb.mxu3 %v2063_v2  ;;  %v6606_v2 = vld [vmem:[%s10216_s4 + $0xcc] sm:$0xf] }
 0x3b1   :  { %v5699_v33 = vor.u32 %v6606_v2, %v5696_v4 }
 0x3b4   :  { %2198 = vmatpush.bf16.msrb.mxu3 %v1970_v56  ;;  %v5629_v56 = vld [vmem:[%s10215_s3 + $0x58] sm:$0xf0] }
 0x3b5   :  { %v8228_v63 = vor.u32 %v6578_v6, %v5629_v56  ;;  %v6603_v6 = vld [vmem:[%s10216_s4 + $0xac] sm:$0xf0]  ;;  %v6602_v56 = vld [vmem:[%s10216_s4 + $0xac] sm:$0xf] }
 0x3b6   :  { %v5679_v61 = vor.u32 %v6603_v6, %v5678_v24 }
 0x3b8   :  { %2199 = vmatpush.bf16.msrb.mxu3 %v8084_v11  ;;  %v6572_v11 = vld [vmem:[%s10215_s3 + $0x24] sm:$0xf] }
 0x3bb   :  { %2161 = vmatmul.bf16.vlgmr.msrb.gmra.mxu2 %v8052_v42  ;;  %v5613_v42 = vld [vmem:[%s10215_s3 + $0x38] sm:$0xf0] }
 0x3bc   :  { %2200 = vmatpush.bf16.msrb.mxu3 %v8063_v36  ;;  %v5605_v36 = vld [vmem:[%s10215_s3 + $0x28] sm:$0xf0] }
 0x3bf   :  { %5642 = vmatmul.msk.bf16.gmra.mxu3 %vm2036_vm5, %v8170_v19 }
 0x3c0   :  { %2201 = vmatpush.bf16.msrb.mxu3 %v8042_v10  ;;  %v8185_v10 = vor.u32 %v6572_v11, %v5605_v36  ;;  %v6605_v11 = vld [vmem:[%s10216_s4 + $0xbc] sm:$0xf0]  ;;  %v6604_v36 = vld [vmem:[%s10216_s4 + $0xbc] sm:$0xf] }
 0x3c4   :  { %2202 = vmatpush.bf16.msrb.mxu3 %v8025_v58  ;;  %v8190_v58 = vpop.f32.mrf.mxu2 }
 0x3c8   :  { %2203 = vmatpush.bf16.msrb.mxu3 %v8007_v27  ;;  %v6574_v27 = vld [vmem:[%s10215_s3 + $0x34] sm:$0xf] }
 0x3c9   :  { %v8198_v62 = vor.u32 %v6574_v27, %v5613_v42  ;;  %v5688_v42 = vld [vmem:[%s10216_s4 + $0xc0] sm:$0xf0] }
 0x3ca   :  { %v5691_v18 = vor.u32 %v6604_v36, %v5688_v42 }
 0x3cb   :  { %2166 = vmatmul.bf16.gmra.mxu2 %v8073_v46 }
 0x3cc   :  { %2204 = vmatpush.bf16.msrb.mxu3 %v7989_v44  ;;  %v8202_v44 = vpop.f32.mrf.mxu2 }
 0x3cf   :  { %5643 = vmatmul.msk.bf16.gmra.mxu3 %vm2036_vm5, %v8185_v10 }
 0x3d4   :  { %v8205_v46 = vpop.f32.mrf.mxu2 }
 0x3db   :  { %2171 = vmatmul.bf16.gmra.mxu2 %v8094_v50 }
 0x3dc   :  { %v8217_v43 = vpop.f32.mrf.mxu2 }
 0x3df   :  { %5644 = vmatmul.msk.bf16.gmra.mxu3 %vm2036_vm5, %v8198_v62 }
 0x3e4   :  { %v8220_v50 = vpop.f32.mrf.mxu2 }
 0x3eb   :  { %2176 = vmatmul.bf16.gmra.mxu2 %v8111_v38  ;;  %v6617_v38 = vld [vmem:[%s10216_s4 + $0x11c] sm:$0xf0] }
 0x3ec   :  { %v8232_v55 = vpop.f32.mrf.mxu2  ;;  %v5735_v45 = vor.u32 %v6617_v38, %v5734_v8  ;;  %v5680_v8 = vld [vmem:[%s10216_s4 + $0xb0] sm:$0xf0] }
 0x3ed   :  { %v5683_v38 = vor.u32 %v6602_v56, %v5680_v8 }
 0x3ee   :  { %2549 = vmatpush.bf16.msra.mxu2 %v5735_v45 }
 0x3ef   :  { %5645 = vmatmul.msk.bf16.gmra.mxu3 %vm2036_vm5, %v8213_v57 }
 0x3f2   :  { %2550 = vmatpush.bf16.msra.mxu2 %v5727_v17 }
 0x3f4   :  { %v8234_v49 = vpop.f32.mrf.mxu2 }
 0x3f6   :  { %2551 = vmatpush.bf16.msra.mxu2 %v5719_v51 }
 0x3fa   :  { %2552 = vmatpush.bf16.msra.mxu2 %v5711_v32 }
 0x3fb   :  { %2181 = vmatmul.bf16.gmra.mxu2 %v5620_v48  ;;  %v6609_v48 = vld [vmem:[%s10216_s4 + $0xdc] sm:$0xf0] }
 0x3fc   :  { %v8246_v5 = vpop.f32.mrf.mxu2  ;;  %v5703_v16 = vor.u32 %v6609_v48, %v5702_v13 }
 0x3fe   :  { %2553 = vmatpush.bf16.msra.mxu2 %v5703_v16 }
 0x3ff   :  { %5646 = vmatmul.msk.bf16.gmra.mxu3 %vm2036_vm5, %v8228_v63 }
 0x402   :  { %2554 = vmatpush.bf16.msra.mxu2 %v5695_v14 }
 0x40b   :  { %2186 = vmatmul.bf16.gmra.mxu2 %v8136_v1  ;;  %v5704_v1 = vld [vmem:[%s10216_s4 + $0xe0] sm:$0xf0] }
 0x40e   :  { %v8273_v39 = vpop.f32.mrf.mxu2 }
 0x40f   :  { %5647 = vmatmul.msk.bf16.gmra.mxu3 %vm2036_vm5, %v8242_v47 }
 0x416   :  { %v8298_v30 = vpop.f32.mrf.mxu2 }
 0x41b   :  { %2191 = vmatmul.bf16.gmra.mxu2 %v8159_v35  ;;  %v5686_v35 = vld [vmem:[%s10216_s4 + $0xb8] sm:$0xf] }
 0x41c   :  { %v5687_v27 = vor.u32 %v6605_v11, %v5686_v35 }
 0x41e   :  { %v8328_v54 = vpop.f32.mrf.mxu2  ;;  %2555 = vmatpush.bf16.msra.mxu2 %v5687_v27 }
 0x41f   :  { %5648 = vmatmul.msk.bf16.vlgmr.msrb.gmra.mxu3 %vm2036_vm5, %v8147_v37  ;;  %v5707_v37 = vor.u32 %v6608_v41, %v5704_v1 }
 0x421   :  { %2641 = vmatpush.bf16.msrb.mxu0 %v5707_v37 }
 0x422   :  { %2556 = vmatpush.bf16.msra.mxu2 %v5679_v61 }
 0x425   :  { %2642 = vmatpush.bf16.msrb.mxu0 %v5699_v33 }
 0x426   :  { %v8353_v9 = vpop.f32.mrf.mxu2 }
 0x429   :  { %2643 = vmatpush.bf16.msrb.mxu0 %v5691_v18 }
 0x42d   :  { %2644 = vmatpush.bf16.msrb.mxu0 %v5683_v38 }
 0x42e   :  { %v8358_v45 = vpop.f32.mrf.mxu2 }
 0x42f   :  { %5649 = vmatmul.msk.bf16.gmra.mxu3 %vm2036_vm5, %v8170_v19 }
 0x432   :  { %v2118_v15 = vpop.f32.mrf.mxu3 }
 0x433   :  { %v2119_v29 = vadd.f32 %v2118_v15, %v8190_v58 }
 0x436   :  { %v8368_v26 = vpop.f32.mrf.mxu2 }
 0x43a   :  { %v2120_v20 = vpop.f32.mrf.mxu3 }
 0x43b   :  { %v2121_v7 = vadd.f32 %v2120_v20, %v8202_v44 }
 0x43d   :  { %v8362_v22 = vpack.c.bf16 %v2121_v7, %v2119_v29 }
 0x43e   :  { %v8372_v51 = vpop.f32.mrf.mxu2 }
 0x43f   :  { %5650 = vmatmul.msk.bf16.gmra.mxu3 %vm2036_vm5, %v8185_v10  ;;  %v2299_v19 = vshrl.u32 %v8362_v22, 16  ;;  %v2301_v25 = vshll.u32 %v8362_v22, 16 }
 0x441   :  { %v3453_v17 = vrot.slane %v2299_v19, 1  ;;  %v3454_v0 = vrot.slane %v2301_v25, 2  ;;  %v2303_v10 = vrot.slane %v2301_v25, 1 }
 0x442   :  { %v2123_v40 = vpop.f32.mrf.mxu3 }
 0x443   :  { %v3455_v52 = vor.u32 %v3454_v0, %v3453_v17  ;;  %v2124_v58 = vadd.f32 %v2123_v40, %v8205_v46  ;;  %v2304_v28 = vor.u32 %v2303_v10, %v2299_v19 }
 0x446   :  { %v8381_v13 = vpop.f32.mrf.mxu2 }
 0x44a   :  { %v2125_v23 = vpop.f32.mrf.mxu3 }
 0x44b   :  { %v2126_v44 = vadd.f32 %v2125_v23, %v8217_v43 }
 0x44d   :  { %v8374_v12 = vpack.c.bf16 %v2126_v44, %v2124_v58 }
 0x44e   :  { %v8394_v37 = vpop.f32.mrf.mxu2 }
 0x44f   :  { %5651 = vmatmul.msk.bf16.gmra.mxu3 %vm2036_vm5, %v8198_v62  ;;  %v2306_v59 = vshll.u32 %v8374_v12, 16  ;;  %v2322_v3 = vshrl.u32 %v8374_v12, 16 }
 0x451   :  { %v2308_v60 = vrot.slane %v2306_v59, 1  ;;  %v3456_v32 = vrot.slane %v2322_v3, 1  ;;  %v3457_v21 = vrot.slane %v2306_v59, 2 }
 0x452   :  { %v2128_v31 = vpop.f32.mrf.mxu3 }
 0x453   :  { %v2309_v46 = vsel %vm99_vm1, %v2304_v28, %v2308_v60  ;;  %v3458_v43 = vor.u32 %v3457_v21, %v3456_v32  ;;  %v2129_v41 = vadd.f32 %v2128_v31, %v8220_v50  ;;  %v2324_v2 = vor.u32 %v2322_v3, %v2308_v60  ;;  %v5830_v28 = vld [vmem:[%s10216_s4 + $0x78] sm:$0xf0]  ;;  %v5820_v32 = vld [vmem:[%s10216_s4 + $0x60] sm:$0xf]  ;;  %v6595_v21 = vld [vmem:[%s10216_s4 + $0x64] sm:$0xf0] }
 0x454   :  { %2557 = vmatmul.bf16.vlgmr.msra.gmra.mxu2 %v2309_v46  ;;  %2645 = vmatmul.bf16.vlgmr.msrb.gmra.mxu0 %v2309_v46  ;;  %v6594_v31 = vld [vmem:[%s10216_s4 + $0x64] sm:$0xf] }
 0x455   :  { %v8384_v48 = vsel %vm1072_vm2, %v3455_v52, %v3458_v43 }
 0x45a   :  { %v2130_v62 = vpop.f32.mrf.mxu3 }
 0x45b   :  { %v2131_v16 = vadd.f32 %v2130_v62, %v8232_v55  ;;  %v5822_v62 = vld [vmem:[%s10216_s4 + $0x68] sm:$0xf0] }
 0x45d   :  { %v8388_v1 = vpack.c.bf16 %v2131_v16, %v2129_v41  ;;  %v5825_v41 = vor.u32 %v6594_v31, %v5822_v62  ;;  %v5790_v31 = vld [vmem:[%s10216_s4 + $0x28] sm:$0xf0] }
 0x45f   :  { %10462 = vst [vmem:[#allocation33_spill] sm:$0xff] %v8388_v1  ;;  %5652 = vmatmul.msk.bf16.gmra.mxu3 %vm2036_vm5, %v8213_v57  ;;  %v2326_v34 = vshll.u32 %v8388_v1, 16  ;;  %v2338_v53 = vshrl.u32 %v8388_v1, 16  ;;  %v8400_v57 = vpop.f32.mrf.mxu2 }
 0x461   :  { %v2328_v4 = vrot.slane %v2326_v34, 1  ;;  %v3467_v14 = vrot.slane %v2338_v53, 1  ;;  %v3468_v33 = vrot.slane %v2326_v34, 2 }
 0x462   :  { %v2133_v35 = vpop.f32.mrf.mxu3 }
 0x463   :  { %v2329_v50 = vsel %vm99_vm1, %v2324_v2, %v2328_v4  ;;  %v3469_v11 = vor.u32 %v3468_v33, %v3467_v14  ;;  %v2134_v27 = vadd.f32 %v2133_v35, %v8234_v49  ;;  %v2340_v56 = vor.u32 %v2338_v53, %v2328_v4  ;;  %v5812_v2 = vld [vmem:[%s10216_s4 + $0x50] sm:$0xf]  ;;  %v6593_v4 = vld [vmem:[%s10216_s4 + $0x54] sm:$0xf0]  ;;  %v6592_v14 = vld [vmem:[%s10216_s4 + $0x54] sm:$0xf] }
 0x464   :  { %2562 = vmatmul.bf16.gmra.mxu2 %v2329_v50  ;;  %2650 = vmatmul.bf16.gmra.mxu0 %v2329_v50  ;;  %v5813_v50 = vor.u32 %v6593_v4, %v5812_v2  ;;  %v5750_v4 = vld [vmem:[%s10216_s4 + $0x138] sm:$0xf] }
 0x465   :  { %v8398_v55 = vsel %vm1072_vm2, %v3458_v43, %v3469_v11  ;;  %v5821_v43 = vor.u32 %v6595_v21, %v5820_v32 }
 0x467   :  { %v8411_v29 = vpop.f32.mrf.mxu2 }
 0x46a   :  { %v2135_v36 = vpop.f32.mrf.mxu3 }
 0x46b   :  { %v2136_v42 = vadd.f32 %v2135_v36, %v8246_v5 }
 0x46d   :  { %v8404_v18 = vpack.c.bf16 %v2136_v42, %v2134_v27  ;;  %v5675_v42 = vld [vmem:[%s10216_s4 + $0x148] sm:$0xff] }
 0x46f   :  { %5653 = vmatmul.msk.bf16.gmra.mxu3 %vm2036_vm5, %v8228_v63  ;;  %v2342_v24 = vshll.u32 %v8404_v18, 16  ;;  %v2354_v6 = vshrl.u32 %v8404_v18, 16  ;;  %v8420_v17 = vpop.f32.mrf.mxu2 }
 0x471   :  { %v2344_v61 = vrot.slane %v2342_v24, 1  ;;  %v3475_v8 = vrot.slane %v2354_v6, 1  ;;  %v3476_v38 = vrot.slane %v2342_v24, 2  ;;  %v5804_v24 = vld [vmem:[%s10216_s4 + $0x40] sm:$0xf] }
 0x472   :  { %v2138_v15 = vpop.f32.mrf.mxu3 }
 0x473   :  { %v2345_v20 = vsel %vm99_vm1, %v2340_v56, %v2344_v61  ;;  %v3477_v49 = vor.u32 %v3476_v38, %v3475_v8  ;;  %v2139_v7 = vadd.f32 %v2138_v15, %v8273_v39  ;;  %v2356_v52 = vor.u32 %v2354_v6, %v2344_v61  ;;  %v5828_v39 = vld [vmem:[%s10216_s4 + $0x70] sm:$0xf]  ;;  %v6590_v56 = vld [vmem:[%s10216_s4 + $0x44] sm:$0xf]  ;;  %v5806_v61 = vld [vmem:[%s10216_s4 + $0x48] sm:$0xf0] }
 0x474   :  { %2567 = vmatmul.bf16.gmra.mxu2 %v2345_v20  ;;  %2655 = vmatmul.bf16.gmra.mxu0 %v2345_v20  ;;  %v5809_v15 = vor.u32 %v6590_v56, %v5806_v61  ;;  %v5742_v61 = vld [vmem:[%s10216_s4 + $0x128] sm:$0xf] }
 0x475   :  { %v8414_v5 = vsel %vm1072_vm2, %v3469_v11, %v3477_v49  ;;  %v5814_v11 = vld [vmem:[%s10216_s4 + $0x58] sm:$0xf0] }
 0x476   :  { %v5817_v36 = vor.u32 %v6592_v14, %v5814_v11  ;;  %v6621_v14 = vld [vmem:[%s10216_s4 + $0x13c] sm:$0xf0] }
 0x477   :  { %v8457_v34 = vpop.f32.mrf.mxu2  ;;  %v5751_v11 = vor.u32 %v6621_v14, %v5750_v4 }
 0x47a   :  { %v2140_v63 = vpop.f32.mrf.mxu3 }
 0x47b   :  { %v2141_v19 = vadd.f32 %v2140_v63, %v8298_v30  ;;  %v6597_v30 = vld [vmem:[%s10216_s4 + $0x74] sm:$0xf0] }
 0x47c   :  { %v5829_v3 = vor.u32 %v6597_v30, %v5828_v39  ;;  %v6588_v39 = vld [vmem:[%s10216_s4 + $0x34] sm:$0xf]  ;;  %v5798_v30 = vld [vmem:[%s10216_s4 + $0x38] sm:$0xf0] }
 0x47d   :  { %v8418_v25 = vpack.c.bf16 %v2141_v19, %v2139_v7 }
 0x47e   :  { %2850 = vmatpush.bf16.msrb.mxu2 %v5829_v3  ;;  %v5788_v3 = vld [vmem:[%s10216_s4 + $0x20] sm:$0xf] }
 0x47f   :  { %10463 = vst [vmem:[#allocation34_spill] sm:$0xff] %v8418_v25  ;;  %5654 = vmatmul.msk.bf16.gmra.mxu3 %vm2036_vm5, %v8242_v47  ;;  %v2358_v0 = vshll.u32 %v8418_v25, 16  ;;  %v2370_v40 = vshrl.u32 %v8418_v25, 16  ;;  %v6596_v47 = vld [vmem:[%s10216_s4 + $0x74] sm:$0xf]  ;;  %v8494_v7 = vpop.f32.mrf.mxu2 }
 0x480   :  { %v5833_v60 = vor.u32 %v6596_v47, %v5830_v28  ;;  %v5801_v47 = vor.u32 %v6588_v39, %v5798_v30  ;;  %v6587_v28 = vld [vmem:[%s10216_s4 + $0x24] sm:$0xf0] }
 0x481   :  { %v2360_v23 = vrot.slane %v2358_v0, 1  ;;  %v3483_v58 = vrot.slane %v2370_v40, 1  ;;  %v3484_v44 = vrot.slane %v2358_v0, 2  ;;  %v5789_v21 = vor.u32 %v6587_v28, %v5788_v3 }
 0x482   :  { %v2143_v10 = vpop.f32.mrf.mxu3  ;;  %2938 = vmatpush.bf16.msra.mxu0 %v5833_v60  ;;  %2851 = vmatpush.bf16.msrb.mxu2 %v5821_v43  ;;  %v6586_v60 = vld [vmem:[%s10216_s4 + $0x24] sm:$0xf] }
 0x483   :  { %v2361_v59 = vsel %vm99_vm1, %v2356_v52, %v2360_v23  ;;  %v8448_v46 = vor.u32 %v3484_v44, %v3483_v58  ;;  %v2144_v33 = vadd.f32 %v2143_v10, %v8328_v54  ;;  %v6591_v54 = vld [vmem:[%s10216_s4 + $0x44] sm:$0xf0]  ;;  %v5796_v44 = vld [vmem:[%s10216_s4 + $0x30] sm:$0xf]  ;;  %v5793_v62 = vor.u32 %v6586_v60, %v5790_v31 }
 0x484   :  { %2572 = vmatmul.bf16.gmra.mxu2 %v2361_v59  ;;  %2660 = vmatmul.bf16.gmra.mxu0 %v2361_v59  ;;  %v5805_v6 = vor.u32 %v6591_v54, %v5804_v24  ;;  %v2476_v59 = vunpack.c.l.b16 %v5675_v42  ;;  %v6585_v24 = vld [vmem:[%s10216_s4 + $0x14] sm:$0xf0] }
 0x485   :  { %v8455_v16 = vsel %vm1072_vm2, %v3477_v49, %v8448_v46  ;;  %v2372_v49 = vor.u32 %v2370_v40, %v2360_v23  ;;  %v6589_v40 = vld [vmem:[%s10216_s4 + $0x34] sm:$0xf0] }
 0x486   :  { %2939 = vmatpush.bf16.msra.mxu0 %v5825_v41  ;;  %2852 = vmatpush.bf16.msrb.mxu2 %v5813_v50  ;;  %v5797_v10 = vor.u32 %v6589_v40, %v5796_v44  ;;  %v2498_v43 = vpack.c.b16 %v2476_v59, %v2476_v59 }
 0x487   :  { %v8541_v50 = vpop.f32.mrf.mxu2 }
 0x48a   :  { %v2145_v53 = vpop.f32.mrf.mxu3  ;;  %2940 = vmatpush.bf16.msra.mxu0 %v5817_v36  ;;  %2853 = vmatpush.bf16.msrb.mxu2 %v5805_v6  ;;  %v5752_v36 = vld [vmem:[%s10216_s4 + $0x140] sm:$0xf0] }
 0x48b   :  { %v2146_v35 = vadd.f32 %v2145_v53, %v8353_v9  ;;  %v2477_v9 = vunpack.c.h.b16 %v5675_v42  ;;  %v2544_v53 = vsel %vm2542_vm6, %v2498_v43, 0  ;;  %v5780_v42 = vld [vmem:[%s10216_s4 + $0x10] sm:$0xf] }
 0x48c   :  { %2598 = vmatpush.bf16.msra.mxu3 %v2544_v53 }
 0x48d   :  { %v8473_v27 = vpack.c.bf16 %v2146_v35, %v2144_v33  ;;  %v2499_v20 = vpack.c.b16 %v2477_v9, %v2477_v9  ;;  %v6620_v33 = vld [vmem:[%s10216_s4 + $0x13c] sm:$0xf]  ;;  %v5781_v9 = vor.u32 %v6585_v24, %v5780_v42 }
 0x48e   :  { %2941 = vmatpush.bf16.msra.mxu0 %v5809_v15  ;;  %2854 = vmatpush.bf16.msrb.mxu2 %v5797_v10  ;;  %v5755_v54 = vor.u32 %v6620_v33, %v5752_v36  ;;  %v6618_v15 = vld [vmem:[%s10216_s4 + $0x12c] sm:$0xf] }
 0x48f   :  { %v2374_v8 = vshll.u32 %v8473_v27, 16  ;;  %v2386_v38 = vshrl.u32 %v8473_v27, 16  ;;  %v2547_v58 = vsel %vm2542_vm6, %v2499_v20, 0  ;;  %v5774_v10 = vld [vmem:[%s10216_s4 + $0x8] sm:$0xf0]  ;;  %v8592_v31 = vpop.f32.mrf.mxu2 }
 0x490   :  { %2686 = vmatpush.bf16.msrb.mxu1 %v2547_v58  ;;  %2599 = vmatpush.bf16.msra.mxu3 %v5751_v11 }
 0x491   :  { %v8492_v63 = vrot.slane %v2374_v8, 1  ;;  %v3491_v19 = vrot.slane %v2386_v38, 1  ;;  %v3492_v0 = vrot.slane %v2374_v8, 2  ;;  %v6619_v8 = vld [vmem:[%s10216_s4 + $0x12c] sm:$0xf0] }
 0x492   :  { %v2148_v52 = vpop.f32.mrf.mxu3  ;;  %2942 = vmatpush.bf16.msra.mxu0 %v5801_v47  ;;  %2855 = vmatpush.bf16.msrb.mxu2 %v5789_v21  ;;  %v5743_v20 = vor.u32 %v6619_v8, %v5742_v61 }
 0x493   :  { %v2377_v23 = vsel %vm99_vm1, %v2372_v49, %v8492_v63  ;;  %v3493_v32 = vor.u32 %v3492_v0, %v3491_v19  ;;  %v5744_v49 = vld [vmem:[%s10216_s4 + $0x130] sm:$0xf0]  ;;  %v5772_v19 = vld [vmem:[%s10216_s4] sm:$0xf]  ;;  %v6583_v0 = vld [vmem:[%s10216_s4 + $0x4] sm:$0xf0]  ;;  %v2388_v30 = vor.u32 %v2386_v38, %v8492_v63 }
 0x494   :  { %2577 = vmatmul.bf16.gmra.mxu2 %v2377_v23  ;;  %2665 = vmatmul.bf16.gmra.mxu0 %v2377_v23  ;;  %v5747_v44 = vor.u32 %v6618_v15, %v5744_v49  ;;  %v5773_v40 = vor.u32 %v6583_v0, %v5772_v19  ;;  %v6582_v23 = vld [vmem:[%s10216_s4 + $0x4] sm:$0xf] }
 0x495   :  { %v8527_v41 = vsel %vm1072_vm2, %v8448_v46, %v3493_v32  ;;  %v2149_v46 = vadd.f32 %v2148_v52, %v8358_v45  ;;  %v6584_v45 = vld [vmem:[%s10216_s4 + $0x14] sm:$0xf]  ;;  %2687 = vmatpush.bf16.msrb.mxu1 %v5755_v54  ;;  %v5777_v39 = vor.u32 %v6582_v23, %v5774_v10  ;;  %2600 = vmatpush.bf16.msra.mxu3 %v5743_v20 }
 0x496   :  { %2943 = vmatpush.bf16.msra.mxu0 %v5793_v62  ;;  %2856 = vmatpush.bf16.msrb.mxu2 %v5781_v9 }
 0x499   :  { %2688 = vmatpush.bf16.msrb.mxu1 %v5747_v44 }
 0x49a   :  { %v2150_v2 = vpop.f32.mrf.mxu3  ;;  %2857 = vmatpush.bf16.msrb.mxu2 %v5773_v40 }
 0x49b   :  { %v2151_v35 = vadd.f32 %v2150_v2, %v8368_v26  ;;  %v5782_v26 = vld [vmem:[%s10216_s4 + $0x18] sm:$0xf0]  ;;  %v8602_v2 = vpop.f32.mrf.mxu2 }
 0x49c   :  { %v5785_v56 = vor.u32 %v6584_v45, %v5782_v26 }
 0x49d   :  { %v8558_v6 = vpack.c.bf16 %v2151_v35, %v2149_v46 }
 0x49e   :  { %2944 = vmatpush.bf16.msra.mxu0 %v5785_v56 }
 0x49f   :  { %v2390_v52 = vshll.u32 %v8558_v6, 16  ;;  %v2402_v58 = vshrl.u32 %v8558_v6, 16 }
 0x4a1   :  { %v2392_v47 = vrot.slane %v2390_v52, 1  ;;  %v3499_v59 = vrot.slane %v2402_v58, 1  ;;  %v3500_v3 = vrot.slane %v2390_v52, 2 }
 0x4a2   :  { %v2206_v28 = vpop.f32.mrf.mxu3  ;;  %2945 = vmatpush.bf16.msra.mxu0 %v5777_v39 }
 0x4a3   :  { %v2393_v60 = vsel %vm99_vm1, %v2388_v30, %v2392_v47  ;;  %v8590_v21 = vor.u32 %v3500_v3, %v3499_v59  ;;  %v2207_v63 = vadd.f32 %v2206_v28, %v8372_v51  ;;  %v2404_v11 = vor.u32 %v2402_v58, %v2392_v47 }
 0x4a4   :  { %2582 = vmatmul.bf16.gmra.mxu2 %v2393_v60  ;;  %2670 = vmatmul.bf16.gmra.mxu0 %v2393_v60 }
 0x4a5   :  { %v8596_v43 = vsel %vm1072_vm2, %v3493_v32, %v8590_v21  ;;  %v8606_v32 = vpop.f32.mrf.mxu2 }
 0x4aa   :  { %v2208_v38 = vpop.f32.mrf.mxu3 }
 0x4ab   :  { %v2209_v62 = vadd.f32 %v2208_v38, %v8381_v13 }
 0x4ad   :  { %v8600_v53 = vpack.c.bf16 %v2209_v62, %v2207_v63  ;;  %v8615_v49 = vpop.f32.mrf.mxu2 }
 0x4af   :  { %v2311_v4 = vshrl.u32 %v8600_v53, 16  ;;  %v2313_v14 = vshll.u32 %v8600_v53, 16 }
 0x4b1   :  { %v3460_v33 = vrot.slane %v2311_v4, 1  ;;  %v3461_v46 = vrot.slane %v2313_v14, 2  ;;  %v2315_v54 = vrot.slane %v2313_v14, 1 }
 0x4b2   :  { %v2211_v35 = vpop.f32.mrf.mxu3 }
 0x4b3   :  { %v3462_v36 = vor.u32 %v3461_v46, %v3460_v33  ;;  %v2212_v13 = vadd.f32 %v2211_v35, %v8394_v37  ;;  %v2316_v26 = vor.u32 %v2315_v54, %v2311_v4 }
 0x4b4   :  { %2587 = vmatmul.bf16.gmra.mxu2 %v2404_v11  ;;  %2675 = vmatmul.bf16.gmra.mxu0 %v2404_v11 }
 0x4b5   :  { %v8628_v44 = vpop.f32.mrf.mxu2 }
 0x4ba   :  { %v2213_v51 = vpop.f32.mrf.mxu3 }
 0x4bb   :  { %v2214_v42 = vadd.f32 %v2213_v51, %v8400_v57 }
 0x4bd   :  { %v8610_v24 = vpack.c.bf16 %v2214_v42, %v2212_v13 }
 0x4bf   :  { %v2318_v9 = vshll.u32 %v8610_v24, 16  ;;  %v2330_v45 = vshrl.u32 %v8610_v24, 16 }
 0x4c1   :  { %v2320_v56 = vrot.slane %v2318_v9, 1  ;;  %v3463_v61 = vrot.slane %v2330_v45, 1  ;;  %v3464_v8 = vrot.slane %v2318_v9, 2 }
 0x4c2   :  { %v2216_v15 = vpop.f32.mrf.mxu3 }
 0x4c3   :  { %v2321_v20 = vsel %vm99_vm1, %v2316_v26, %v2320_v56  ;;  %v3465_v37 = vor.u32 %v3464_v8, %v3463_v61  ;;  %v2217_v0 = vadd.f32 %v2216_v15, %v8411_v29  ;;  %v2332_v39 = vor.u32 %v2330_v45, %v2320_v56 }
 0x4c4   :  { %5756 = vmatmul.msk.bf16.vlgmr.msra.gmra.mxu3 %vm2520_vm7, %v2321_v20  ;;  %5763 = vmatmul.msk.bf16.vlgmr.msrb.gmra.mxu1 %vm2520_vm7, %v2321_v20 }
 0x4c5   :  { %2858 = vmatmul.bf16.vlgmr.msrb.gmra.mxu2 %v8362_v22  ;;  %2946 = vmatmul.bf16.vlgmr.msra.gmra.mxu0 %v8362_v22  ;;  %v8622_v57 = vsel %vm1072_vm2, %v3462_v36, %v3465_v37 }
 0x4c6   :  { %10464 = vst [vmem:[#allocation35_spill] sm:$0xff] %v8622_v57 }
 0x4ca   :  { %v2218_v19 = vpop.f32.mrf.mxu3 }
 0x4cb   :  { %v2219_v52 = vadd.f32 %v2218_v19, %v8420_v17 }
 0x4cd   :  { %v8626_v58 = vpack.c.bf16 %v2219_v52, %v2217_v0 }
 0x4cf   :  { %v2334_v40 = vshll.u32 %v8626_v58, 16  ;;  %v2346_v23 = vshrl.u32 %v8626_v58, 16 }
 0x4d1   :  { %v8632_v10 = vpop.f32.mrf.mxu0  ;;  %v2336_v30 = vrot.slane %v2334_v40, 1  ;;  %v3471_v47 = vrot.slane %v2346_v23, 1  ;;  %v3472_v59 = vrot.slane %v2334_v40, 2 }
 0x4d2   :  { %v2221_v3 = vpop.f32.mrf.mxu3 }
 0x4d3   :  { %v2337_v28 = vsel %vm99_vm1, %v2332_v39, %v2336_v30  ;;  %v3473_v29 = vor.u32 %v3472_v59, %v3471_v47  ;;  %v2222_v62 = vadd.f32 %v2221_v3, %v8457_v34  ;;  %v2348_v36 = vor.u32 %v2346_v23, %v2336_v30  ;;  %v6636_v59 = vld [vmem:[%s10216_s4 + $0x1c4] sm:$0xf] }
 0x4d4   :  { %5757 = vmatmul.msk.bf16.gmra.mxu3 %vm2520_vm7, %v2337_v28  ;;  %5764 = vmatmul.msk.bf16.gmra.mxu1 %vm2520_vm7, %v2337_v28 }
 0x4d5   :  { %2863 = vmatmul.bf16.gmra.mxu2 %v8374_v12  ;;  %2951 = vmatmul.bf16.gmra.mxu0 %v8374_v12  ;;  %v8640_v17 = vsel %vm1072_vm2, %v3465_v37, %v3473_v29 }
 0x4d6   :  { %10465 = vst [vmem:[#allocation10_spill] sm:$0xff] %v8640_v17 }
 0x4d7   :  { %v8642_v60 = vpop.f32.mrf.mxu2 }
 0x4d9   :  { %v8644_v38 = vpop.f32.mrf.mxu0 }
 0x4da   :  { %v2223_v63 = vpop.f32.mrf.mxu3 }
 0x4db   :  { %v2224_v4 = vadd.f32 %v2223_v63, %v8494_v7 }
 0x4dd   :  { %v8648_v14 = vpack.c.bf16 %v2224_v4, %v2222_v62 }
 0x4df   :  { %10466 = vst [vmem:[#allocation11_spill] sm:$0xff] %v8648_v14  ;;  %v8650_v33 = vpop.f32.mrf.mxu2  ;;  %v2350_v46 = vshll.u32 %v8648_v14, 16  ;;  %v2362_v35 = vshrl.u32 %v8648_v14, 16 }
 0x4e1   :  { %v8654_v11 = vpop.f32.mrf.mxu0  ;;  %v2352_v51 = vrot.slane %v2350_v46, 1  ;;  %v3479_v13 = vrot.slane %v2362_v35, 1  ;;  %v3480_v42 = vrot.slane %v2350_v46, 2  ;;  %v5935_v46 = vld [vmem:[%s10216_s4 + $0x1b0] sm:$0xf] }
 0x4e2   :  { %v2226_v54 = vpop.f32.mrf.mxu3 }
 0x4e3   :  { %v2353_v9 = vsel %vm99_vm1, %v2348_v36, %v2352_v51  ;;  %v3481_v34 = vor.u32 %v3480_v42, %v3479_v13  ;;  %v2227_v61 = vadd.f32 %v2226_v54, %v8541_v50  ;;  %v2364_v52 = vor.u32 %v2362_v35, %v2352_v51  ;;  %v5943_v50 = vld [vmem:[%s10216_s4 + $0x1c0] sm:$0xf]  ;;  %v6635_v35 = vld [vmem:[%s10216_s4 + $0x1b4] sm:$0xf0]  ;;  %v6634_v36 = vld [vmem:[%s10216_s4 + $0x1b4] sm:$0xf] }
 0x4e4   :  { %5758 = vmatmul.msk.bf16.gmra.mxu3 %vm2520_vm7, %v2353_v9  ;;  %5765 = vmatmul.msk.bf16.gmra.mxu1 %vm2520_vm7, %v2353_v9  ;;  %v5936_v51 = vor.u32 %v6635_v35, %v5935_v46  ;;  %v5937_v13 = vld [vmem:[%s10216_s4 + $0x1b8] sm:$0xf0]  ;;  %v5927_v9 = vld [vmem:[%s10216_s4 + $0x1a0] sm:$0xf] }
 0x4e5   :  { %2868 = vmatmul.bf16.gmra.mxu2 %v8388_v1  ;;  %2956 = vmatmul.bf16.gmra.mxu0 %v8388_v1  ;;  %v8662_v7 = vsel %vm1072_vm2, %v3473_v29, %v3481_v34  ;;  %v5945_v29 = vld [vmem:[%s10216_s4 + $0x1c8] sm:$0xf0]  ;;  %v5940_v54 = vor.u32 %v6634_v36, %v5937_v13 }
 0x4e6   :  { %10467 = vst [vmem:[#allocation36_spill] sm:$0xff] %v8662_v7  ;;  %v5948_v63 = vor.u32 %v6636_v59, %v5945_v29  ;;  %v6630_v29 = vld [vmem:[%s10216_s4 + $0x194] sm:$0xf] }
 0x4e7   :  { %v8664_v45 = vpop.f32.mrf.mxu2 }
 0x4e8   :  { %3315 = vmatpush.bf16.msrb.mxu0 %v5948_v63  ;;  %v5921_v63 = vld [vmem:[%s10216_s4 + $0x198] sm:$0xf0] }
 0x4e9   :  { %v8666_v26 = vpop.f32.mrf.mxu0  ;;  %v5924_v36 = vor.u32 %v6630_v29, %v5921_v63  ;;  %v6627_v29 = vld [vmem:[%s10216_s4 + $0x174] sm:$0xf0]  ;;  %v6626_v63 = vld [vmem:[%s10216_s4 + $0x174] sm:$0xf] }
 0x4ea   :  { %v2228_v56 = vpop.f32.mrf.mxu3 }
 0x4eb   :  { %v2229_v8 = vadd.f32 %v2228_v56, %v8592_v31  ;;  %v6637_v31 = vld [vmem:[%s10216_s4 + $0x1c4] sm:$0xf0]  ;;  %v6632_v56 = vld [vmem:[%s10216_s4 + $0x1a4] sm:$0xf] }
 0x4ec   :  { %v5944_v28 = vor.u32 %v6637_v31, %v5943_v50  ;;  %3316 = vmatpush.bf16.msrb.mxu0 %v5940_v54 }
 0x4ed   :  { %v8670_v15 = vpack.c.bf16 %v2229_v8, %v2227_v61 }
 0x4ee   :  { %3227 = vmatpush.bf16.msra.mxu2 %v5944_v28  ;;  %v5919_v28 = vld [vmem:[%s10216_s4 + $0x190] sm:$0xf] }
 0x4ef   :  { %10468 = vst [vmem:[#allocation37_spill] sm:$0xff] %v8670_v15  ;;  %v8672_v20 = vpop.f32.mrf.mxu2  ;;  %v2366_v37 = vshll.u32 %v8670_v15, 16  ;;  %v2378_v19 = vshrl.u32 %v8670_v15, 16 }
 0x4f1   :  { %v8676_v0 = vpop.f32.mrf.mxu0  ;;  %v2368_v40 = vrot.slane %v2366_v37, 1  ;;  %v3487_v23 = vrot.slane %v2378_v19, 1  ;;  %v3488_v39 = vrot.slane %v2366_v37, 2  ;;  %v5929_v37 = vld [vmem:[%s10216_s4 + $0x1a8] sm:$0xf0] }
 0x4f2   :  { %v2231_v30 = vpop.f32.mrf.mxu3  ;;  %3228 = vmatpush.bf16.msra.mxu2 %v5936_v51 }
 0x4f3   :  { %v2369_v47 = vsel %vm99_vm1, %v2364_v52, %v2368_v40  ;;  %v8688_v3 = vor.u32 %v3488_v39, %v3487_v23  ;;  %v2232_v52 = vadd.f32 %v2231_v30, %v8602_v2  ;;  %v5932_v39 = vor.u32 %v6632_v56, %v5929_v37  ;;  %v6631_v2 = vld [vmem:[%s10216_s4 + $0x194] sm:$0xf0]  ;;  %v2275_v37 = vld [vmem:[%s10216_s4 + $0xa0] sm:$0xff] }
 0x4f4   :  { %5759 = vmatmul.msk.bf16.gmra.mxu3 %vm2520_vm7, %v2369_v47  ;;  %5766 = vmatmul.msk.bf16.gmra.mxu1 %vm2520_vm7, %v2369_v47  ;;  %v5920_v30 = vor.u32 %v6631_v2, %v5919_v28 }
 0x4f5   :  { %2873 = vmatmul.bf16.gmra.mxu2 %v8404_v18  ;;  %2961 = vmatmul.bf16.gmra.mxu0 %v8404_v18  ;;  %v8699_v62 = vsel %vm1072_vm2, %v3481_v34, %v8688_v3  ;;  %v6633_v34 = vld [vmem:[%s10216_s4 + $0x1a4] sm:$0xf0] }
 0x4f6   :  { %10469 = vst [vmem:[#allocation38_spill] sm:$0xff] %v8699_v62  ;;  %v5928_v8 = vor.u32 %v6633_v34, %v5927_v9  ;;  %3317 = vmatpush.bf16.msrb.mxu0 %v5932_v39  ;;  %v6629_v9 = vld [vmem:[%s10216_s4 + $0x184] sm:$0xf0]  ;;  %v6628_v34 = vld [vmem:[%s10216_s4 + $0x184] sm:$0xf]  ;;  %v2787_v39 = vunpack.c.h.b16 %v2275_v37 }
 0x4f7   :  { %v8701_v4 = vpop.f32.mrf.mxu2 }
 0x4f8   :  { %3229 = vmatpush.bf16.msra.mxu2 %v5928_v8  ;;  %v5913_v8 = vld [vmem:[%s10216_s4 + $0x188] sm:$0xf0] }
 0x4f9   :  { %v8715_v42 = vpop.f32.mrf.mxu0 }
 0x4fa   :  { %v2233_v61 = vpop.f32.mrf.mxu3  ;;  %3318 = vmatpush.bf16.msrb.mxu0 %v5924_v36  ;;  %v5905_v36 = vld [vmem:[%s10216_s4 + $0x178] sm:$0xf0] }
 0x4fb   :  { %v2234_v23 = vadd.f32 %v2233_v61, %v8606_v32  ;;  %v2380_v32 = vor.u32 %v2378_v19, %v2368_v40  ;;  %v5911_v40 = vld [vmem:[%s10216_s4 + $0x180] sm:$0xf] }
 0x4fc   :  { %3230 = vmatpush.bf16.msra.mxu2 %v5920_v30  ;;  %v5912_v61 = vor.u32 %v6629_v9, %v5911_v40  ;;  %v5903_v30 = vld [vmem:[%s10216_s4 + $0x170] sm:$0xf]  ;;  %v5908_v40 = vor.u32 %v6626_v63, %v5905_v36  ;;  %v5897_v63 = vld [vmem:[%s10216_s4 + $0x168] sm:$0xf0] }
 0x4fd   :  { %v8731_v47 = vpack.c.bf16 %v2234_v23, %v2232_v52  ;;  %v5916_v52 = vor.u32 %v6628_v34, %v5913_v8  ;;  %v2786_v23 = vunpack.c.l.b16 %v2275_v37  ;;  %v5844_v9 = vld [vmem:[%s10216_s4 + $0x90] sm:$0xf]  ;;  %v6601_v34 = vld [vmem:[%s10216_s4 + $0x94] sm:$0xf0]  ;;  %v6600_v37 = vld [vmem:[%s10216_s4 + $0x94] sm:$0xf] }
 0x4fe   :  { %v5845_v8 = vor.u32 %v6601_v34, %v5844_v9  ;;  %v6598_v34 = vld [vmem:[%s10216_s4 + $0x84] sm:$0xf] }
 0x4ff   :  { %10470 = vst [vmem:[#allocation12_spill] sm:$0xff] %v8731_v47  ;;  %v8733_v50 = vpop.f32.mrf.mxu2  ;;  %v2382_v31 = vshll.u32 %v8731_v47, 16  ;;  %v2394_v59 = vshrl.u32 %v8731_v47, 16  ;;  %3319 = vmatpush.bf16.msrb.mxu0 %v5916_v52  ;;  %v2808_v2 = vpack.c.b16 %v2786_v23, %v2786_v23  ;;  %v5846_v52 = vld [vmem:[%s10216_s4 + $0x98] sm:$0xf0] }
 0x500   :  { %3231 = vmatpush.bf16.msra.mxu2 %v5912_v61  ;;  %v5895_v23 = vld [vmem:[%s10216_s4 + $0x160] sm:$0xf] }
 0x501   :  { %v8749_v46 = vpop.f32.mrf.mxu0  ;;  %v8751_v35 = vrot.slane %v2382_v31, 1  ;;  %v3495_v51 = vrot.slane %v2394_v59, 1  ;;  %v3496_v13 = vrot.slane %v2382_v31, 2 }
 0x502   :  { %v2236_v54 = vpop.f32.mrf.mxu3 }
 0x503   :  { %v2385_v19 = vsel %vm99_vm1, %v2380_v32, %v8751_v35  ;;  %v8766_v56 = vor.u32 %v3496_v13, %v3495_v51  ;;  %v2809_v32 = vpack.c.b16 %v2787_v39, %v2787_v39  ;;  %v2845_v13 = vsel %vm2542_vm6, %v2808_v2, 0  ;;  %3320 = vmatpush.bf16.msrb.mxu0 %v5908_v40  ;;  %v6599_v40 = vld [vmem:[%s10216_s4 + $0x84] sm:$0xf0] }
 0x504   :  { %5760 = vmatmul.msk.bf16.gmra.mxu3 %vm2520_vm7, %v2385_v19  ;;  %5767 = vmatmul.msk.bf16.gmra.mxu1 %vm2520_vm7, %v2385_v19  ;;  %v2237_v39 = vadd.f32 %v2236_v54, %v8615_v49 }
 0x505   :  { %2878 = vmatmul.bf16.gmra.mxu2 %v8418_v25  ;;  %2966 = vmatmul.bf16.gmra.mxu0 %v8418_v25  ;;  %v8781_v31 = vsel %vm1072_vm2, %v8688_v3, %v8766_v56  ;;  %v5904_v3 = vor.u32 %v6627_v29, %v5903_v30  ;;  %v2848_v19 = vsel %vm2542_vm6, %v2809_v32, 0  ;;  %v5849_v32 = vor.u32 %v6600_v37, %v5846_v52  ;;  %v6625_v30 = vld [vmem:[%s10216_s4 + $0x164] sm:$0xf0]  ;;  %v6624_v29 = vld [vmem:[%s10216_s4 + $0x164] sm:$0xf] }
 0x506   :  { %10471 = vst [vmem:[#allocation39_spill] sm:$0xff] %v8781_v31  ;;  %2899 = vmatpush.bf16.msrb.mxu3 %v2845_v13  ;;  %2987 = vmatpush.bf16.msra.mxu1 %v2848_v19  ;;  %v5896_v36 = vor.u32 %v6625_v30, %v5895_v23  ;;  %v5900_v13 = vor.u32 %v6624_v29, %v5897_v63  ;;  %v5836_v19 = vld [vmem:[%s10216_s4 + $0x80] sm:$0xf]  ;;  %v5889_v29 = vld [vmem:[%s10216_s4 + $0x158] sm:$0xf0] }
 0x507   :  { %v8783_v28 = vpop.f32.mrf.mxu2  ;;  %3232 = vmatpush.bf16.msra.mxu2 %v5904_v3  ;;  %v5837_v9 = vor.u32 %v6599_v40, %v5836_v19  ;;  %v2396_v52 = vor.u32 %v2394_v59, %v8751_v35 }
 0x508   :  { %3321 = vmatpush.bf16.msrb.mxu0 %v5900_v13 }
 0x509   :  { %v8797_v51 = vpop.f32.mrf.mxu0 }
 0x50a   :  { %v2238_v61 = vpop.f32.mrf.mxu3  ;;  %2900 = vmatpush.bf16.msrb.mxu3 %v5845_v8  ;;  %2988 = vmatpush.bf16.msra.mxu1 %v5849_v32  ;;  %v5887_v8 = vld [vmem:[%s10216_s4 + $0x150] sm:$0xf]  ;;  %v6622_v32 = vld [vmem:[%s10216_s4 + $0x154] sm:$0xf] }
 0x50b   :  { %v2239_v2 = vadd.f32 %v2238_v61, %v8628_v44  ;;  %3233 = vmatpush.bf16.msra.mxu2 %v5896_v36  ;;  %v5838_v61 = vld [vmem:[%s10216_s4 + $0x88] sm:$0xf0]  ;;  %v5892_v35 = vor.u32 %v6622_v32, %v5889_v29 }
 0x50d   :  { %v8827_v49 = vpack.c.bf16 %v2239_v2, %v2237_v39  ;;  %v5841_v39 = vor.u32 %v6598_v34, %v5838_v61  ;;  %v6623_v2 = vld [vmem:[%s10216_s4 + $0x154] sm:$0xf0]  ;;  %3322 = vmatpush.bf16.msrb.mxu0 %v5892_v35 }
 0x50e   :  { %2901 = vmatpush.bf16.msrb.mxu3 %v5837_v9  ;;  %v5888_v30 = vor.u32 %v6623_v2, %v5887_v8 }
 0x50f   :  { %10472 = vst [vmem:[#allocation41_spill] sm:$0xff] %v8827_v49  ;;  %v8829_v44 = vpop.f32.mrf.mxu2  ;;  %v2398_v54 = vshll.u32 %v8827_v49, 16  ;;  %v2405_v3 = vshrl.u32 %v8827_v49, 16  ;;  %2989 = vmatpush.bf16.msra.mxu1 %v5841_v39  ;;  %v3063_v39 = vrot.slane %v8374_v12, 1 }
 0x510   :  { %3234 = vmatpush.bf16.msra.mxu2 %v5888_v30 }
 0x511   :  { %v8848_v37 = vpop.f32.mrf.mxu0  ;;  %v2400_v23 = vrot.slane %v2398_v54, 1  ;;  %v3503_v63 = vrot.slane %v2405_v3, 1  ;;  %v3504_v36 = vrot.slane %v2398_v54, 2 }
 0x513   :  { %v2401_v59 = vsel %vm99_vm1, %v2396_v52, %v2400_v23  ;;  %v8865_v13 = vor.u32 %v3504_v36, %v3503_v63  ;;  %v2407_v61 = vor.u32 %v2405_v3, %v2400_v23  ;;  %v3062_v3 = vrot.slane %v8362_v22, 1 }
 0x514   :  { %5761 = vmatmul.msk.bf16.gmra.mxu3 %vm2520_vm7, %v2401_v59  ;;  %5768 = vmatmul.msk.bf16.gmra.mxu1 %vm2520_vm7, %v2401_v59  ;;  %v3068_v63 = vrot.slane %v8388_v1, 1 }
 0x515   :  { %10473 = vst [vmem:[#allocation40_spill] sm:$0xff] %v8865_v13  ;;  %2883 = vmatmul.bf16.gmra.mxu2 %v8473_v27  ;;  %2971 = vmatmul.bf16.gmra.mxu0 %v8473_v27  ;;  %v8872_v54 = vsel %vm1072_vm2, %v8766_v56, %v8865_v13  ;;  %v3064_v23 = vsel %vm725_vm3, %v3062_v3, %v3063_v39 }
 0x516   :  { %10474 = vst [vmem:[#allocation42_spill] sm:$0xff] %v8872_v54  ;;  %v3069_v3 = vsel %vm725_vm3, %v3063_v39, %v3068_v63  ;;  %v3072_v39 = vrot.slane %v8404_v18, 1 }
 0x517   :  { %v8874_v19 = vpop.f32.mrf.mxu2 }
 0x519   :  { %v8876_v40 = vpop.f32.mrf.mxu0 }
 0x51f   :  { %v8878_v9 = vpop.f32.mrf.mxu2 }
 0x521   :  { %v8880_v34 = vpop.f32.mrf.mxu0 }
 0x524   :  { %5762 = vmatmul.msk.bf16.gmra.mxu3 %vm2520_vm7, %v2407_v61  ;;  %5769 = vmatmul.msk.bf16.gmra.mxu1 %vm2520_vm7, %v2407_v61 }
 0x525   :  { %2888 = vmatmul.bf16.gmra.mxu2 %v8558_v6  ;;  %2976 = vmatmul.bf16.gmra.mxu0 %v8558_v6 }
 0x527   :  { %v8886_v8 = vpop.f32.mrf.mxu2 }
 0x529   :  { %v8888_v56 = vpop.f32.mrf.mxu0 }
 0x52f   :  { %v8890_v52 = vpop.f32.mrf.mxu2 }
 0x531   :  { %v8893_v2 = vpop.f32.mrf.mxu0 }
 0x534   :  { %5850 = vmatmul.msk.bf16.vlgmr.msrb.gmra.mxu3 %vm2520_vm7, %v8600_v53  ;;  %5857 = vmatmul.msk.bf16.vlgmr.msra.gmra.mxu1 %vm2520_vm7, %v8600_v53 }
 0x535   :  { %3235 = vmatmul.bf16.vlgmr.msra.gmra.mxu2 %v3064_v23  ;;  %3323 = vmatmul.bf16.vlgmr.msrb.gmra.mxu0 %v3064_v23 }
 0x537   :  { %v8901_v32 = vpop.f32.mrf.mxu2 }
 0x539   :  { %v8903_v30 = vpop.f32.mrf.mxu0 }
 0x53f   :  { %v8905_v29 = vpop.f32.mrf.mxu2 }
 0x541   :  { %v2690_v36 = vpop.f32.mrf.mxu1 }
 0x542   :  { %v2691_v59 = vadd.f32 %v2690_v36, %v8632_v10  ;;  %v2947_v35 = vpop.f32.mrf.mxu0 }
 0x544   :  { %v8909_v61 = vadd.f32 %v2947_v35, %v2691_v59  ;;  %5851 = vmatmul.msk.bf16.gmra.mxu3 %vm2520_vm7, %v8610_v24  ;;  %5858 = vmatmul.msk.bf16.gmra.mxu1 %vm2520_vm7, %v8610_v24 }
 0x545   :  { %3240 = vmatmul.bf16.gmra.mxu2 %v3069_v3  ;;  %3328 = vmatmul.bf16.gmra.mxu0 %v3069_v3 }
 0x547   :  { %v2602_v23 = vpop.f32.mrf.mxu3 }
 0x548   :  { %v2603_v13 = vadd.f32 %v2602_v23, %v8642_v60  ;;  %v2859_v54 = vpop.f32.mrf.mxu2 }
 0x549   :  { %v2692_v31 = vpop.f32.mrf.mxu1 }
 0x54a   :  { %v8917_v62 = vadd.f32 %v2859_v54, %v2603_v13  ;;  %v2693_v10 = vadd.f32 %v2692_v31, %v8644_v38  ;;  %v2949_v36 = vpop.f32.mrf.mxu0  ;;  %v3073_v38 = vsel %vm725_vm3, %v3068_v63, %v3072_v39  ;;  %v3076_v63 = vrot.slane %v8418_v25, 1 }
 0x54c   :  { %v8920_v59 = vadd.f32 %v2949_v36, %v2693_v10 }
 0x54f   :  { %v2604_v35 = vpop.f32.mrf.mxu3 }
 0x550   :  { %v2605_v7 = vadd.f32 %v2604_v35, %v8650_v33  ;;  %v2861_v17 = vpop.f32.mrf.mxu2 }
 0x551   :  { %v2695_v1 = vpop.f32.mrf.mxu1 }
 0x552   :  { %v8924_v3 = vadd.f32 %v2861_v17, %v2605_v7  ;;  %v2696_v60 = vadd.f32 %v2695_v1, %v8654_v11  ;;  %v2952_v23 = vpop.f32.mrf.mxu0 }
 0x554   :  { %v8927_v57 = vadd.f32 %v2952_v23, %v2696_v60  ;;  %5852 = vmatmul.msk.bf16.gmra.mxu3 %vm2520_vm7, %v8626_v58  ;;  %5859 = vmatmul.msk.bf16.gmra.mxu1 %vm2520_vm7, %v8626_v58 }
 0x555   :  { %3245 = vmatmul.bf16.gmra.mxu2 %v3073_v38  ;;  %3333 = vmatmul.bf16.gmra.mxu0 %v3073_v38 }
 0x557   :  { %v2607_v33 = vpop.f32.mrf.mxu3 }
 0x558   :  { %v2608_v31 = vadd.f32 %v2607_v33, %v8664_v45  ;;  %v2864_v17 = vpop.f32.mrf.mxu2  ;;  %v6058_v33 = vld [vmem:[%s10216_s4 + $0x268] sm:$0xf] }
 0x559   :  { %v2697_v7 = vpop.f32.mrf.mxu1 }
 0x55a   :  { %v8935_v13 = vadd.f32 %v2864_v17, %v2608_v31  ;;  %v2698_v1 = vadd.f32 %v2697_v7, %v8666_v26  ;;  %v2954_v11 = vpop.f32.mrf.mxu0  ;;  %v6657_v26 = vld [vmem:[%s10216_s4 + $0x26c] sm:$0xf0]  ;;  %v6060_v7 = vld [vmem:[%s10216_s4 + $0x270] sm:$0xf0] }
 0x55b   :  { %v6059_v17 = vor.u32 %v6657_v26, %v6058_v33 }
 0x55c   :  { %v8938_v54 = vadd.f32 %v2954_v11, %v2698_v1 }
 0x55d   :  { %3646 = vmatpush.bf16.msrb.mxu2 %v6059_v17 }
 0x55f   :  { %v2609_v10 = vpop.f32.mrf.mxu3 }
 0x560   :  { %v2610_v36 = vadd.f32 %v2609_v10, %v8672_v20  ;;  %v2866_v35 = vpop.f32.mrf.mxu2  ;;  %v6656_v20 = vld [vmem:[%s10216_s4 + $0x26c] sm:$0xf]  ;;  %v6050_v10 = vld [vmem:[%s10216_s4 + $0x258] sm:$0xf] }
 0x561   :  { %v2700_v60 = vpop.f32.mrf.mxu1  ;;  %v6063_v1 = vor.u32 %v6656_v20, %v6060_v7  ;;  %v6042_v7 = vld [vmem:[%s10216_s4 + $0x248] sm:$0xf] }
 0x562   :  { %v8942_v23 = vadd.f32 %v2866_v35, %v2610_v36  ;;  %v2701_v45 = vadd.f32 %v2700_v60, %v8676_v0  ;;  %v2957_v38 = vpop.f32.mrf.mxu0  ;;  %v3077_v0 = vsel %vm725_vm3, %v3072_v39, %v3076_v63  ;;  %v6655_v36 = vld [vmem:[%s10216_s4 + $0x25c] sm:$0xf0]  ;;  %v6654_v39 = vld [vmem:[%s10216_s4 + $0x25c] sm:$0xf] }
 0x563   :  { %3734 = vmatpush.bf16.msra.mxu0 %v6063_v1  ;;  %v6652_v1 = vld [vmem:[%s10216_s4 + $0x24c] sm:$0xf] }
 0x564   :  { %v8954_v31 = vadd.f32 %v2957_v38, %v2701_v45  ;;  %5853 = vmatmul.msk.bf16.gmra.mxu3 %vm2520_vm7, %v8648_v14  ;;  %5860 = vmatmul.msk.bf16.gmra.mxu1 %vm2520_vm7, %v8648_v14  ;;  %v6051_v45 = vor.u32 %v6655_v36, %v6050_v10  ;;  %v6052_v38 = vld [vmem:[%s10216_s4 + $0x260] sm:$0xf0] }
 0x565   :  { %3250 = vmatmul.bf16.gmra.mxu2 %v3077_v0  ;;  %3338 = vmatmul.bf16.gmra.mxu0 %v3077_v0  ;;  %v6055_v26 = vor.u32 %v6654_v39, %v6052_v38 }
 0x566   :  { %3647 = vmatpush.bf16.msrb.mxu2 %v6051_v45  ;;  %v6650_v45 = vld [vmem:[%s10216_s4 + $0x23c] sm:$0xf] }
 0x567   :  { %v2612_v11 = vpop.f32.mrf.mxu3  ;;  %3735 = vmatpush.bf16.msra.mxu0 %v6055_v26  ;;  %v10271_v26 = vrot.slane %v8473_v27, 1 }
 0x568   :  { %v2613_v35 = vadd.f32 %v2612_v11, %v8701_v4  ;;  %v2869_v60 = vpop.f32.mrf.mxu2  ;;  %v6653_v4 = vld [vmem:[%s10216_s4 + $0x24c] sm:$0xf0] }
 0x569   :  { %v2702_v33 = vpop.f32.mrf.mxu1  ;;  %v6043_v10 = vor.u32 %v6653_v4, %v6042_v7 }
 0x56a   :  { %v8979_v20 = vadd.f32 %v2869_v60, %v2613_v35  ;;  %v2703_v0 = vadd.f32 %v2702_v33, %v8715_v42  ;;  %v2959_v17 = vpop.f32.mrf.mxu0  ;;  %v6044_v42 = vld [vmem:[%s10216_s4 + $0x250] sm:$0xf0]  ;;  %v6034_v35 = vld [vmem:[%s10216_s4 + $0x238] sm:$0xf]  ;;  %v6651_v60 = vld [vmem:[%s10216_s4 + $0x23c] sm:$0xf0] }
 0x56b   :  { %v6047_v36 = vor.u32 %v6652_v1, %v6044_v42  ;;  %3648 = vmatpush.bf16.msrb.mxu2 %v6043_v10 }
 0x56c   :  { %v8991_v11 = vadd.f32 %v2959_v17, %v2703_v0  ;;  %v6035_v0 = vor.u32 %v6651_v60, %v6034_v35  ;;  %v6036_v17 = vld [vmem:[%s10216_s4 + $0x240] sm:$0xf0] }
 0x56d   :  { %3736 = vmatpush.bf16.msra.mxu0 %v6047_v36  ;;  %v6039_v4 = vor.u32 %v6650_v45, %v6036_v17  ;;  %v6649_v36 = vld [vmem:[%s10216_s4 + $0x22c] sm:$0xf0]  ;;  %v6028_v45 = vld [vmem:[%s10216_s4 + $0x230] sm:$0xf0] }
 0x56f   :  { %v2614_v39 = vpop.f32.mrf.mxu3  ;;  %3649 = vmatpush.bf16.msrb.mxu2 %v6035_v0 }
 0x570   :  { %v2615_v38 = vadd.f32 %v2614_v39, %v8733_v50  ;;  %v2871_v33 = vpop.f32.mrf.mxu2  ;;  %v6026_v50 = vld [vmem:[%s10216_s4 + $0x228] sm:$0xf]  ;;  %v6648_v39 = vld [vmem:[%s10216_s4 + $0x22c] sm:$0xf] }
 0x571   :  { %v2705_v7 = vpop.f32.mrf.mxu1  ;;  %3737 = vmatpush.bf16.msra.mxu0 %v6039_v4  ;;  %v6027_v60 = vor.u32 %v6649_v36, %v6026_v50  ;;  %v6646_v50 = vld [vmem:[%s10216_s4 + $0x21c] sm:$0xf] }
 0x572   :  { %v9010_v1 = vadd.f32 %v2871_v33, %v2615_v38  ;;  %v2706_v10 = vadd.f32 %v2705_v7, %v8749_v46  ;;  %v2962_v42 = vpop.f32.mrf.mxu0  ;;  %v3081_v46 = vsel %vm725_vm3, %v3076_v63, %v10271_v26  ;;  %v5884_v38 = vld [vmem:[%s10216_s4 + $0x1f0] sm:$0xff]  ;;  %v6031_v33 = vor.u32 %v6648_v39, %v6028_v45  ;;  %v6018_v63 = vld [vmem:[%s10216_s4 + $0x218] sm:$0xf] }
 0x573   :  { %v3156_v0 = vunpack.c.l.b16 %v5884_v38  ;;  %v3157_v17 = vunpack.c.h.b16 %v5884_v38  ;;  %3650 = vmatpush.bf16.msrb.mxu2 %v6027_v60  ;;  %v6020_v60 = vld [vmem:[%s10216_s4 + $0x220] sm:$0xf0] }
 0x574   :  { %v9022_v35 = vadd.f32 %v2962_v42, %v2706_v10  ;;  %5854 = vmatmul.msk.bf16.gmra.mxu3 %vm2520_vm7, %v8670_v15  ;;  %5861 = vmatmul.msk.bf16.gmra.mxu1 %vm2520_vm7, %v8670_v15  ;;  %v6647_v42 = vld [vmem:[%s10216_s4 + $0x21c] sm:$0xf0] }
 0x575   :  { %3255 = vmatmul.bf16.gmra.mxu2 %v3081_v46  ;;  %3343 = vmatmul.bf16.gmra.mxu0 %v3081_v46  ;;  %v3178_v4 = vpack.c.b16 %v3156_v0, %v3156_v0  ;;  %v3179_v10 = vpack.c.b16 %v3157_v17, %v3157_v17  ;;  %v6019_v46 = vor.u32 %v6647_v42, %v6018_v63  ;;  %v5961_v63 = vld [vmem:[%s10216_s4 + $0x1e8] sm:$0xf0]  ;;  %v6010_v42 = vld [vmem:[%s10216_s4 + $0x208] sm:$0xf] }
 0x576   :  { %3738 = vmatpush.bf16.msra.mxu0 %v6031_v33  ;;  %v6023_v0 = vor.u32 %v6646_v50, %v6020_v60  ;;  %v6645_v50 = vld [vmem:[%s10216_s4 + $0x20c] sm:$0xf0] }
 0x577   :  { %v2617_v7 = vpop.f32.mrf.mxu3  ;;  %v3222_v38 = vsel %vm2542_vm6, %v3178_v4, 0  ;;  %v3225_v33 = vsel %vm2542_vm6, %v3179_v10, 0  ;;  %3651 = vmatpush.bf16.msrb.mxu2 %v6019_v46  ;;  %v6640_v4 = vld [vmem:[%s10216_s4 + $0x1e4] sm:$0xf]  ;;  %v3084_v46 = vrot.slane %v8558_v6, 1 }
 0x578   :  { %v2618_v36 = vadd.f32 %v2617_v7, %v8783_v28  ;;  %v2874_v39 = vpop.f32.mrf.mxu2  ;;  %3276 = vmatpush.bf16.msra.mxu3 %v3222_v38  ;;  %3364 = vmatpush.bf16.msrb.mxu1 %v3225_v33  ;;  %v5959_v28 = vld [vmem:[%s10216_s4 + $0x1e0] sm:$0xf]  ;;  %v6641_v7 = vld [vmem:[%s10216_s4 + $0x1e4] sm:$0xf0]  ;;  %v5951_v38 = vld [vmem:[%s10216_s4 + $0x1d0] sm:$0xf] }
 0x579   :  { %v2707_v45 = vpop.f32.mrf.mxu1  ;;  %v6639_v33 = vld [vmem:[%s10216_s4 + $0x1d4] sm:$0xf0] }
 0x57a   :  { %v9054_v17 = vadd.f32 %v2874_v39, %v2618_v36  ;;  %v2708_v26 = vadd.f32 %v2707_v45, %v8797_v51  ;;  %v2964_v25 = vpop.f32.mrf.mxu0  ;;  %3739 = vmatpush.bf16.msra.mxu0 %v6023_v0  ;;  %v5960_v51 = vor.u32 %v6641_v7, %v5959_v28  ;;  %v5964_v36 = vor.u32 %v6640_v4, %v5961_v63  ;;  %v6638_v0 = vld [vmem:[%s10216_s4 + $0x1d4] sm:$0xf]  ;;  %v6002_v63 = vld [vmem:[%s10216_s4 + $0x1f8] sm:$0xf] }
 0x57b   :  { %v6011_v39 = vor.u32 %v6645_v50, %v6010_v42  ;;  %v5952_v4 = vor.u32 %v6639_v33, %v5951_v38  ;;  %v6643_v42 = vld [vmem:[%s10216_s4 + $0x1fc] sm:$0xf0] }
 0x57c   :  { %v9066_v10 = vadd.f32 %v2964_v25, %v2708_v26  ;;  %v6644_v25 = vld [vmem:[%s10216_s4 + $0x20c] sm:$0xf]  ;;  %v6012_v26 = vld [vmem:[%s10216_s4 + $0x210] sm:$0xf0]  ;;  %3277 = vmatpush.bf16.msra.mxu3 %v5960_v51  ;;  %3365 = vmatpush.bf16.msrb.mxu1 %v5964_v36  ;;  %v5953_v51 = vld [vmem:[%s10216_s4 + $0x1d8] sm:$0xf0] }
 0x57d   :  { %v6015_v60 = vor.u32 %v6644_v25, %v6012_v26  ;;  %3652 = vmatpush.bf16.msrb.mxu2 %v6011_v39  ;;  %v5956_v36 = vor.u32 %v6638_v0, %v5953_v51  ;;  %v6003_v39 = vor.u32 %v6643_v42, %v6002_v63  ;;  %v6004_v25 = vld [vmem:[%s10216_s4 + $0x200] sm:$0xf0]  ;;  %v10475_v0 = vrot.slane %v8473_v27, 1 }
 0x57f   :  { %v2619_v45 = vpop.f32.mrf.mxu3  ;;  %3740 = vmatpush.bf16.msra.mxu0 %v6015_v60 }
 0x580   :  { %v2620_v28 = vadd.f32 %v2619_v45, %v8829_v44  ;;  %v2876_v7 = vpop.f32.mrf.mxu2  ;;  %v6642_v44 = vld [vmem:[%s10216_s4 + $0x1fc] sm:$0xf]  ;;  %3278 = vmatpush.bf16.msra.mxu3 %v5952_v4  ;;  %3366 = vmatpush.bf16.msrb.mxu1 %v5956_v36 }
 0x581   :  { %v2710_v50 = vpop.f32.mrf.mxu1  ;;  %v6007_v38 = vor.u32 %v6642_v44, %v6004_v25  ;;  %3653 = vmatpush.bf16.msrb.mxu2 %v6003_v39 }
 0x582   :  { %v9109_v26 = vadd.f32 %v2876_v7, %v2620_v28  ;;  %v2711_v60 = vadd.f32 %v2710_v50, %v8848_v37  ;;  %v2967_v45 = vpop.f32.mrf.mxu0  ;;  %v3085_v28 = vsel %vm725_vm3, %v10475_v0, %v3084_v46 }
 0x583   :  { %3741 = vmatpush.bf16.msra.mxu0 %v6007_v38 }
 0x584   :  { %v9112_v33 = vadd.f32 %v2967_v45, %v2711_v60  ;;  %5855 = vmatmul.msk.bf16.gmra.mxu3 %vm2520_vm7, %v8731_v47  ;;  %5862 = vmatmul.msk.bf16.gmra.mxu1 %vm2520_vm7, %v8731_v47 }
 0x585   :  { %3260 = vmatmul.bf16.gmra.mxu2 %v3085_v28  ;;  %3348 = vmatmul.bf16.gmra.mxu0 %v3085_v28 }
 0x587   :  { %v2622_v37 = vpop.f32.mrf.mxu3 }
 0x588   :  { %v2623_v7 = vadd.f32 %v2622_v37, %v8874_v19  ;;  %v2879_v4 = vpop.f32.mrf.mxu2 }
 0x589   :  { %v2712_v51 = vpop.f32.mrf.mxu1 }
 0x58a   :  { %v9122_v63 = vadd.f32 %v2879_v4, %v2623_v7  ;;  %v2713_v42 = vadd.f32 %v2712_v51, %v8876_v40  ;;  %v2969_v50 = vpop.f32.mrf.mxu0 }
 0x58c   :  { %v9125_v36 = vadd.f32 %v2969_v50, %v2713_v42  ;;  %v3066_v50 = vrot.slane %v8610_v24, 1 }
 0x58f   :  { %v2624_v39 = vpop.f32.mrf.mxu3 }
 0x590   :  { %v2625_v44 = vadd.f32 %v2624_v39, %v8878_v9  ;;  %v2881_v25 = vpop.f32.mrf.mxu2 }
 0x591   :  { %v2715_v60 = vpop.f32.mrf.mxu1 }
 0x592   :  { %v9128_v45 = vadd.f32 %v2881_v25, %v2625_v44  ;;  %v2716_v38 = vadd.f32 %v2715_v60, %v8880_v34  ;;  %v2972_v0 = vpop.f32.mrf.mxu0 }
 0x594   :  { %v9131_v19 = vadd.f32 %v2972_v0, %v2716_v38  ;;  %5856 = vmatmul.msk.bf16.gmra.mxu3 %vm2520_vm7, %v8827_v49  ;;  %5863 = vmatmul.msk.bf16.gmra.mxu1 %vm2520_vm7, %v8827_v49 }
 0x595   :  { %3265 = vmatmul.bf16.gmra.mxu2 %v3084_v46  ;;  %3353 = vmatmul.bf16.gmra.mxu0 %v3084_v46  ;;  %v3065_v46 = vrot.slane %v8600_v53, 1 }
 0x597   :  { %v2627_v40 = vpop.f32.mrf.mxu3  ;;  %v3067_v0 = vsel %vm725_vm3, %v3065_v46, %v3066_v50 }
 0x598   :  { %v2628_v9 = vadd.f32 %v2627_v40, %v8886_v8  ;;  %v2884_v28 = vpop.f32.mrf.mxu2 }
 0x599   :  { %v2717_v37 = vpop.f32.mrf.mxu1 }
 0x59a   :  { %v9138_v7 = vadd.f32 %v2884_v28, %v2628_v9  ;;  %v2718_v34 = vadd.f32 %v2717_v37, %v8888_v56  ;;  %v2974_v4 = vpop.f32.mrf.mxu0 }
 0x59c   :  { %v9141_v51 = vadd.f32 %v2974_v4, %v2718_v34 }
 0x59f   :  { %v2629_v42 = vpop.f32.mrf.mxu3 }
 0x5a0   :  { %v2630_v39 = vadd.f32 %v2629_v42, %v8890_v52  ;;  %v2886_v44 = vpop.f32.mrf.mxu2 }
 0x5a1   :  { %v2720_v25 = vpop.f32.mrf.mxu1 }
 0x5a2   :  { %v9146_v60 = vadd.f32 %v2886_v44, %v2630_v39  ;;  %v2721_v8 = vadd.f32 %v2720_v25, %v8893_v2  ;;  %v2977_v38 = vpop.f32.mrf.mxu0  ;;  %v3070_v39 = vrot.slane %v8626_v58, 1 }
 0x5a4   :  { %v9150_v56 = vadd.f32 %v2977_v38, %v2721_v8  ;;  %5965 = vmatmul.msk.bf16.vlgmr.msra.gmra.mxu3 %vm2520_vm7, %v3067_v0  ;;  %5972 = vmatmul.msk.bf16.vlgmr.msrb.gmra.mxu1 %vm2520_vm7, %v3067_v0  ;;  %v3071_v8 = vsel %vm725_vm3, %v3066_v50, %v3070_v39 }
 0x5a5   :  { %3654 = vmatmul.bf16.vlgmr.msrb.gmra.mxu2 %v8384_v48  ;;  %3742 = vmatmul.bf16.vlgmr.msra.gmra.mxu0 %v8384_v48 }
 0x5a7   :  { %v2632_v52 = vpop.f32.mrf.mxu3 }
 0x5a8   :  { %v2633_v40 = vadd.f32 %v2632_v52, %v8901_v32  ;;  %v2889_v9 = vpop.f32.mrf.mxu2  ;;  %v3074_v52 = vrot.slane %v8648_v14, 1 }
 0x5a9   :  { %v2722_v28 = vpop.f32.mrf.mxu1 }
 0x5aa   :  { %v9157_v37 = vadd.f32 %v2889_v9, %v2633_v40  ;;  %v2723_v2 = vadd.f32 %v2722_v28, %v8903_v30  ;;  %v2979_v34 = vpop.f32.mrf.mxu0 }
 0x5ac   :  { %v9160_v4 = vadd.f32 %v2979_v34, %v2723_v2 }
 0x5af   :  { %v2634_v42 = vpop.f32.mrf.mxu3 }
 0x5b0   :  { %v2635_v44 = vadd.f32 %v2634_v42, %v8905_v29  ;;  %v2891_v25 = vpop.f32.mrf.mxu2  ;;  %v3078_v42 = vrot.slane %v8670_v15, 1  ;;  %v10476_v15 = vrot.slane %v8731_v47, 1 }
 0x5b1   :  { %v2991_v46 = vpop.f32.mrf.mxu1 }
 0x5b2   :  { %v9164_v48 = vadd.f32 %v2891_v25, %v2635_v44  ;;  %v9167_v32 = vadd.f32 %v2991_v46, %v8909_v61  ;;  %v9195_v28 = vpop.f32.mrf.mxu0 }
 0x5b4   :  { %5966 = vmatmul.msk.bf16.gmra.mxu3 %vm2520_vm7, %v3071_v8  ;;  %5973 = vmatmul.msk.bf16.gmra.mxu1 %vm2520_vm7, %v3071_v8 }
 0x5b5   :  { %3659 = vmatmul.bf16.gmra.mxu2 %v8398_v55  ;;  %3747 = vmatmul.bf16.gmra.mxu0 %v8398_v55  ;;  %v3075_v55 = vsel %vm725_vm3, %v3070_v39, %v3074_v52 }
 0x5b7   :  { %v2903_v30 = vpop.f32.mrf.mxu3 }
 0x5b8   :  { %v9175_v29 = vadd.f32 %v2903_v30, %v8917_v62  ;;  %v9200_v2 = vpop.f32.mrf.mxu2  ;;  %v6175_v30 = vld [vmem:[%s10216_s4 + $0x318] sm:$0xf0] }
 0x5b9   :  { %v2993_v38 = vpop.f32.mrf.mxu1 }
 0x5ba   :  { %v9178_v0 = vadd.f32 %v2993_v38, %v8920_v59  ;;  %v9210_v25 = vpop.f32.mrf.mxu0 }
 0x5bf   :  { %v2905_v61 = vpop.f32.mrf.mxu3 }
 0x5c0   :  { %v9182_v50 = vadd.f32 %v2905_v61, %v8924_v3  ;;  %v9223_v46 = vpop.f32.mrf.mxu2 }
 0x5c1   :  { %v2996_v40 = vpop.f32.mrf.mxu1 }
 0x5c2   :  { %v9185_v9 = vadd.f32 %v2996_v40, %v8927_v57  ;;  %v6165_v40 = vld [vmem:[%s10216_s4 + $0x300] sm:$0xf] }
 0x5c4   :  { %5967 = vmatmul.msk.bf16.gmra.mxu3 %vm2520_vm7, %v3075_v55  ;;  %5974 = vmatmul.msk.bf16.gmra.mxu1 %vm2520_vm7, %v3075_v55  ;;  %v6674_v55 = vld [vmem:[%s10216_s4 + $0x304] sm:$0xf] }
 0x5c5   :  { %3664 = vmatmul.bf16.gmra.mxu2 %v8414_v5  ;;  %3752 = vmatmul.bf16.gmra.mxu0 %v8414_v5 }
 0x5c7   :  { %v2908_v62 = vpop.f32.mrf.mxu3 }
 0x5c8   :  { %v9193_v59 = vadd.f32 %v2908_v62, %v8935_v13  ;;  %v3079_v13 = vsel %vm725_vm3, %v3074_v52, %v3078_v42 }
 0x5c9   :  { %v2998_v3 = vpop.f32.mrf.mxu1 }
 0x5ca   :  { %v9198_v57 = vadd.f32 %v2998_v3, %v8938_v54  ;;  %v6173_v54 = vld [vmem:[%s10216_s4 + $0x310] sm:$0xf] }
 0x5cf   :  { %v2910_v34 = vpop.f32.mrf.mxu3 }
 0x5d0   :  { %v9204_v39 = vadd.f32 %v2910_v34, %v8942_v23  ;;  %v6677_v23 = vld [vmem:[%s10216_s4 + $0x314] sm:$0xf0] }
 0x5d1   :  { %v3001_v44 = vpop.f32.mrf.mxu1  ;;  %v6174_v8 = vor.u32 %v6677_v23, %v6173_v54  ;;  %v6673_v54 = vld [vmem:[%s10216_s4 + $0x2f4] sm:$0xf0]  ;;  %v6672_v23 = vld [vmem:[%s10216_s4 + $0x2f4] sm:$0xf] }
 0x5d2   :  { %v9207_v5 = vadd.f32 %v3001_v44, %v8954_v31  ;;  %v6676_v31 = vld [vmem:[%s10216_s4 + $0x314] sm:$0xf] }
 0x5d3   :  { %v6178_v38 = vor.u32 %v6676_v31, %v6175_v30  ;;  %4037 = vmatpush.bf16.msra.mxu2 %v6174_v8  ;;  %v9260_v30 = vpop.f32.mrf.mxu0 }
 0x5d4   :  { %5968 = vmatmul.msk.bf16.gmra.mxu3 %vm2520_vm7, %v3079_v13  ;;  %5975 = vmatmul.msk.bf16.gmra.mxu1 %vm2520_vm7, %v3079_v13  ;;  %v6157_v13 = vld [vmem:[%s10216_s4 + $0x2f0] sm:$0xf] }
 0x5d5   :  { %3669 = vmatmul.bf16.gmra.mxu2 %v8455_v16  ;;  %3757 = vmatmul.bf16.gmra.mxu0 %v8455_v16  ;;  %v6675_v16 = vld [vmem:[%s10216_s4 + $0x304] sm:$0xf0]  ;;  %v6158_v31 = vor.u32 %v6673_v54, %v6157_v13 }
 0x5d6   :  { %4125 = vmatpush.bf16.msrb.mxu0 %v6178_v38  ;;  %v6166_v3 = vor.u32 %v6675_v16, %v6165_v40  ;;  %v9262_v38 = vpop.f32.mrf.mxu2  ;;  %v10273_v40 = vrot.slane %v8731_v47, 1 }
 0x5d7   :  { %v2913_v61 = vpop.f32.mrf.mxu3 }
 0x5d8   :  { %v9231_v52 = vadd.f32 %v2913_v61, %v8979_v20  ;;  %v6167_v20 = vld [vmem:[%s10216_s4 + $0x308] sm:$0xf0]  ;;  %4038 = vmatpush.bf16.msra.mxu2 %v6166_v3  ;;  %v6670_v3 = vld [vmem:[%s10216_s4 + $0x2e4] sm:$0xf] }
 0x5d9   :  { %v3003_v62 = vpop.f32.mrf.mxu1  ;;  %v6170_v44 = vor.u32 %v6674_v55, %v6167_v20  ;;  %v6149_v55 = vld [vmem:[%s10216_s4 + $0x2e0] sm:$0xf] }
 0x5da   :  { %v9246_v34 = vadd.f32 %v3003_v62, %v8991_v11  ;;  %v6159_v11 = vld [vmem:[%s10216_s4 + $0x2f8] sm:$0xf0]  ;;  %v6671_v62 = vld [vmem:[%s10216_s4 + $0x2e4] sm:$0xf0] }
 0x5db   :  { %4126 = vmatpush.bf16.msrb.mxu0 %v6170_v44  ;;  %v6162_v8 = vor.u32 %v6672_v23, %v6159_v11  ;;  %v6150_v44 = vor.u32 %v6671_v62, %v6149_v55  ;;  %v3083_v23 = vsel %vm725_vm3, %v3078_v42, %v10273_v40  ;;  %v6669_v11 = vld [vmem:[%s10216_s4 + $0x2d4] sm:$0xf0]  ;;  %v6074_v40 = vld [vmem:[%s10216_s4 + $0x288] sm:$0xf] }
 0x5dc   :  { %4039 = vmatpush.bf16.msra.mxu2 %v6158_v31  ;;  %v6141_v31 = vld [vmem:[%s10216_s4 + $0x2d0] sm:$0xf] }
 0x5dd   :  { %v6142_v42 = vor.u32 %v6669_v11, %v6141_v31  ;;  %v6133_v31 = vld [vmem:[%s10216_s4 + $0x2c0] sm:$0xf]  ;;  %v6666_v11 = vld [vmem:[%s10216_s4 + $0x2c4] sm:$0xf] }
 0x5df   :  { %v2915_v61 = vpop.f32.mrf.mxu3  ;;  %4127 = vmatpush.bf16.msrb.mxu0 %v6162_v8  ;;  %v6143_v8 = vld [vmem:[%s10216_s4 + $0x2d8] sm:$0xf0] }
 0x5e0   :  { %v9266_v16 = vadd.f32 %v2915_v61, %v9010_v1  ;;  %v6151_v1 = vld [vmem:[%s10216_s4 + $0x2e8] sm:$0xf0]  ;;  %4040 = vmatpush.bf16.msra.mxu2 %v6150_v44  ;;  %v5999_v61 = vld [vmem:[%s10216_s4 + $0x298] sm:$0xff]  ;;  %v9305_v44 = vpop.f32.mrf.mxu0 }
 0x5e1   :  { %v3006_v20 = vpop.f32.mrf.mxu1  ;;  %v6154_v54 = vor.u32 %v6670_v3, %v6151_v1  ;;  %v3575_v62 = vunpack.c.l.b16 %v5999_v61  ;;  %v3576_v3 = vunpack.c.h.b16 %v5999_v61 }
 0x5e2   :  { %v9281_v13 = vadd.f32 %v3006_v20, %v9022_v35  ;;  %v6668_v35 = vld [vmem:[%s10216_s4 + $0x2d4] sm:$0xf] }
 0x5e3   :  { %4128 = vmatpush.bf16.msrb.mxu0 %v6154_v54  ;;  %v6146_v55 = vor.u32 %v6668_v35, %v6143_v8  ;;  %v6667_v54 = vld [vmem:[%s10216_s4 + $0x2c4] sm:$0xf0]  ;;  %v9319_v35 = vpop.f32.mrf.mxu2 }
 0x5e4   :  { %5969 = vmatmul.msk.bf16.gmra.mxu3 %vm2520_vm7, %v3083_v23  ;;  %5976 = vmatmul.msk.bf16.gmra.mxu1 %vm2520_vm7, %v3083_v23  ;;  %v3598_v23 = vpack.c.b16 %v3576_v3, %v3576_v3  ;;  %v6134_v8 = vor.u32 %v6667_v54, %v6133_v31  ;;  %v6661_v31 = vld [vmem:[%s10216_s4 + $0x28c] sm:$0xf0] }
 0x5e5   :  { %3674 = vmatmul.bf16.gmra.mxu2 %v8527_v41  ;;  %3762 = vmatmul.bf16.gmra.mxu0 %v8527_v41  ;;  %v3597_v41 = vpack.c.b16 %v3575_v62, %v3575_v62  ;;  %v6075_v54 = vor.u32 %v6661_v31, %v6074_v40  ;;  %v6664_v40 = vld [vmem:[%s10216_s4 + $0x2b4] sm:$0xf]  ;;  %v3086_v31 = vrot.slane %v8827_v49, 1 }
 0x5e6   :  { %4041 = vmatpush.bf16.msra.mxu2 %v6142_v42  ;;  %v3644_v3 = vsel %vm2542_vm6, %v3598_v23, 0 }
 0x5e7   :  { %v2918_v20 = vpop.f32.mrf.mxu3  ;;  %4129 = vmatpush.bf16.msrb.mxu0 %v6146_v55  ;;  %v3641_v62 = vsel %vm2542_vm6, %v3597_v41, 0  ;;  %3783 = vmatpush.bf16.msra.mxu1 %v3644_v3  ;;  %v6076_v55 = vld [vmem:[%s10216_s4 + $0x290] sm:$0xf0]  ;;  %v6125_v41 = vld [vmem:[%s10216_s4 + $0x2b0] sm:$0xf]  ;;  %v3087_v14 = vsel %vm725_vm3, %v10476_v15, %v3086_v31 }
 0x5e8   :  { %v9308_v1 = vadd.f32 %v2918_v20, %v9054_v17  ;;  %v6135_v17 = vld [vmem:[%s10216_s4 + $0x2c8] sm:$0xf0]  ;;  %3695 = vmatpush.bf16.msrb.mxu3 %v3641_v62 }
 0x5e9   :  { %v3008_v42 = vpop.f32.mrf.mxu1  ;;  %v6138_v20 = vor.u32 %v6666_v11, %v6135_v17  ;;  %v6665_v11 = vld [vmem:[%s10216_s4 + $0x2b4] sm:$0xf0] }
 0x5ea   :  { %v9325_v61 = vadd.f32 %v3008_v42, %v9066_v10  ;;  %v6660_v10 = vld [vmem:[%s10216_s4 + $0x28c] sm:$0xf]  ;;  %4042 = vmatpush.bf16.msra.mxu2 %v6134_v8  ;;  %v6127_v42 = vld [vmem:[%s10216_s4 + $0x2b8] sm:$0xf0]  ;;  %v6126_v17 = vor.u32 %v6665_v11, %v6125_v41 }
 0x5eb   :  { %v6079_v23 = vor.u32 %v6660_v10, %v6076_v55  ;;  %4130 = vmatpush.bf16.msrb.mxu0 %v6138_v20  ;;  %v6130_v62 = vor.u32 %v6664_v40, %v6127_v42  ;;  %v6066_v10 = vld [vmem:[%s10216_s4 + $0x278] sm:$0xf]  ;;  %v6659_v55 = vld [vmem:[%s10216_s4 + $0x27c] sm:$0xf0]  ;;  %v6658_v20 = vld [vmem:[%s10216_s4 + $0x27c] sm:$0xf]  ;;  %v9375_v40 = vpop.f32.mrf.mxu0  ;;  %v9386_v49 = vpop.f32.mrf.mxu2 }
 0x5ec   :  { %3696 = vmatpush.bf16.msrb.mxu3 %v6075_v54  ;;  %v6067_v11 = vor.u32 %v6659_v55, %v6066_v10  ;;  %v6117_v54 = vld [vmem:[%s10216_s4 + $0x2a0] sm:$0xf]  ;;  %v6662_v10 = vld [vmem:[%s10216_s4 + $0x2a4] sm:$0xf]  ;;  %v6119_v55 = vld [vmem:[%s10216_s4 + $0x2a8] sm:$0xf0] }
 0x5ed   :  { %3784 = vmatpush.bf16.msra.mxu1 %v6079_v23  ;;  %v6663_v23 = vld [vmem:[%s10216_s4 + $0x2a4] sm:$0xf0] }
 0x5ee   :  { %4043 = vmatpush.bf16.msra.mxu2 %v6126_v17 }
 0x5ef   :  { %v2920_v3 = vpop.f32.mrf.mxu3  ;;  %4131 = vmatpush.bf16.msrb.mxu0 %v6130_v62 }
 0x5f0   :  { %v9355_v8 = vadd.f32 %v2920_v3, %v9109_v26  ;;  %v6068_v26 = vld [vmem:[%s10216_s4 + $0x280] sm:$0xf0]  ;;  %v6118_v3 = vor.u32 %v6663_v23, %v6117_v54  ;;  %3697 = vmatpush.bf16.msrb.mxu3 %v6067_v11 }
 0x5f1   :  { %v3011_v41 = vpop.f32.mrf.mxu1  ;;  %v6071_v17 = vor.u32 %v6658_v20, %v6068_v26 }
 0x5f2   :  { %v9378_v42 = vadd.f32 %v3011_v41, %v9112_v33  ;;  %v6122_v33 = vor.u32 %v6662_v10, %v6119_v55  ;;  %4044 = vmatpush.bf16.msra.mxu2 %v6118_v3 }
 0x5f3   :  { %3785 = vmatpush.bf16.msra.mxu1 %v6071_v17  ;;  %v9401_v11 = vpop.f32.mrf.mxu0  ;;  %v9403_v26 = vpop.f32.mrf.mxu2 }
 0x5f4   :  { %5970 = vmatmul.msk.bf16.gmra.mxu3 %vm2520_vm7, %v3087_v14  ;;  %5977 = vmatmul.msk.bf16.gmra.mxu1 %vm2520_vm7, %v3087_v14 }
 0x5f5   :  { %3679 = vmatmul.bf16.gmra.mxu2 %v8596_v43  ;;  %3767 = vmatmul.bf16.gmra.mxu0 %v8596_v43 }
 0x5f6   :  { %4132 = vmatpush.bf16.msrb.mxu0 %v6122_v33 }
 0x5f7   :  { %v2923_v62 = vpop.f32.mrf.mxu3 }
 0x5f8   :  { %v9396_v20 = vadd.f32 %v2923_v62, %v9122_v63 }
 0x5f9   :  { %v3013_v41 = vpop.f32.mrf.mxu1 }
 0x5fa   :  { %v9399_v15 = vadd.f32 %v3013_v41, %v9125_v36 }
 0x5fb   :  { %v9415_v63 = vpop.f32.mrf.mxu0  ;;  %v9417_v36 = vpop.f32.mrf.mxu2 }
 0x5ff   :  { %v2925_v14 = vpop.f32.mrf.mxu3 }
 0x600   :  { %v9406_v54 = vadd.f32 %v2925_v14, %v9128_v45  ;;  %v10477_v14 = vld [vmem:[#allocation35_spill] sm:$0xff] }
 0x601   :  { %v3016_v43 = vpop.f32.mrf.mxu1 }
 0x602   :  { %v9409_v23 = vadd.f32 %v3016_v43, %v9131_v19 }
 0x603   :  { %v9425_v55 = vpop.f32.mrf.mxu0  ;;  %v9431_v33 = vpop.f32.mrf.mxu2 }
 0x604   :  { %5971 = vmatmul.msk.bf16.gmra.mxu3 %vm2520_vm7, %v3086_v31  ;;  %5978 = vmatmul.msk.bf16.gmra.mxu1 %vm2520_vm7, %v3086_v31 }
 0x605   :  { %3684 = vmatmul.bf16.gmra.mxu2 %v8590_v21  ;;  %3772 = vmatmul.bf16.gmra.mxu0 %v8590_v21  ;;  %v3873_v21 = vrot.slane %v8374_v12, 2 }
 0x607   :  { %v2928_v17 = vpop.f32.mrf.mxu3 }
 0x608   :  { %v9420_v45 = vadd.f32 %v2928_v17, %v9138_v7  ;;  %v3872_v7 = vrot.slane %v8362_v22, 2 }
 0x609   :  { %v3018_v3 = vpop.f32.mrf.mxu1 }
 0x60a   :  { %v9423_v19 = vadd.f32 %v3018_v3, %v9141_v51  ;;  %v3874_v51 = vsel %vm1451_vm4, %v3872_v7, %v3873_v21 }
 0x60b   :  { %v9445_v17 = vpop.f32.mrf.mxu0  ;;  %v9450_v22 = vpop.f32.mrf.mxu2 }
 0x60f   :  { %v2930_v10 = vpop.f32.mrf.mxu3 }
 0x610   :  { %v9428_v31 = vadd.f32 %v2930_v10, %v9146_v60 }
 0x611   :  { %v3021_v62 = vpop.f32.mrf.mxu1 }
 0x612   :  { %v9434_v41 = vadd.f32 %v3021_v62, %v9150_v56  ;;  %v10479_v62 = vld [vmem:[#allocation33_spill] sm:$0xff] }
 0x613   :  { %v3878_v7 = vrot.slane %v10479_v62, 2  ;;  %v9457_v47 = vpop.f32.mrf.mxu0 }
 0x614   :  { %6080 = vmatmul.msk.bf16.vlgmr.msrb.gmra.mxu3 %vm2520_vm7, %v10477_v14  ;;  %6087 = vmatmul.msk.bf16.vlgmr.msra.gmra.mxu1 %vm2520_vm7, %v10477_v14 }
 0x615   :  { %4045 = vmatmul.bf16.vlgmr.msra.gmra.mxu2 %v3874_v51  ;;  %4133 = vmatmul.bf16.vlgmr.msrb.gmra.mxu0 %v3874_v51 }
 0x617   :  { %v2933_v60 = vpop.f32.mrf.mxu3 }
 0x618   :  { %v9443_v12 = vadd.f32 %v2933_v60, %v9157_v37  ;;  %v10481_v60 = vld [vmem:[#allocation10_spill] sm:$0xff] }
 0x619   :  { %v3023_v43 = vpop.f32.mrf.mxu1 }
 0x61a   :  { %v9448_v56 = vadd.f32 %v3023_v43, %v9160_v4  ;;  %v3879_v4 = vsel %vm1451_vm4, %v3873_v21, %v3878_v7 }
 0x61f   :  { %v2935_v3 = vpop.f32.mrf.mxu3 }
 0x620   :  { %v9453_v10 = vadd.f32 %v2935_v3, %v9164_v48  ;;  %v9467_v48 = vpop.f32.mrf.mxu2 }
 0x621   :  { %v3368_v14 = vpop.f32.mrf.mxu1 }
 0x622   :  { %10478 = vst [vmem:[#allocation43_spill] sm:$0xff] %v9453_v10  ;;  %v3369_v51 = vadd.f32 %v3368_v14, %v9195_v28 }
 0x624   :  { %v9460_v37 = vadd.f32 %v3369_v51, %v9167_v32  ;;  %6081 = vmatmul.msk.bf16.gmra.mxu3 %vm2520_vm7, %v10481_v60  ;;  %6088 = vmatmul.msk.bf16.gmra.mxu1 %vm2520_vm7, %v10481_v60  ;;  %v9477_v51 = vpop.f32.mrf.mxu0 }
 0x625   :  { %4050 = vmatmul.bf16.gmra.mxu2 %v3879_v4  ;;  %4138 = vmatmul.bf16.gmra.mxu0 %v3879_v4  ;;  %v3882_v4 = vrot.slane %v8404_v18, 2 }
 0x626   :  { %10480 = vst [vmem:[#allocation45_spill] sm:$0xff] %v9460_v37 }
 0x627   :  { %v3280_v43 = vpop.f32.mrf.mxu3 }
 0x628   :  { %v3281_v28 = vadd.f32 %v3280_v43, %v9200_v2  ;;  %v9479_v60 = vpop.f32.mrf.mxu2  ;;  %v3883_v43 = vsel %vm1451_vm4, %v3878_v7, %v3882_v4 }
 0x629   :  { %v3370_v3 = vpop.f32.mrf.mxu1 }
 0x62a   :  { %v9471_v62 = vadd.f32 %v3281_v28, %v9175_v29  ;;  %v3371_v32 = vadd.f32 %v3370_v3, %v9210_v25 }
 0x62c   :  { %v9475_v14 = vadd.f32 %v3371_v32, %v9178_v0  ;;  %v10482_v0 = vld [vmem:[#allocation36_spill] sm:$0xff]  ;;  %v10483_v32 = vld [vmem:[#allocation34_spill] sm:$0xff] }
 0x62f   :  { %v3282_v21 = vpop.f32.mrf.mxu3 }
 0x630   :  { %v3283_v37 = vadd.f32 %v3282_v21, %v9223_v46  ;;  %v9495_v46 = vpop.f32.mrf.mxu0  ;;  %v3886_v21 = vrot.slane %v10483_v32, 2  ;;  %v3890_v32 = vrot.slane %v8473_v27, 2  ;;  %v6114_v27 = vld [vmem:[%s10216_s4 + $0x340] sm:$0xff] }
 0x631   :  { %v3373_v10 = vpop.f32.mrf.mxu1 }
 0x632   :  { %v9484_v2 = vadd.f32 %v3283_v37, %v9182_v50  ;;  %v3374_v29 = vadd.f32 %v3373_v10, %v9260_v30  ;;  %v9498_v37 = vpop.f32.mrf.mxu2 }
 0x634   :  { %v9488_v25 = vadd.f32 %v3374_v29, %v9185_v9  ;;  %6082 = vmatmul.msk.bf16.gmra.mxu3 %vm2520_vm7, %v10482_v0  ;;  %6089 = vmatmul.msk.bf16.gmra.mxu1 %vm2520_vm7, %v10482_v0 }
 0x635   :  { %4055 = vmatmul.bf16.gmra.mxu2 %v3883_v43  ;;  %4143 = vmatmul.bf16.gmra.mxu0 %v3883_v43 }
 0x637   :  { %v3285_v18 = vpop.f32.mrf.mxu3 }
 0x638   :  { %v3286_v50 = vadd.f32 %v3285_v18, %v9262_v38  ;;  %v9509_v0 = vpop.f32.mrf.mxu0 }
 0x639   :  { %v3375_v30 = vpop.f32.mrf.mxu1 }
 0x63a   :  { %v9501_v9 = vadd.f32 %v3286_v50, %v9193_v59  ;;  %v3376_v10 = vadd.f32 %v3375_v30, %v9305_v44  ;;  %v9515_v59 = vpop.f32.mrf.mxu2 }
 0x63c   :  { %v9505_v28 = vadd.f32 %v3376_v10, %v9198_v57  ;;  %v10484_v57 = vld [vmem:[#allocation38_spill] sm:$0xff] }
 0x63f   :  { %v3287_v3 = vpop.f32.mrf.mxu3 }
 0x640   :  { %v3288_v7 = vadd.f32 %v3287_v3, %v9319_v35  ;;  %v3887_v35 = vsel %vm1451_vm4, %v3882_v4, %v3886_v21  ;;  %v9530_v30 = vpop.f32.mrf.mxu0 }
 0x641   :  { %v3378_v29 = vpop.f32.mrf.mxu1 }
 0x642   :  { %v9512_v38 = vadd.f32 %v3288_v7, %v9204_v39  ;;  %v3379_v43 = vadd.f32 %v3378_v29, %v9375_v40  ;;  %v9535_v3 = vpop.f32.mrf.mxu2 }
 0x644   :  { %v9518_v44 = vadd.f32 %v3379_v43, %v9207_v5  ;;  %6083 = vmatmul.msk.bf16.gmra.mxu3 %vm2520_vm7, %v10484_v57  ;;  %6090 = vmatmul.msk.bf16.gmra.mxu1 %vm2520_vm7, %v10484_v57  ;;  %v10485_v43 = vld [vmem:[#allocation39_spill] sm:$0xff] }
 0x645   :  { %4060 = vmatmul.bf16.gmra.mxu2 %v3887_v35  ;;  %4148 = vmatmul.bf16.gmra.mxu0 %v3887_v35 }
 0x647   :  { %v3290_v18 = vpop.f32.mrf.mxu3 }
 0x648   :  { %v3291_v39 = vadd.f32 %v3290_v18, %v9386_v49 }
 0x649   :  { %v3380_v50 = vpop.f32.mrf.mxu1 }
 0x64a   :  { %v9527_v40 = vadd.f32 %v3291_v39, %v9231_v52  ;;  %v3381_v5 = vadd.f32 %v3380_v50, %v9401_v11 }
 0x64c   :  { %v9533_v10 = vadd.f32 %v3381_v5, %v9246_v34  ;;  %v3891_v34 = vsel %vm1451_vm4, %v3886_v21, %v3890_v32 }
 0x64f   :  { %v3292_v7 = vpop.f32.mrf.mxu3 }
 0x650   :  { %v3293_v4 = vadd.f32 %v3292_v7, %v9403_v26  ;;  %v3966_v26 = vunpack.c.l.b16 %v6114_v27 }
 0x651   :  { %v3383_v29 = vpop.f32.mrf.mxu1 }
 0x652   :  { %v9540_v49 = vadd.f32 %v3293_v4, %v9266_v16  ;;  %v3384_v52 = vadd.f32 %v3383_v29, %v9415_v63  ;;  %v9554_v16 = vpop.f32.mrf.mxu0  ;;  %v3967_v63 = vunpack.c.h.b16 %v6114_v27  ;;  %v3988_v18 = vpack.c.b16 %v3966_v26, %v3966_v26 }
 0x653   :  { %v3894_v27 = vrot.slane %v8558_v6, 2 }
 0x654   :  { %v9544_v11 = vadd.f32 %v3384_v52, %v9281_v13  ;;  %6084 = vmatmul.msk.bf16.gmra.mxu3 %vm2520_vm7, %v10485_v43  ;;  %6091 = vmatmul.msk.bf16.gmra.mxu1 %vm2520_vm7, %v10485_v43  ;;  %v9556_v13 = vpop.f32.mrf.mxu2  ;;  %v3989_v39 = vpack.c.b16 %v3967_v63, %v3967_v63  ;;  %v4032_v7 = vsel %vm2542_vm6, %v3988_v18, 0  ;;  %v6191_v43 = vld [vmem:[%s10216_s4 + $0x338] sm:$0xf0]  ;;  %v6678_v18 = vld [vmem:[%s10216_s4 + $0x324] sm:$0xf] }
 0x655   :  { %4065 = vmatmul.bf16.gmra.mxu2 %v3891_v34  ;;  %4153 = vmatmul.bf16.gmra.mxu0 %v3891_v34 }
 0x656   :  { %v4035_v4 = vsel %vm2542_vm6, %v3989_v39, 0  ;;  %4086 = vmatpush.bf16.msra.mxu3 %v4032_v7 }
 0x657   :  { %v3295_v57 = vpop.f32.mrf.mxu3  ;;  %4174 = vmatpush.bf16.msrb.mxu1 %v4035_v4 }
 0x658   :  { %v3296_v35 = vadd.f32 %v3295_v57, %v9417_v36  ;;  %v6189_v36 = vld [vmem:[%s10216_s4 + $0x330] sm:$0xf]  ;;  %v6181_v57 = vld [vmem:[%s10216_s4 + $0x320] sm:$0xf] }
 0x659   :  { %v3385_v50 = vpop.f32.mrf.mxu1 }
 0x65a   :  { %v9560_v21 = vadd.f32 %v3296_v35, %v9308_v1  ;;  %v3386_v5 = vadd.f32 %v3385_v50, %v9425_v55  ;;  %v6681_v1 = vld [vmem:[%s10216_s4 + $0x334] sm:$0xf0]  ;;  %v6680_v55 = vld [vmem:[%s10216_s4 + $0x334] sm:$0xf]  ;;  %v9581_v26 = vpop.f32.mrf.mxu0  ;;  %v6679_v35 = vld [vmem:[%s10216_s4 + $0x324] sm:$0xf0] }
 0x65b   :  { %v6190_v52 = vor.u32 %v6681_v1, %v6189_v36  ;;  %v6194_v34 = vor.u32 %v6680_v55, %v6191_v43  ;;  %v6182_v50 = vor.u32 %v6679_v35, %v6181_v57  ;;  %v10486_v1 = vld [vmem:[#allocation42_spill] sm:$0xff]  ;;  %v3895_v55 = vsel %vm1451_vm4, %v3890_v32, %v3894_v27 }
 0x65c   :  { %v9566_v29 = vadd.f32 %v3386_v5, %v9325_v61  ;;  %v9593_v39 = vpop.f32.mrf.mxu2 }
 0x65d   :  { %4087 = vmatpush.bf16.msra.mxu3 %v6190_v52  ;;  %4175 = vmatpush.bf16.msrb.mxu1 %v6194_v34 }
 0x65f   :  { %v3297_v61 = vpop.f32.mrf.mxu3 }
 0x660   :  { %v3298_v63 = vadd.f32 %v3297_v61, %v9431_v33  ;;  %v6183_v33 = vld [vmem:[%s10216_s4 + $0x328] sm:$0xf0] }
 0x661   :  { %v3388_v6 = vpop.f32.mrf.mxu1  ;;  %v6186_v4 = vor.u32 %v6678_v18, %v6183_v33  ;;  %4088 = vmatpush.bf16.msra.mxu3 %v6182_v50 }
 0x662   :  { %v9599_v5 = vadd.f32 %v3298_v63, %v9355_v8  ;;  %v3389_v7 = vadd.f32 %v3388_v6, %v9445_v17  ;;  %v9615_v34 = vpop.f32.mrf.mxu0 }
 0x663   :  { %4176 = vmatpush.bf16.msrb.mxu1 %v6186_v4  ;;  %v3876_v4 = vrot.slane %v8610_v24, 2 }
 0x664   :  { %v9603_v36 = vadd.f32 %v3389_v7, %v9378_v42  ;;  %6085 = vmatmul.msk.bf16.gmra.mxu3 %vm2520_vm7, %v10486_v1  ;;  %6092 = vmatmul.msk.bf16.gmra.mxu1 %vm2520_vm7, %v10486_v1  ;;  %v9617_v61 = vpop.f32.mrf.mxu2 }
 0x665   :  { %4070 = vmatmul.bf16.gmra.mxu2 %v3895_v55  ;;  %4158 = vmatmul.bf16.gmra.mxu0 %v3895_v55 }
 0x667   :  { %v3300_v8 = vpop.f32.mrf.mxu3 }
 0x668   :  { %v3301_v52 = vadd.f32 %v3300_v8, %v9450_v22 }
 0x669   :  { %v3390_v17 = vpop.f32.mrf.mxu1 }
 0x66a   :  { %v9612_v43 = vadd.f32 %v3301_v52, %v9396_v20  ;;  %v3391_v42 = vadd.f32 %v3390_v17, %v9457_v47  ;;  %v10487_v47 = vld [vmem:[#allocation40_spill] sm:$0xff] }
 0x66c   :  { %v9620_v63 = vadd.f32 %v3391_v42, %v9399_v15  ;;  %v9634_v15 = vpop.f32.mrf.mxu0  ;;  %v9636_v6 = vpop.f32.mrf.mxu2 }
 0x66f   :  { %v3302_v32 = vpop.f32.mrf.mxu3 }
 0x670   :  { %v3303_v57 = vadd.f32 %v3302_v32, %v9467_v48  ;;  %v3880_v32 = vrot.slane %v8626_v58, 2 }
 0x671   :  { %v3393_v35 = vpop.f32.mrf.mxu1 }
 0x672   :  { %v9624_v18 = vadd.f32 %v3303_v57, %v9406_v54  ;;  %v3394_v22 = vadd.f32 %v3393_v35, %v9477_v51 }
 0x674   :  { %v9628_v20 = vadd.f32 %v3394_v22, %v9409_v23  ;;  %6086 = vmatmul.msk.bf16.gmra.mxu3 %vm2520_vm7, %v10487_v47  ;;  %6093 = vmatmul.msk.bf16.gmra.mxu1 %vm2520_vm7, %v10487_v47  ;;  %v10489_v22 = vld [vmem:[#allocation43_spill] sm:$0xff] }
 0x675   :  { %4075 = vmatmul.bf16.gmra.mxu2 %v3894_v27  ;;  %4163 = vmatmul.bf16.gmra.mxu0 %v3894_v27  ;;  %v3875_v27 = vrot.slane %v8600_v53, 2 }
 0x677   :  { %v3305_v48 = vpop.f32.mrf.mxu3  ;;  %v3877_v52 = vsel %vm1451_vm4, %v3875_v27, %v3876_v4 }
 0x678   :  { %v3306_v54 = vadd.f32 %v3305_v48, %v9479_v60  ;;  %v10491_v48 = vld [vmem:[#allocation45_spill] sm:$0xff] }
 0x679   :  { %v3395_v50 = vpop.f32.mrf.mxu1 }
 0x67a   :  { %v9640_v51 = vadd.f32 %v3306_v54, %v9420_v45  ;;  %v3396_v23 = vadd.f32 %v3395_v50, %v9495_v46  ;;  %v3753_v45 = vpop.f32.mrf.mxu0 }
 0x67c   :  { %v9644_v33 = vadd.f32 %v3396_v23, %v9423_v19 }
 0x67f   :  { %v3307_v7 = vpop.f32.mrf.mxu3 }
 0x680   :  { %v3308_v1 = vadd.f32 %v3307_v7, %v9498_v37  ;;  %v3665_v37 = vpop.f32.mrf.mxu2 }
 0x681   :  { %v3398_v55 = vpop.f32.mrf.mxu1 }
 0x682   :  { %v9650_v8 = vadd.f32 %v3308_v1, %v9428_v31  ;;  %v3399_v60 = vadd.f32 %v3398_v55, %v9509_v0  ;;  %v9667_v42 = vpop.f32.mrf.mxu0  ;;  %v10492_v55 = vld [vmem:[#allocation11_spill] sm:$0xff] }
 0x683   :  { %v3884_v27 = vrot.slane %v10492_v55, 2 }
 0x684   :  { %v9655_v46 = vadd.f32 %v3399_v60, %v9434_v41  ;;  %6195 = vmatmul.msk.bf16.vlgmr.msra.gmra.mxu3 %vm2520_vm7, %v3877_v52  ;;  %6202 = vmatmul.msk.bf16.vlgmr.msrb.gmra.mxu1 %vm2520_vm7, %v3877_v52 }
 0x687   :  { %v3310_v24 = vpop.f32.mrf.mxu3 }
 0x688   :  { %v3311_v19 = vadd.f32 %v3310_v24, %v9515_v59 }
 0x689   :  { %v3400_v53 = vpop.f32.mrf.mxu1 }
 0x68a   :  { %v9661_v31 = vadd.f32 %v3311_v19, %v9443_v12  ;;  %v3401_v0 = vadd.f32 %v3400_v53, %v9530_v30  ;;  %v9675_v12 = vpop.f32.mrf.mxu2  ;;  %v3881_v30 = vsel %vm1451_vm4, %v3876_v4, %v3880_v32  ;;  %v3758_v58 = vpop.f32.mrf.mxu0  ;;  %v3885_v19 = vsel %vm1451_vm4, %v3880_v32, %v3884_v27 }
 0x68c   :  { %v9665_v17 = vadd.f32 %v3401_v0, %v9448_v56 }
 0x68e   :  { %10488 = vst [vmem:[#allocation44_spill] sm:$0xff] %v9665_v17 }
 0x68f   :  { %v3312_v41 = vpop.f32.mrf.mxu3 }
 0x690   :  { %v3313_v57 = vadd.f32 %v3312_v41, %v9535_v3 }
 0x691   :  { %v3787_v35 = vpop.f32.mrf.mxu1 }
 0x692   :  { %v9672_v59 = vadd.f32 %v3313_v57, %v10489_v22  ;;  %v3788_v47 = vadd.f32 %v3787_v35, %v9554_v16  ;;  %v3670_v4 = vpop.f32.mrf.mxu2  ;;  %v9693_v52 = vpop.f32.mrf.mxu0  ;;  %v10493_v57 = vld [vmem:[#allocation37_spill] sm:$0xff] }
 0x693   :  { %v3888_v35 = vrot.slane %v10493_v57, 2 }
 0x694   :  { %10490 = vst [vmem:[#allocation46_spill] sm:$0xff] %v9672_v59  ;;  %v9679_v56 = vadd.f32 %v3788_v47, %v10491_v48  ;;  %6196 = vmatmul.msk.bf16.gmra.mxu3 %vm2520_vm7, %v3881_v30  ;;  %6203 = vmatmul.msk.bf16.gmra.mxu1 %vm2520_vm7, %v3881_v30 }
 0x697   :  { %v3699_v54 = vpop.f32.mrf.mxu3 }
 0x698   :  { %v3700_v3 = vadd.f32 %v3699_v54, %v9556_v13 }
 0x699   :  { %v3789_v50 = vpop.f32.mrf.mxu1 }
 0x69a   :  { %v9685_v23 = vadd.f32 %v3700_v3, %v9471_v62  ;;  %v3790_v16 = vadd.f32 %v3789_v50, %v9581_v26  ;;  %v3763_v41 = vpop.f32.mrf.mxu0 }
 0x69c   :  { %v9689_v7 = vadd.f32 %v3790_v16, %v9475_v14  ;;  %v9705_v14 = vpop.f32.mrf.mxu2 }
 0x69f   :  { %v3701_v1 = vpop.f32.mrf.mxu3 }
 0x6a0   :  { %v3702_v60 = vadd.f32 %v3701_v1, %v9593_v39 }
 0x6a1   :  { %v3792_v24 = vpop.f32.mrf.mxu1 }
 0x6a2   :  { %v9696_v13 = vadd.f32 %v3702_v60, %v9484_v2  ;;  %v3793_v62 = vadd.f32 %v3792_v24, %v9615_v34 }
 0x6a4   :  { %v9701_v26 = vadd.f32 %v3793_v62, %v9488_v25  ;;  %6197 = vmatmul.msk.bf16.gmra.mxu3 %vm2520_vm7, %v3885_v19  ;;  %6204 = vmatmul.msk.bf16.gmra.mxu1 %vm2520_vm7, %v3885_v19  ;;  %v3675_v47 = vpop.f32.mrf.mxu2 }
 0x6a7   :  { %v3704_v39 = vpop.f32.mrf.mxu3 }
 0x6a8   :  { %v3705_v53 = vadd.f32 %v3704_v39, %v9617_v61 }
 0x6a9   :  { %v3794_v0 = vpop.f32.mrf.mxu1 }
 0x6aa   :  { %v9709_v2 = vadd.f32 %v3705_v53, %v9501_v9  ;;  %v3795_v34 = vadd.f32 %v3794_v0, %v9634_v15  ;;  %v3889_v9 = vsel %vm1451_vm4, %v3884_v27, %v3888_v35 }
 0x6ac   :  { %v9713_v32 = vadd.f32 %v3795_v34, %v9505_v28  ;;  %v9726_v28 = vpop.f32.mrf.mxu0 }
 0x6af   :  { %v3706_v25 = vpop.f32.mrf.mxu3 }
 0x6b0   :  { %v3707_v22 = vadd.f32 %v3706_v25, %v9636_v6 }
 0x6b1   :  { %v3797_v30 = vpop.f32.mrf.mxu1 }
 0x6b2   :  { %v9718_v48 = vadd.f32 %v3707_v22, %v9512_v38  ;;  %v3798_v61 = vadd.f32 %v3797_v30, %v3753_v45  ;;  %v9733_v38 = vpop.f32.mrf.mxu2 }
 0x6b4   :  { %v9722_v54 = vadd.f32 %v3798_v61, %v9518_v44  ;;  %6198 = vmatmul.msk.bf16.gmra.mxu3 %vm2520_vm7, %v3889_v9  ;;  %6205 = vmatmul.msk.bf16.gmra.mxu1 %vm2520_vm7, %v3889_v9  ;;  %v3768_v45 = vpop.f32.mrf.mxu0  ;;  %v10494_v44 = vld [vmem:[#allocation12_spill] sm:$0xff] }
 0x6b5   :  { %v3892_v1 = vrot.slane %v10494_v44, 2 }
 0x6b7   :  { %v3709_v15 = vpop.f32.mrf.mxu3  ;;  %v3893_v60 = vsel %vm1451_vm4, %v3888_v35, %v3892_v1 }
 0x6b8   :  { %v3710_v3 = vadd.f32 %v3709_v15, %v3665_v37 }
 0x6b9   :  { %v9728_v6 = vpop.f32.mrf.mxu1 }
 0x6ba   :  { %v9731_v50 = vadd.f32 %v3710_v3, %v9527_v40  ;;  %v3680_v40 = vpop.f32.mrf.mxu2 }
 0x6bc   :  { %v9744_v19 = vpop.f32.mrf.mxu0 }
 0x6bf   :  { %v9735_v16 = vpop.f32.mrf.mxu3 }
 0x6c1   :  { %v3802_v55 = vpop.f32.mrf.mxu1 }
 0x6c2   :  { %v3803_v27 = vadd.f32 %v3802_v55, %v3758_v58  ;;  %v9751_v58 = vpop.f32.mrf.mxu2 }
 0x6c4   :  { %v9740_v24 = vadd.f32 %v3803_v27, %v9544_v11  ;;  %6199 = vmatmul.msk.bf16.gmra.mxu3 %vm2520_vm7, %v3893_v60  ;;  %6206 = vmatmul.msk.bf16.gmra.mxu1 %vm2520_vm7, %v3893_v60  ;;  %v10495_v11 = vld [vmem:[#allocation41_spill] sm:$0xff]  ;;  %v3773_v35 = vpop.f32.mrf.mxu0 }
 0x6c5   :  { %v3896_v34 = vrot.slane %v10495_v11, 2 }
 0x6c7   :  { %v3714_v37 = vpop.f32.mrf.mxu3  ;;  %v3897_v22 = vsel %vm1451_vm4, %v3892_v1, %v3896_v34 }
 0x6c8   :  { %v3715_v62 = vadd.f32 %v3714_v37, %v3670_v4 }
 0x6c9   :  { %v9746_v39 = vpop.f32.mrf.mxu1 }
 0x6ca   :  { %v9749_v53 = vadd.f32 %v3715_v62, %v9560_v21  ;;  %v3685_v61 = vpop.f32.mrf.mxu2 }
 0x6cc   :  { %v9767_v3 = vpop.f32.mrf.mxu0 }
 0x6cd   :  { %10496 = vst [vmem:[#allocation13_spill] sm:$0xff] %v9767_v3 }
 0x6cf   :  { %v9753_v0 = vpop.f32.mrf.mxu3 }
 0x6d1   :  { %v3807_v25 = vpop.f32.mrf.mxu1 }
 0x6d2   :  { %v3808_v57 = vadd.f32 %v3807_v25, %v3763_v41 }
 0x6d4   :  { %v9758_v4 = vadd.f32 %v3808_v57, %v9603_v36  ;;  %6200 = vmatmul.msk.bf16.gmra.mxu3 %vm2520_vm7, %v3897_v22  ;;  %6207 = vmatmul.msk.bf16.gmra.mxu1 %vm2520_vm7, %v3897_v22  ;;  %v9771_v36 = vpop.f32.mrf.mxu2 }
 0x6d5   :  { %10497 = vst [vmem:[#allocation47_spill] sm:$0xff] %v9771_v36 }
 0x6d7   :  { %v3719_v21 = vpop.f32.mrf.mxu3 }
 0x6d8   :  { %v3720_v30 = vadd.f32 %v3719_v21, %v3675_v47  ;;  %v4134_v47 = vpop.f32.mrf.mxu0 }
 0x6d9   :  { %v9762_v9 = vpop.f32.mrf.mxu1 }
 0x6da   :  { %v9765_v15 = vadd.f32 %v3720_v30, %v9612_v43 }
 0x6dc   :  { %v4046_v62 = vpop.f32.mrf.mxu2 }
 0x6df   :  { %v9769_v41 = vpop.f32.mrf.mxu3 }
 0x6e1   :  { %v3812_v44 = vpop.f32.mrf.mxu1 }
 0x6e2   :  { %v3813_v1 = vadd.f32 %v3812_v44, %v3768_v45  ;;  %v4136_v45 = vpop.f32.mrf.mxu0 }
 0x6e4   :  { %v9774_v55 = vadd.f32 %v3813_v1, %v9628_v20  ;;  %6201 = vmatmul.msk.bf16.gmra.mxu3 %vm2520_vm7, %v3896_v34  ;;  %6208 = vmatmul.msk.bf16.gmra.mxu1 %vm2520_vm7, %v3896_v34  ;;  %v4048_v22 = vpop.f32.mrf.mxu2 }
 0x6e7   :  { %v3724_v27 = vpop.f32.mrf.mxu3 }
 0x6e8   :  { %v3725_v60 = vadd.f32 %v3724_v27, %v3680_v40 }
 0x6e9   :  { %v9778_v43 = vpop.f32.mrf.mxu1 }
 0x6ea   :  { %v9781_v37 = vadd.f32 %v3725_v60, %v9640_v51  ;;  %v4139_v44 = vpop.f32.mrf.mxu0 }
 0x6ec   :  { %v4051_v1 = vpop.f32.mrf.mxu2 }
 0x6ef   :  { %v9783_v11 = vpop.f32.mrf.mxu3 }
 0x6f1   :  { %v3817_v25 = vpop.f32.mrf.mxu1 }
 0x6f2   :  { %v3818_v57 = vadd.f32 %v3817_v25, %v3773_v35  ;;  %v4141_v35 = vpop.f32.mrf.mxu0 }
 0x6f4   :  { %v9786_v20 = vadd.f32 %v3818_v57, %v9655_v46  ;;  %v4241_v46 = vld [vmem:[%s10217_s5] sm:$0x3] }
 0x6f6   :  { %10498 = vst [vmem:[#allocation14_spill] sm:$0xff] %v9786_v20 }
 0x6f7   :  { %v3729_v21 = vpop.f32.mrf.mxu3 }
 0x6f8   :  { %v3730_v34 = vadd.f32 %v3729_v21, %v3685_v61  ;;  %v9799_v61 = vperm.slane %v4241_v46, 1 }
 0x6f9   :  { %v9788_v30 = vpop.f32.mrf.mxu1 }
 0x6fa   :  { %10499 = vst [vmem:[#allocation48_spill] sm:$0xff] %v9788_v30  ;;  %v9791_v40 = vadd.f32 %v3730_v34, %v9661_v31 }
 0x6fc   :  { %10500 = vst [vmem:[#allocation2_spill] sm:$0xff] %v9791_v40  ;;  %v4053_v40 = vpop.f32.mrf.mxu2 }
 0x6ff   :  { %v9793_v51 = vpop.f32.mrf.mxu3 }
 0x700   :  { %10501 = vst [vmem:[#allocation3_spill] sm:$0xff] %v9793_v51 }
 0x701   :  { %v4178_v27 = vpop.f32.mrf.mxu1 }
 0x702   :  { %v4179_v60 = vadd.f32 %v4178_v27, %v4134_v47  ;;  %v9804_v27 = vperm.slane %v4241_v46, 0 }
 0x704   :  { %v4214_v59 = vadd.f32 %v4179_v60, %v9679_v56  ;;  %v4144_v60 = vpop.f32.mrf.mxu0  ;;  %v4056_v46 = vpop.f32.mrf.mxu2 }
 0x706   :  { %v4248_v51 = vadd.f32 %v9799_v61, %v4214_v59 }
 0x707   :  { %v4090_v25 = vpop.f32.mrf.mxu3 }
 0x708   :  { %v4091_v57 = vadd.f32 %v4090_v25, %v4046_v62  ;;  %v4276_v17 = vmax.f32 %v4248_v51, 0.0 }
 0x709   :  { %v4180_v21 = vpop.f32.mrf.mxu1 }
 0x70a   :  { %v4213_v31 = vadd.f32 %v4091_v57, %v9685_v23  ;;  %v4181_v34 = vadd.f32 %v4180_v21, %v4136_v45 }
 0x70c   :  { %v4216_v47 = vadd.f32 %v4181_v34, %v9689_v7  ;;  %v4247_v62 = vadd.f32 %v9804_v27, %v4213_v31 }
 0x70e   :  { %v4250_v56 = vadd.f32 %v9799_v61, %v4216_v47  ;;  %v4275_v57 = vmax.f32 %v4247_v62, 0.0 }
 0x70f   :  { %v4092_v36 = vpop.f32.mrf.mxu3 }
 0x710   :  { %v4093_v20 = vadd.f32 %v4092_v36, %v4048_v22  ;;  %v4278_v30 = vmax.f32 %v4250_v56, 0.0  ;;  %v4146_v36 = vpop.f32.mrf.mxu0 }
 0x711   :  { %v4183_v3 = vpop.f32.mrf.mxu1 }
 0x712   :  { %v4215_v23 = vadd.f32 %v4093_v20, %v9696_v13  ;;  %v4184_v45 = vadd.f32 %v4183_v3, %v4139_v44  ;;  %v9809_v25 = vpack.c.bf16 %v4278_v30, %v4276_v17  ;;  %v4058_v20 = vpop.f32.mrf.mxu2 }
 0x714   :  { %v4249_v59 = vadd.f32 %v9804_v27, %v4215_v23  ;;  %v4218_v7 = vadd.f32 %v4184_v45, %v9701_v26 }
 0x716   :  { %v4277_v21 = vmax.f32 %v4249_v59, 0.0  ;;  %v4252_v13 = vadd.f32 %v9799_v61, %v4218_v7  ;;  %v3800_v7 = vadd.f32 %v9728_v6, %v9667_v42 }
 0x717   :  { %v4095_v34 = vpop.f32.mrf.mxu3 }
 0x718   :  { %v4096_v47 = vadd.f32 %v4095_v34, %v4051_v1  ;;  %v9813_v51 = vpack.c.bf16 %v4277_v21, %v4275_v57  ;;  %v4280_v30 = vmax.f32 %v4252_v13, 0.0 }
 0x719   :  { %v4185_v22 = vpop.f32.mrf.mxu1 }
 0x71a   :  { %v4217_v31 = vadd.f32 %v4096_v47, %v9709_v2  ;;  %v4186_v56 = vadd.f32 %v4185_v22, %v4141_v35  ;;  %v4149_v2 = vpop.f32.mrf.mxu0 }
 0x71c   :  { %v4220_v17 = vadd.f32 %v4186_v56, %v9713_v32  ;;  %v4251_v1 = vadd.f32 %v9804_v27, %v4217_v31  ;;  %v4061_v31 = vpop.f32.mrf.mxu2 }
 0x71e   :  { %v4254_v3 = vadd.f32 %v9799_v61, %v4220_v17  ;;  %v4279_v21 = vmax.f32 %v4251_v1, 0.0  ;;  %v3712_v17 = vadd.f32 %v9735_v16, %v9675_v12 }
 0x71f   :  { %v4097_v26 = vpop.f32.mrf.mxu3 }
 0x720   :  { %v4098_v44 = vadd.f32 %v4097_v26, %v4053_v40  ;;  %v4282_v62 = vmax.f32 %v4254_v3, 0.0 }
 0x721   :  { %v4188_v23 = vpop.f32.mrf.mxu1 }
 0x722   :  { %v4219_v45 = vadd.f32 %v4098_v44, %v9718_v48  ;;  %v4189_v59 = vadd.f32 %v4188_v23, %v4144_v60  ;;  %v9821_v57 = vpack.c.bf16 %v4282_v62, %v4280_v30  ;;  %v3833_v48 = vadd.f32 %v3800_v7, %v9533_v10  ;;  %v4151_v42 = vpop.f32.mrf.mxu0 }
 0x724   :  { %v4253_v35 = vadd.f32 %v9804_v27, %v4219_v45  ;;  %v4222_v32 = vadd.f32 %v4189_v59, %v9722_v54  ;;  %v4063_v12 = vpop.f32.mrf.mxu2  ;;  %v3805_v59 = vadd.f32 %v9746_v39, %v9693_v52 }
 0x726   :  { %v4281_v34 = vmax.f32 %v4253_v35, 0.0  ;;  %v4256_v54 = vadd.f32 %v9799_v61, %v4222_v32 }
 0x727   :  { %v4100_v40 = vpop.f32.mrf.mxu3 }
 0x728   :  { %v4101_v47 = vadd.f32 %v4100_v40, %v4056_v46  ;;  %v9827_v22 = vpack.c.bf16 %v4281_v34, %v4279_v21  ;;  %v3832_v46 = vadd.f32 %v3712_v17, %v9540_v49  ;;  %v4284_v30 = vmax.f32 %v4256_v54, 0.0 }
 0x729   :  { %v4190_v56 = vpop.f32.mrf.mxu1 }
 0x72a   :  { %v4221_v60 = vadd.f32 %v4101_v47, %v9731_v50  ;;  %v4191_v13 = vadd.f32 %v4190_v56, %v4146_v36  ;;  %v4154_v32 = vpop.f32.mrf.mxu0  ;;  %v3717_v56 = vadd.f32 %v9753_v0, %v9705_v14 }
 0x72c   :  { %v4224_v3 = vadd.f32 %v4191_v13, %v3833_v48  ;;  %v4255_v10 = vadd.f32 %v9804_v27, %v4221_v60  ;;  %v4066_v52 = vpop.f32.mrf.mxu2 }
 0x72e   :  { %v4258_v6 = vadd.f32 %v9799_v61, %v4224_v3  ;;  %v4283_v35 = vmax.f32 %v4255_v10, 0.0 }
 0x72f   :  { %v4102_v26 = vpop.f32.mrf.mxu3 }
 0x730   :  { %v4103_v44 = vadd.f32 %v4102_v26, %v4058_v20  ;;  %v4286_v62 = vmax.f32 %v4258_v6, 0.0  ;;  %v3810_v26 = vadd.f32 %v9762_v9, %v9726_v28 }
 0x731   :  { %v4193_v23 = vpop.f32.mrf.mxu1 }
 0x732   :  { %v4223_v50 = vadd.f32 %v4103_v44, %v3832_v46  ;;  %v4194_v36 = vadd.f32 %v4193_v23, %v4149_v2  ;;  %v9837_v1 = vpack.c.bf16 %v4286_v62, %v4284_v30  ;;  %v3837_v2 = vadd.f32 %v3805_v59, %v9566_v29  ;;  %v4156_v3 = vpop.f32.mrf.mxu0 }
 0x734   :  { %v4257_v16 = vadd.f32 %v9804_v27, %v4223_v50  ;;  %v4226_v45 = vadd.f32 %v4194_v36, %v9740_v24  ;;  %v4068_v44 = vpop.f32.mrf.mxu2  ;;  %v3841_v50 = vadd.f32 %v3810_v26, %v9620_v63 }
 0x736   :  { %v4285_v49 = vmax.f32 %v4257_v16, 0.0  ;;  %v4260_v24 = vadd.f32 %v9799_v61, %v4226_v45  ;;  %v3722_v45 = vadd.f32 %v9769_v41, %v9733_v38 }
 0x737   :  { %v4105_v20 = vpop.f32.mrf.mxu3 }
 0x738   :  { %v4106_v7 = vadd.f32 %v4105_v20, %v4061_v31  ;;  %v9843_v21 = vpack.c.bf16 %v4285_v49, %v4283_v35  ;;  %v3836_v31 = vadd.f32 %v3717_v56, %v9599_v5  ;;  %v4288_v13 = vmax.f32 %v4260_v24, 0.0 }
 0x739   :  { %v4195_v34 = vpop.f32.mrf.mxu1 }
 0x73a   :  { %v4225_v40 = vadd.f32 %v4106_v7, %v9749_v53  ;;  %v4196_v47 = vadd.f32 %v4195_v34, %v4151_v42  ;;  %v4159_v16 = vpop.f32.mrf.mxu0 }
 0x73c   :  { %v4228_v48 = vadd.f32 %v4196_v47, %v3837_v2  ;;  %v4259_v53 = vadd.f32 %v9804_v27, %v4225_v40  ;;  %v4071_v63 = vpop.f32.mrf.mxu2 }
 0x73e   :  { %v4262_v39 = vadd.f32 %v9799_v61, %v4228_v48  ;;  %v4287_v46 = vmax.f32 %v4259_v53, 0.0 }
 0x73f   :  { %v4107_v60 = vpop.f32.mrf.mxu3 }
 0x740   :  { %v4108_v17 = vadd.f32 %v4107_v60, %v4063_v12  ;;  %v4290_v54 = vmax.f32 %v4262_v39, 0.0 }
 0x741   :  { %v4198_v29 = vpop.f32.mrf.mxu1 }
 0x742   :  { %v4227_v42 = vadd.f32 %v4108_v17, %v3836_v31  ;;  %v9853_v6 = vpack.c.bf16 %v4290_v54, %v4288_v13  ;;  %v4199_v0 = vadd.f32 %v4198_v29, %v4154_v32  ;;  %v4161_v56 = vpop.f32.mrf.mxu0 }
 0x744   :  { %v4261_v14 = vadd.f32 %v9804_v27, %v4227_v42  ;;  %v4230_v62 = vadd.f32 %v4199_v0, %v9758_v4  ;;  %v3840_v4 = vadd.f32 %v3722_v45, %v9624_v18  ;;  %v4073_v54 = vpop.f32.mrf.mxu2  ;;  %v10504_v45 = vld [vmem:[#allocation14_spill] sm:$0xff] }
 0x746   :  { %v4289_v30 = vmax.f32 %v4261_v14, 0.0  ;;  %v4264_v59 = vadd.f32 %v9799_v61, %v4230_v62 }
 0x747   :  { %v4110_v5 = vpop.f32.mrf.mxu3 }
 0x748   :  { %v9859_v23 = vpack.c.bf16 %v4289_v30, %v4287_v46  ;;  %v4111_v36 = vadd.f32 %v4110_v5, %v4066_v52  ;;  %v4292_v32 = vmax.f32 %v4264_v59, 0.0 }
 0x749   :  { %v4200_v10 = vpop.f32.mrf.mxu1 }
 0x74a   :  { %v4201_v12 = vadd.f32 %v4200_v10, %v4156_v3  ;;  %v4229_v9 = vadd.f32 %v4111_v36, %v9765_v15  ;;  %v3815_v15 = vadd.f32 %v9778_v43, %v9744_v19  ;;  %v3727_v3 = vadd.f32 %v9783_v11, %v9751_v58  ;;  %v4164_v42 = vpop.f32.mrf.mxu0  ;;  %v10502_v10 = vld [vmem:[#allocation13_spill] sm:$0xff] }
 0x74c   :  { %v4232_v28 = vadd.f32 %v4201_v12, %v3841_v50  ;;  %v4263_v2 = vadd.f32 %v9804_v27, %v4229_v9  ;;  %v3845_v31 = vadd.f32 %v3815_v15, %v9644_v33  ;;  %v4076_v62 = vpop.f32.mrf.mxu2 }
 0x74e   :  { %v4266_v35 = vadd.f32 %v9799_v61, %v4232_v28  ;;  %v4291_v24 = vmax.f32 %v4263_v2, 0.0 }
 0x74f   :  { %v4112_v49 = vpop.f32.mrf.mxu3 }
 0x750   :  { %v4294_v20 = vmax.f32 %v4266_v35, 0.0  ;;  %v4113_v7 = vadd.f32 %v4112_v49, %v4068_v44  ;;  %v10505_v35 = vld [vmem:[#allocation44_spill] sm:$0xff] }
 0x751   :  { %v4203_v34 = vpop.f32.mrf.mxu1 }
 0x752   :  { %v4231_v40 = vadd.f32 %v4113_v7, %v3840_v4  ;;  %v9869_v47 = vpack.c.bf16 %v4294_v20, %v4292_v32  ;;  %v4204_v41 = vadd.f32 %v4203_v34, %v4159_v16  ;;  %v4166_v28 = vpop.f32.mrf.mxu0  ;;  %v10506_v20 = vld [vmem:[#allocation47_spill] sm:$0xff] }
 0x753   :  { %v10507_v7 = vld [vmem:[#allocation3_spill] sm:$0xff] }
 0x754   :  { %v4265_v38 = vadd.f32 %v9804_v27, %v4231_v40  ;;  %v4234_v52 = vadd.f32 %v4204_v41, %v9774_v55  ;;  %v3844_v55 = vadd.f32 %v3727_v3, %v9650_v8  ;;  %v10508_v40 = vld [vmem:[#allocation2_spill] sm:$0xff] }
 0x756   :  { %v4293_v48 = vmax.f32 %v4265_v38, 0.0  ;;  %v4268_v29 = vadd.f32 %v9799_v61, %v4234_v52 }
 0x757   :  { %v4115_v18 = vpop.f32.mrf.mxu3 }
 0x758   :  { %v4316_v39 = vpack.c.bf16 %v4293_v48, %v4291_v24  ;;  %v4116_v13 = vadd.f32 %v4115_v18, %v4071_v63  ;;  %v4296_v0 = vmax.f32 %v4268_v29, 0.0  ;;  %v3732_v63 = vadd.f32 %v10507_v7, %v10506_v20  ;;  %v10509_v24 = vld [vmem:[#allocation46_spill] sm:$0xff]  ;;  %v6711_v20 = vld [vmem:[%s10219_s7 + $0xd8] sm:$0xff] }
 0x759   :  { %v4205_v60 = vpop.f32.mrf.mxu1  ;;  %v6716_v7 = vld [vmem:[%s10219_s7 + $0x100] sm:$0xff] }
 0x75a   :  { %v4206_v17 = vadd.f32 %v4205_v60, %v4161_v56  ;;  %v4233_v19 = vadd.f32 %v4116_v13, %v9781_v37  ;;  %v10503_v37 = vld [vmem:[#allocation48_spill] sm:$0xff]  ;;  %v4078_v56 = vpop.f32.mrf.mxu2  ;;  %v3848_v48 = vadd.f32 %v3732_v63, %v10509_v24  ;;  %v6715_v24 = vld [vmem:[%s10219_s7 + $0xf8] sm:$0xff] }
 0x75b   :  { %v3820_v50 = vadd.f32 %v10503_v37, %v10502_v10  ;;  %v6694_v10 = vld [vmem:[%s10219_s7 + $0x50] sm:$0xff]  ;;  %v6721_v37 = vld [vmem:[%s10219_s7 + $0x128] sm:$0xff] }
 0x75c   :  { %v4236_v53 = vadd.f32 %v4206_v17, %v3845_v31  ;;  %v4267_v30 = vadd.f32 %v9804_v27, %v4233_v19 }
 0x75d   :  { %v3849_v49 = vadd.f32 %v3820_v50, %v10505_v35  ;;  %v6717_v35 = vld [vmem:[%s10219_s7 + $0x108] sm:$0xff] }
 0x75e   :  { %v4270_v43 = vadd.f32 %v9799_v61, %v4236_v53  ;;  %v4295_v36 = vmax.f32 %v4267_v30, 0.0  ;;  %v6697_v30 = vld [vmem:[%s10219_s7 + $0x68] sm:$0xff] }
 0x75f   :  { %v4117_v14 = vpop.f32.mrf.mxu3 }
 0x760   :  { %v4298_v26 = vmax.f32 %v4270_v43, 0.0  ;;  %v4118_v33 = vadd.f32 %v4117_v14, %v4073_v54  ;;  %v6701_v43 = vld [vmem:[%s10219_s7 + $0x88] sm:$0xff]  ;;  %v6700_v14 = vld [vmem:[%s10219_s7 + $0x80] sm:$0xff] }
 0x761   :  { %v4208_v46 = vpop.f32.mrf.mxu1  ;;  %4562 = vmatpush.bf16.msra.mxu0 %v6701_v43 }
 0x762   :  { %v4235_v44 = vadd.f32 %v4118_v33, %v3844_v55  ;;  %v4319_v5 = vpack.c.bf16 %v4298_v26, %v4296_v0  ;;  %v4209_v11 = vadd.f32 %v4208_v46, %v4164_v42  ;;  %v6686_v42 = vld [vmem:[%s10219_s7 + $0x10] sm:$0xff]  ;;  %v6692_v55 = vld [vmem:[%s10219_s7 + $0x40] sm:$0xff]  ;;  %v6685_v0 = vld [vmem:[%s10219_s7 + $0x8] sm:$0xff] }
 0x763   :  { %v6684_v26 = vld [vmem:[%s10219_s7] sm:$0xff]  ;;  %v6699_v33 = vld [vmem:[%s10219_s7 + $0x78] sm:$0xff]  ;;  %v6698_v46 = vld [vmem:[%s10219_s7 + $0x70] sm:$0xff] }
 0x764   :  { %v4269_v58 = vadd.f32 %v9804_v27, %v4235_v44  ;;  %v4238_v8 = vadd.f32 %v4209_v11, %v10504_v45  ;;  %v6696_v44 = vld [vmem:[%s10219_s7 + $0x60] sm:$0xff]  ;;  %v6695_v11 = vld [vmem:[%s10219_s7 + $0x58] sm:$0xff] }
 0x765   :  { %4563 = vmatpush.bf16.msra.mxu0 %v6700_v14  ;;  %v6719_v45 = vld [vmem:[%s10219_s7 + $0x118] sm:$0xff] }
 0x766   :  { %v4297_v12 = vmax.f32 %v4269_v58, 0.0  ;;  %v4272_v34 = vadd.f32 %v9799_v61, %v4238_v8  ;;  %v6702_v58 = vld [vmem:[%s10219_s7 + $0x90] sm:$0xff] }
 0x767   :  { %v4120_v16 = vpop.f32.mrf.mxu3 }
 0x768   :  { %v4318_v59 = vpack.c.bf16 %v4297_v12, %v4295_v36  ;;  %v4121_v4 = vadd.f32 %v4120_v16, %v4076_v62  ;;  %v4300_v18 = vmax.f32 %v4272_v34, 0.0  ;;  %v6720_v36 = vld [vmem:[%s10219_s7 + $0x120] sm:$0xff]  ;;  %v6710_v34 = vld [vmem:[%s10219_s7 + $0xd0] sm:$0xff] }
 0x769   :  { %v4210_v9 = vpop.f32.mrf.mxu1  ;;  %4564 = vmatpush.bf16.msra.mxu0 %v6699_v33 }
 0x76a   :  { %v4211_v32 = vadd.f32 %v4210_v9, %v4166_v28  ;;  %v4237_v38 = vadd.f32 %v4121_v4, %v10508_v40  ;;  %v6718_v28 = vld [vmem:[%s10219_s7 + $0x110] sm:$0xff]  ;;  %v6723_v4 = vld [vmem:[%s10219_s7 + $0x138] sm:$0xff] }
 0x76c   :  { %v4240_v2 = vadd.f32 %v4211_v32, %v3849_v49  ;;  %v4271_v31 = vadd.f32 %v9804_v27, %v4237_v38  ;;  %v6722_v38 = vld [vmem:[%s10219_s7 + $0x130] sm:$0xff] }
 0x76d   :  { %4565 = vmatpush.bf16.msra.mxu0 %v6698_v46  ;;  %v6712_v46 = vld [vmem:[%s10219_s7 + $0xe0] sm:$0xff] }
 0x76e   :  { %v4274_v41 = vadd.f32 %v9799_v61, %v4240_v2  ;;  %v4299_v29 = vmax.f32 %v4271_v31, 0.0 }
 0x76f   :  { %v4122_v15 = vpop.f32.mrf.mxu3 }
 0x770   :  { %v4302_v52 = vmax.f32 %v4274_v41, 0.0  ;;  %v4123_v60 = vadd.f32 %v4122_v15, %v4078_v56 }
 0x771   :  { %4566 = vmatpush.bf16.msra.mxu0 %v6697_v30 }
 0x772   :  { %v4239_v13 = vadd.f32 %v4123_v60, %v3848_v48  ;;  %v4321_v17 = vpack.c.bf16 %v4302_v52, %v4300_v18  ;;  %v6709_v18 = vld [vmem:[%s10219_s7 + $0xc8] sm:$0xff] }
 0x774   :  { %v4273_v54 = vadd.f32 %v9804_v27, %v4239_v13  ;;  %v4349_v3 = vsel %vm1451_vm4, %v4321_v17, 0  ;;  %v6682_v27 = vld [vmem:[%s10218_s6] sm:$0xff] }
 0x775   :  { %4375 = vmatpush.bf16.msrb.mxu3 %v4349_v3  ;;  %4567 = vmatpush.bf16.msra.mxu0 %v6696_v44 }
 0x776   :  { %v4301_v53 = vmax.f32 %v4273_v54, 0.0 }
 0x778   :  { %v4320_v19 = vpack.c.bf16 %v4301_v53, %v4299_v29  ;;  %v6714_v53 = vld [vmem:[%s10219_s7 + $0xf0] sm:$0xff] }
 0x779   :  { %4376 = vmatpush.bf16.msrb.mxu3 %v4319_v5  ;;  %v6703_v5 = vld [vmem:[%s10219_s7 + $0x98] sm:$0xff]  ;;  %4568 = vmatpush.bf16.msra.mxu0 %v6695_v11 }
 0x77a   :  { %v4346_v61 = vsel %vm1451_vm4, %v4320_v19, 0  ;;  %4591 = vmatpush.bf16.msra.mxu1 %v6703_v5 }
 0x77b   :  { %4352 = vmatpush.bf16.msrb.mxu2 %v4346_v61  ;;  %v6708_v61 = vld [vmem:[%s10219_s7 + $0xc0] sm:$0xff] }
 0x77d   :  { %4377 = vmatpush.bf16.msrb.mxu3 %v9869_v47  ;;  %v6687_v47 = vld [vmem:[%s10219_s7 + $0x18] sm:$0xff]  ;;  %4569 = vmatpush.bf16.msra.mxu0 %v6694_v10 }
 0x77e   :  { %4592 = vmatpush.bf16.msra.mxu1 %v6702_v58  ;;  %v6705_v58 = vld [vmem:[%s10219_s7 + $0xa8] sm:$0xff] }
 0x77f   :  { %4353 = vmatpush.bf16.msrb.mxu2 %v4318_v59 }
 0x781   :  { %4378 = vmatpush.bf16.msrb.mxu3 %v9853_v6  ;;  %4829 = vmatpush.bf16.msrb.mxu0 %v6711_v20 }
 0x783   :  { %4354 = vmatpush.bf16.msrb.mxu2 %v4316_v39  ;;  %v6693_v39 = vld [vmem:[%s10219_s7 + $0x48] sm:$0xff] }
 0x785   :  { %4379 = vmatpush.bf16.msrb.mxu3 %v9837_v1  ;;  %v6683_v1 = vld [vmem:[%s10218_s6 + $0x8] sm:$0xff]  ;;  %4830 = vmatpush.bf16.msrb.mxu0 %v6710_v34 }
 0x787   :  { %4355 = vmatpush.bf16.msrb.mxu2 %v9859_v23  ;;  %v6688_v23 = vld [vmem:[%s10219_s7 + $0x20] sm:$0xff] }
 0x789   :  { %4380 = vmatpush.bf16.msrb.mxu3 %v9821_v57  ;;  %v4307_v57 = vld [vmem:[%s10218_s6 + $0x10] sm:$0xf]  ;;  %4831 = vmatpush.bf16.msrb.mxu0 %v6709_v18 }
 0x78b   :  { %4356 = vmatpush.bf16.msrb.mxu2 %v9843_v21  ;;  %v4331_v21 = vunpack.c.l.b16 %v4307_v57 }
 0x78d   :  { %4381 = vmatpush.bf16.msrb.mxu3 %v9809_v25  ;;  %v4334_v6 = vpack.c.b16 %v4331_v21, %v4331_v21  ;;  %v6691_v25 = vld [vmem:[%s10219_s7 + $0x38] sm:$0xff]  ;;  %4832 = vmatpush.bf16.msrb.mxu0 %v6708_v61 }
 0x78f   :  { %4357 = vmatpush.bf16.msrb.mxu2 %v9827_v22  ;;  %v6689_v22 = vld [vmem:[%s10219_s7 + $0x28] sm:$0xff] }
 0x790   :  { %6220 = vmatmul.msk.bf16.vlgmr.msrb.gmra.mxu3 %vm4335_vm8, %v6682_v27 }
 0x791   :  { %4703 = vmatpush.bf16.msra.mxu3 %v6693_v39  ;;  %v6707_v39 = vld [vmem:[%s10219_s7 + $0xb8] sm:$0xff] }
 0x792   :  { %4833 = vmatpush.bf16.msrb.mxu0 %v6707_v39 }
 0x793   :  { %4358 = vmatpush.bf16.msrb.mxu2 %v9813_v51  ;;  %v6690_v51 = vld [vmem:[%s10219_s7 + $0x30] sm:$0xff] }
 0x795   :  { %4704 = vmatpush.bf16.msra.mxu3 %v6692_v55  ;;  %v6713_v55 = vld [vmem:[%s10219_s7 + $0xe8] sm:$0xff] }
 0x796   :  { %6217 = vmatmul.msk.bf16.vlgmr.msrb.gmra.mxu2 %vm4335_vm8, %v6682_v27  ;;  %4858 = vmatpush.bf16.msrb.mxu1 %v6713_v55 }
 0x797   :  { %4674 = vmatpush.bf16.msra.mxu2 %v6691_v25 }
 0x799   :  { %5024 = vmatpush.bf16.msrb.mxu3 %v6723_v4 }
 0x79a   :  { %4859 = vmatpush.bf16.msrb.mxu1 %v6712_v46  ;;  %v6724_v46 = vld [vmem:[%s10219_s7 + $0x140] sm:$0xff] }
 0x79b   :  { %4675 = vmatpush.bf16.msra.mxu2 %v6690_v51 }
 0x79d   :  { %5025 = vmatpush.bf16.msrb.mxu3 %v6722_v38 }
 0x79f   :  { %4676 = vmatpush.bf16.msra.mxu2 %v6689_v22 }
 0x7a0   :  { %6221 = vmatmul.msk.bf16.gmra.mxu3 %vm4335_vm8, %v6683_v1 }
 0x7a3   :  { %4677 = vmatpush.bf16.msra.mxu2 %v6688_v23 }
 0x7a6   :  { %6218 = vmatmul.msk.bf16.gmra.mxu2 %vm4335_vm8, %v6683_v1 }
 0x7a7   :  { %4678 = vmatpush.bf16.msra.mxu2 %v6687_v47 }
 0x7ab   :  { %4679 = vmatpush.bf16.msra.mxu2 %v6686_v42 }
 0x7af   :  { %4680 = vmatpush.bf16.msra.mxu2 %v6685_v0  ;;  %v6706_v0 = vld [vmem:[%s10219_s7 + $0xb0] sm:$0xff] }
 0x7b0   :  { %6222 = vmatmul.msk.bf16.gmra.mxu3 %vm4335_vm8, %v4334_v6  ;;  %4834 = vmatpush.bf16.msrb.mxu0 %v6706_v0  ;;  %v6725_v0 = vld [vmem:[%s10219_s7 + $0x148] sm:$0xff] }
 0x7b3   :  { %4681 = vmatpush.bf16.msra.mxu2 %v6684_v26 }
 0x7b4   :  { %4835 = vmatpush.bf16.msrb.mxu0 %v6705_v58 }
 0x7b6   :  { %6219 = vmatmul.msk.bf16.gmra.mxu2 %vm4335_vm8, %v4334_v6 }
 0x7b7   :  { %4995 = vmatpush.bf16.msrb.mxu2 %v6721_v37 }
 0x7bb   :  { %4996 = vmatpush.bf16.msrb.mxu2 %v6720_v36  ;;  %v6704_v36 = vld [vmem:[%s10219_s7 + $0xa0] sm:$0xff] }
 0x7bc   :  { %4836 = vmatpush.bf16.msrb.mxu0 %v6704_v36 }
 0x7bf   :  { %4997 = vmatpush.bf16.msrb.mxu2 %v6719_v45 }
 0x7c3   :  { %4998 = vmatpush.bf16.msrb.mxu2 %v6718_v28 }
 0x7c7   :  { %4999 = vmatpush.bf16.msrb.mxu2 %v6717_v35 }
 0x7cb   :  { %5000 = vmatpush.bf16.msrb.mxu2 %v6716_v7 }
 0x7cf   :  { %5001 = vmatpush.bf16.msrb.mxu2 %v6715_v24 }
 0x7d3   :  { %5002 = vmatpush.bf16.msrb.mxu2 %v6714_v53  ;;  %v6730_v53 = vld [vmem:[%s10219_s7 + $0x170] sm:$0xff] }
 0x813   :  { %v4383_v62 = vpop.f32.mrf.mxu3 }
 0x819   :  { %v4360_v50 = vpop.f32.mrf.mxu2 }
 0x81b   :  { %v4385_v12 = vpop.f32.mrf.mxu3 }
 0x81c   :  { %v9982_v16 = vpack.c.bf16 %v4385_v12, %v4383_v62 }
 0x81e   :  { %6326 = vmatmul.msk.bf16.vlgmr.msra.gmra.mxu3 %vm247_vm0, %v9982_v16  ;;  %v4459_v49 = vshll.u32 %v9982_v16, 16  ;;  %v4457_v56 = vshrl.u32 %v9982_v16, 16  ;;  %v5070_v52 = vrot.slane %v9982_v16, 2 }
 0x820   :  { %v4461_v40 = vrot.slane %v4459_v49, 1  ;;  %v4908_v35 = vrot.slane %v4457_v56, 1  ;;  %v4909_v4 = vrot.slane %v4459_v49, 2 }
 0x821   :  { %v4362_v8 = vpop.f32.mrf.mxu2 }
 0x822   :  { %v9989_v59 = vpack.c.bf16 %v4362_v8, %v4360_v50  ;;  %v4462_v60 = vor.u32 %v4461_v40, %v4457_v56  ;;  %v4910_v34 = vor.u32 %v4909_v4, %v4908_v35 }
 0x823   :  { %v4388_v9 = vpop.f32.mrf.mxu3 }
 0x824   :  { %4682 = vmatmul.bf16.vlgmr.msra.gmra.mxu2 %v9989_v59  ;;  %v4447_v41 = vshll.u32 %v9989_v59, 16  ;;  %v4445_v27 = vshrl.u32 %v9989_v59, 16  ;;  %v5067_v21 = vrot.slane %v9989_v59, 2 }
 0x826   :  { %v4449_v3 = vrot.slane %v4447_v41, 1  ;;  %v4901_v40 = vrot.slane %v4445_v27, 1  ;;  %v4902_v38 = vrot.slane %v4447_v41, 2  ;;  %v6731_v41 = vld [vmem:[%s10219_s7 + $0x178] sm:$0xff] }
 0x828   :  { %v4450_v25 = vor.u32 %v4449_v3, %v4445_v27  ;;  %v4903_v49 = vor.u32 %v4902_v38, %v4901_v40 }
 0x829   :  { %v4365_v32 = vpop.f32.mrf.mxu2 }
 0x82b   :  { %v4390_v63 = vpop.f32.mrf.mxu3 }
 0x82c   :  { %v10011_v2 = vpack.c.bf16 %v4390_v63, %v4388_v9 }
 0x82e   :  { %v4464_v15 = vshll.u32 %v10011_v2, 16  ;;  %6327 = vmatmul.msk.bf16.gmra.mxu3 %vm247_vm0, %v10011_v2  ;;  %v5071_v48 = vrot.slane %v10011_v2, 2  ;;  %v4476_v44 = vshrl.u32 %v10011_v2, 16  ;;  %v4751_v27 = vrot.slane %v10011_v2, 1 }
 0x830   :  { %v4466_v31 = vrot.slane %v4464_v15, 1  ;;  %v10036_v17 = vsel %vm1451_vm4, %v5070_v52, %v5071_v48  ;;  %v4911_v8 = vrot.slane %v4476_v44, 1  ;;  %v4912_v28 = vrot.slane %v4464_v15, 2 }
 0x831   :  { %v4367_v13 = vpop.f32.mrf.mxu2 }
 0x832   :  { %v10038_v54 = vpack.c.bf16 %v4367_v13, %v4365_v32  ;;  %v4467_v29 = vsel %vm99_vm1, %v4462_v60, %v4466_v31  ;;  %v4478_v10 = vor.u32 %v4476_v44, %v4466_v31  ;;  %v4913_v20 = vor.u32 %v4912_v28, %v4911_v8 }
 0x833   :  { %6283 = vmatmul.msk.bf16.vlgmr.msra.gmra.mxu1 %vm247_vm0, %v4467_v29  ;;  %v4393_v19 = vpop.f32.mrf.mxu3 }
 0x834   :  { %v4452_v1 = vshll.u32 %v10038_v54, 16  ;;  %4687 = vmatmul.bf16.gmra.mxu2 %v10038_v54  ;;  %v10053_v57 = vpack.c.bf16 %v4393_v19, %v4393_v19  ;;  %v5068_v6 = vrot.slane %v10038_v54, 2  ;;  %v4468_v12 = vshrl.u32 %v10038_v54, 16 }
 0x835   :  { %v4914_v15 = vsel %vm1072_vm2, %v4910_v34, %v4913_v20 }
 0x836   :  { %v4454_v51 = vrot.slane %v4452_v1, 1  ;;  %v10058_v22 = vsel %vm1451_vm4, %v5067_v21, %v5068_v6  ;;  %v5075_v43 = vrot.slane %v10053_v57, 2  ;;  %v4480_v14 = vshll.u32 %v10053_v57, 16 }
 0x837   :  { %v4904_v7 = vrot.slane %v4468_v12, 1  ;;  %v4905_v63 = vrot.slane %v4452_v1, 2  ;;  %v4487_v56 = vshrl.u32 %v10053_v57, 16  ;;  %v6729_v1 = vld [vmem:[%s10219_s7 + $0x168] sm:$0xff]  ;;  %v4755_v55 = vrot.slane %v10053_v57, 1 }
 0x838   :  { %v4455_v23 = vsel %vm99_vm1, %v4450_v25, %v4454_v51  ;;  %v10077_v26 = vsel %vm1451_vm4, %v5071_v48, %v5075_v43  ;;  %v4482_v5 = vrot.slane %v4480_v14, 1  ;;  %v4470_v9 = vor.u32 %v4468_v12, %v4454_v51  ;;  %v6728_v51 = vld [vmem:[%s10219_s7 + $0x160] sm:$0xff] }
 0x839   :  { %4570 = vmatmul.bf16.vlgmr.msra.gmra.mxu0 %v4455_v23  ;;  %v4370_v47 = vpop.f32.mrf.mxu2  ;;  %v4906_v24 = vor.u32 %v4905_v63, %v4904_v7  ;;  %v4919_v60 = vrot.slane %v4487_v56, 1  ;;  %v4920_v31 = vrot.slane %v4480_v14, 2  ;;  %v4748_v23 = vrot.slane %v10038_v54, 1  ;;  %v6733_v14 = vld [vmem:[%s10219_s7 + $0x188] sm:$0xff]  ;;  %v6726_v54 = vld [vmem:[%s10219_s7 + $0x150] sm:$0xff] }
 0x83a   :  { %v10065_v42 = vpack.c.bf16 %v4370_v47, %v4370_v47  ;;  %v4483_v50 = vsel %vm99_vm1, %v4478_v10, %v4482_v5  ;;  %v4489_v48 = vor.u32 %v4487_v56, %v4482_v5  ;;  %5149 = vmatpush.bf16.msra.mxu0 %v6731_v41  ;;  %v4747_v47 = vrot.slane %v9989_v59, 1  ;;  %5178 = vmatpush.bf16.msra.mxu1 %v6733_v14  ;;  %v6732_v59 = vld [vmem:[%s10219_s7 + $0x180] sm:$0xff] }
 0x83b   :  { %v4395_v33 = vpop.f32.mrf.mxu3  ;;  %v4907_v18 = vsel %vm1072_vm2, %v4903_v49, %v4906_v24  ;;  %v4921_v3 = vor.u32 %v4920_v31, %v4919_v60 }
 0x83c   :  { %v5073_v30 = vrot.slane %v10065_v42, 2  ;;  %v4472_v62 = vshll.u32 %v10065_v42, 16  ;;  %v4484_v52 = vshrl.u32 %v10065_v42, 16  ;;  %v4749_v39 = vsel %vm725_vm3, %v4747_v47, %v4748_v23 }
 0x83d   :  { %v4922_v61 = vsel %vm1072_vm2, %v4913_v20, %v4921_v3  ;;  %v4756_v33 = vsel %vm725_vm3, %v4751_v27, %v4755_v55  ;;  %v4753_v44 = vrot.slane %v10065_v42, 1 }
 0x83e   :  { %6328 = vmatmul.msk.bf16.gmra.mxu3 %vm247_vm0, %v10053_v57  ;;  %v10092_v11 = vsel %vm1451_vm4, %v5068_v6, %v5073_v30  ;;  %v4474_v45 = vrot.slane %v4472_v62, 1  ;;  %v4915_v29 = vrot.slane %v4484_v52, 1  ;;  %v4916_v19 = vrot.slane %v4472_v62, 2  ;;  %5150 = vmatpush.bf16.msra.mxu0 %v6730_v53 }
 0x83f   :  { %v4750_v6 = vrot.slane %v9982_v16, 1  ;;  %v6727_v16 = vld [vmem:[%s10219_s7 + $0x158] sm:$0xff]  ;;  %5179 = vmatpush.bf16.msra.mxu1 %v6732_v59  ;;  %v4754_v5 = vsel %vm725_vm3, %v4748_v23, %v4753_v44 }
 0x840   :  { %v4475_v32 = vsel %vm99_vm1, %v4470_v9, %v4474_v45  ;;  %v4486_v13 = vor.u32 %v4484_v52, %v4474_v45  ;;  %v4917_v21 = vor.u32 %v4916_v19, %v4915_v29 }
 0x841   :  { %v4372_v37 = vpop.f32.mrf.mxu2  ;;  %v4752_v25 = vsel %vm725_vm3, %v4750_v6, %v4751_v27 }
 0x842   :  { %5151 = vmatpush.bf16.msra.mxu0 %v6729_v1  ;;  %v4918_v2 = vsel %vm1072_vm2, %v4906_v24, %v4917_v21 }
 0x843   :  { %6284 = vmatmul.msk.bf16.gmra.mxu1 %vm247_vm0, %v4483_v50 }
 0x844   :  { %4692 = vmatmul.bf16.gmra.mxu2 %v10065_v42 }
 0x846   :  { %5152 = vmatpush.bf16.msra.mxu0 %v6728_v51 }
 0x849   :  { %4575 = vmatmul.bf16.gmra.mxu0 %v4475_v32 }
 0x84a   :  { %5153 = vmatpush.bf16.msra.mxu0 %v6727_v16 }
 0x84e   :  { %6452 = vmatmul.msk.bf16.vlgmr.msrb.gmra.mxu3 %vm247_vm0, %v4914_v15  ;;  %5154 = vmatpush.bf16.msra.mxu0 %v6726_v54 }
 0x852   :  { %5155 = vmatpush.bf16.msra.mxu0 %v6725_v0 }
 0x853   :  { %6285 = vmatmul.msk.bf16.gmra.mxu1 %vm247_vm0, %v4489_v48 }
 0x854   :  { %5003 = vmatmul.bf16.vlgmr.msrb.gmra.mxu2 %v4907_v18 }
 0x856   :  { %5156 = vmatpush.bf16.msra.mxu0 %v6724_v46 }
 0x859   :  { %4580 = vmatmul.bf16.gmra.mxu0 %v4486_v13 }
 0x85e   :  { %6453 = vmatmul.msk.bf16.gmra.mxu3 %vm247_vm0, %v4922_v61 }
 0x863   :  { %6389 = vmatmul.msk.bf16.vlgmr.msrb.gmra.mxu1 %vm247_vm0, %v4752_v25 }
 0x864   :  { %5008 = vmatmul.bf16.gmra.mxu2 %v4918_v2 }
 0x869   :  { %4837 = vmatmul.bf16.vlgmr.msrb.gmra.mxu0 %v4749_v39 }
 0x86e   :  { %6454 = vmatmul.msk.bf16.gmra.mxu3 %vm247_vm0, %v4921_v3 }
 0x873   :  { %6390 = vmatmul.msk.bf16.gmra.mxu1 %vm247_vm0, %v4756_v33 }
 0x874   :  { %5013 = vmatmul.bf16.gmra.mxu2 %v4917_v21 }
 0x879   :  { %4842 = vmatmul.bf16.gmra.mxu0 %v4754_v5 }
 0x883   :  { %6391 = vmatmul.msk.bf16.gmra.mxu1 %vm247_vm0, %v4755_v55 }
 0x889   :  { %4847 = vmatmul.bf16.gmra.mxu0 %v4753_v44 }
 0x893   :  { %6515 = vmatmul.msk.bf16.vlgmr.msra.gmra.mxu1 %vm247_vm0, %v10036_v17 }
 0x899   :  { %5157 = vmatmul.bf16.vlgmr.msra.gmra.mxu0 %v10058_v22 }
 0x8a1   :  { %v4706_v58 = vpop.f32.mrf.mxu3 }
 0x8a3   :  { %6516 = vmatmul.msk.bf16.gmra.mxu1 %vm247_vm0, %v10077_v26 }
 0x8a7   :  { %v4683_v62 = vpop.f32.mrf.mxu2 }
 0x8a9   :  { %5162 = vmatmul.bf16.gmra.mxu0 %v10092_v11  ;;  %v4708_v10 = vpop.f32.mrf.mxu3 }
 0x8af   :  { %v4685_v37 = vpop.f32.mrf.mxu2 }
 0x8b0   :  { %v4594_v50 = vpop.f32.mrf.mxu1 }
 0x8b1   :  { %v4711_v36 = vpop.f32.mrf.mxu3 }
 0x8b3   :  { %6517 = vmatmul.msk.bf16.gmra.mxu1 %vm247_vm0, %v5075_v43 }
 0x8b6   :  { %v4571_v12 = vpop.f32.mrf.mxu0 }
 0x8b7   :  { %v4595_v45 = vadd.f32 %v4594_v50, %v4571_v12  ;;  %v4688_v17 = vpop.f32.mrf.mxu2 }
 0x8b8   :  { %v4596_v8 = vpop.f32.mrf.mxu1 }
 0x8b9   :  { %5167 = vmatmul.bf16.gmra.mxu0 %v5073_v30  ;;  %v4684_v22 = vadd.f32 %v4683_v62, %v4595_v45  ;;  %v4713_v26 = vpop.f32.mrf.mxu3 }
 0x8bb   :  { %v4707_v28 = vadd.f32 %v4706_v58, %v4684_v22 }
 0x8be   :  { %v4573_v9 = vpop.f32.mrf.mxu0 }
 0x8bf   :  { %v4597_v11 = vadd.f32 %v4596_v8, %v4573_v9  ;;  %v4690_v35 = vpop.f32.mrf.mxu2 }
 0x8c0   :  { %v4599_v4 = vpop.f32.mrf.mxu1 }
 0x8c1   :  { %v4686_v32 = vadd.f32 %v4685_v37, %v4597_v11  ;;  %v4716_v20 = vpop.f32.mrf.mxu3 }
 0x8c3   :  { %v4709_v7 = vadd.f32 %v4708_v10, %v4686_v32 }
 0x8c6   :  { %v4576_v57 = vpop.f32.mrf.mxu0 }
 0x8c7   :  { %v4600_v63 = vadd.f32 %v4599_v4, %v4576_v57  ;;  %v4693_v43 = vpop.f32.mrf.mxu2 }
 0x8c8   :  { %v4601_v34 = vpop.f32.mrf.mxu1 }
 0x8c9   :  { %v4689_v40 = vadd.f32 %v4688_v17, %v4600_v63  ;;  %v4718_v38 = vpop.f32.mrf.mxu3 }
 0x8cb   :  { %v4712_v15 = vadd.f32 %v4711_v36, %v4689_v40  ;;  %v6741_v40 = vld [vmem:[%s10220_s8] ss:$0 sm:$0xff] }
 0x8ce   :  { %v4578_v56 = vpop.f32.mrf.mxu0 }
 0x8cf   :  { %v4602_v42 = vadd.f32 %v4601_v34, %v4578_v56  ;;  %v4695_v30 = vpop.f32.mrf.mxu2 }
 0x8d0   :  { %v4604_v24 = vpop.f32.mrf.mxu1 }
 0x8d1   :  { %v4691_v48 = vadd.f32 %v4690_v35, %v4602_v42  ;;  %v5027_v49 = vpop.f32.mrf.mxu3 }
 0x8d3   :  { %v4714_v18 = vadd.f32 %v4713_v26, %v4691_v48 }
 0x8d6   :  { %v4581_v52 = vpop.f32.mrf.mxu0 }
 0x8d7   :  { %v4605_v60 = vadd.f32 %v4604_v24, %v4581_v52  ;;  %v5004_v31 = vpop.f32.mrf.mxu2 }
 0x8d8   :  { %v4606_v13 = vpop.f32.mrf.mxu1  ;;  %v5028_v41 = vadd.f32 %v5027_v49, %v5004_v31 }
 0x8d9   :  { %v4694_v3 = vadd.f32 %v4693_v43, %v4605_v60  ;;  %v5029_v29 = vpop.f32.mrf.mxu3 }
 0x8db   :  { %v4717_v53 = vadd.f32 %v4716_v20, %v4694_v3 }
 0x8de   :  { %v4583_v19 = vpop.f32.mrf.mxu0 }
 0x8df   :  { %v5006_v61 = vpop.f32.mrf.mxu2 }
 0x8e0   :  { %v4861_v27 = vpop.f32.mrf.mxu1  ;;  %v5030_v1 = vadd.f32 %v5029_v29, %v5006_v61 }
 0x8e1   :  { %v5032_v21 = vpop.f32.mrf.mxu3 }
 0x8e6   :  { %v4838_v6 = vpop.f32.mrf.mxu0 }
 0x8e7   :  { %v4862_v25 = vadd.f32 %v4861_v27, %v4838_v6  ;;  %v5009_v51 = vpop.f32.mrf.mxu2 }
 0x8e8   :  { %v4863_v2 = vpop.f32.mrf.mxu1  ;;  %v5033_v23 = vadd.f32 %v5032_v21, %v5009_v51 }
 0x8e9   :  { %v4875_v47 = vadd.f32 %v4862_v25, %v4707_v28  ;;  %v5034_v39 = vpop.f32.mrf.mxu3  ;;  %v6740_v25 = vld [vmem:[%s10221_s10 + $0x30] sm:$0xff] }
 0x8eb   :  { %v5041_v16 = vadd.f32 %v5028_v41, %v4875_v47  ;;  %v5254_v41 = vld [vmem:[%s10221_s10 + $0x38] sm:$0xf] }
 0x8ec   :  { %v5288_v29 = vunpack.c.l.b16 %v5254_v41 }
 0x8ee   :  { %v4840_v14 = vpop.f32.mrf.mxu0  ;;  %v5296_v61 = vpack.c.b16 %v5288_v29, %v5288_v29 }
 0x8ef   :  { %v4864_v54 = vadd.f32 %v4863_v2, %v4840_v14  ;;  %v5011_v59 = vpop.f32.mrf.mxu2 }
 0x8f0   :  { %v4866_v55 = vpop.f32.mrf.mxu1  ;;  %v5035_v0 = vadd.f32 %v5034_v39, %v5011_v59  ;;  %v5309_v21 = vsel %vm2542_vm6, %v5296_v61, 0 }
 0x8f1   :  { %v4876_v33 = vadd.f32 %v4864_v54, %v4709_v7  ;;  %v5037_v46 = vpop.f32.mrf.mxu3  ;;  %5311 = vmatpush.bf16.msra.mxu3 %v5309_v21 }
 0x8f3   :  { %v5042_v44 = vadd.f32 %v5030_v1, %v4876_v33 }
 0x8f5   :  { %5312 = vmatpush.bf16.msra.mxu3 %v6740_v25 }
 0x8f6   :  { %v4843_v5 = vpop.f32.mrf.mxu0 }
 0x8f7   :  { %v4867_v58 = vadd.f32 %v4866_v55, %v4843_v5  ;;  %v5014_v62 = vpop.f32.mrf.mxu2  ;;  %v6738_v55 = vld [vmem:[%s10221_s10 + $0x20] sm:$0xff] }
 0x8f8   :  { %v4868_v10 = vpop.f32.mrf.mxu1  ;;  %v5038_v4 = vadd.f32 %v5037_v46, %v5014_v62  ;;  %v6735_v62 = vld [vmem:[%s10221_s10 + $0x8] sm:$0xff] }
 0x8f9   :  { %v4877_v37 = vadd.f32 %v4867_v58, %v4712_v15  ;;  %v5039_v50 = vpop.f32.mrf.mxu3  ;;  %v6736_v58 = vld [vmem:[%s10221_s10 + $0x10] sm:$0xff] }
 0x8fb   :  { %v5043_v36 = vadd.f32 %v5033_v23, %v4877_v37  ;;  %v6734_v37 = vld [vmem:[%s10221_s10] sm:$0xff] }
 0x8fe   :  { %v4845_v12 = vpop.f32.mrf.mxu0 }
 0x8ff   :  { %v4869_v45 = vadd.f32 %v4868_v10, %v4845_v12  ;;  %v5016_v17 = vpop.f32.mrf.mxu2  ;;  %v5214_v10 = vld [vmem:[%s10222_s9] sm:$0xf] }
 0x900   :  { %v4871_v8 = vpop.f32.mrf.mxu1 }
 0x901   :  { %v4878_v22 = vadd.f32 %v4869_v45, %v4714_v18  ;;  %v6742_v45 = vld [vmem:[%s10223_s11] ss:$0 sm:$0xff] }
 0x903   :  { %v5044_v26 = vadd.f32 %v5035_v0, %v4878_v22 }
 0x906   :  { %v4848_v28 = vpop.f32.mrf.mxu0 }
 0x907   :  { %v4872_v9 = vadd.f32 %v4871_v8, %v4848_v28 }
 0x908   :  { %v4873_v11 = vpop.f32.mrf.mxu1 }
 0x909   :  { %v4879_v35 = vadd.f32 %v4872_v9, %v4717_v53 }
 0x90b   :  { %v5045_v32 = vadd.f32 %v5038_v4, %v4879_v35 }
 0x90e   :  { %v4850_v20 = vpop.f32.mrf.mxu0 }
 0x910   :  { %v5181_v7 = vpop.f32.mrf.mxu1 }
 0x916   :  { %v5158_v57 = vpop.f32.mrf.mxu0 }
 0x917   :  { %v5182_v43 = vadd.f32 %v5181_v7, %v5158_v57 }
 0x918   :  { %v5183_v63 = vpop.f32.mrf.mxu1 }
 0x919   :  { %v5195_v34 = vadd.f32 %v5182_v43, %v5041_v16  ;;  %v6739_v16 = vld [vmem:[%s10221_s10 + $0x28] sm:$0xff] }
 0x91a   :  { %5313 = vmatpush.bf16.msra.mxu3 %v6739_v16 }
 0x91b   :  { %v5204_v42 = vadd.f32 %v6741_v40, %v5195_v34 }
 0x91d   :  { %v5209_v48 = vmax.f32 %v5204_v42, 0.0 }
 0x91e   :  { %v5160_v38 = vpop.f32.mrf.mxu0  ;;  %5314 = vmatpush.bf16.msra.mxu3 %v6738_v55 }
 0x91f   :  { %v5184_v15 = vadd.f32 %v5183_v63, %v5160_v38 }
 0x920   :  { %v5186_v56 = vpop.f32.mrf.mxu1 }
 0x921   :  { %v5196_v30 = vadd.f32 %v5184_v15, %v5042_v44  ;;  %v6737_v44 = vld [vmem:[%s10221_s10 + $0x18] sm:$0xff] }
 0x922   :  { %5315 = vmatpush.bf16.msra.mxu3 %v6737_v44 }
 0x923   :  { %v5205_v24 = vadd.f32 %v6741_v40, %v5196_v30 }
 0x925   :  { %v5210_v49 = vmax.f32 %v5205_v24, 0.0 }
 0x926   :  { %v5163_v18 = vpop.f32.mrf.mxu0  ;;  %5316 = vmatpush.bf16.msra.mxu3 %v6736_v58 }
 0x927   :  { %v5215_v52 = vpack.c.bf16 %v5210_v49, %v5209_v48  ;;  %v5187_v31 = vadd.f32 %v5186_v56, %v5163_v18 }
 0x928   :  { %v5188_v60 = vpop.f32.mrf.mxu1 }
 0x929   :  { %v5197_v13 = vadd.f32 %v5187_v31, %v5043_v36 }
 0x92a   :  { %5317 = vmatpush.bf16.msra.mxu3 %v6735_v62 }
 0x92b   :  { %v5206_v27 = vadd.f32 %v6741_v40, %v5197_v13 }
 0x92d   :  { %v5211_v51 = vmax.f32 %v5206_v27, 0.0 }
 0x92e   :  { %v5165_v3 = vpop.f32.mrf.mxu0  ;;  %5318 = vmatpush.bf16.msra.mxu3 %v6734_v37 }
 0x92f   :  { %v5189_v53 = vadd.f32 %v5188_v60, %v5165_v3 }
 0x930   :  { %v5191_v19 = vpop.f32.mrf.mxu1 }
 0x931   :  { %v5198_v1 = vadd.f32 %v5189_v53, %v5044_v26 }
 0x933   :  { %v5207_v6 = vadd.f32 %v6741_v40, %v5198_v1 }
 0x935   :  { %v5212_v2 = vmax.f32 %v5207_v6, 0.0 }
 0x936   :  { %v5168_v23 = vpop.f32.mrf.mxu0 }
 0x937   :  { %v5192_v47 = vadd.f32 %v5191_v19, %v5168_v23  ;;  %v5216_v39 = vpack.c.bf16 %v5212_v2, %v5211_v51 }
 0x938   :  { %v5193_v14 = vpop.f32.mrf.mxu1 }
 0x939   :  { %v5199_v54 = vadd.f32 %v5192_v47, %v5045_v32 }
 0x93b   :  { %v5208_v59 = vadd.f32 %v6741_v40, %v5199_v54 }
 0x93d   :  { %v5213_v0 = vmax.f32 %v5208_v59, 0.0 }
 0x93e   :  { %v5170_v33 = vpop.f32.mrf.mxu0 }
 0x93f   :  { %v5217_v46 = vpack.c.bf16 %v5213_v0, %v5213_v0 }
 0x941   :  { %v5224_v5 = vsel %vm5222_vm9, %v5217_v46, 0 }
 0x942   :  { %5231 = vmatpush.bf16.msra.mxu2 %v5224_v5 }
 0x946   :  { %5232 = vmatpush.bf16.msra.mxu2 %v5216_v39 }
 0x94a   :  { %5233 = vmatpush.bf16.msra.mxu2 %v5215_v52 }
 0x94d   :  { %6518 = vmatmul.msk.bf16.vlgmr.msra.gmra.mxu2 %vm5218_vm10, %v5214_v10 }
 0x9d0   :  { %v5235_v50 = vpop.f32.mrf.mxu2 }
 0x9d1   :  { %v5239_v36 = vpack.c.bf16 %v5235_v50, %v5235_v50 }
 0x9d3   :  { %6547 = vmatmul.msk.bf16.vlgmr.msra.gmra.mxu3 %vm5304_vm11, %v5239_v36 }
 0x9d8   :  { %v5237_v12 = vpop.f32.mrf.mxu2 }
 0xa56   :  { %v5320_v17 = vpop.f32.mrf.mxu3 }
 0xa57   :  { %v5321_v8 = vadd.f32 %v6742_v45, %v5320_v17 }
 0xa59   :  { %5324 = vst [vmem:[%s10224_s12] sm:$0xff] %v5321_v8 }
 0xa5e   :  { %v5322_v22 = vpop.f32.mrf.mxu3 }

</bundles_post_ra>
